<compile_context>
chip_gen: v6e
topology: v6e:2x2x1
jax: 0.10.0
libtpu: 0.0.40
codegen_flags: <defaults>
</compile_context>

<pallas_src>
import jax
import jax.numpy as jnp
import numpy as np
from jax.experimental import pallas as pl
from jax.experimental.pallas import tpu as pltpu

# ------------------------- static config (small demo shapes) ---------------
B = 2
H = W = 16            # spatial size (PyTorch module assumes 128; we shrink)
CIN = 5               # conv1 in-channels (after the .view collapse)
C1 = 32               # conv1 out-channels
C2 = 64               # conv2 out-channels
FC1 = 32
FC2 = 32
BH = B * H                     # matmul M dimension for the conv stack
K1_LANES = 128                 # W*CIN = 80 padded up to one full lane group
CONV_OUT_SIZE = C2 * H * W     # analogue of _calculate_conv_output_dims()
FC_K = CONV_OUT_SIZE           # fc1 contraction length (16384)
FC_KT = 4096                   # fc1 K tile (streams fc1_w in 256 KiB blocks)
OUT_LANES = 128                # lane-dense FC output width


# ------------------------- conv stack kernel (single grid step) ------------
def conv_stack_kernel(xs_ref, w1_ref, b1_ref, w2_ref, b2_ref, out_ref, h1p):
    """Both conv layers, whole batch, one grid step.

    xs_ref : (3, B*H, 128)        bf16  pre-shifted (ky) conv1 input rows
    w1_ref : (3, 128, W*C1)       bf16  banded conv1 weights (x-pad folded in)
    b1_ref : (1, W*C1)            f32   conv1 bias tiled over x
    w2_ref : (3, W*C1, W*C2)      bf16  banded conv2 weights
    b2_ref : (1, W*C2)            f32   conv2 bias tiled over x
    out_ref: (B*H, W*C2)          bf16  conv2 output, rows=(b,y), lanes=x*C2+c
    h1p    : VMEM (B, H+2, W*C1)  f32   y-halo scratch for conv1 activations
    """
    # ---- conv1: 3 banded bf16 matmuls (one per ky); x zero-padding lives in
    #      the weights, y zero-padding in the pre-shifted input copies. ------
    h1 = jnp.dot(xs_ref[0], w1_ref[0], preferred_element_type=jnp.float32)
    h1 = h1 + jnp.dot(xs_ref[1], w1_ref[1], preferred_element_type=jnp.float32)
    h1 = h1 + jnp.dot(xs_ref[2], w1_ref[2], preferred_element_type=jnp.float32)
    h1 = jnp.maximum(h1 + b1_ref[...], 0.0)                  # (B*H, W*C1) f32

    # ---- y-halo for conv2: zero ONLY the halo rows; interior overwritten ---
    h1p[:, 0:1, :] = jnp.zeros((B, 1, W * C1), jnp.float32)
    h1p[:, H + 1:H + 2, :] = jnp.zeros((B, 1, W * C1), jnp.float32)
    h1p[:, 1:1 + H, :] = h1.reshape(B, H, W * C1)

    # ---- conv2: 3 banded bf16 matmuls over ky-shifted full-lane row windows.
    acc = jnp.dot(h1p[:, 0:H, :].reshape(BH, W * C1).astype(jnp.bfloat16),
                  w2_ref[0], preferred_element_type=jnp.float32)
    acc = acc + jnp.dot(h1p[:, 1:1 + H, :].reshape(BH, W * C1).astype(jnp.bfloat16),
                        w2_ref[1], preferred_element_type=jnp.float32)
    acc = acc + jnp.dot(h1p[:, 2:2 + H, :].reshape(BH, W * C1).astype(jnp.bfloat16),
                        w2_ref[2], preferred_element_type=jnp.float32)
    out_ref[...] = jnp.maximum(acc + b2_ref[...], 0.0).astype(jnp.bfloat16)


def conv_forward(xs, w1b, b1, w2b, b2):
    """xs: (3, B*H, 128) bf16 -> (B*H, W*C2) bf16 ('NHWC' row/lane order)."""
    return pl.pallas_call(
        conv_stack_kernel,
        out_shape=jax.ShapeDtypeStruct((BH, W * C2), jnp.bfloat16),
        grid_spec=pltpu.PrefetchScalarGridSpec(
            num_scalar_prefetch=0,
            grid=(1,),
            in_specs=[
                pl.BlockSpec((3, BH, K1_LANES), lambda i: (0, 0, 0)),
                pl.BlockSpec((3, K1_LANES, W * C1), lambda i: (0, 0, 0)),
                pl.BlockSpec((1, W * C1), lambda i: (0, 0)),
                pl.BlockSpec((3, W * C1, W * C2), lambda i: (0, 0, 0)),
                pl.BlockSpec((1, W * C2), lambda i: (0, 0)),
            ],
            out_specs=pl.BlockSpec((BH, W * C2), lambda i: (0, 0)),
            scratch_shapes=[
                pltpu.VMEM((B, H + 2, W * C1), jnp.float32),
            ],
        ),
        compiler_params=pltpu.CompilerParams(
            dimension_semantics=("arbitrary",),
            vmem_limit_bytes=32 * 1024 * 1024),
    )(xs, w1b, b1, w2b, b2)


# ------------------------- fully-connected stack kernel --------------------
def fc_stack_kernel(flat_ref, w1_ref, b1_ref, w2_ref, b2_ref, w3_ref, b3_ref,
                    out_ref, acc):
    """K-tiled fc stack.  Grid axis 0 tiles the fc1 contraction (FC_KT rows of
    fc1_w per step) so the dominant weight DMA is double-buffered/pipelined.

    flat_ref: (B, FC_KT) bf16   current K-slice of the flattened conv output
    w1_ref  : (FC_KT, FC1) bf16 current K-slice of fc1 weights
    out_ref : (B, 128) f32      lane-dense, value broadcast across lanes
    acc     : VMEM (B, FC1) f32 fc1 accumulator
    """
    k = pl.program_id(0)

    @pl.when(k == 0)
    def _():
        acc[...] = jnp.zeros_like(acc)

    acc[...] += jnp.dot(flat_ref[...], w1_ref[...],
                        preferred_element_type=jnp.float32)

    @pl.when(k == pl.num_programs(0) - 1)
    def _():
        f1 = jnp.maximum(acc[...] + b1_ref[...], 0.0)
        f2 = jnp.dot(f1.astype(jnp.bfloat16), w2_ref[...],
                     preferred_element_type=jnp.float32)
        f2 = jnp.maximum(f2 + b2_ref[...], 0.0)
        # final Linear(fc2 -> 1) as a VPU lane reduction (no N=1 MXU pass)
        val = jnp.sum(f2 * w3_ref[...], axis=-1, keepdims=True) + b3_ref[...]
        out_ref[...] = jnp.broadcast_to(val, out_ref.shape)


def fc_forward(flat, w1, b1, w2, b2, w3, b3):
    n_kt = FC_K // FC_KT
    return pl.pallas_call(
        fc_stack_kernel,
        out_shape=jax.ShapeDtypeStruct((B, OUT_LANES), jnp.float32),
        grid_spec=pltpu.PrefetchScalarGridSpec(
            num_scalar_prefetch=0,
            grid=(n_kt,),
            in_specs=[
                pl.BlockSpec((B, FC_KT), lambda k: (0, k)),
                pl.BlockSpec((FC_KT, FC1), lambda k: (k, 0)),
                pl.BlockSpec((1, FC1), lambda k: (0, 0)),
                pl.BlockSpec((FC1, FC2), lambda k: (0, 0)),
                pl.BlockSpec((1, FC2), lambda k: (0, 0)),
                pl.BlockSpec((1, FC2), lambda k: (0, 0)),
                pl.BlockSpec((1, 1), lambda k: (0, 0)),
            ],
            out_specs=pl.BlockSpec((B, OUT_LANES), lambda k: (0, 0)),
            scratch_shapes=[pltpu.VMEM((B, FC1), jnp.float32)],
        ),
        compiler_params=pltpu.CompilerParams(
            dimension_semantics=("arbitrary",),
            vmem_limit_bytes=32 * 1024 * 1024),
    )(flat, w1, b1, w2, b2, w3, b3)


# ------------------------- parameters (PyTorch layouts + kernel layouts) ---
def init_torch_params(key):
    """Deterministic params in PyTorch layouts (OIHW conv, (out,in) linear)."""
    ks = jax.random.split(key, 10)
    s = 0.05
    return dict(
        conv1_w=jax.random.normal(ks[0], (C1, CIN, 3, 3), jnp.float32) * s,
        conv1_b=jax.random.normal(ks[1], (C1,), jnp.float32) * s,
        conv2_w=jax.random.normal(ks[2], (C2, C1, 3, 3), jnp.float32) * s,
        conv2_b=jax.random.normal(ks[3], (C2,), jnp.float32) * s,
        fc1_w=jax.random.normal(ks[4], (FC1, CONV_OUT_SIZE), jnp.float32) * s,
        fc1_b=jax.random.normal(ks[5], (FC1,), jnp.float32) * s,
        fc2_w=jax.random.normal(ks[6], (FC2, FC1), jnp.float32) * s,
        fc2_b=jax.random.normal(ks[7], (FC2,), jnp.float32) * s,
        fc3_w=jax.random.normal(ks[8], (1, FC2), jnp.float32) * s,
        fc3_b=jax.random.normal(ks[9], (1,), jnp.float32) * s,
    )


def conv3x3_banded_weights(w_oihw, width, k_pad=None):
    """OIHW 3x3 conv weights -> per-ky banded matmul weights (bf16).

    Output[ky, xin*cin + ci, x*cout + co] = w_oihw[co, ci, ky, xin - x + 1]
    for xin in {x-1, x, x+1} ∩ [0, width); zero elsewhere — i.e. the x-padding
    of the convolution is folded into the weight band.  Rows beyond width*cin
    (lane padding of the activation) are zero.
    """
    w = np.asarray(jax.device_get(w_oihw), dtype=np.float32)   # (cout,cin,3,3)
    cout, cin = w.shape[0], w.shape[1]
    rows = k_pad if k_pad is not None else width * cin
    wt = np.transpose(w, (2, 3, 1, 0))                         # (ky,kx,cin,cout)
    out = np.zeros((3, rows, width * cout), np.float32)
    for x in range(width):
        for kx in range(3):
            xin = x + kx - 1
            if 0 <= xin < width:
                out[:, xin * cin:(xin + 1) * cin,
                    x * cout:(x + 1) * cout] = wt[:, kx]
    return jnp.asarray(out, dtype=jnp.bfloat16)


def prepare_kernel_params(tp):
    """Convert PyTorch-layout params into kernel-friendly (mostly bf16) layouts."""
    # fc1: fold the PyTorch NCHW flatten order into the weight rows so the
    # kernel's (y, x, c) flatten order multiplies it directly.
    f1 = tp["fc1_w"].T.reshape(C2, H, W, FC1)          # rows were c*H*W + y*W + x
    f1 = jnp.transpose(f1, (1, 2, 0, 3)).reshape(H * W * C2, FC1)

    return dict(
        conv1_w=conv3x3_banded_weights(tp["conv1_w"], W, k_pad=K1_LANES),
        conv1_b=jnp.tile(tp["conv1_b"], (W,)).reshape(1, W * C1),
        conv2_w=conv3x3_banded_weights(tp["conv2_w"], W),
        conv2_b=jnp.tile(tp["conv2_b"], (W,)).reshape(1, W * C2),
        fc1_w=f1.astype(jnp.bfloat16),
        fc1_b=tp["fc1_b"].reshape(1, FC1),
        fc2_w=tp["fc2_w"].T.astype(jnp.bfloat16),
        fc2_b=tp["fc2_b"].reshape(1, FC2),
        fc3_w=tp["fc3_w"].astype(jnp.float32),          # (1, FC2) row vector
        fc3_b=tp["fc3_b"].reshape(1, 1),
    )


# ------------------------- full forward -------------------------------------
@jax.jit
def critic_forward(state, params):
    # state: (B, c1, c2, H, W) with c1*c2 == 5  (matches state.view(B,-1,H,W))
    b = state.shape[0]
    h, w = state.shape[-2], state.shape[-1]
    x = state.reshape(b, -1, h, w)                     # (B, 5, H, W)  NCHW
    x = jnp.transpose(x, (0, 2, 3, 1))                 # (B, H, W, 5)  NHWC

    # 2-D activation layout for the conv stack: rows=(b,y), lanes=x*CIN+c.
    x2 = x.reshape(b, h, w * CIN)
    x2 = jnp.pad(x2, ((0, 0), (0, 0), (0, K1_LANES - w * CIN)))   # lane pad
    xp = jnp.pad(x2, ((0, 0), (1, 1), (0, 0)))                    # y halo
    # three ky-shifted copies (tiny tensor; pure XLA) -> zero in-kernel slicing
    xs = jnp.stack([xp[:, ky:ky + h, :] for ky in range(3)], axis=0)
    xs = xs.reshape(3, b * h, K1_LANES).astype(jnp.bfloat16)

    conv_out = conv_forward(xs, params["conv1_w"], params["conv1_b"],
                            params["conv2_w"], params["conv2_b"])
    # metadata-only reshape (rows of each image are contiguous): no transpose
    flat = conv_out.reshape(b, h * w * C2)
    out = fc_forward(flat,
                     params["fc1_w"], params["fc1_b"],
                     params["fc2_w"], params["fc2_b"],
                     params["fc3_w"], params["fc3_b"])
    return out[:, 0]                                   # (B,) == value.squeeze()


# ------------------------- pure-JAX reference (PyTorch semantics) -----------
def reference_forward(state, tp):
    """Faithful PyTorch-order reference using the same bf16 matmul operands."""
    b = state.shape[0]
    x = state.reshape(b, -1, H, W)
    x = jnp.transpose(x, (0, 2, 3, 1))                 # NHWC

    def conv3x3_relu(xin, w_oihw, bias):
        hh, ww = xin.shape[1], xin.shape[2]
        xp = jnp.pad(xin, ((0, 0), (1, 1), (1, 1), (0, 0)))
        acc = jnp.zeros((b, hh, ww, w_oihw.shape[0]), jnp.float32)
        for ky in range(3):
            for kx in range(3):
                patch = xp[:, ky:ky + hh, kx:kx + ww, :].astype(jnp.bfloat16)
                wtap = jnp.transpose(w_oihw[:, :, ky, kx]).astype(jnp.bfloat16)
                acc = acc + jnp.einsum('bhwi,io->bhwo', patch, wtap,
                                       preferred_element_type=jnp.float32)
        return jnp.maximum(acc + bias, 0.0)

    h = conv3x3_relu(x, tp["conv1_w"], tp["conv1_b"])
    h = conv3x3_relu(h, tp["conv2_w"], tp["conv2_b"])
    flat = jnp.transpose(h, (0, 3, 1, 2)).reshape(b, -1)   # PyTorch NCHW flatten
    f1 = jnp.maximum(
        jnp.dot(flat.astype(jnp.bfloat16), tp["fc1_w"].T.astype(jnp.bfloat16),
                preferred_element_type=jnp.float32) + tp["fc1_b"], 0.0)
    f2 = jnp.maximum(
        jnp.dot(f1.astype(jnp.bfloat16), tp["fc2_w"].T.astype(jnp.bfloat16),
                preferred_element_type=jnp.float32) + tp["fc2_b"], 0.0)
    val = jnp.dot(f2, tp["fc3_w"].T) + tp["fc3_b"]
    return jnp.squeeze(val)


if __name__ == "__main__":
    key = jax.random.PRNGKey(0)
    pkey, xkey = jax.random.split(key)
    torch_params = init_torch_params(pkey)
    params = prepare_kernel_params(torch_params)

    # 5-D state like the PyTorch module expects: (B, 5, 1, H, W)
    state = jax.random.normal(xkey, (B, 5, 1, H, W), jnp.float32)

    value = critic_forward(state, params)
    jax.block_until_ready(value)
    assert value.shape == (B,), value.shape

    ref = reference_forward(state, torch_params)
    assert jnp.allclose(value, ref, atol=3e-2, rtol=3e-2), (value, ref)

    print("KERNEL_OK")
</pallas_src>

<mosaic_0001>
module attributes {stable_mosaic.version = 11 : i64} {
  func.func @conv_stack_kernel(%arg0: i32, %arg1: memref<3x32x128xbf16, #tpu.memory_space<vmem>>, %arg2: memref<3x128x512xbf16, #tpu.memory_space<vmem>>, %arg3: memref<1x512xf32, #tpu.memory_space<vmem>>, %arg4: memref<3x512x1024xbf16, #tpu.memory_space<vmem>>, %arg5: memref<1x1024xf32, #tpu.memory_space<vmem>>, %arg6: memref<32x1024xbf16, #tpu.memory_space<vmem>>, %arg7: memref<2x18x512xf32, #tpu.memory_space<vmem>>) attributes {dimension_semantics = [#tpu.dimension_semantics<arbitrary>], iteration_bounds = array<i64: 1>, scalar_prefetch = 0 : i64, scratch_operands = 1 : i64, tpu.core_type = #tpu.core_type<tc>, window_params = [{pipeline_mode = #tpu.pipeline_mode<synchronous>, transform_indices = @transform_0, window_bounds = array<i64: 3, 32, 128>}, {pipeline_mode = #tpu.pipeline_mode<synchronous>, transform_indices = @transform_1, window_bounds = array<i64: 3, 128, 512>}, {pipeline_mode = #tpu.pipeline_mode<synchronous>, transform_indices = @transform_2, window_bounds = array<i64: 1, 512>}, {pipeline_mode = #tpu.pipeline_mode<synchronous>, transform_indices = @transform_3, window_bounds = array<i64: 3, 512, 1024>}, {pipeline_mode = #tpu.pipeline_mode<synchronous>, transform_indices = @transform_4, window_bounds = array<i64: 1, 1024>}, {pipeline_mode = #tpu.pipeline_mode<synchronous>, transform_indices = @transform_5, window_bounds = array<i64: 32, 1024>}]} {
    %c0 = arith.constant 0 : index
    %c0_0 = arith.constant 0 : index
    %c0_1 = arith.constant 0 : index
    %0 = vector.load %arg1[%c0, %c0_0, %c0_1] : memref<3x32x128xbf16, #tpu.memory_space<vmem>>, vector<1x32x128xbf16>
    %1 = vector.shape_cast %0 : vector<1x32x128xbf16> to vector<32x128xbf16>
    %c0_2 = arith.constant 0 : index
    %c0_3 = arith.constant 0 : index
    %c0_4 = arith.constant 0 : index
    %2 = vector.load %arg2[%c0_2, %c0_3, %c0_4] : memref<3x128x512xbf16, #tpu.memory_space<vmem>>, vector<1x128x512xbf16>
    %3 = vector.shape_cast %2 : vector<1x128x512xbf16> to vector<128x512xbf16>
    %cst = arith.constant dense<0.000000e+00> : vector<32x512xf32>
    %4 = tpu.matmul %1, %3, %cst {dimension_numbers = #tpu.dot_dimension_numbers<[1], [0], [0], [1], [0, 0, 1, 1], [], []>} : vector<32x128xbf16>, vector<128x512xbf16>, vector<32x512xf32> -> vector<32x512xf32>
    %c1 = arith.constant 1 : index
    %c0_5 = arith.constant 0 : index
    %c0_6 = arith.constant 0 : index
    %5 = vector.load %arg1[%c1, %c0_5, %c0_6] : memref<3x32x128xbf16, #tpu.memory_space<vmem>>, vector<1x32x128xbf16>
    %6 = vector.shape_cast %5 : vector<1x32x128xbf16> to vector<32x128xbf16>
    %c1_7 = arith.constant 1 : index
    %c0_8 = arith.constant 0 : index
    %c0_9 = arith.constant 0 : index
    %7 = vector.load %arg2[%c1_7, %c0_8, %c0_9] : memref<3x128x512xbf16, #tpu.memory_space<vmem>>, vector<1x128x512xbf16>
    %8 = vector.shape_cast %7 : vector<1x128x512xbf16> to vector<128x512xbf16>
    %cst_10 = arith.constant dense<0.000000e+00> : vector<32x512xf32>
    %9 = tpu.matmul %6, %8, %cst_10 {dimension_numbers = #tpu.dot_dimension_numbers<[1], [0], [0], [1], [0, 0, 1, 1], [], []>} : vector<32x128xbf16>, vector<128x512xbf16>, vector<32x512xf32> -> vector<32x512xf32>
    %10 = arith.addf %4, %9 : vector<32x512xf32>
    %c2 = arith.constant 2 : index
    %c0_11 = arith.constant 0 : index
    %c0_12 = arith.constant 0 : index
    %11 = vector.load %arg1[%c2, %c0_11, %c0_12] : memref<3x32x128xbf16, #tpu.memory_space<vmem>>, vector<1x32x128xbf16>
    %12 = vector.shape_cast %11 : vector<1x32x128xbf16> to vector<32x128xbf16>
    %c2_13 = arith.constant 2 : index
    %c0_14 = arith.constant 0 : index
    %c0_15 = arith.constant 0 : index
    %13 = vector.load %arg2[%c2_13, %c0_14, %c0_15] : memref<3x128x512xbf16, #tpu.memory_space<vmem>>, vector<1x128x512xbf16>
    %14 = vector.shape_cast %13 : vector<1x128x512xbf16> to vector<128x512xbf16>
    %cst_16 = arith.constant dense<0.000000e+00> : vector<32x512xf32>
    %15 = tpu.matmul %12, %14, %cst_16 {dimension_numbers = #tpu.dot_dimension_numbers<[1], [0], [0], [1], [0, 0, 1, 1], [], []>} : vector<32x128xbf16>, vector<128x512xbf16>, vector<32x512xf32> -> vector<32x512xf32>
    %16 = arith.addf %10, %15 : vector<32x512xf32>
    %c0_17 = arith.constant 0 : index
    %c0_18 = arith.constant 0 : index
    %17 = vector.load %arg3[%c0_17, %c0_18] : memref<1x512xf32, #tpu.memory_space<vmem>>, vector<1x512xf32>
    %18 = vector.broadcast %17 : vector<1x512xf32> to vector<32x512xf32>
    %19 = arith.addf %16, %18 : vector<32x512xf32>
    %cst_19 = arith.constant 0.000000e+00 : f32
    %20 = vector.broadcast %cst_19 : f32 to vector<32x512xf32>
    %21 = arith.maximumf %19, %20 : vector<32x512xf32>
    %cst_20 = arith.constant 0.000000e+00 : f32
    %22 = vector.broadcast %cst_20 : f32 to vector<2x1x512xf32>
    %c0_21 = arith.constant 0 : index
    %c0_22 = arith.constant 0 : index
    %c0_23 = arith.constant 0 : index
    %23 = vector.load %arg7[%c0_21, %c0_22, %c0_23] : memref<2x18x512xf32, #tpu.memory_space<vmem>>, vector<2x1x512xf32>
    tpu.vector_store %arg7[%c0_21, %c0_22, %c0_23], %22 {strides = array<i32>} : memref<2x18x512xf32, #tpu.memory_space<vmem>>, vector<2x1x512xf32>,
    %cst_24 = arith.constant 0.000000e+00 : f32
    %24 = vector.broadcast %cst_24 : f32 to vector<2x1x512xf32>
    %c0_25 = arith.constant 0 : index
    %c17 = arith.constant 17 : index
    %c0_26 = arith.constant 0 : index
    %25 = vector.load %arg7[%c0_25, %c17, %c0_26] : memref<2x18x512xf32, #tpu.memory_space<vmem>>, vector<2x1x512xf32>
    tpu.vector_store %arg7[%c0_25, %c17, %c0_26], %24 {strides = array<i32>} : memref<2x18x512xf32, #tpu.memory_space<vmem>>, vector<2x1x512xf32>,
    %26 = vector.shape_cast %21 : vector<32x512xf32> to vector<2x16x512xf32>
    %c0_27 = arith.constant 0 : index
    %c1_28 = arith.constant 1 : index
    %c0_29 = arith.constant 0 : index
    %27 = vector.load %arg7[%c0_27, %c1_28, %c0_29] : memref<2x18x512xf32, #tpu.memory_space<vmem>>, vector<2x16x512xf32>
    tpu.vector_store %arg7[%c0_27, %c1_28, %c0_29], %26 {strides = array<i32>} : memref<2x18x512xf32, #tpu.memory_space<vmem>>, vector<2x16x512xf32>,
    %c0_30 = arith.constant 0 : index
    %c0_31 = arith.constant 0 : index
    %c0_32 = arith.constant 0 : index
    %28 = vector.load %arg7[%c0_30, %c0_31, %c0_32] : memref<2x18x512xf32, #tpu.memory_space<vmem>>, vector<2x16x512xf32>
    %29 = vector.shape_cast %28 : vector<2x16x512xf32> to vector<32x512xf32>
    %30 = arith.truncf %29 : vector<32x512xf32> to vector<32x512xbf16>
    %c0_33 = arith.constant 0 : index
    %c0_34 = arith.constant 0 : index
    %c0_35 = arith.constant 0 : index
    %31 = vector.load %arg4[%c0_33, %c0_34, %c0_35] : memref<3x512x1024xbf16, #tpu.memory_space<vmem>>, vector<1x512x1024xbf16>
    %32 = vector.shape_cast %31 : vector<1x512x1024xbf16> to vector<512x1024xbf16>
    %cst_36 = arith.constant dense<0.000000e+00> : vector<32x1024xf32>
    %33 = tpu.matmul %30, %32, %cst_36 {dimension_numbers = #tpu.dot_dimension_numbers<[1], [0], [0], [1], [0, 0, 1, 1], [], []>} : vector<32x512xbf16>, vector<512x1024xbf16>, vector<32x1024xf32> -> vector<32x1024xf32>
    %c0_37 = arith.constant 0 : index
    %c1_38 = arith.constant 1 : index
    %c0_39 = arith.constant 0 : index
    %34 = vector.load %arg7[%c0_37, %c1_38, %c0_39] : memref<2x18x512xf32, #tpu.memory_space<vmem>>, vector<2x16x512xf32>
    %35 = vector.shape_cast %34 : vector<2x16x512xf32> to vector<32x512xf32>
    %36 = arith.truncf %35 : vector<32x512xf32> to vector<32x512xbf16>
    %c1_40 = arith.constant 1 : index
    %c0_41 = arith.constant 0 : index
    %c0_42 = arith.constant 0 : index
    %37 = vector.load %arg4[%c1_40, %c0_41, %c0_42] : memref<3x512x1024xbf16, #tpu.memory_space<vmem>>, vector<1x512x1024xbf16>
    %38 = vector.shape_cast %37 : vector<1x512x1024xbf16> to vector<512x1024xbf16>
    %cst_43 = arith.constant dense<0.000000e+00> : vector<32x1024xf32>
    %39 = tpu.matmul %36, %38, %cst_43 {dimension_numbers = #tpu.dot_dimension_numbers<[1], [0], [0], [1], [0, 0, 1, 1], [], []>} : vector<32x512xbf16>, vector<512x1024xbf16>, vector<32x1024xf32> -> vector<32x1024xf32>
    %40 = arith.addf %33, %39 : vector<32x1024xf32>
    %c0_44 = arith.constant 0 : index
    %c2_45 = arith.constant 2 : index
    %c0_46 = arith.constant 0 : index
    %41 = vector.load %arg7[%c0_44, %c2_45, %c0_46] : memref<2x18x512xf32, #tpu.memory_space<vmem>>, vector<2x16x512xf32>
    %42 = vector.shape_cast %41 : vector<2x16x512xf32> to vector<32x512xf32>
    %43 = arith.truncf %42 : vector<32x512xf32> to vector<32x512xbf16>
    %c2_47 = arith.constant 2 : index
    %c0_48 = arith.constant 0 : index
    %c0_49 = arith.constant 0 : index
    %44 = vector.load %arg4[%c2_47, %c0_48, %c0_49] : memref<3x512x1024xbf16, #tpu.memory_space<vmem>>, vector<1x512x1024xbf16>
    %45 = vector.shape_cast %44 : vector<1x512x1024xbf16> to vector<512x1024xbf16>
    %cst_50 = arith.constant dense<0.000000e+00> : vector<32x1024xf32>
    %46 = tpu.matmul %43, %45, %cst_50 {dimension_numbers = #tpu.dot_dimension_numbers<[1], [0], [0], [1], [0, 0, 1, 1], [], []>} : vector<32x512xbf16>, vector<512x1024xbf16>, vector<32x1024xf32> -> vector<32x1024xf32>
    %47 = arith.addf %40, %46 : vector<32x1024xf32>
    %c0_51 = arith.constant 0 : index
    %c0_52 = arith.constant 0 : index
    %48 = vector.load %arg5[%c0_51, %c0_52] : memref<1x1024xf32, #tpu.memory_space<vmem>>, vector<1x1024xf32>
    %49 = vector.broadcast %48 : vector<1x1024xf32> to vector<32x1024xf32>
    %50 = arith.addf %47, %49 : vector<32x1024xf32>
    %cst_53 = arith.constant 0.000000e+00 : f32
    %51 = vector.broadcast %cst_53 : f32 to vector<32x1024xf32>
    %52 = arith.maximumf %50, %51 : vector<32x1024xf32>
    %53 = arith.truncf %52 : vector<32x1024xf32> to vector<32x1024xbf16>
    %c0_54 = arith.constant 0 : index
    %c0_55 = arith.constant 0 : index
    %54 = vector.load %arg6[%c0_54, %c0_55] : memref<32x1024xbf16, #tpu.memory_space<vmem>>, vector<32x1024xbf16>
    tpu.vector_store %arg6[%c0_54, %c0_55], %53 {strides = array<i32>} : memref<32x1024xbf16, #tpu.memory_space<vmem>>, vector<32x1024xbf16>,
    return
  }
  func.func @transform_0(%arg0: i32) -> (i32, i32, i32) {
    %c0_i32 = arith.constant 0 : i32
    %c0_i32_0 = arith.constant 0 : i32
    %c0_i32_1 = arith.constant 0 : i32
    %c0_i32_2 = arith.constant 0 : i32
    return %c0_i32, %c0_i32_0, %c0_i32_1 : i32, i32, i32
  }
  func.func @transform_1(%arg0: i32) -> (i32, i32, i32) {
    %c0_i32 = arith.constant 0 : i32
    %c0_i32_0 = arith.constant 0 : i32
    %c0_i32_1 = arith.constant 0 : i32
    %c0_i32_2 = arith.constant 0 : i32
    return %c0_i32, %c0_i32_0, %c0_i32_1 : i32, i32, i32
  }
  func.func @transform_2(%arg0: i32) -> (i32, i32) {
    %c0_i32 = arith.constant 0 : i32
    %c0_i32_0 = arith.constant 0 : i32
    %c0_i32_1 = arith.constant 0 : i32
    return %c0_i32, %c0_i32_0 : i32, i32
  }
  func.func @transform_3(%arg0: i32) -> (i32, i32, i32) {
    %c0_i32 = arith.constant 0 : i32
    %c0_i32_0 = arith.constant 0 : i32
    %c0_i32_1 = arith.constant 0 : i32
    %c0_i32_2 = arith.constant 0 : i32
    return %c0_i32, %c0_i32_0, %c0_i32_1 : i32, i32, i32
  }
  func.func @transform_4(%arg0: i32) -> (i32, i32) {
    %c0_i32 = arith.constant 0 : i32
    %c0_i32_0 = arith.constant 0 : i32
    %c0_i32_1 = arith.constant 0 : i32
    return %c0_i32, %c0_i32_0 : i32, i32
  }
  func.func @transform_5(%arg0: i32) -> (i32, i32) {
    %c0_i32 = arith.constant 0 : i32
    %c0_i32_0 = arith.constant 0 : i32
    %c0_i32_1 = arith.constant 0 : i32
    return %c0_i32, %c0_i32_0 : i32, i32
  }
}

module attributes {stable_mosaic.version = 11 : i64} {
  func.func @fc_stack_kernel(%arg0: i32, %arg1: memref<2x4096xbf16, #tpu.memory_space<vmem>>, %arg2: memref<4096x32xbf16, #tpu.memory_space<vmem>>, %arg3: memref<1x32xf32, #tpu.memory_space<vmem>>, %arg4: memref<32x32xbf16, #tpu.memory_space<vmem>>, %arg5: memref<1x32xf32, #tpu.memory_space<vmem>>, %arg6: memref<1x32xf32, #tpu.memory_space<vmem>>, %arg7: memref<1x1xf32, #tpu.memory_space<vmem>>, %arg8: memref<2x128xf32, #tpu.memory_space<vmem>>, %arg9: memref<2x32xf32, #tpu.memory_space<vmem>>) attributes {dimension_semantics = [#tpu.dimension_semantics<arbitrary>], iteration_bounds = array<i64: 4>, scalar_prefetch = 0 : i64, scratch_operands = 1 : i64, tpu.core_type = #tpu.core_type<tc>, window_params = [{transform_indices = @transform_0, window_bounds = array<i64: 2, 4096>}, {transform_indices = @transform_1, window_bounds = array<i64: 4096, 32>}, {pipeline_mode = #tpu.pipeline_mode<synchronous>, transform_indices = @transform_2, window_bounds = array<i64: 1, 32>}, {pipeline_mode = #tpu.pipeline_mode<synchronous>, transform_indices = @transform_3, window_bounds = array<i64: 32, 32>}, {pipeline_mode = #tpu.pipeline_mode<synchronous>, transform_indices = @transform_4, window_bounds = array<i64: 1, 32>}, {pipeline_mode = #tpu.pipeline_mode<synchronous>, transform_indices = @transform_5, window_bounds = array<i64: 1, 32>}, {pipeline_mode = #tpu.pipeline_mode<synchronous>, transform_indices = @transform_6, window_bounds = array<i64: 1, 1>}, {pipeline_mode = #tpu.pipeline_mode<synchronous>, transform_indices = @transform_7, window_bounds = array<i64: 2, 128>}]} {
    %c0_i32 = arith.constant 0 : i32
    %0 = arith.cmpi eq, %arg0, %c0_i32 : i32
    %1 = arith.extui %0 : i1 to i32
    %c0_i32_0 = arith.constant 0 : i32
    %2 = arith.cmpi ne, %1, %c0_i32_0 : i32
    scf.if %2 {
      %cst_9 = arith.constant 0.000000e+00 : f32
      %12 = vector.broadcast %cst_9 : f32 to vector<2x32xf32>
      %c0_10 = arith.constant 0 : index
      %c0_11 = arith.constant 0 : index
      %13 = vector.load %arg9[%c0_10, %c0_11] : memref<2x32xf32, #tpu.memory_space<vmem>>, vector<2x32xf32>
      tpu.vector_store %arg9[%c0_10, %c0_11], %12 {strides = array<i32>} : memref<2x32xf32, #tpu.memory_space<vmem>>, vector<2x32xf32>,
    } else {
    }
    %c0 = arith.constant 0 : index
    %c0_1 = arith.constant 0 : index
    %3 = vector.load %arg9[%c0, %c0_1] : memref<2x32xf32, #tpu.memory_space<vmem>>, vector<2x32xf32>
    %c0_2 = arith.constant 0 : index
    %c0_3 = arith.constant 0 : index
    %4 = vector.load %arg1[%c0_2, %c0_3] : memref<2x4096xbf16, #tpu.memory_space<vmem>>, vector<2x4096xbf16>
    %c0_4 = arith.constant 0 : index
    %c0_5 = arith.constant 0 : index
    %5 = vector.load %arg2[%c0_4, %c0_5] : memref<4096x32xbf16, #tpu.memory_space<vmem>>, vector<4096x32xbf16>
    %cst = arith.constant dense<0.000000e+00> : vector<2x32xf32>
    %6 = tpu.matmul %4, %5, %cst {dimension_numbers = #tpu.dot_dimension_numbers<[1], [0], [0], [1], [0, 0, 1, 1], [], []>} : vector<2x4096xbf16>, vector<4096x32xbf16>, vector<2x32xf32> -> vector<2x32xf32>
    %7 = arith.addf %3, %6 : vector<2x32xf32>
    %c0_6 = arith.constant 0 : index
    %c0_7 = arith.constant 0 : index
    %8 = vector.load %arg9[%c0_6, %c0_7] : memref<2x32xf32, #tpu.memory_space<vmem>>, vector<2x32xf32>
    tpu.vector_store %arg9[%c0_6, %c0_7], %7 {strides = array<i32>} : memref<2x32xf32, #tpu.memory_space<vmem>>, vector<2x32xf32>,
    %c3_i32 = arith.constant 3 : i32
    %9 = arith.cmpi eq, %arg0, %c3_i32 : i32
    %10 = arith.extui %9 : i1 to i32
    %c0_i32_8 = arith.constant 0 : i32
    %11 = arith.cmpi ne, %10, %c0_i32_8 : i32
    scf.if %11 {
      %c0_9 = arith.constant 0 : index
      %c0_10 = arith.constant 0 : index
      %12 = vector.load %arg9[%c0_9, %c0_10] : memref<2x32xf32, #tpu.memory_space<vmem>>, vector<2x32xf32>
      %c0_11 = arith.constant 0 : index
      %c0_12 = arith.constant 0 : index
      %13 = vector.load %arg3[%c0_11, %c0_12] : memref<1x32xf32, #tpu.memory_space<vmem>>, vector<1x32xf32>
      %14 = vector.broadcast %13 : vector<1x32xf32> to vector<2x32xf32>
      %15 = arith.addf %12, %14 : vector<2x32xf32>
      %cst_13 = arith.constant 0.000000e+00 : f32
      %16 = vector.broadcast %cst_13 : f32 to vector<2x32xf32>
      %17 = arith.maximumf %15, %16 : vector<2x32xf32>
      %18 = arith.truncf %17 : vector<2x32xf32> to vector<2x32xbf16>
      %c0_14 = arith.constant 0 : index
      %c0_15 = arith.constant 0 : index
      %19 = vector.load %arg4[%c0_14, %c0_15] : memref<32x32xbf16, #tpu.memory_space<vmem>>, vector<32x32xbf16>
      %cst_16 = arith.constant dense<0.000000e+00> : vector<2x32xf32>
      %20 = tpu.matmul %18, %19, %cst_16 {dimension_numbers = #tpu.dot_dimension_numbers<[1], [0], [0], [1], [0, 0, 1, 1], [], []>} : vector<2x32xbf16>, vector<32x32xbf16>, vector<2x32xf32> -> vector<2x32xf32>
      %c0_17 = arith.constant 0 : index
      %c0_18 = arith.constant 0 : index
      %21 = vector.load %arg5[%c0_17, %c0_18] : memref<1x32xf32, #tpu.memory_space<vmem>>, vector<1x32xf32>
      %22 = vector.broadcast %21 : vector<1x32xf32> to vector<2x32xf32>
      %23 = arith.addf %20, %22 : vector<2x32xf32>
      %cst_19 = arith.constant 0.000000e+00 : f32
      %24 = vector.broadcast %cst_19 : f32 to vector<2x32xf32>
      %25 = arith.maximumf %23, %24 : vector<2x32xf32>
      %c0_20 = arith.constant 0 : index
      %c0_21 = arith.constant 0 : index
      %26 = vector.load %arg6[%c0_20, %c0_21] : memref<1x32xf32, #tpu.memory_space<vmem>>, vector<1x32xf32>
      %27 = vector.broadcast %26 : vector<1x32xf32> to vector<2x32xf32>
      %28 = arith.mulf %25, %27 : vector<2x32xf32>
      %cst_22 = arith.constant dense<0.000000e+00> : vector<2xf32>
      %29 = vector.multi_reduction <add>, %28, %cst_22 [1] : vector<2x32xf32> to vector<2xf32>
      %30 = vector.shape_cast %29 : vector<2xf32> to vector<2x1xf32>
      %c0_23 = arith.constant 0 : index
      %c0_24 = arith.constant 0 : index
      %31 = vector.load %arg7[%c0_23, %c0_24] : memref<1x1xf32, #tpu.memory_space<vmem>>, vector<1x1xf32>
      %32 = vector.broadcast %31 : vector<1x1xf32> to vector<2x1xf32>
      %33 = arith.addf %30, %32 : vector<2x1xf32>
      %34 = vector.shape_cast %33 : vector<2x1xf32> to vector<2x1xf32>
      %35 = vector.broadcast %34 : vector<2x1xf32> to vector<2x128xf32>
      %c0_25 = arith.constant 0 : index
      %c0_26 = arith.constant 0 : index
      %36 = vector.load %arg8[%c0_25, %c0_26] : memref<2x128xf32, #tpu.memory_space<vmem>>, vector<2x128xf32>
      tpu.vector_store %arg8[%c0_25, %c0_26], %35 {strides = array<i32>} : memref<2x128xf32, #tpu.memory_space<vmem>>, vector<2x128xf32>,
    } else {
    }
    return
  }
  func.func @transform_0(%arg0: i32) -> (i32, i32) {
    %c0_i32 = arith.constant 0 : i32
    %c0_i32_0 = arith.constant 0 : i32
    return %c0_i32, %arg0 : i32, i32
  }
  func.func @transform_1(%arg0: i32) -> (i32, i32) {
    %c0_i32 = arith.constant 0 : i32
    %c0_i32_0 = arith.constant 0 : i32
    return %arg0, %c0_i32 : i32, i32
  }
  func.func @transform_2(%arg0: i32) -> (i32, i32) {
    %c0_i32 = arith.constant 0 : i32
    %c0_i32_0 = arith.constant 0 : i32
    %c0_i32_1 = arith.constant 0 : i32
    return %c0_i32, %c0_i32_0 : i32, i32
  }
  func.func @transform_3(%arg0: i32) -> (i32, i32) {
    %c0_i32 = arith.constant 0 : i32
    %c0_i32_0 = arith.constant 0 : i32
    %c0_i32_1 = arith.constant 0 : i32
    return %c0_i32, %c0_i32_0 : i32, i32
  }
  func.func @transform_4(%arg0: i32) -> (i32, i32) {
    %c0_i32 = arith.constant 0 : i32
    %c0_i32_0 = arith.constant 0 : i32
    %c0_i32_1 = arith.constant 0 : i32
    return %c0_i32, %c0_i32_0 : i32, i32
  }
  func.func @transform_5(%arg0: i32) -> (i32, i32) {
    %c0_i32 = arith.constant 0 : i32
    %c0_i32_0 = arith.constant 0 : i32
    %c0_i32_1 = arith.constant 0 : i32
    return %c0_i32, %c0_i32_0 : i32, i32
  }
  func.func @transform_6(%arg0: i32) -> (i32, i32) {
    %c0_i32 = arith.constant 0 : i32
    %c0_i32_0 = arith.constant 0 : i32
    %c0_i32_1 = arith.constant 0 : i32
    return %c0_i32, %c0_i32_0 : i32, i32
  }
  func.func @transform_7(%arg0: i32) -> (i32, i32) {
    %c0_i32 = arith.constant 0 : i32
    %c0_i32_0 = arith.constant 0 : i32
    %c0_i32_1 = arith.constant 0 : i32
    return %c0_i32, %c0_i32_0 : i32, i32
  }
}

</mosaic_0001>

<bundles_post_ra>
// kernel: critic_forward.3
= control target key start
LH: loop header
LB: loop body
LE: loop exit
PB: predicated region body
PF: predicated region fallthrough
CT: control target
= control target key end

     0   :  { %s4336_s26 = smov 0   ;;  %s4689_s0 = inlined_call_operand.vmem [shape: bf16[2,16384], index: 0, kind: input, shape index: {}]   ;;  %s4690_s1 = inlined_call_operand.vmem [shape: bf16[16384,32], index: 1, kind: input, shape index: {}]   ;;  %s4691_s2 = inlined_call_operand.vmem [shape: f32[1,32], index: 2, kind: input, shape index: {}]   ;;  %s4692_s3 = inlined_call_operand.vmem [shape: bf16[32,32], index: 3, kind: input, shape index: {}]   ;;  %s4693_s4 = inlined_call_operand.vmem [shape: f32[1,32], index: 4, kind: input, shape index: {}]   ;;  %s4694_s5 = inlined_call_operand.vmem [shape: f32[1,32], index: 5, kind: input, shape index: {}]   ;;  %s4695_s6 = inlined_call_operand.<no memory space> [shape: f32[1,1], index: 6, kind: input, shape index: {}]   ;;  %s4696_s7 = inlined_call_operand.vmem [shape: f32[2,128], index: 7, kind: output, shape index: {}]  }
   0x1   :  { %v12_v0 = vstv %s4695_s6 }
   0x2   :  { %13 = vst [vmem:[#allocation3] sm:$0x1] %v12_v0 }
   0x3 LB: > { %s4342_s27 = sadd.s32 4294967295, %s4286_s26   ;;  %p3370_p0 = scmp.ge.s32.totalorder %s4286_s26, 1  ;;  %s4286_s26 = sphi %s4336_s26, %s19_s26  }
   0x4   : > { %p245_p1 = scmp.lt.s32.totalorder %s4286_s26, 5 }
   0x6   : > { %p246_p2 = pnand %p3370_p0, %p245_p1 }
   0x7   : > { %s3371_s6 = sshll.u32 (!%p246_p2), %s4342_s27, 5  ;;  %s3372_s28 = sshll.u32 (!%p246_p2), %s4342_s27, 9 }
   0x8   : > { %249 = sbr.rel (%p246_p2) target bundleno = 962 (0x3c2), region = 48  ;;  %p277_p3 = scmp.lt.s32.totalorder (!%p246_p2), %s3371_s6, 127 }
   0x9   : > { %p282_p4 = scmp.lt.s32.totalorder (!%p246_p2), %s3372_s28, 2047  ;;  %p3374_p5 = scmp.ne.s32.totalorder (!%p246_p2), %s4342_s27, 0 }
   0xd   : > { %s4698_s6 = smov (!%p277_p3, %s3371_s6), 127  ;;  %s4700_s28 = smov (!%p282_p4, %s3372_s28), 2047 }
   0xe   : > { %s4351_s8 = scalar_lea.vmem %s4689_s0, %s4698_s6  ;;  %s3373_s9 = sshll.u32 %s4700_s28, 2 }
   0xf   : > { %s4356_s12 = scalar_lea.vmem %s4690_s1, %s3373_s9  ;;  %291 = sbr.rel (%p3374_p5) target bundleno = 22 (0x16), region = 52 }
  0x14   : > { %vm292_vm0 = vcmask 254976   ;;  %v4288_v1 = vmov 0.0  }
  0x15   : > { %293 = vst.msk [vmem:[#allocation2] sm:$0x3] %vm292_vm0, %v4288_v1 }
  0x16 PF: > { %v4017_v2 = vld [vmem:[%s4356_s12 + $0x78] sm:$0xff]   ;;  %v4021_v6 = vld [vmem:[%s4356_s12 + $0x70] sm:$0xff]   ;;  %v4025_v10 = vld [vmem:[%s4356_s12 + $0x68] sm:$0xff]   ;;  %v819_v30 = vlaneseq  ;;  %v4289_v38 = vmov 1966171168   ;;  %vm3220_vm1 = vcmask 254976  }
  0x17   : > { %v4018_v3 = vld [vmem:[%s4356_s12 + $0xf8] sm:$0xff]   ;;  %3641 = vmatprep.subr.bf16.mxu0 %v4017_v2  ;;  %v4022_v7 = vld [vmem:[%s4356_s12 + $0xf0] sm:$0xff]   ;;  %v4026_v11 = vld [vmem:[%s4356_s12 + $0xe8] sm:$0xff]   ;;  %v817_v39 = vunpack.c.l.s4 %v4289_v38  ;;  %p3631_p6 = scmp.ne.s32.totalorder %s4342_s27, 3 }
  0x18   : > { %v4019_v4 = vld [vmem:[%s4356_s12 + $0x38] sm:$0xff]   ;;  %3663 = vmatprep.subr.bf16.mxu1 %v4018_v3  ;;  %v4023_v8 = vld [vmem:[%s4356_s12 + $0x30] sm:$0xff]   ;;  %v4027_v12 = vld [vmem:[%s4356_s12 + $0x28] sm:$0xff]   ;;  %v820_v35 = vshrl.u32 %v819_v30, 7 }
  0x19   : > { %v4020_v5 = vld [vmem:[%s4356_s12 + $0xb8] sm:$0xff]   ;;  %3642 = vmatpush3.bf16.msra.mxu0 %v4019_v4  ;;  %v4024_v9 = vld [vmem:[%s4356_s12 + $0xb0] sm:$0xff]   ;;  %v4028_v13 = vld [vmem:[%s4356_s12 + $0xa8] sm:$0xff]   ;;  %v818_v42 = vunpack.c.0.s8 %v817_v39 }
  0x1a   : > { %3664 = vmatpush3.bf16.msra.mxu1 %v4020_v5  ;;  %3643 = vmatprep.subr.bf16.mxu0 %v4021_v6  ;;  %v4029_v14 = vld [vmem:[%s4356_s12 + $0x60] sm:$0xff]   ;;  %v4033_v18 = vld [vmem:[%s4356_s12 + $0x58] sm:$0xff]   ;;  %v4037_v22 = vld [vmem:[%s4356_s12 + $0x50] sm:$0xff]  }
  0x1b   : > { %3665 = vmatprep.subr.bf16.mxu1 %v4022_v7  ;;  %v4030_v15 = vld [vmem:[%s4356_s12 + $0xe0] sm:$0xff]   ;;  %v4034_v19 = vld [vmem:[%s4356_s12 + $0xd8] sm:$0xff]   ;;  %v4038_v23 = vld [vmem:[%s4356_s12 + $0xd0] sm:$0xff]   ;;  %v4394_v43 = vsub.s32 %v818_v42, %v820_v35 }
  0x1c   : > { %v4031_v16 = vld [vmem:[%s4356_s12 + $0x20] sm:$0xff]   ;;  %v4035_v20 = vld [vmem:[%s4356_s12 + $0x18] sm:$0xff]   ;;  %v4039_v24 = vld [vmem:[%s4356_s12 + $0x10] sm:$0xff]  }
  0x1d   : > { %3644 = vmatpush3.bf16.msra.mxu0 %v4023_v8  ;;  %v4032_v17 = vld [vmem:[%s4356_s12 + $0xa0] sm:$0xff]   ;;  %v4036_v21 = vld [vmem:[%s4356_s12 + $0x98] sm:$0xff]   ;;  %v4040_v25 = vld [vmem:[%s4356_s12 + $0x90] sm:$0xff]  }
  0x1e   : > { %3666 = vmatpush3.bf16.msra.mxu1 %v4024_v9  ;;  %3645 = vmatprep.subr.bf16.mxu0 %v4025_v10  ;;  %v4041_v26 = vld [vmem:[%s4356_s12 + $0x48] sm:$0xff]   ;;  %v4045_v31 = vld [vmem:[%s4356_s12 + $0x40] sm:$0xff]   ;;  %v4050_v37 = vld [vmem:[%s4356_s12 + $0x178] sm:$0xff]  }
  0x1f   : > { %3667 = vmatprep.subr.bf16.mxu1 %v4026_v11  ;;  %v4042_v27 = vld [vmem:[%s4356_s12 + $0xc8] sm:$0xff]   ;;  %v4046_v32 = vld [vmem:[%s4356_s12 + $0xc0] sm:$0xff]   ;;  %v4051_v40 = vld [vmem:[%s4356_s12 + $0x1f8] sm:$0xff]  }
  0x20   : > { %v4043_v28 = vld [vmem:[%s4356_s12 + $0x8] sm:$0xff]   ;;  %v4047_v33 = vld [vmem:[%s4356_s12] sm:$0xff]   ;;  %v4052_v49 = vld [vmem:[%s4356_s12 + $0x138] sm:$0xff]  }
  0x21   : > { %3646 = vmatpush3.bf16.msra.mxu0 %v4027_v12  ;;  %v4044_v29 = vld [vmem:[%s4356_s12 + $0x88] sm:$0xff]   ;;  %v4048_v34 = vld [vmem:[%s4356_s12 + $0x80] sm:$0xff]   ;;  %v4053_v51 = vld [vmem:[%s4356_s12 + $0x1b8] sm:$0xff]  }
  0x22   : > { %3668 = vmatpush3.bf16.msra.mxu1 %v4028_v13  ;;  %3647 = vmatprep.subr.bf16.mxu0 %v4029_v14  ;;  %v295_v36 = vld [vmem:[%s4351_s8] sm:$0xff]  ;;  %v4054_v54 = vld [vmem:[%s4356_s12 + $0x170] sm:$0xff]   ;;  %v4058_v60 = vld [vmem:[%s4356_s12 + $0x168] sm:$0xff]  }
  0x23   : > { %3669 = vmatprep.subr.bf16.mxu1 %v4030_v15  ;;  %v815_v41 = vcombine.high %v295_v36, %v295_v36  ;;  %v822_v44 = vrot.slane %v295_v36, %v4394_v43  ;;  %v4055_v56 = vld [vmem:[%s4356_s12 + $0x1f0] sm:$0xff]   ;;  %v4059_v61 = vld [vmem:[%s4356_s12 + $0x1e8] sm:$0xff]   ;;  %v4062_v0 = vld [vmem:[%s4356_s12 + $0x160] sm:$0xff]  }
  0x24   : > { %v4056_v57 = vld [vmem:[%s4356_s12 + $0x130] sm:$0xff]   ;;  %v4060_v62 = vld [vmem:[%s4356_s12 + $0x128] sm:$0xff]   ;;  %v4063_v1 = vld [vmem:[%s4356_s12 + $0x1e0] sm:$0xff]  }
  0x25   : > { %3648 = vmatpush3.bf16.msra.mxu0 %v4031_v16  ;;  %v4398_v45 = vrot.slane %v815_v41, %v4394_v43  ;;  %v830_v46 = vcombine.high %v822_v44, %v822_v44  ;;  %v838_v47 = vrot.slane %v822_v44, %v4394_v43  ;;  %v4057_v59 = vld [vmem:[%s4356_s12 + $0x1b0] sm:$0xff]   ;;  %v4061_v63 = vld [vmem:[%s4356_s12 + $0x1a8] sm:$0xff]   ;;  %v4064_v2 = vld [vmem:[%s4356_s12 + $0x120] sm:$0xff]  }
  0x26   : > { %3670 = vmatpush3.bf16.msra.mxu1 %v4032_v17  ;;  %3649 = vmatprep.subr.bf16.mxu0 %v4033_v18  ;;  %v4065_v3 = vld [vmem:[%s4356_s12 + $0x1a0] sm:$0xff]   ;;  %v4066_v4 = vld [vmem:[%s4356_s12 + $0x158] sm:$0xff]   ;;  %v4070_v8 = vld [vmem:[%s4356_s12 + $0x150] sm:$0xff]  }
  0x27   : > { %3671 = vmatprep.subr.bf16.mxu1 %v4034_v19  ;;  %v831_v48 = vcombine.high %v4398_v45, %v4398_v45  ;;  %v852_v50 = vrot.slane %v830_v46, %v4394_v43  ;;  %v860_v53 = vcombine.high %v838_v47, %v838_v47  ;;  %v4067_v5 = vld [vmem:[%s4356_s12 + $0x1d8] sm:$0xff]   ;;  %v4071_v9 = vld [vmem:[%s4356_s12 + $0x1d0] sm:$0xff]   ;;  %v4074_v12 = vld [vmem:[%s4356_s12 + $0x148] sm:$0xff]  }
  0x28   : > { %v4068_v6 = vld [vmem:[%s4356_s12 + $0x118] sm:$0xff]   ;;  %v4072_v10 = vld [vmem:[%s4356_s12 + $0x110] sm:$0xff]   ;;  %v4075_v13 = vld [vmem:[%s4356_s12 + $0x1c8] sm:$0xff]  }
  0x29   : > { %3650 = vmatpush3.bf16.msra.mxu0 %v4035_v20  ;;  %v859_v52 = vrot.slane %v831_v48, %v4394_v43  ;;  %2611 = vmatprep.mubr.bf16.mxu0 %v852_v50  ;;  %v862_v55 = vcombine.high %v852_v50, %v852_v50  ;;  %v4069_v7 = vld [vmem:[%s4356_s12 + $0x198] sm:$0xff]   ;;  %v4073_v11 = vld [vmem:[%s4356_s12 + $0x190] sm:$0xff]   ;;  %v4076_v14 = vld [vmem:[%s4356_s12 + $0x108] sm:$0xff]   ;;  %v845_v20 = vrot.slane %v4398_v45, %v4394_v43 }
  0x2a   : > { %3672 = vmatpush3.bf16.msra.mxu1 %v4036_v21  ;;  %3651 = vmatprep.subr.bf16.mxu0 %v4037_v22  ;;  %v4077_v15 = vld [vmem:[%s4356_s12 + $0x188] sm:$0xff]   ;;  %v4078_v16 = vld [vmem:[%s4356_s12 + $0x140] sm:$0xff]   ;;  %v4082_v21 = vld [vmem:[%s4356_s12 + $0x278] sm:$0xff]  }
  0x2b   : > { %3673 = vmatprep.subr.bf16.mxu1 %v4038_v23  ;;  %v863_v58 = vcombine.high %v859_v52, %v859_v52  ;;  %2651 = vmatprep.mubr.bf16.mxu1 %v862_v55  ;;  %v4079_v17 = vld [vmem:[%s4356_s12 + $0x1c0] sm:$0xff]   ;;  %v4083_v22 = vld [vmem:[%s4356_s12 + $0x2f8] sm:$0xff]   ;;  %v4090_v30 = vld [vmem:[%s4356_s12 + $0x268] sm:$0xff]  }
  0x2c   : > { %v4080_v18 = vld [vmem:[%s4356_s12 + $0x100] sm:$0xff]   ;;  %v4084_v23 = vld [vmem:[%s4356_s12 + $0x238] sm:$0xff]   ;;  %v4102_v42 = vld [vmem:[%s4356_s12 + $0x250] sm:$0xff]  }
  0x2d   : > { %3652 = vmatpush3.bf16.msra.mxu0 %v4039_v24  ;;  %v4081_v19 = vld [vmem:[%s4356_s12 + $0x180] sm:$0xff]   ;;  %v4085_v24 = vld [vmem:[%s4356_s12 + $0x2b8] sm:$0xff]   ;;  %v4103_v44 = vld [vmem:[%s4356_s12 + $0x2d0] sm:$0xff]  }
  0x2e   : > { %3674 = vmatpush3.bf16.msra.mxu1 %v4040_v25  ;;  %3653 = vmatprep.subr.bf16.mxu0 %v4041_v26  ;;  %v861_v25 = vcombine.high %v845_v20, %v845_v20  ;;  %v4086_v26 = vld [vmem:[%s4356_s12 + $0x270] sm:$0xff]   ;;  %v4095_v35 = vld [vmem:[%s4356_s12 + $0x2e0] sm:$0xff]   ;;  %v4098_v38 = vld [vmem:[%s4356_s12 + $0x258] sm:$0xff]  }
  0x2f   : > { %3675 = vmatprep.subr.bf16.mxu1 %v4042_v27  ;;  %v4087_v27 = vld [vmem:[%s4356_s12 + $0x2f0] sm:$0xff]   ;;  %v4096_v36 = vld [vmem:[%s4356_s12 + $0x220] sm:$0xff]   ;;  %v4099_v39 = vld [vmem:[%s4356_s12 + $0x2d8] sm:$0xff]  }
  0x30   : > { %v4101_v41 = vld [vmem:[%s4356_s12 + $0x298] sm:$0xff]   ;;  %v4104_v45 = vld [vmem:[%s4356_s12 + $0x210] sm:$0xff]   ;;  %v296_v48 = vld [vmem:[%s4351_s8 + $0x8] sm:$0xff] }
  0x31   : > { %3654 = vmatpush3.bf16.msra.mxu0 %v4043_v28  ;;  %v4088_v28 = vld [vmem:[%s4356_s12 + $0x230] sm:$0xff]   ;;  %v871_v50 = vrot.slane %v296_v48, %v4394_v43 }
  0x32   : > { %3676 = vmatpush3.bf16.msra.mxu1 %v4044_v29  ;;  %3655 = vmatprep.subr.bf16.mxu0 %v4045_v31  ;;  %v4089_v29 = vld [vmem:[%s4356_s12 + $0x2b0] sm:$0xff]   ;;  %v4091_v31 = vld [vmem:[%s4356_s12 + $0x2e8] sm:$0xff]  }
  0x33   : > { %3677 = vmatprep.subr.bf16.mxu1 %v4046_v32  ;;  %v4092_v32 = vld [vmem:[%s4356_s12 + $0x228] sm:$0xff]   ;;  %v4105_v46 = vld [vmem:[%s4356_s12 + $0x290] sm:$0xff]  }
  0x35   : > { %3656 = vmatpush3.bf16.msra.mxu0 %v4047_v33  ;;  %v4093_v33 = vld [vmem:[%s4356_s12 + $0x2a8] sm:$0xff]  }
  0x36   : > { %3678 = vmatpush3.bf16.msra.mxu1 %v4048_v34  ;;  %3685 = vmatprep.subr.bf16.mxu0 %v4050_v37  ;;  %v4094_v34 = vld [vmem:[%s4356_s12 + $0x260] sm:$0xff]  }
  0x37   : > { %3707 = vmatprep.subr.bf16.mxu1 %v4051_v40  ;;  %v4097_v37 = vld [vmem:[%s4356_s12 + $0x2a0] sm:$0xff]   ;;  %v4100_v40 = vld [vmem:[%s4356_s12 + $0x218] sm:$0xff]  }
  0x38   : > { %2612 = vmatmul.mubr.bf16.vlgmr.msra.gmra.mxu0 %v838_v47  ;;  %v4106_v47 = vld [vmem:[%s4356_s12 + $0x248] sm:$0xff]  }
  0x39   : > { %3686 = vmatpush3.bf16.msra.mxu0 %v4052_v49  ;;  %2652 = vmatmul.mubr.bf16.vlgmr.msra.gmra.mxu1 %v860_v53  ;;  %v4107_v49 = vld [vmem:[%s4356_s12 + $0x2c8] sm:$0xff]  }
  0x3a   : > { %3687 = vmatprep.subr.bf16.mxu0 %v4054_v54  ;;  %3708 = vmatpush3.bf16.msra.mxu1 %v4053_v51  ;;  %v864_v51 = vcombine.high %v296_v48, %v296_v48  ;;  %v4109_v53 = vld [vmem:[%s4356_s12 + $0x288] sm:$0xff]   ;;  %v879_v54 = vcombine.high %v871_v50, %v871_v50 }
  0x3b   : > { %2691 = vmatprep.mubr.bf16.mxu0 %v859_v52  ;;  %3709 = vmatprep.subr.bf16.mxu1 %v4055_v56  ;;  %v4108_v52 = vld [vmem:[%s4356_s12 + $0x208] sm:$0xff]   ;;  %v4110_v56 = vld [vmem:[%s4356_s12 + $0x240] sm:$0xff]  }
  0x3c   : > { %2731 = vmatprep.mubr.bf16.mxu1 %v863_v58  ;;  %v4468_v55 = vrot.slane %v864_v51, %v4394_v43  ;;  %v901_v58 = vrot.slane %v879_v54, %v4394_v43  ;;  %v4157_v48 = vld [vmem:[%s4356_s12 + $0x428] sm:$0xff]   ;;  %v4160_v51 = vld [vmem:[%s4356_s12 + $0x4e0] sm:$0xff]   ;;  %v4163_v54 = vld [vmem:[%s4356_s12 + $0x458] sm:$0xff]  }
  0x3d   : > { %3688 = vmatpush3.bf16.msra.mxu0 %v4056_v57  ;;  %v4111_v57 = vld [vmem:[%s4356_s12 + $0x2c0] sm:$0xff]  }
  0x3e   : > { %3689 = vmatprep.subr.bf16.mxu0 %v4058_v60  ;;  %3710 = vmatpush3.bf16.msra.mxu1 %v4057_v59  ;;  %v880_v59 = vcombine.high %v4468_v55, %v4468_v55  ;;  %v4112_v60 = vld [vmem:[%s4356_s12 + $0x200] sm:$0xff]  }
  0x3f   : > { %3711 = vmatprep.subr.bf16.mxu1 %v4059_v61  ;;  %v4113_v61 = vld [vmem:[%s4356_s12 + $0x280] sm:$0xff]  }
  0x41   : > { %3690 = vmatpush3.bf16.msra.mxu0 %v4060_v62  ;;  %v911_v62 = vcombine.high %v901_v58, %v901_v58 }
  0x42   : > { %3691 = vmatprep.subr.bf16.mxu0 %v4062_v0  ;;  %3712 = vmatpush3.bf16.msra.mxu1 %v4061_v63  ;;  %v887_v63 = vrot.slane %v871_v50, %v4394_v43  ;;  %v4114_v0 = vld [vmem:[%s4356_s12 + $0x378] sm:$0xff]   ;;  %v4159_v50 = vld [vmem:[%s4356_s12 + $0x460] sm:$0xff]  }
  0x43   : > { %3713 = vmatprep.subr.bf16.mxu1 %v4063_v1  ;;  %v4115_v1 = vld [vmem:[%s4356_s12 + $0x3f8] sm:$0xff]  }
  0x45   : > { %3692 = vmatpush3.bf16.msra.mxu0 %v4064_v2  ;;  %v908_v2 = vrot.slane %v880_v59, %v4394_v43  ;;  %v4168_v59 = vld [vmem:[%s4356_s12 + $0x4d0] sm:$0xff]  }
  0x46   : > { %3693 = vmatprep.subr.bf16.mxu0 %v4066_v4  ;;  %3714 = vmatpush3.bf16.msra.mxu1 %v4065_v3  ;;  %v4116_v3 = vld [vmem:[%s4356_s12 + $0x338] sm:$0xff]  }
  0x47   : > { %3715 = vmatprep.subr.bf16.mxu1 %v4067_v5  ;;  %v4117_v4 = vld [vmem:[%s4356_s12 + $0x3b8] sm:$0xff]   ;;  %v909_v5 = vcombine.high %v887_v63, %v887_v63 }
  0x49   : > { %3694 = vmatpush3.bf16.msra.mxu0 %v4068_v6  ;;  %v4118_v6 = vld [vmem:[%s4356_s12 + $0x370] sm:$0xff]  }
  0x4a   : > { %3695 = vmatprep.subr.bf16.mxu0 %v4070_v8  ;;  %3716 = vmatpush3.bf16.msra.mxu1 %v4069_v7  ;;  %v4119_v7 = vld [vmem:[%s4356_s12 + $0x3f0] sm:$0xff]   ;;  %v912_v8 = vcombine.high %v908_v2, %v908_v2 }
  0x4b   : > { %3717 = vmatprep.subr.bf16.mxu1 %v4071_v9  ;;  %v4120_v9 = vld [vmem:[%s4356_s12 + $0x330] sm:$0xff]  }
  0x4d   : > { %3696 = vmatpush3.bf16.msra.mxu0 %v4072_v10  ;;  %v4121_v10 = vld [vmem:[%s4356_s12 + $0x3b0] sm:$0xff]  }
  0x4e   : > { %3697 = vmatprep.subr.bf16.mxu0 %v4074_v12  ;;  %3718 = vmatpush3.bf16.msra.mxu1 %v4073_v11  ;;  %v4122_v11 = vld [vmem:[%s4356_s12 + $0x368] sm:$0xff]  }
  0x4f   : > { %3719 = vmatprep.subr.bf16.mxu1 %v4075_v13  ;;  %v4123_v12 = vld [vmem:[%s4356_s12 + $0x3e8] sm:$0xff]  }
  0x50   : > { %v4124_v13 = vld [vmem:[%s4356_s12 + $0x328] sm:$0xff]  }
  0x51   : > { %3698 = vmatpush3.bf16.msra.mxu0 %v4076_v14  ;;  %v4125_v14 = vld [vmem:[%s4356_s12 + $0x3a8] sm:$0xff]  }
  0x52   : > { %3699 = vmatprep.subr.bf16.mxu0 %v4078_v16  ;;  %3720 = vmatpush3.bf16.msra.mxu1 %v4077_v15  ;;  %v4126_v15 = vld [vmem:[%s4356_s12 + $0x360] sm:$0xff]  }
  0x53   : > { %3721 = vmatprep.subr.bf16.mxu1 %v4079_v17  ;;  %v4127_v16 = vld [vmem:[%s4356_s12 + $0x3e0] sm:$0xff]  }
  0x54   : > { %v4128_v17 = vld [vmem:[%s4356_s12 + $0x320] sm:$0xff]  }
  0x55   : > { %3700 = vmatpush3.bf16.msra.mxu0 %v4080_v18  ;;  %v4129_v18 = vld [vmem:[%s4356_s12 + $0x3a0] sm:$0xff]  }
  0x56   : > { %3729 = vmatprep.subr.bf16.mxu0 %v4082_v21  ;;  %3722 = vmatpush3.bf16.msra.mxu1 %v4081_v19  ;;  %v4130_v19 = vld [vmem:[%s4356_s12 + $0x358] sm:$0xff]  }
  0x57   : > { %3751 = vmatprep.subr.bf16.mxu1 %v4083_v22  ;;  %v4132_v21 = vld [vmem:[%s4356_s12 + $0x318] sm:$0xff]  }
  0x58   : > { %2692 = vmatmul.mubr.bf16.vlgmr.msra.gmra.mxu0 %v845_v20  ;;  %v4131_v20 = vld [vmem:[%s4356_s12 + $0x3d8] sm:$0xff]  }
  0x59   : > { %3730 = vmatpush3.bf16.msra.mxu0 %v4084_v23  ;;  %2732 = vmatmul.mubr.bf16.vlgmr.msra.gmra.mxu1 %v861_v25  ;;  %v4133_v22 = vld [vmem:[%s4356_s12 + $0x398] sm:$0xff]   ;;  %v4134_v23 = vld [vmem:[%s4356_s12 + $0x350] sm:$0xff]  }
  0x5a   : > { %3731 = vmatprep.subr.bf16.mxu0 %v4086_v26  ;;  %3752 = vmatpush3.bf16.msra.mxu1 %v4085_v24  ;;  %v4135_v24 = vld [vmem:[%s4356_s12 + $0x3d0] sm:$0xff]  }
  0x5b   : > { %3753 = vmatprep.subr.bf16.mxu1 %v4087_v27  ;;  %2771 = vmatprep.mubr.bf16.mxu0 %v901_v58  ;;  %v4136_v25 = vld [vmem:[%s4356_s12 + $0x310] sm:$0xff]   ;;  %v4138_v27 = vld [vmem:[%s4356_s12 + $0x348] sm:$0xff]  }
  0x5c   : > { %2811 = vmatprep.mubr.bf16.mxu1 %v911_v62  ;;  %v4137_v26 = vld [vmem:[%s4356_s12 + $0x390] sm:$0xff]   ;;  %v4171_v62 = vld [vmem:[%s4356_s12 + $0x448] sm:$0xff]  }
  0x5d   : > { %3732 = vmatpush3.bf16.msra.mxu0 %v4088_v28  ;;  %v4139_v28 = vld [vmem:[%s4356_s12 + $0x3c8] sm:$0xff]   ;;  %v4167_v58 = vld [vmem:[%s4356_s12 + $0x450] sm:$0xff]  }
  0x5e   : > { %3733 = vmatprep.subr.bf16.mxu0 %v4090_v30  ;;  %3754 = vmatpush3.bf16.msra.mxu1 %v4089_v29  ;;  %v4140_v29 = vld [vmem:[%s4356_s12 + $0x308] sm:$0xff]  }
  0x5f   : > { %3755 = vmatprep.subr.bf16.mxu1 %v4091_v31  ;;  %v4141_v30 = vld [vmem:[%s4356_s12 + $0x388] sm:$0xff]   ;;  %v4142_v31 = vld [vmem:[%s4356_s12 + $0x340] sm:$0xff]  }
  0x61   : > { %3734 = vmatpush3.bf16.msra.mxu0 %v4092_v32  ;;  %v4143_v32 = vld [vmem:[%s4356_s12 + $0x3c0] sm:$0xff]  }
  0x62   : > { %3735 = vmatprep.subr.bf16.mxu0 %v4094_v34  ;;  %3756 = vmatpush3.bf16.msra.mxu1 %v4093_v33  ;;  %v4144_v33 = vld [vmem:[%s4356_s12 + $0x300] sm:$0xff]  }
  0x63   : > { %3757 = vmatprep.subr.bf16.mxu1 %v4095_v35  ;;  %v4145_v34 = vld [vmem:[%s4356_s12 + $0x380] sm:$0xff]   ;;  %v894_v35 = vrot.slane %v4468_v55, %v4394_v43  ;;  %v4164_v55 = vld [vmem:[%s4356_s12 + $0x4d8] sm:$0xff]  }
  0x65   : > { %3736 = vmatpush3.bf16.msra.mxu0 %v4096_v36  ;;  %v4147_v36 = vld [vmem:[%s4356_s12 + $0x478] sm:$0xff]  }
  0x66   : > { %3737 = vmatprep.subr.bf16.mxu0 %v4098_v38  ;;  %3758 = vmatpush3.bf16.msra.mxu1 %v4097_v37  ;;  %v4148_v37 = vld [vmem:[%s4356_s12 + $0x4f8] sm:$0xff]  }
  0x67   : > { %3759 = vmatprep.subr.bf16.mxu1 %v4099_v39  ;;  %v4149_v38 = vld [vmem:[%s4356_s12 + $0x438] sm:$0xff]  }
  0x68   : > { %v4150_v39 = vld [vmem:[%s4356_s12 + $0x4b8] sm:$0xff]  }
  0x69   : > { %3738 = vmatpush3.bf16.msra.mxu0 %v4100_v40  ;;  %v910_v40 = vcombine.high %v894_v35, %v894_v35 }
  0x6a   : > { %3739 = vmatprep.subr.bf16.mxu0 %v4102_v42  ;;  %3760 = vmatpush3.bf16.msra.mxu1 %v4101_v41  ;;  %v4151_v41 = vld [vmem:[%s4356_s12 + $0x470] sm:$0xff]  }
  0x6b   : > { %3761 = vmatprep.subr.bf16.mxu1 %v4103_v44  ;;  %v4152_v42 = vld [vmem:[%s4356_s12 + $0x4f0] sm:$0xff]  }
  0x6c   : > { %v4153_v44 = vld [vmem:[%s4356_s12 + $0x430] sm:$0xff]  }
  0x6d   : > { %3740 = vmatpush3.bf16.msra.mxu0 %v4104_v45  ;;  %v4154_v45 = vld [vmem:[%s4356_s12 + $0x4b0] sm:$0xff]  }
  0x6e   : > { %3741 = vmatprep.subr.bf16.mxu0 %v4106_v47  ;;  %3762 = vmatpush3.bf16.msra.mxu1 %v4105_v46  ;;  %v4155_v46 = vld [vmem:[%s4356_s12 + $0x468] sm:$0xff]  }
  0x6f   : > { %3763 = vmatprep.subr.bf16.mxu1 %v4107_v49  ;;  %v4156_v47 = vld [vmem:[%s4356_s12 + $0x4e8] sm:$0xff]  }
  0x70   : > { %v4158_v49 = vld [vmem:[%s4356_s12 + $0x4a8] sm:$0xff]  }
  0x71   : > { %3742 = vmatpush3.bf16.msra.mxu0 %v4108_v52  ;;  %v4161_v52 = vld [vmem:[%s4356_s12 + $0x420] sm:$0xff]  }
  0x72   : > { %3743 = vmatprep.subr.bf16.mxu0 %v4110_v56  ;;  %3764 = vmatpush3.bf16.msra.mxu1 %v4109_v53  ;;  %v4162_v53 = vld [vmem:[%s4356_s12 + $0x4a0] sm:$0xff]   ;;  %v4165_v56 = vld [vmem:[%s4356_s12 + $0x418] sm:$0xff]  }
  0x73   : > { %3765 = vmatprep.subr.bf16.mxu1 %v4111_v57  ;;  %v4166_v57 = vld [vmem:[%s4356_s12 + $0x498] sm:$0xff]  }
  0x75   : > { %3744 = vmatpush3.bf16.msra.mxu0 %v4112_v60  ;;  %v4169_v60 = vld [vmem:[%s4356_s12 + $0x410] sm:$0xff]  }
  0x76   : > { %3773 = vmatprep.subr.bf16.mxu0 %v4114_v0  ;;  %3766 = vmatpush3.bf16.msra.mxu1 %v4113_v61  ;;  %v4170_v61 = vld [vmem:[%s4356_s12 + $0x490] sm:$0xff]   ;;  %v4172_v0 = vld [vmem:[%s4356_s12 + $0x4c8] sm:$0xff]  }
  0x77   : > { %3795 = vmatprep.subr.bf16.mxu1 %v4115_v1 }
  0x78   : > { %2772 = vmatmul.mubr.bf16.vlgmr.msra.gmra.mxu0 %v887_v63  ;;  %v297_v63 = vld [vmem:[%s4351_s8 + $0x10] sm:$0xff] }
  0x79   : > { %3774 = vmatpush3.bf16.msra.mxu0 %v4116_v3  ;;  %2851 = vmatprep.mubr.bf16.mxu0 %v908_v2  ;;  %v920_v1 = vrot.slane %v297_v63, %v4394_v43  ;;  %v913_v2 = vcombine.high %v297_v63, %v297_v63  ;;  %v4173_v3 = vld [vmem:[%s4356_s12 + $0x408] sm:$0xff]  }
  0x7a   : > { %2812 = vmatmul.mubr.bf16.vlgmr.msra.gmra.mxu1 %v909_v5  ;;  %3775 = vmatprep.subr.bf16.mxu0 %v4118_v6  ;;  %v4222_v63 = vld [vmem:[%s4356_s12 + $0x628] sm:$0xff]  }
  0x7b   : > { %3796 = vmatpush3.bf16.msra.mxu1 %v4117_v4  ;;  %2891 = vmatprep.mubr.bf16.mxu1 %v912_v8  ;;  %v4174_v4 = vld [vmem:[%s4356_s12 + $0x488] sm:$0xff]   ;;  %v928_v5 = vcombine.high %v920_v1, %v920_v1  ;;  %v4544_v6 = vrot.slane %v913_v2, %v4394_v43  ;;  %v4176_v8 = vld [vmem:[%s4356_s12 + $0x4c0] sm:$0xff]  }
  0x7c   : > { %3797 = vmatprep.subr.bf16.mxu1 %v4119_v7  ;;  %v4175_v7 = vld [vmem:[%s4356_s12 + $0x440] sm:$0xff]  }
  0x7d   : > { %3776 = vmatpush3.bf16.msra.mxu0 %v4120_v9  ;;  %v950_v9 = vrot.slane %v928_v5, %v4394_v43  ;;  %v4225_v2 = vld [vmem:[%s4356_s12 + $0x6e0] sm:$0xff]   ;;  %v4228_v5 = vld [vmem:[%s4356_s12 + $0x658] sm:$0xff]  }
  0x7e   : > { %3777 = vmatprep.subr.bf16.mxu0 %v4122_v11  ;;  %v4177_v11 = vld [vmem:[%s4356_s12 + $0x400] sm:$0xff]  }
  0x7f   : > { %3798 = vmatpush3.bf16.msra.mxu1 %v4121_v10  ;;  %v929_v10 = vcombine.high %v4544_v6, %v4544_v6 }
  0x80   : > { %3799 = vmatprep.subr.bf16.mxu1 %v4123_v12  ;;  %v4178_v12 = vld [vmem:[%s4356_s12 + $0x480] sm:$0xff]  }
  0x81   : > { %3778 = vmatpush3.bf16.msra.mxu0 %v4124_v13  ;;  %v960_v13 = vcombine.high %v950_v9, %v950_v9 }
  0x82   : > { %3779 = vmatprep.subr.bf16.mxu0 %v4126_v15  ;;  %v4179_v15 = vld [vmem:[%s4356_s12 + $0x578] sm:$0xff]  }
  0x83   : > { %3800 = vmatpush3.bf16.msra.mxu1 %v4125_v14  ;;  %v936_v14 = vrot.slane %v920_v1, %v4394_v43  ;;  %v4224_v1 = vld [vmem:[%s4356_s12 + $0x660] sm:$0xff]  }
  0x84   : > { %3801 = vmatprep.subr.bf16.mxu1 %v4127_v16  ;;  %v4180_v16 = vld [vmem:[%s4356_s12 + $0x5f8] sm:$0xff]  }
  0x85   : > { %3780 = vmatpush3.bf16.msra.mxu0 %v4128_v17  ;;  %v957_v17 = vrot.slane %v929_v10, %v4394_v43  ;;  %v4233_v10 = vld [vmem:[%s4356_s12 + $0x6d0] sm:$0xff]  }
  0x86   : > { %3781 = vmatprep.subr.bf16.mxu0 %v4130_v19  ;;  %v4182_v19 = vld [vmem:[%s4356_s12 + $0x5b8] sm:$0xff]  }
  0x87   : > { %3802 = vmatpush3.bf16.msra.mxu1 %v4129_v18  ;;  %v4181_v18 = vld [vmem:[%s4356_s12 + $0x538] sm:$0xff]  }
  0x88   : > { %3803 = vmatprep.subr.bf16.mxu1 %v4131_v20  ;;  %v958_v20 = vcombine.high %v936_v14, %v936_v14 }
  0x89   : > { %3782 = vmatpush3.bf16.msra.mxu0 %v4132_v21  ;;  %v4183_v21 = vld [vmem:[%s4356_s12 + $0x570] sm:$0xff]  }
  0x8a   : > { %3783 = vmatprep.subr.bf16.mxu0 %v4134_v23  ;;  %v961_v23 = vcombine.high %v957_v17, %v957_v17 }
  0x8b   : > { %3804 = vmatpush3.bf16.msra.mxu1 %v4133_v22  ;;  %v4184_v22 = vld [vmem:[%s4356_s12 + $0x5f0] sm:$0xff]  }
  0x8c   : > { %3805 = vmatprep.subr.bf16.mxu1 %v4135_v24  ;;  %v4185_v24 = vld [vmem:[%s4356_s12 + $0x530] sm:$0xff]  }
  0x8d   : > { %3784 = vmatpush3.bf16.msra.mxu0 %v4136_v25  ;;  %v4186_v25 = vld [vmem:[%s4356_s12 + $0x5b0] sm:$0xff]  }
  0x8e   : > { %3785 = vmatprep.subr.bf16.mxu0 %v4138_v27  ;;  %v4188_v27 = vld [vmem:[%s4356_s12 + $0x5e8] sm:$0xff]  }
  0x8f   : > { %3806 = vmatpush3.bf16.msra.mxu1 %v4137_v26  ;;  %v4187_v26 = vld [vmem:[%s4356_s12 + $0x568] sm:$0xff]  }
  0x90   : > { %3807 = vmatprep.subr.bf16.mxu1 %v4139_v28  ;;  %v4189_v28 = vld [vmem:[%s4356_s12 + $0x528] sm:$0xff]  }
  0x91   : > { %3786 = vmatpush3.bf16.msra.mxu0 %v4140_v29  ;;  %v4190_v29 = vld [vmem:[%s4356_s12 + $0x5a8] sm:$0xff]  }
  0x92   : > { %3787 = vmatprep.subr.bf16.mxu0 %v4142_v31  ;;  %v4192_v31 = vld [vmem:[%s4356_s12 + $0x5e0] sm:$0xff]  }
  0x93   : > { %3808 = vmatpush3.bf16.msra.mxu1 %v4141_v30  ;;  %v4191_v30 = vld [vmem:[%s4356_s12 + $0x560] sm:$0xff]  }
  0x94   : > { %3809 = vmatprep.subr.bf16.mxu1 %v4143_v32  ;;  %v4193_v32 = vld [vmem:[%s4356_s12 + $0x520] sm:$0xff]  }
  0x95   : > { %3788 = vmatpush3.bf16.msra.mxu0 %v4144_v33  ;;  %v4194_v33 = vld [vmem:[%s4356_s12 + $0x5a0] sm:$0xff]  }
  0x96   : > { %3817 = vmatprep.subr.bf16.mxu0 %v4147_v36  ;;  %v4197_v36 = vld [vmem:[%s4356_s12 + $0x518] sm:$0xff]  }
  0x97   : > { %3810 = vmatpush3.bf16.msra.mxu1 %v4145_v34  ;;  %v4195_v34 = vld [vmem:[%s4356_s12 + $0x558] sm:$0xff]  }
  0x98   : > { %2852 = vmatmul.mubr.bf16.vlgmr.msra.gmra.mxu0 %v894_v35  ;;  %3839 = vmatprep.subr.bf16.mxu1 %v4148_v37  ;;  %v4196_v35 = vld [vmem:[%s4356_s12 + $0x5d8] sm:$0xff]  }
  0x99   : > { %3818 = vmatpush3.bf16.msra.mxu0 %v4149_v38  ;;  %2931 = vmatprep.mubr.bf16.mxu0 %v950_v9  ;;  %v4198_v37 = vld [vmem:[%s4356_s12 + $0x598] sm:$0xff]   ;;  %v4199_v38 = vld [vmem:[%s4356_s12 + $0x550] sm:$0xff]  }
  0x9a   : > { %2892 = vmatmul.mubr.bf16.vlgmr.msra.gmra.mxu1 %v910_v40  ;;  %3819 = vmatprep.subr.bf16.mxu0 %v4151_v41  ;;  %v4201_v40 = vld [vmem:[%s4356_s12 + $0x510] sm:$0xff]  }
  0x9b   : > { %3840 = vmatpush3.bf16.msra.mxu1 %v4150_v39  ;;  %2971 = vmatprep.mubr.bf16.mxu1 %v960_v13  ;;  %v4200_v39 = vld [vmem:[%s4356_s12 + $0x5d0] sm:$0xff]   ;;  %v4236_v13 = vld [vmem:[%s4356_s12 + $0x648] sm:$0xff]  }
  0x9c   : > { %3841 = vmatprep.subr.bf16.mxu1 %v4152_v42  ;;  %v4202_v41 = vld [vmem:[%s4356_s12 + $0x590] sm:$0xff]   ;;  %v4203_v42 = vld [vmem:[%s4356_s12 + $0x548] sm:$0xff]  }
  0x9d   : > { %3820 = vmatpush3.bf16.msra.mxu0 %v4153_v44  ;;  %v4204_v44 = vld [vmem:[%s4356_s12 + $0x5c8] sm:$0xff]   ;;  %v4232_v9 = vld [vmem:[%s4356_s12 + $0x650] sm:$0xff]  }
  0x9e   : > { %3821 = vmatprep.subr.bf16.mxu0 %v4155_v46  ;;  %v4206_v46 = vld [vmem:[%s4356_s12 + $0x588] sm:$0xff]  }
  0x9f   : > { %3842 = vmatpush3.bf16.msra.mxu1 %v4154_v45  ;;  %v4205_v45 = vld [vmem:[%s4356_s12 + $0x508] sm:$0xff]  }
  0xa0   : > { %3843 = vmatprep.subr.bf16.mxu1 %v4156_v47  ;;  %v4207_v47 = vld [vmem:[%s4356_s12 + $0x540] sm:$0xff]  }
  0xa1   : > { %3822 = vmatpush3.bf16.msra.mxu0 %v4157_v48  ;;  %v4208_v48 = vld [vmem:[%s4356_s12 + $0x5c0] sm:$0xff]  }
  0xa2   : > { %3823 = vmatprep.subr.bf16.mxu0 %v4159_v50  ;;  %v4210_v50 = vld [vmem:[%s4356_s12 + $0x580] sm:$0xff]  }
  0xa3   : > { %3844 = vmatpush3.bf16.msra.mxu1 %v4158_v49  ;;  %v4209_v49 = vld [vmem:[%s4356_s12 + $0x500] sm:$0xff]  }
  0xa4   : > { %3845 = vmatprep.subr.bf16.mxu1 %v4160_v51  ;;  %v943_v51 = vrot.slane %v4544_v6, %v4394_v43  ;;  %v4229_v6 = vld [vmem:[%s4356_s12 + $0x6d8] sm:$0xff]  }
  0xa5   : > { %3824 = vmatpush3.bf16.msra.mxu0 %v4161_v52  ;;  %v4212_v52 = vld [vmem:[%s4356_s12 + $0x678] sm:$0xff]  }
  0xa6   : > { %3825 = vmatprep.subr.bf16.mxu0 %v4163_v54  ;;  %v4214_v54 = vld [vmem:[%s4356_s12 + $0x638] sm:$0xff]  }
  0xa7   : > { %3846 = vmatpush3.bf16.msra.mxu1 %v4162_v53  ;;  %v4213_v53 = vld [vmem:[%s4356_s12 + $0x6f8] sm:$0xff]  }
  0xa8   : > { %3847 = vmatprep.subr.bf16.mxu1 %v4164_v55  ;;  %v4215_v55 = vld [vmem:[%s4356_s12 + $0x6b8] sm:$0xff]  }
  0xa9   : > { %3826 = vmatpush3.bf16.msra.mxu0 %v4165_v56  ;;  %v959_v56 = vcombine.high %v943_v51, %v943_v51 }
  0xaa   : > { %3827 = vmatprep.subr.bf16.mxu0 %v4167_v58  ;;  %v4217_v58 = vld [vmem:[%s4356_s12 + $0x6f0] sm:$0xff]  }
  0xab   : > { %3848 = vmatpush3.bf16.msra.mxu1 %v4166_v57  ;;  %v4216_v57 = vld [vmem:[%s4356_s12 + $0x670] sm:$0xff]  }
  0xac   : > { %3849 = vmatprep.subr.bf16.mxu1 %v4168_v59  ;;  %v4218_v59 = vld [vmem:[%s4356_s12 + $0x630] sm:$0xff]  }
  0xad   : > { %3828 = vmatpush3.bf16.msra.mxu0 %v4169_v60  ;;  %v4219_v60 = vld [vmem:[%s4356_s12 + $0x6b0] sm:$0xff]  }
  0xae   : > { %3829 = vmatprep.subr.bf16.mxu0 %v4171_v62  ;;  %v4221_v62 = vld [vmem:[%s4356_s12 + $0x6e8] sm:$0xff]  }
  0xaf   : > { %3850 = vmatpush3.bf16.msra.mxu1 %v4170_v61  ;;  %v4220_v61 = vld [vmem:[%s4356_s12 + $0x668] sm:$0xff]  }
  0xb0   : > { %3851 = vmatprep.subr.bf16.mxu1 %v4172_v0  ;;  %v4223_v0 = vld [vmem:[%s4356_s12 + $0x6a8] sm:$0xff]  }
  0xb1   : > { %3830 = vmatpush3.bf16.msra.mxu0 %v4173_v3  ;;  %v4226_v3 = vld [vmem:[%s4356_s12 + $0x620] sm:$0xff]  }
  0xb2   : > { %3831 = vmatprep.subr.bf16.mxu0 %v4175_v7  ;;  %v4230_v7 = vld [vmem:[%s4356_s12 + $0x618] sm:$0xff]  }
  0xb3   : > { %3852 = vmatpush3.bf16.msra.mxu1 %v4174_v4  ;;  %v4227_v4 = vld [vmem:[%s4356_s12 + $0x6a0] sm:$0xff]  }
  0xb4   : > { %3853 = vmatprep.subr.bf16.mxu1 %v4176_v8  ;;  %v4231_v8 = vld [vmem:[%s4356_s12 + $0x698] sm:$0xff]  }
  0xb5   : > { %3832 = vmatpush3.bf16.msra.mxu0 %v4177_v11  ;;  %v4234_v11 = vld [vmem:[%s4356_s12 + $0x610] sm:$0xff]  }
  0xb6   : > { %3861 = vmatprep.subr.bf16.mxu0 %v4179_v15  ;;  %v4237_v15 = vld [vmem:[%s4356_s12 + $0x6c8] sm:$0xff]  }
  0xb7   : > { %3854 = vmatpush3.bf16.msra.mxu1 %v4178_v12  ;;  %v4235_v12 = vld [vmem:[%s4356_s12 + $0x690] sm:$0xff]  }
  0xb8   : > { %2932 = vmatmul.mubr.bf16.vlgmr.msra.gmra.mxu0 %v936_v14  ;;  %3883 = vmatprep.subr.bf16.mxu1 %v4180_v16  ;;  %v298_v14 = vld [vmem:[%s4351_s8 + $0x18] sm:$0xff] }
  0xb9   : > { %3862 = vmatpush3.bf16.msra.mxu0 %v4181_v18  ;;  %3011 = vmatprep.mubr.bf16.mxu0 %v957_v17  ;;  %v969_v16 = vrot.slane %v298_v14, %v4394_v43  ;;  %v962_v17 = vcombine.high %v298_v14, %v298_v14  ;;  %v4238_v18 = vld [vmem:[%s4356_s12 + $0x608] sm:$0xff]  }
  0xba   : > { %2972 = vmatmul.mubr.bf16.vlgmr.msra.gmra.mxu1 %v958_v20  ;;  %3863 = vmatprep.subr.bf16.mxu0 %v4183_v21 }
  0xbb   : > { %3884 = vmatpush3.bf16.msra.mxu1 %v4182_v19  ;;  %3051 = vmatprep.mubr.bf16.mxu1 %v961_v23  ;;  %v4240_v19 = vld [vmem:[%s4356_s12 + $0x640] sm:$0xff]   ;;  %v977_v20 = vcombine.high %v969_v16, %v969_v16  ;;  %v4620_v21 = vrot.slane %v962_v17, %v4394_v43 }
  0xbc   : > { %3885 = vmatprep.subr.bf16.mxu1 %v4184_v22  ;;  %v4239_v22 = vld [vmem:[%s4356_s12 + $0x688] sm:$0xff]   ;;  %v4241_v23 = vld [vmem:[%s4356_s12 + $0x6c0] sm:$0xff]  }
  0xbd   : > { %3864 = vmatpush3.bf16.msra.mxu0 %v4185_v24  ;;  %v999_v24 = vrot.slane %v977_v20, %v4394_v43 }
  0xbe   : > { %3865 = vmatprep.subr.bf16.mxu0 %v4187_v26  ;;  %v4242_v26 = vld [vmem:[%s4356_s12 + $0x600] sm:$0xff]  }
  0xbf   : > { %3886 = vmatpush3.bf16.msra.mxu1 %v4186_v25  ;;  %v978_v25 = vcombine.high %v4620_v21, %v4620_v21 }
  0xc0   : > { %3887 = vmatprep.subr.bf16.mxu1 %v4188_v27  ;;  %v1009_v27 = vcombine.high %v999_v24, %v999_v24 }
  0xc1   : > { %3866 = vmatpush3.bf16.msra.mxu0 %v4189_v28  ;;  %v985_v28 = vrot.slane %v969_v16, %v4394_v43 }
  0xc2   : > { %3867 = vmatprep.subr.bf16.mxu0 %v4191_v30  ;;  %v4243_v30 = vld [vmem:[%s4356_s12 + $0x680] sm:$0xff]  }
  0xc3   : > { %3888 = vmatpush3.bf16.msra.mxu1 %v4190_v29  ;;  %v4244_v29 = vld [vmem:[%s4356_s12 + $0x778] sm:$0xff]  }
  0xc4   : > { %3889 = vmatprep.subr.bf16.mxu1 %v4192_v31  ;;  %v1006_v31 = vrot.slane %v978_v25, %v4394_v43 }
  0xc5   : > { %3868 = vmatpush3.bf16.msra.mxu0 %v4193_v32  ;;  %v4245_v32 = vld [vmem:[%s4356_s12 + $0x7f8] sm:$0xff]  }
  0xc6   : > { %3869 = vmatprep.subr.bf16.mxu0 %v4195_v34  ;;  %v1007_v34 = vcombine.high %v985_v28, %v985_v28 }
  0xc7   : > { %3890 = vmatpush3.bf16.msra.mxu1 %v4194_v33  ;;  %v4246_v33 = vld [vmem:[%s4356_s12 + $0x738] sm:$0xff]  }
  0xc8   : > { %3891 = vmatprep.subr.bf16.mxu1 %v4196_v35  ;;  %v4248_v35 = vld [vmem:[%s4356_s12 + $0x770] sm:$0xff]  }
  0xc9   : > { %3870 = vmatpush3.bf16.msra.mxu0 %v4197_v36  ;;  %v4247_v36 = vld [vmem:[%s4356_s12 + $0x7b8] sm:$0xff]  }
  0xca   : > { %3871 = vmatprep.subr.bf16.mxu0 %v4199_v38 }
  0xcb   : > { %3892 = vmatpush3.bf16.msra.mxu1 %v4198_v37  ;;  %v1010_v37 = vcombine.high %v1006_v31, %v1006_v31 }
  0xcc   : > { %3893 = vmatprep.subr.bf16.mxu1 %v4200_v39  ;;  %v4249_v39 = vld [vmem:[%s4356_s12 + $0x7f0] sm:$0xff]  }
  0xcd   : > { %3872 = vmatpush3.bf16.msra.mxu0 %v4201_v40  ;;  %v4250_v40 = vld [vmem:[%s4356_s12 + $0x730] sm:$0xff]  }
  0xce   : > { %3873 = vmatprep.subr.bf16.mxu0 %v4203_v42 }
  0xcf   : > { %3894 = vmatpush3.bf16.msra.mxu1 %v4202_v41 }
  0xd0   : > { %3895 = vmatprep.subr.bf16.mxu1 %v4204_v44  ;;  %v4252_v44 = vld [vmem:[%s4356_s12 + $0x768] sm:$0xff]  }
  0xd1   : > { %3874 = vmatpush3.bf16.msra.mxu0 %v4205_v45 }
  0xd2   : > { %3875 = vmatprep.subr.bf16.mxu0 %v4207_v47 }
  0xd3   : > { %3896 = vmatpush3.bf16.msra.mxu1 %v4206_v46  ;;  %v4251_v46 = vld [vmem:[%s4356_s12 + $0x7b0] sm:$0xff]  }
  0xd4   : > { %3897 = vmatprep.subr.bf16.mxu1 %v4208_v48 }
  0xd5   : > { %3876 = vmatpush3.bf16.msra.mxu0 %v4209_v49  ;;  %v4253_v49 = vld [vmem:[%s4356_s12 + $0x7e8] sm:$0xff]  }
  0xd6   : > { %3905 = vmatprep.subr.bf16.mxu0 %v4212_v52 }
  0xd7   : > { %3898 = vmatpush3.bf16.msra.mxu1 %v4210_v50 }
  0xd8   : > { %3012 = vmatmul.mubr.bf16.vlgmr.msra.gmra.mxu0 %v943_v51  ;;  %3927 = vmatprep.subr.bf16.mxu1 %v4213_v53  ;;  %v4254_v51 = vld [vmem:[%s4356_s12 + $0x728] sm:$0xff]  }
  0xd9   : > { %3906 = vmatpush3.bf16.msra.mxu0 %v4214_v54  ;;  %3091 = vmatprep.mubr.bf16.mxu0 %v999_v24  ;;  %v4256_v54 = vld [vmem:[%s4356_s12 + $0x760] sm:$0xff]  }
  0xda   : > { %3052 = vmatmul.mubr.bf16.vlgmr.msra.gmra.mxu1 %v959_v56  ;;  %3907 = vmatprep.subr.bf16.mxu0 %v4216_v57  ;;  %v4255_v56 = vld [vmem:[%s4356_s12 + $0x7a8] sm:$0xff]  }
  0xdb   : > { %3928 = vmatpush3.bf16.msra.mxu1 %v4215_v55  ;;  %3131 = vmatprep.mubr.bf16.mxu1 %v1009_v27 }
  0xdc   : > { %3929 = vmatprep.subr.bf16.mxu1 %v4217_v58  ;;  %v4257_v58 = vld [vmem:[%s4356_s12 + $0x7e0] sm:$0xff]  }
  0xdd   : > { %3908 = vmatpush3.bf16.msra.mxu0 %v4218_v59  ;;  %v4258_v59 = vld [vmem:[%s4356_s12 + $0x720] sm:$0xff]  }
  0xde   : > { %3909 = vmatprep.subr.bf16.mxu0 %v4220_v61  ;;  %v4259_v61 = vld [vmem:[%s4356_s12 + $0x7a0] sm:$0xff]  }
  0xdf   : > { %3930 = vmatpush3.bf16.msra.mxu1 %v4219_v60  ;;  %v4260_v60 = vld [vmem:[%s4356_s12 + $0x758] sm:$0xff]  }
  0xe0   : > { %3931 = vmatprep.subr.bf16.mxu1 %v4221_v62  ;;  %v4261_v62 = vld [vmem:[%s4356_s12 + $0x7d8] sm:$0xff]  }
  0xe1   : > { %3910 = vmatpush3.bf16.msra.mxu0 %v4222_v63  ;;  %v4262_v63 = vld [vmem:[%s4356_s12 + $0x718] sm:$0xff]  }
  0xe2   : > { %3911 = vmatprep.subr.bf16.mxu0 %v4224_v1  ;;  %v4263_v1 = vld [vmem:[%s4356_s12 + $0x798] sm:$0xff]  }
  0xe3   : > { %3932 = vmatpush3.bf16.msra.mxu1 %v4223_v0  ;;  %v4264_v0 = vld [vmem:[%s4356_s12 + $0x750] sm:$0xff]  }
  0xe4   : > { %3933 = vmatprep.subr.bf16.mxu1 %v4225_v2  ;;  %v4265_v2 = vld [vmem:[%s4356_s12 + $0x7d0] sm:$0xff]  }
  0xe5   : > { %3912 = vmatpush3.bf16.msra.mxu0 %v4226_v3  ;;  %v4266_v3 = vld [vmem:[%s4356_s12 + $0x710] sm:$0xff]  }
  0xe6   : > { %3913 = vmatprep.subr.bf16.mxu0 %v4228_v5  ;;  %v4267_v5 = vld [vmem:[%s4356_s12 + $0x790] sm:$0xff]  }
  0xe7   : > { %3934 = vmatpush3.bf16.msra.mxu1 %v4227_v4  ;;  %v4268_v4 = vld [vmem:[%s4356_s12 + $0x748] sm:$0xff]  }
  0xe8   : > { %3935 = vmatprep.subr.bf16.mxu1 %v4229_v6  ;;  %v4269_v6 = vld [vmem:[%s4356_s12 + $0x7c8] sm:$0xff]  }
  0xe9   : > { %3914 = vmatpush3.bf16.msra.mxu0 %v4230_v7  ;;  %v4270_v7 = vld [vmem:[%s4356_s12 + $0x708] sm:$0xff]  }
  0xea   : > { %3915 = vmatprep.subr.bf16.mxu0 %v4232_v9  ;;  %v4271_v9 = vld [vmem:[%s4356_s12 + $0x788] sm:$0xff]  }
  0xeb   : > { %3936 = vmatpush3.bf16.msra.mxu1 %v4231_v8  ;;  %v4272_v8 = vld [vmem:[%s4356_s12 + $0x740] sm:$0xff]  }
  0xec   : > { %3937 = vmatprep.subr.bf16.mxu1 %v4233_v10  ;;  %v4273_v10 = vld [vmem:[%s4356_s12 + $0x7c0] sm:$0xff]  }
  0xed   : > { %3916 = vmatpush3.bf16.msra.mxu0 %v4234_v11  ;;  %v4274_v11 = vld [vmem:[%s4356_s12 + $0x700] sm:$0xff]  }
  0xee   : > { %3917 = vmatprep.subr.bf16.mxu0 %v4236_v13  ;;  %v4275_v13 = vld [vmem:[%s4356_s12 + $0x780] sm:$0xff]  }
  0xef   : > { %3938 = vmatpush3.bf16.msra.mxu1 %v4235_v12  ;;  %v992_v12 = vrot.slane %v4620_v21, %v4394_v43 }
  0xf0   : > { %3939 = vmatprep.subr.bf16.mxu1 %v4237_v15 }
  0xf1   : > { %3918 = vmatpush3.bf16.msra.mxu0 %v4238_v18  ;;  %v1008_v14 = vcombine.high %v992_v12, %v992_v12 }
  0xf2   : > { %3919 = vmatprep.subr.bf16.mxu0 %v4240_v19 }
  0xf3   : > { %3940 = vmatpush3.bf16.msra.mxu1 %v4239_v22 }
  0xf4   : > { %3941 = vmatprep.subr.bf16.mxu1 %v4241_v23 }
  0xf5   : > { %3920 = vmatpush3.bf16.msra.mxu0 %v4242_v26 }
  0xf6   : > { %3949 = vmatprep.subr.bf16.mxu0 %v4244_v29 }
  0xf7   : > { %3942 = vmatpush3.bf16.msra.mxu1 %v4243_v30 }
  0xf8   : > { %v3657_v38 = vpop.f32.mrf.mxu0  ;;  %3092 = vmatmul.mubr.bf16.vlgmr.msra.gmra.mxu0 %v985_v28  ;;  %3971 = vmatprep.subr.bf16.mxu1 %v4245_v32 }
  0xf9   : > { %3950 = vmatpush3.bf16.msra.mxu0 %v4246_v33  ;;  %3171 = vmatprep.mubr.bf16.mxu0 %v1006_v31  ;;  %v3679_v41 = vpop.f32.mrf.mxu1 }
  0xfa   : > { %3132 = vmatmul.mubr.bf16.vlgmr.msra.gmra.mxu1 %v1007_v34  ;;  %v3658_v42 = vpop.f32.mrf.mxu0  ;;  %3951 = vmatprep.subr.bf16.mxu0 %v4248_v35 }
  0xfb   : > { %3972 = vmatpush3.bf16.msra.mxu1 %v4247_v36  ;;  %v3659_v45 = vadd.f32 %v3658_v42, %v3657_v38  ;;  %3211 = vmatprep.mubr.bf16.mxu1 %v1010_v37  ;;  %v3680_v47 = vpop.f32.mrf.mxu1 }
  0xfc   : > { %v3660_v48 = vpop.f32.mrf.mxu0  ;;  %3973 = vmatprep.subr.bf16.mxu1 %v4249_v39  ;;  %v3681_v50 = vadd.f32 %v3680_v47, %v3679_v41 }
  0xfd   : > { %3952 = vmatpush3.bf16.msra.mxu0 %v4250_v40  ;;  %v3682_v52 = vpop.f32.mrf.mxu1 }
  0xfe   : > { %v3661_v53 = vpop.f32.mrf.mxu0  ;;  %3953 = vmatprep.subr.bf16.mxu0 %v4252_v44  ;;  %v2654_v55 = vadd.f32 %v3681_v50, %v3659_v45 }
  0xff   : > { %3974 = vmatpush3.bf16.msra.mxu1 %v4251_v46  ;;  %v3683_v57 = vpop.f32.mrf.mxu1 }
 0x100   : > { %3975 = vmatprep.subr.bf16.mxu1 %v4253_v49 }
 0x101   : > { %3954 = vmatpush3.bf16.msra.mxu0 %v4254_v51 }
 0x102   : > { %3955 = vmatprep.subr.bf16.mxu0 %v4256_v54 }
 0x103   : > { %3976 = vmatpush3.bf16.msra.mxu1 %v4255_v56 }
 0x104   : > { %3977 = vmatprep.subr.bf16.mxu1 %v4257_v58 }
 0x105   : > { %3956 = vmatpush3.bf16.msra.mxu0 %v4258_v59 }
 0x106   : > { %3957 = vmatprep.subr.bf16.mxu0 %v4260_v60 }
 0x107   : > { %3978 = vmatpush3.bf16.msra.mxu1 %v4259_v61 }
 0x108   : > { %3979 = vmatprep.subr.bf16.mxu1 %v4261_v62 }
 0x109   : > { %3958 = vmatpush3.bf16.msra.mxu0 %v4262_v63 }
 0x10a   : > { %3959 = vmatprep.subr.bf16.mxu0 %v4264_v0 }
 0x10b   : > { %3980 = vmatpush3.bf16.msra.mxu1 %v4263_v1 }
 0x10c   : > { %3981 = vmatprep.subr.bf16.mxu1 %v4265_v2 }
 0x10d   : > { %3960 = vmatpush3.bf16.msra.mxu0 %v4266_v3 }
 0x10e   : > { %3961 = vmatprep.subr.bf16.mxu0 %v4268_v4 }
 0x10f   : > { %3982 = vmatpush3.bf16.msra.mxu1 %v4267_v5 }
 0x110   : > { %3983 = vmatprep.subr.bf16.mxu1 %v4269_v6 }
 0x111   : > { %3962 = vmatpush3.bf16.msra.mxu0 %v4270_v7 }
 0x112   : > { %3963 = vmatprep.subr.bf16.mxu0 %v4272_v8 }
 0x113   : > { %3984 = vmatpush3.bf16.msra.mxu1 %v4271_v9 }
 0x114   : > { %3985 = vmatprep.subr.bf16.mxu1 %v4273_v10 }
 0x115   : > { %3964 = vmatpush3.bf16.msra.mxu0 %v4274_v11 }
 0x117   : > { %3986 = vmatpush3.bf16.msra.mxu1 %v4275_v13 }
 0x118   : > { %v3701_v15 = vpop.f32.mrf.mxu0  ;;  %3172 = vmatmul.mubr.bf16.vlgmr.msra.gmra.mxu0 %v992_v12 }
 0x119   : > { %v3723_v16 = vpop.f32.mrf.mxu1 }
 0x11a   : > { %3212 = vmatmul.mubr.bf16.vlgmr.msra.gmra.mxu1 %v1008_v14  ;;  %v3702_v17 = vpop.f32.mrf.mxu0 }
 0x11b   : > { %v3703_v18 = vadd.f32 %v3702_v17, %v3701_v15  ;;  %v3724_v19 = vpop.f32.mrf.mxu1 }
 0x11c   : > { %v3704_v20 = vpop.f32.mrf.mxu0  ;;  %v3725_v23 = vadd.f32 %v3724_v19, %v3723_v16 }
 0x11d   : > { %v2694_v22 = vadd.f32 %v3703_v18, %v2654_v55  ;;  %v3726_v24 = vpop.f32.mrf.mxu1 }
 0x11e   : > { %v3705_v25 = vpop.f32.mrf.mxu0 }
 0x11f   : > { %v2734_v26 = vadd.f32 %v3725_v23, %v2694_v22  ;;  %v3727_v43 = vpop.f32.mrf.mxu1 }
 0x138   : > { %v3745_v21 = vpop.f32.mrf.mxu0 }
 0x13a   : > { %v3767_v27 = vpop.f32.mrf.mxu1  ;;  %v3746_v28 = vpop.f32.mrf.mxu0 }
 0x13b   : > { %v3747_v29 = vadd.f32 %v3746_v28, %v3745_v21 }
 0x13c   : > { %v3768_v30 = vpop.f32.mrf.mxu1  ;;  %v3748_v31 = vpop.f32.mrf.mxu0 }
 0x13d   : > { %v2774_v32 = vadd.f32 %v3747_v29, %v2734_v26  ;;  %v3769_v33 = vadd.f32 %v3768_v30, %v3767_v27  ;;  %v294_v30 = vld [vmem:[#allocation2] sm:$0x3] }
 0x13e   : > { %v3770_v34 = vpop.f32.mrf.mxu1  ;;  %v3749_v35 = vpop.f32.mrf.mxu0 }
 0x13f   : > { %v2814_v36 = vadd.f32 %v3769_v33, %v2774_v32 }
 0x140   : > { %v3771_v37 = vpop.f32.mrf.mxu1 }
 0x158   : > { %v3789_v38 = vpop.f32.mrf.mxu0 }
 0x15a   : > { %v3811_v39 = vpop.f32.mrf.mxu1  ;;  %v3790_v40 = vpop.f32.mrf.mxu0 }
 0x15b   : > { %v3791_v41 = vadd.f32 %v3790_v40, %v3789_v38 }
 0x15c   : > { %v3812_v42 = vpop.f32.mrf.mxu1  ;;  %v3792_v44 = vpop.f32.mrf.mxu0 }
 0x15d   : > { %v2854_v45 = vadd.f32 %v3791_v41, %v2814_v36  ;;  %v3813_v46 = vadd.f32 %v3812_v42, %v3811_v39 }
 0x15e   : > { %v3814_v47 = vpop.f32.mrf.mxu1  ;;  %v3793_v48 = vpop.f32.mrf.mxu0 }
 0x15f   : > { %v2894_v49 = vadd.f32 %v3813_v46, %v2854_v45 }
 0x160   : > { %v3815_v50 = vpop.f32.mrf.mxu1 }
 0x178   : > { %v3833_v51 = vpop.f32.mrf.mxu0 }
 0x17a   : > { %v3855_v52 = vpop.f32.mrf.mxu1  ;;  %v3834_v53 = vpop.f32.mrf.mxu0 }
 0x17b   : > { %v3835_v54 = vadd.f32 %v3834_v53, %v3833_v51 }
 0x17c   : > { %v3856_v55 = vpop.f32.mrf.mxu1  ;;  %v3836_v56 = vpop.f32.mrf.mxu0 }
 0x17d   : > { %v2934_v57 = vadd.f32 %v3835_v54, %v2894_v49  ;;  %v3857_v58 = vadd.f32 %v3856_v55, %v3855_v52 }
 0x17e   : > { %v3858_v59 = vpop.f32.mrf.mxu1  ;;  %v3837_v60 = vpop.f32.mrf.mxu0 }
 0x17f   : > { %v2974_v61 = vadd.f32 %v3857_v58, %v2934_v57 }
 0x180   : > { %v3859_v62 = vpop.f32.mrf.mxu1 }
 0x198   : > { %v3877_v63 = vpop.f32.mrf.mxu0 }
 0x19a   : > { %v3899_v0 = vpop.f32.mrf.mxu1  ;;  %v3878_v1 = vpop.f32.mrf.mxu0 }
 0x19b   : > { %v3879_v15 = vadd.f32 %v3878_v1, %v3877_v63 }
 0x19c   : > { %v3900_v2 = vpop.f32.mrf.mxu1  ;;  %v3880_v3 = vpop.f32.mrf.mxu0 }
 0x19d   : > { %v3014_v16 = vadd.f32 %v3879_v15, %v2974_v61  ;;  %v3901_v17 = vadd.f32 %v3900_v2, %v3899_v0 }
 0x19e   : > { %v3902_v4 = vpop.f32.mrf.mxu1  ;;  %v3881_v5 = vpop.f32.mrf.mxu0 }
 0x19f   : > { %v3054_v19 = vadd.f32 %v3901_v17, %v3014_v16 }
 0x1a0   : > { %v3903_v6 = vpop.f32.mrf.mxu1 }
 0x1b8   : > { %v3921_v7 = vpop.f32.mrf.mxu0 }
 0x1ba   : > { %v3943_v8 = vpop.f32.mrf.mxu1  ;;  %v3922_v9 = vpop.f32.mrf.mxu0 }
 0x1bb   : > { %v3923_v18 = vadd.f32 %v3922_v9, %v3921_v7 }
 0x1bc   : > { %v3944_v10 = vpop.f32.mrf.mxu1  ;;  %v3924_v11 = vpop.f32.mrf.mxu0 }
 0x1bd   : > { %v3094_v20 = vadd.f32 %v3923_v18, %v3054_v19  ;;  %v3945_v22 = vadd.f32 %v3944_v10, %v3943_v8 }
 0x1be   : > { %v3946_v12 = vpop.f32.mrf.mxu1  ;;  %v3925_v13 = vpop.f32.mrf.mxu0 }
 0x1bf   : > { %v3134_v26 = vadd.f32 %v3945_v22, %v3094_v20 }
 0x1c0   : > { %v3947_v14 = vpop.f32.mrf.mxu1 }
 0x1d8   : > { %v3965_v23 = vpop.f32.mrf.mxu0 }
 0x1da   : > { %v3987_v24 = vpop.f32.mrf.mxu1  ;;  %v3966_v25 = vpop.f32.mrf.mxu0 }
 0x1db   : > { %v3967_v43 = vadd.f32 %v3966_v25, %v3965_v23 }
 0x1dc   : > { %v3988_v21 = vpop.f32.mrf.mxu1  ;;  %v3968_v27 = vpop.f32.mrf.mxu0 }
 0x1dd   : > { %v3174_v28 = vadd.f32 %v3967_v43, %v3134_v26  ;;  %v3989_v29 = vadd.f32 %v3988_v21, %v3987_v24 }
 0x1de   : > { %v3990_v31 = vpop.f32.mrf.mxu1  ;;  %v3969_v32 = vpop.f32.mrf.mxu0 }
 0x1df   : > { %v3214_v33 = vadd.f32 %v3989_v29, %v3174_v28  ;;  %3225 = sbr.rel (%p3631_p6) target bundleno = 962 (0x3c2), region = 56 }
 0x1e0   : > { %v3991_v34 = vpop.f32.mrf.mxu1 }
 0x1e1   : > { %v3219_v35 = vadd.f32 %v3214_v33, %v294_v30 }
 0x1e3   : > { %3221 = vst.msk [vmem:[#allocation2] sm:$0x3] %vm3220_vm1, %v3219_v35 }
 0x1e4   : > { %v4278_v36 = vld [vmem:[%s4692_s3 + $0x8] sm:$0xff]   ;;  %v4290_v37 = vmov 0.0   ;;  %v4279_v38 = vld [vmem:[%s4692_s3] sm:$0xff]   ;;  %vm4291_vm2 = vmmov 0   ;;  %vm3260_vm3 = vcmask 261120   ;;  %v4292_v55 = vmov 0  }
 0x1e5   : > { %3996 = vmatprep.subr.bf16.mxu0 %v4290_v37  ;;  %4000 = vmatprep.mubr.msk.bf16.mxu0 %vm4291_vm2, %v4290_v37  ;;  %v3632_v40 = vld [vmem:[%s4691_s2] ss:$0 sm:$0xff]  ;;  %v3638_v56 = vld [vmem:[#allocation3] ss:$0 sm:$0xff] }
 0x1e6   : > { %3997 = vmatpush3.bf16.msra.mxu0 %v4278_v36  ;;  %v3633_v45 = vld [vmem:[%s4693_s4] ss:$0 sm:$0xff]  ;;  %4277 = vset.pattern.permute.xlu0 %v4292_v55 }
 0x1e7   : > { %3998 = vmatprep.subr.bf16.mxu0 %v4290_v37  ;;  %v3637_v49 = vld [vmem:[%s4694_s5] ss:$0 sm:$0xff] }
 0x1ea   : > { %v3226_v39 = vld [vmem:[#allocation2] sm:$0x3]  ;;  %3999 = vmatpush3.bf16.msra.mxu0 %v4279_v38 }
 0x1eb   : > { %v3234_v41 = vadd.f32 %v3632_v40, %v3226_v39 }
 0x1ed   : > { %v3235_v42 = vmax.f32 %v3234_v41, 0.0 }
 0x1ef   : > { %v3236_v44 = vpack.c.bf16 %v3235_v42, %v3235_v42 }
 0x1f1   : > { %4001 = vmatmul.mubr.msk.bf16.vlgmr.msra.gmra.mxu0 %vm3260_vm3, %v3236_v44 }
 0x2b1   : > { %v3298_v46 = vpop.f32.mrf.mxu0 }
 0x2b2   : > { %v3299_v47 = vadd.f32 %v3633_v45, %v3298_v46 }
 0x2b3   : > { %v4002_v48 = vpop.f32.mrf.mxu0 }
 0x2b4   : > { %v3304_v50 = vmax.f32 %v3299_v47, 0.0 }
 0x2b5   : > { %v3301_v51 = vpop.f32.mrf.mxu0 }
 0x2b6   : > { %v3312_v52 = vmul.f32 %v3637_v49, %v3304_v50 }
 0x2b7   : > { %v4003_v53 = vpop.f32.mrf.mxu0 }
 0x2b8   : > { %v3313_v54 = vsel %vm3220_vm1, %v3312_v52, 0.0 }
 0x2b9   : > { %3314 = vadd.xlane.f32.xlu0 %v3313_v54 }
 0x342   : > { %v3315_v57 = vpop.xlane.xlu0 %3314 }
 0x343   : > { %v3323_v58 = vadd.f32 %v3638_v56, %v3315_v57 }
 0x345   : > { %3326 = vperm.xlu0 %4277, %v3323_v58  }
 0x3c0   : > { %v3327_v59 = vpop.permute.xlu0 %3326 }
 0x3c1   : > { %3329 = vst [vmem:[%s4696_s7] sm:$0x3] %v3327_v59 }
 0x3c2 PF: > { %s19_s26 = sadd.s32 1, %s4286_s26  }
 0x3c3   : > { %p16_p7 = scmp.ge.s32.totalorder %s19_s26, 6  }
 0x3c5   :  { %18 = sbr.rel (!%p16_p7) target bundleno = 3 (0x3), region = 85 }

// kernel: critic_forward.2
= control target key start
LH: loop header
LB: loop body
LE: loop exit
PB: predicated region body
PF: predicated region fallthrough
CT: control target
= control target key end

     0   :  { %10 = vsyncpa [#allocation4], 0  ;;  %s9403_s0 = inlined_call_operand.vmem [shape: bf16[3,32,128], index: 0, kind: input, shape index: {}]   ;;  %s9404_s1 = inlined_call_operand.hbm [shape: bf16[3,128,512], index: 1, kind: input, shape index: {}]   ;;  %s9405_s2 = inlined_call_operand.hbm [shape: f32[1,512], index: 2, kind: input, shape index: {}]   ;;  %s9406_s3 = inlined_call_operand.hbm [shape: bf16[3,512,1024], index: 3, kind: input, shape index: {}]   ;;  %s9407_s4 = inlined_call_operand.hbm [shape: f32[1,1024], index: 4, kind: input, shape index: {}]   ;;  %s9408_s5 = inlined_call_operand.vmem [shape: bf16[32,1024], index: 5, kind: output, shape index: {}]  }
   0x1   :  { %11 = vsyncpa [#allocation6], 0 }
   0x2   :  { %12 = vsyncpa [#allocation9], 0  ;;  %s8727_s18 = smov [#allocation5]   ;;  %s8728_s20 = smov [#allocation3]  }
   0x3   :  { %s33_s19 = sshll.u32 %s8727_s18, 4  ;;  %s20_s21 = sshll.u32 %s8728_s20, 4  ;;  %s34_s19 = int_to_ptr.vmem [resolvable:$true] %s33_s19  ;;  %s21_s21 = int_to_ptr.vmem [resolvable:$true] %s20_s21 }
   0x4   :  { %s8649_s22 = scalar_lea.vmem %s34_s19, 64  ;;  %p8654_p1 = scmp.lt.s32.totalorder %s34_s19, %s34_s19 }
   0x5   :  { %p8650_p0 = scmp.ne.s32.totalorder %s34_s19, %s8649_s22  ;;  %p8655_p2 = scmp.lt.s32.totalorder %s8649_s22, %s8649_s22 }
   0x7   :  { %p8656_p3 = por %p8655_p2, %p8654_p1 }
   0x9   :  { %p8657_p4 = pnand %p8656_p3, %p8650_p0 }
   0xb   :  { %8660 = shalt.err (!%p8657_p4)
}
   0xc   :  { %36 = dma.hbm_to_vmem [thread:$0]  %s9405_s2, 64, %s34_s19, [#allocation6]  }
   0xd   :  { %s8669_s25 = scalar_lea.vmem %s21_s21, 12288  ;;  %p8674_p6 = scmp.lt.s32.totalorder %s21_s21, %s21_s21 }
   0xe   :  { %p8670_p5 = scmp.ne.s32.totalorder %s21_s21, %s8669_s25  ;;  %p8675_p7 = scmp.lt.s32.totalorder %s8669_s25, %s8669_s25 }
  0x10   :  { %p8676_p8 = por %p8675_p7, %p8674_p6 }
  0x12   :  { %p8677_p9 = pnand %p8676_p8, %p8670_p5 }
  0x14   :  { %8680 = shalt.err (!%p8677_p9)
}
  0x15   :  { %s8729_s26 = smov 256   ;;  %s8730_s27 = smov 16  }
  0x16   :  { %26 = dma.hbm_to_vmem [thread:$0]  %s9404_s1, 12288, %s21_s21, [#allocation4], %s8729_s26, %s8729_s26, %s8730_s27  }
  0x17   :  { %s8731_s30 = smov [#allocation7]  }
  0x18   :  { %s42_s6 = sshll.u32 %s8731_s30, 4  ;;  %s43_s6 = int_to_ptr.vmem [resolvable:$true] %s42_s6 }
  0x19   :  { %s8689_s7 = scalar_lea.vmem %s43_s6, 98304  ;;  %p8694_p11 = scmp.lt.s32.totalorder %s43_s6, %s43_s6 }
  0x1a   :  { %p8690_p10 = scmp.ne.s32.totalorder %s43_s6, %s8689_s7  ;;  %p8695_p12 = scmp.lt.s32.totalorder %s8689_s7, %s8689_s7 }
  0x1c   :  { %p8696_p13 = por %p8695_p12, %p8694_p11 }
  0x1e   :  { %p8697_p0 = pnand %p8696_p13, %p8690_p10 }
  0x20   :  { %8700 = shalt.err (!%p8697_p0)
}
  0x21   :  { %s8732_s2 = smov 512   ;;  %s8733_s8 = smov 32  }
  0x22   :  { %48 = dma.hbm_to_vmem [thread:$0]  %s9406_s3, 98304, %s43_s6, [#allocation6], %s8732_s2, %s8732_s2, %s8733_s8  }
  0x23   :  { %s8734_s11 = smov [#allocation8]  }
  0x24   :  { %s55_s12 = sshll.u32 %s8734_s11, 4  ;;  %s56_s12 = int_to_ptr.vmem [resolvable:$true] %s55_s12 }
  0x25   :  { %s8709_s1 = scalar_lea.vmem %s56_s12, 128  ;;  %p8714_p2 = scmp.lt.s32.totalorder %s56_s12, %s56_s12 }
  0x26   :  { %p8710_p1 = scmp.ne.s32.totalorder %s56_s12, %s8709_s1  ;;  %p8715_p3 = scmp.lt.s32.totalorder %s8709_s1, %s8709_s1 }
  0x28   :  { %p8716_p4 = por %p8715_p3, %p8714_p2 }
  0x2a   :  { %p8717_p5 = pnand %p8716_p4, %p8710_p1 }
  0x2c   :  { %8720 = shalt.err (!%p8717_p5)
}
  0x2d   :  { %58 = dma.hbm_to_vmem [thread:$0]  %s9407_s4, 128, %s56_s12, [#allocation9]  }
  0x2e   :  { %8721 = dma.done.wait [#allocation4], 12288  }
  0x2f   :  { %8722 = vsyncadd [#allocation4], 4294955008 }
  0x30   :  { %8723 = dma.done.wait [#allocation6], 98368  }
  0x31   :  { %8724 = vsyncadd [#allocation6], 4294868928 }
  0x32   :  { %8725 = dma.done.wait [#allocation9], 128  }
  0x33   :  { %8726 = vsyncadd [#allocation9], 4294967168  ;;  %v8735_v0 = vmov 0   ;;  %v8477_v1 = vld [vmem:[#allocation3 + $0x1e4] ss:$16 sps:$4 sm:$0xff]   ;;  %v8556_v44 = vld [vmem:[%s9403_s0 + $0x18] sm:$0xff]  }
  0x34   :  { %350 = vmatprep.mubr.bf16.mxu0 %v8735_v0  ;;  %403 = vmatprep.mubr.bf16.mxu1 %v8735_v0  ;;  %v8479_v2 = vld [vmem:[#allocation3 + $0x1ec] ss:$16 sps:$4 sm:$0xff]   ;;  %v8481_v3 = vld [vmem:[#allocation3 + $0x1e0] ss:$16 sps:$4 sm:$0xff]   ;;  %v8482_v4 = vld [vmem:[#allocation3 + $0x1e8] ss:$16 sps:$4 sm:$0xff]  }
  0x35   :  { %318 = vmatprep.subr.bf16.mxu0 %v8477_v1  ;;  %371 = vmatprep.subr.bf16.mxu1 %v8479_v2  ;;  %v8483_v5 = vld [vmem:[#allocation3 + $0x1c4] ss:$16 sps:$4 sm:$0xff]   ;;  %v8485_v6 = vld [vmem:[#allocation3 + $0x1cc] ss:$16 sps:$4 sm:$0xff]   ;;  %v8487_v7 = vld [vmem:[#allocation3 + $0x1c0] ss:$16 sps:$4 sm:$0xff]  }
  0x36   :  { %319 = vmatpush1.bf16.msra.mxu0 %v8481_v3  ;;  %372 = vmatpush1.bf16.msra.mxu1 %v8482_v4  ;;  %v8488_v8 = vld [vmem:[#allocation3 + $0x1c8] ss:$16 sps:$4 sm:$0xff]   ;;  %v8489_v9 = vld [vmem:[#allocation3 + $0x1a4] ss:$16 sps:$4 sm:$0xff]   ;;  %v8491_v10 = vld [vmem:[#allocation3 + $0x1ac] ss:$16 sps:$4 sm:$0xff]  }
  0x37   :  { %320 = vmatprep.subr.bf16.mxu0 %v8483_v5  ;;  %373 = vmatprep.subr.bf16.mxu1 %v8485_v6  ;;  %v8493_v11 = vld [vmem:[#allocation3 + $0x1a0] ss:$16 sps:$4 sm:$0xff]   ;;  %v8494_v12 = vld [vmem:[#allocation3 + $0x1a8] ss:$16 sps:$4 sm:$0xff]   ;;  %v8495_v13 = vld [vmem:[#allocation3 + $0x184] ss:$16 sps:$4 sm:$0xff]  }
  0x38   :  { %v8497_v14 = vld [vmem:[#allocation3 + $0x18c] ss:$16 sps:$4 sm:$0xff]   ;;  %v8499_v15 = vld [vmem:[#allocation3 + $0x180] ss:$16 sps:$4 sm:$0xff]   ;;  %v8500_v16 = vld [vmem:[#allocation3 + $0x188] ss:$16 sps:$4 sm:$0xff]  }
  0x39   :  { %v8501_v17 = vld [vmem:[#allocation3 + $0x164] ss:$16 sps:$4 sm:$0xff]   ;;  %v8503_v18 = vld [vmem:[#allocation3 + $0x16c] ss:$16 sps:$4 sm:$0xff]   ;;  %v8505_v19 = vld [vmem:[#allocation3 + $0x160] ss:$16 sps:$4 sm:$0xff]  }
  0x3a   :  { %321 = vmatpush1.bf16.msra.mxu0 %v8487_v7  ;;  %374 = vmatpush1.bf16.msra.mxu1 %v8488_v8  ;;  %v8506_v20 = vld [vmem:[#allocation3 + $0x168] ss:$16 sps:$4 sm:$0xff]   ;;  %v8507_v21 = vld [vmem:[#allocation3 + $0x144] ss:$16 sps:$4 sm:$0xff]   ;;  %v8509_v22 = vld [vmem:[#allocation3 + $0x14c] ss:$16 sps:$4 sm:$0xff]  }
  0x3b   :  { %322 = vmatprep.subr.bf16.mxu0 %v8489_v9  ;;  %375 = vmatprep.subr.bf16.mxu1 %v8491_v10  ;;  %v8511_v23 = vld [vmem:[#allocation3 + $0x140] ss:$16 sps:$4 sm:$0xff]   ;;  %v8512_v24 = vld [vmem:[#allocation3 + $0x148] ss:$16 sps:$4 sm:$0xff]   ;;  %v8513_v25 = vld [vmem:[#allocation3 + $0x124] ss:$16 sps:$4 sm:$0xff]  }
  0x3c   :  { %v8515_v26 = vld [vmem:[#allocation3 + $0x12c] ss:$16 sps:$4 sm:$0xff]   ;;  %v8517_v27 = vld [vmem:[#allocation3 + $0x120] ss:$16 sps:$4 sm:$0xff]   ;;  %v8518_v28 = vld [vmem:[#allocation3 + $0x128] ss:$16 sps:$4 sm:$0xff]  }
  0x3d   :  { %v8519_v29 = vld [vmem:[#allocation3 + $0x104] ss:$16 sps:$4 sm:$0xff]   ;;  %v8521_v30 = vld [vmem:[#allocation3 + $0x10c] ss:$16 sps:$4 sm:$0xff]   ;;  %v8523_v31 = vld [vmem:[#allocation3 + $0x100] ss:$16 sps:$4 sm:$0xff]  }
  0x3e   :  { %323 = vmatpush1.bf16.msra.mxu0 %v8493_v11  ;;  %376 = vmatpush1.bf16.msra.mxu1 %v8494_v12  ;;  %v8524_v32 = vld [vmem:[#allocation3 + $0x108] ss:$16 sps:$4 sm:$0xff]   ;;  %v8528_v33 = vld [vmem:[#allocation3 + $0xe4] ss:$16 sps:$4 sm:$0xff]   ;;  %v8531_v34 = vld [vmem:[#allocation3 + $0xec] ss:$16 sps:$4 sm:$0xff]  }
  0x3f   :  { %324 = vmatprep.subr.bf16.mxu0 %v8495_v13  ;;  %377 = vmatprep.subr.bf16.mxu1 %v8497_v14  ;;  %v8525_v35 = vld [vmem:[%s9403_s0 + $0x10] sm:$0xff]   ;;  %v8529_v37 = vld [vmem:[#allocation3 + $0xe8] ss:$16 sps:$4 sm:$0xff]   ;;  %v8537_v39 = vld [vmem:[#allocation3 + $0xcc] ss:$16 sps:$4 sm:$0xff]   ;;  %vm1119_vm1 = vcmask 1040384  }
  0x40   :  { %v8526_v36 = vld [vmem:[#allocation3 + $0xe0] ss:$16 sps:$4 sm:$0xff]   ;;  %v8534_v38 = vld [vmem:[#allocation3 + $0xc4] ss:$16 sps:$4 sm:$0xff]   ;;  %v8535_v41 = vld [vmem:[#allocation3 + $0xc8] ss:$16 sps:$4 sm:$0xff]  }
  0x41   :  { %v8532_v40 = vld [vmem:[#allocation3 + $0xc0] ss:$16 sps:$4 sm:$0xff]   ;;  %v8540_v42 = vld [vmem:[#allocation3 + $0xa4] ss:$16 sps:$4 sm:$0xff]   ;;  %v8543_v43 = vld [vmem:[#allocation3 + $0xac] ss:$16 sps:$4 sm:$0xff]  }
  0x42   :  { %325 = vmatpush1.bf16.msra.mxu0 %v8499_v15  ;;  %378 = vmatpush1.bf16.msra.mxu1 %v8500_v16  ;;  %v8538_v45 = vld [vmem:[#allocation3 + $0xa0] ss:$16 sps:$4 sm:$0xff]   ;;  %v8541_v46 = vld [vmem:[#allocation3 + $0xa8] ss:$16 sps:$4 sm:$0xff]   ;;  %v8546_v47 = vld [vmem:[#allocation3 + $0x84] ss:$16 sps:$4 sm:$0xff]  }
  0x43   :  { %326 = vmatprep.subr.bf16.mxu0 %v8501_v17  ;;  %379 = vmatprep.subr.bf16.mxu1 %v8503_v18  ;;  %v8549_v48 = vld [vmem:[#allocation3 + $0x8c] ss:$16 sps:$4 sm:$0xff]   ;;  %v8544_v49 = vld [vmem:[#allocation3 + $0x80] ss:$16 sps:$4 sm:$0xff]   ;;  %v8547_v50 = vld [vmem:[#allocation3 + $0x88] ss:$16 sps:$4 sm:$0xff]  }
  0x44   :  { %v8552_v51 = vld [vmem:[#allocation3 + $0x64] ss:$16 sps:$4 sm:$0xff]   ;;  %v8555_v52 = vld [vmem:[#allocation3 + $0x6c] ss:$16 sps:$4 sm:$0xff]   ;;  %v8550_v53 = vld [vmem:[#allocation3 + $0x60] ss:$16 sps:$4 sm:$0xff]  }
  0x45   :  { %v8553_v54 = vld [vmem:[#allocation3 + $0x68] ss:$16 sps:$4 sm:$0xff]   ;;  %v8559_v55 = vld [vmem:[#allocation3 + $0x44] ss:$16 sps:$4 sm:$0xff]   ;;  %v8562_v56 = vld [vmem:[#allocation3 + $0x4c] ss:$16 sps:$4 sm:$0xff]  }
  0x46   :  { %327 = vmatpush1.bf16.msra.mxu0 %v8505_v19  ;;  %380 = vmatpush1.bf16.msra.mxu1 %v8506_v20  ;;  %v8557_v57 = vld [vmem:[#allocation3 + $0x40] ss:$16 sps:$4 sm:$0xff]   ;;  %v8560_v58 = vld [vmem:[#allocation3 + $0x48] ss:$16 sps:$4 sm:$0xff]   ;;  %v8565_v59 = vld [vmem:[#allocation3 + $0x24] ss:$16 sps:$4 sm:$0xff]  }
  0x47   :  { %328 = vmatprep.subr.bf16.mxu0 %v8507_v21  ;;  %381 = vmatprep.subr.bf16.mxu1 %v8509_v22  ;;  %v8568_v60 = vld [vmem:[#allocation3 + $0x2c] ss:$16 sps:$4 sm:$0xff]   ;;  %v8563_v61 = vld [vmem:[#allocation3 + $0x20] ss:$16 sps:$4 sm:$0xff]   ;;  %v8566_v62 = vld [vmem:[#allocation3 + $0x28] ss:$16 sps:$4 sm:$0xff]  }
  0x48   :  { %v8571_v63 = vld [vmem:[#allocation3 + $0x4] ss:$16 sps:$4 sm:$0xff]   ;;  %v8574_v1 = vld [vmem:[#allocation3 + $0xc] ss:$16 sps:$4 sm:$0xff]   ;;  %v8569_v2 = vld [vmem:[#allocation3] ss:$16 sps:$4 sm:$0xff]  }
  0x49   :  { %v8572_v3 = vld [vmem:[#allocation3 + $0x8] ss:$16 sps:$4 sm:$0xff]   ;;  %v8578_v4 = vld [vmem:[#allocation3 + $0x2e4] ss:$16 sps:$4 sm:$0xff]   ;;  %v8581_v5 = vld [vmem:[#allocation3 + $0x2ec] ss:$16 sps:$4 sm:$0xff]  }
  0x4a   :  { %329 = vmatpush1.bf16.msra.mxu0 %v8511_v23  ;;  %382 = vmatpush1.bf16.msra.mxu1 %v8512_v24  ;;  %v8575_v6 = vld [vmem:[%s9403_s0] sm:$0xff]   ;;  %v8579_v8 = vld [vmem:[#allocation3 + $0x2e8] ss:$16 sps:$4 sm:$0xff]   ;;  %v8587_v10 = vld [vmem:[#allocation3 + $0x2cc] ss:$16 sps:$4 sm:$0xff]   ;;  %vm1512_vm2 = vcmask 1046528  }
  0x4b   :  { %330 = vmatprep.subr.bf16.mxu0 %v8513_v25  ;;  %383 = vmatprep.subr.bf16.mxu1 %v8515_v26  ;;  %v8576_v7 = vld [vmem:[#allocation3 + $0x2e0] ss:$16 sps:$4 sm:$0xff]   ;;  %v8584_v9 = vld [vmem:[#allocation3 + $0x2c4] ss:$16 sps:$4 sm:$0xff]   ;;  %v8585_v12 = vld [vmem:[#allocation3 + $0x2c8] ss:$16 sps:$4 sm:$0xff]  }
  0x4c   :  { %v8582_v11 = vld [vmem:[#allocation3 + $0x2c0] ss:$16 sps:$4 sm:$0xff]   ;;  %v8591_v13 = vld [vmem:[#allocation3 + $0x2a4] ss:$16 sps:$4 sm:$0xff]   ;;  %v8594_v14 = vld [vmem:[#allocation3 + $0x2ac] ss:$16 sps:$4 sm:$0xff]  }
  0x4d   :  { %v8588_v15 = vld [vmem:[%s9403_s0 + $0x8] sm:$0xff]   ;;  %v8589_v16 = vld [vmem:[#allocation3 + $0x2a0] ss:$16 sps:$4 sm:$0xff]   ;;  %v8597_v18 = vld [vmem:[#allocation3 + $0x284] ss:$16 sps:$4 sm:$0xff]   ;;  %vm5274_vm3 = vcmask 1045504  }
  0x4e   :  { %331 = vmatpush1.bf16.msra.mxu0 %v8517_v27  ;;  %384 = vmatpush1.bf16.msra.mxu1 %v8518_v28  ;;  %v8592_v17 = vld [vmem:[#allocation3 + $0x2a8] ss:$16 sps:$4 sm:$0xff]   ;;  %v8600_v19 = vld [vmem:[#allocation3 + $0x28c] ss:$16 sps:$4 sm:$0xff]   ;;  %v8595_v20 = vld [vmem:[#allocation3 + $0x280] ss:$16 sps:$4 sm:$0xff]  }
  0x4f   :  { %332 = vmatprep.subr.bf16.mxu0 %v8519_v29  ;;  %385 = vmatprep.subr.bf16.mxu1 %v8521_v30  ;;  %v8598_v21 = vld [vmem:[#allocation3 + $0x288] ss:$16 sps:$4 sm:$0xff]   ;;  %v8603_v22 = vld [vmem:[#allocation3 + $0x264] ss:$16 sps:$4 sm:$0xff]   ;;  %v8606_v23 = vld [vmem:[#allocation3 + $0x26c] ss:$16 sps:$4 sm:$0xff]  }
  0x50   :  { %v8601_v24 = vld [vmem:[#allocation3 + $0x260] ss:$16 sps:$4 sm:$0xff]   ;;  %v8604_v25 = vld [vmem:[#allocation3 + $0x268] ss:$16 sps:$4 sm:$0xff]   ;;  %v8609_v26 = vld [vmem:[#allocation3 + $0x244] ss:$16 sps:$4 sm:$0xff]  }
  0x51   :  { %v8612_v27 = vld [vmem:[#allocation3 + $0x24c] ss:$16 sps:$4 sm:$0xff]   ;;  %v8607_v28 = vld [vmem:[#allocation3 + $0x240] ss:$16 sps:$4 sm:$0xff]   ;;  %v8610_v29 = vld [vmem:[#allocation3 + $0x248] ss:$16 sps:$4 sm:$0xff]  }
  0x52   :  { %333 = vmatpush1.bf16.msra.mxu0 %v8523_v31  ;;  %386 = vmatpush1.bf16.msra.mxu1 %v8524_v32  ;;  %v8615_v30 = vld [vmem:[#allocation3 + $0x224] ss:$16 sps:$4 sm:$0xff]   ;;  %v8618_v31 = vld [vmem:[#allocation3 + $0x22c] ss:$16 sps:$4 sm:$0xff]   ;;  %v8613_v32 = vld [vmem:[#allocation3 + $0x220] ss:$16 sps:$4 sm:$0xff]  }
  0x53   :  { %596 = vmatprep.subr.bf16.mxu0 %v8528_v33  ;;  %649 = vmatprep.subr.bf16.mxu1 %v8531_v34  ;;  %v8616_v33 = vld [vmem:[#allocation3 + $0x228] ss:$16 sps:$4 sm:$0xff]   ;;  %v8621_v34 = vld [vmem:[#allocation3 + $0x204] ss:$16 sps:$4 sm:$0xff]  }
  0x55   :  { %351 = vmatmul.mubr.bf16.vlgmr.msra.gmra.mxu0 %v8525_v35  ;;  %404 = vmatmul.mubr.bf16.vlgmr.msra.gmra.mxu1 %v8525_v35  ;;  %v8624_v35 = vld [vmem:[#allocation3 + $0x20c] ss:$16 sps:$4 sm:$0xff]  }
  0x56   :  { %597 = vmatpush1.bf16.msra.mxu0 %v8526_v36  ;;  %650 = vmatpush1.bf16.msra.mxu1 %v8529_v37  ;;  %v8619_v36 = vld [vmem:[#allocation3 + $0x200] ss:$16 sps:$4 sm:$0xff]   ;;  %v8622_v37 = vld [vmem:[#allocation3 + $0x208] ss:$16 sps:$4 sm:$0xff]  }
  0x57   :  { %598 = vmatprep.subr.bf16.mxu0 %v8534_v38  ;;  %651 = vmatprep.subr.bf16.mxu1 %v8537_v39  ;;  %v8625_v38 = vld [vmem:[%s9403_s0 + $0x20] sm:$0xff]   ;;  %v8626_v39 = vld [vmem:[%s9403_s0 + $0x28] sm:$0xff]  }
  0x58   :  { %360 = vmatprep.mubr.bf16.mxu0 %v8735_v0  ;;  %413 = vmatprep.mubr.bf16.mxu1 %v8735_v0 }
  0x5a   :  { %599 = vmatpush1.bf16.msra.mxu0 %v8532_v40  ;;  %652 = vmatpush1.bf16.msra.mxu1 %v8535_v41  ;;  %v1634_v40 = vld [vmem:[#allocation7 + $0x9c0] sm:$0xff] }
  0x5b   :  { %600 = vmatprep.subr.bf16.mxu0 %v8540_v42  ;;  %653 = vmatprep.subr.bf16.mxu1 %v8543_v43  ;;  %v1638_v41 = vld [vmem:[#allocation7 + $0x9e0] sm:$0xff] }
  0x5c   :  { %v1762_v42 = vld [vmem:[#allocation7 + $0xdc0] sm:$0xff]  ;;  %v7723_v43 = vcombine.low %v1634_v40, %v1638_v41 }
  0x5d   :  { %361 = vmatmul.mubr.bf16.gmra.mxu0 %v8556_v44  ;;  %414 = vmatmul.mubr.bf16.gmra.mxu1 %v8556_v44  ;;  %v7724_v44 = vcombine.high %v1634_v40, %v1638_v41  ;;  %v1826_v40 = vld [vmem:[#allocation7 + $0xfc0] sm:$0xff] }
  0x5e   :  { %601 = vmatpush1.bf16.msra.mxu0 %v8538_v45  ;;  %654 = vmatpush1.bf16.msra.mxu1 %v8541_v46  ;;  %v1766_v45 = vld [vmem:[#allocation7 + $0xde0] sm:$0xff] }
  0x5f   :  { %602 = vmatprep.subr.bf16.mxu0 %v8546_v47  ;;  %655 = vmatprep.subr.bf16.mxu1 %v8549_v48  ;;  %v7851_v46 = vcombine.low %v1762_v42, %v1766_v45  ;;  %v7852_v47 = vcombine.high %v1762_v42, %v1766_v45  ;;  %v1626_v48 = vld [vmem:[#allocation7 + $0x980] sm:$0xff] }
  0x60   :  { %628 = vmatprep.mubr.bf16.mxu0 %v8735_v0  ;;  %681 = vmatprep.mubr.bf16.mxu1 %v8735_v0  ;;  %v1830_v41 = vld [vmem:[#allocation7 + $0xfe0] sm:$0xff] }
  0x61   :  { %v7916_v45 = vcombine.high %v1826_v40, %v1830_v41 }
  0x62   :  { %603 = vmatpush1.bf16.msra.mxu0 %v8544_v49  ;;  %656 = vmatpush1.bf16.msra.mxu1 %v8547_v50  ;;  %v1754_v49 = vld [vmem:[#allocation7 + $0xd80] sm:$0xff] }
  0x63   :  { %604 = vmatprep.subr.bf16.mxu0 %v8552_v51  ;;  %657 = vmatprep.subr.bf16.mxu1 %v8555_v52  ;;  %v1758_v51 = vld [vmem:[#allocation7 + $0xda0] sm:$0xff] }
  0x66   :  { %605 = vmatpush1.bf16.msra.mxu0 %v8550_v53  ;;  %658 = vmatpush1.bf16.msra.mxu1 %v8553_v54  ;;  %v7843_v53 = vcombine.low %v1754_v49, %v1758_v51  ;;  %v7844_v54 = vcombine.high %v1754_v49, %v1758_v51  ;;  %v1818_v49 = vld [vmem:[#allocation7 + $0xf80] sm:$0xff] }
  0x67   :  { %606 = vmatprep.subr.bf16.mxu0 %v8559_v55  ;;  %659 = vmatprep.subr.bf16.mxu1 %v8562_v56  ;;  %v1618_v55 = vld [vmem:[#allocation7 + $0x940] sm:$0xff] }
  0x68   :  { %v1622_v56 = vld [vmem:[#allocation7 + $0x960] sm:$0xff] }
  0x69   :  { %v1822_v51 = vld [vmem:[#allocation7 + $0xfa0] sm:$0xff] }
  0x6a   :  { %607 = vmatpush1.bf16.msra.mxu0 %v8557_v57  ;;  %660 = vmatpush1.bf16.msra.mxu1 %v8560_v58  ;;  %v1746_v57 = vld [vmem:[#allocation7 + $0xd40] sm:$0xff]  ;;  %v7708_v58 = vcombine.high %v1618_v55, %v1622_v56 }
  0x6b   :  { %608 = vmatprep.subr.bf16.mxu0 %v8565_v59  ;;  %661 = vmatprep.subr.bf16.mxu1 %v8568_v60  ;;  %v1750_v59 = vld [vmem:[#allocation7 + $0xd60] sm:$0xff]  ;;  %v7707_v60 = vcombine.low %v1618_v55, %v1622_v56 }
  0x6c   :  { %v1682_v55 = vld [vmem:[#allocation7 + $0xb40] sm:$0xff] }
  0x6d   :  { %v1686_v56 = vld [vmem:[#allocation7 + $0xb60] sm:$0xff] }
  0x6e   :  { %609 = vmatpush1.bf16.msra.mxu0 %v8563_v61  ;;  %662 = vmatpush1.bf16.msra.mxu1 %v8566_v62  ;;  %v7835_v61 = vcombine.low %v1746_v57, %v1750_v59  ;;  %v7836_v62 = vcombine.high %v1746_v57, %v1750_v59  ;;  %v1810_v57 = vld [vmem:[#allocation7 + $0xf40] sm:$0xff] }
  0x6f   :  { %610 = vmatprep.subr.bf16.mxu0 %v8571_v63  ;;  %663 = vmatprep.subr.bf16.mxu1 %v8574_v1  ;;  %v1610_v63 = vld [vmem:[#allocation7 + $0x900] sm:$0xff] }
  0x70   :  { %v1614_v1 = vld [vmem:[#allocation7 + $0x920] sm:$0xff] }
  0x71   :  { %v1814_v59 = vld [vmem:[#allocation7 + $0xf60] sm:$0xff] }
  0x72   :  { %611 = vmatpush1.bf16.msra.mxu0 %v8569_v2  ;;  %664 = vmatpush1.bf16.msra.mxu1 %v8572_v3  ;;  %v1738_v2 = vld [vmem:[#allocation7 + $0xd00] sm:$0xff]  ;;  %v7700_v3 = vcombine.high %v1610_v63, %v1614_v1 }
  0x73   :  { %912 = vmatprep.subr.bf16.mxu0 %v8578_v4  ;;  %965 = vmatprep.subr.bf16.mxu1 %v8581_v5  ;;  %v1742_v4 = vld [vmem:[#allocation7 + $0xd20] sm:$0xff]  ;;  %v7699_v5 = vcombine.low %v1610_v63, %v1614_v1 }
  0x74   :  { %v1674_v63 = vld [vmem:[#allocation7 + $0xb00] sm:$0xff] }
  0x75   :  { %629 = vmatmul.mubr.bf16.vlgmr.msra.gmra.mxu0 %v8575_v6  ;;  %682 = vmatmul.mubr.bf16.vlgmr.msra.gmra.mxu1 %v8575_v6  ;;  %v7827_v6 = vcombine.low %v1738_v2, %v1742_v4  ;;  %v1678_v1 = vld [vmem:[#allocation7 + $0xb20] sm:$0xff] }
  0x76   :  { %913 = vmatpush1.bf16.msra.mxu0 %v8576_v7  ;;  %966 = vmatpush1.bf16.msra.mxu1 %v8579_v8  ;;  %v7828_v7 = vcombine.high %v1738_v2, %v1742_v4  ;;  %v1602_v8 = vld [vmem:[#allocation7 + $0x8c0] sm:$0xff] }
  0x77   :  { %914 = vmatprep.subr.bf16.mxu0 %v8584_v9  ;;  %967 = vmatprep.subr.bf16.mxu1 %v8587_v10  ;;  %v1606_v9 = vld [vmem:[#allocation7 + $0x8e0] sm:$0xff] }
  0x78   :  { %638 = vmatprep.mubr.bf16.mxu0 %v8735_v0  ;;  %691 = vmatprep.mubr.bf16.mxu1 %v8735_v0  ;;  %v1730_v10 = vld [vmem:[#allocation7 + $0xcc0] sm:$0xff] }
  0x79   :  { %v1802_v2 = vld [vmem:[#allocation7 + $0xf00] sm:$0xff] }
  0x7a   :  { %915 = vmatpush1.bf16.msra.mxu0 %v8582_v11  ;;  %968 = vmatpush1.bf16.msra.mxu1 %v8585_v12  ;;  %v7692_v11 = vcombine.high %v1602_v8, %v1606_v9  ;;  %v1734_v12 = vld [vmem:[#allocation7 + $0xce0] sm:$0xff] }
  0x7b   :  { %916 = vmatprep.subr.bf16.mxu0 %v8591_v13  ;;  %969 = vmatprep.subr.bf16.mxu1 %v8594_v14  ;;  %v7691_v13 = vcombine.low %v1602_v8, %v1606_v9  ;;  %v7819_v14 = vcombine.low %v1730_v10, %v1734_v12  ;;  %v1806_v4 = vld [vmem:[#allocation7 + $0xf20] sm:$0xff] }
  0x7c   :  { %v1666_v8 = vld [vmem:[#allocation7 + $0xac0] sm:$0xff] }
  0x7d   :  { %639 = vmatmul.mubr.bf16.gmra.mxu0 %v8588_v15  ;;  %692 = vmatmul.mubr.bf16.gmra.mxu1 %v8588_v15  ;;  %v7820_v15 = vcombine.high %v1730_v10, %v1734_v12  ;;  %v1670_v9 = vld [vmem:[#allocation7 + $0xae0] sm:$0xff] }
  0x7e   :  { %917 = vmatpush1.bf16.msra.mxu0 %v8589_v16  ;;  %970 = vmatpush1.bf16.msra.mxu1 %v8592_v17  ;;  %v1594_v16 = vld [vmem:[#allocation7 + $0x880] sm:$0xff] }
  0x7f   :  { %918 = vmatprep.subr.bf16.mxu0 %v8597_v18  ;;  %971 = vmatprep.subr.bf16.mxu1 %v8600_v19  ;;  %v1598_v17 = vld [vmem:[#allocation7 + $0x8a0] sm:$0xff] }
  0x80   :  { %944 = vmatprep.mubr.bf16.mxu0 %v8735_v0  ;;  %997 = vmatprep.mubr.bf16.mxu1 %v8735_v0  ;;  %v1722_v18 = vld [vmem:[#allocation7 + $0xc80] sm:$0xff]  ;;  %v7684_v19 = vcombine.high %v1594_v16, %v1598_v17 }
  0x81   :  { %v1794_v10 = vld [vmem:[#allocation7 + $0xec0] sm:$0xff] }
  0x82   :  { %919 = vmatpush1.bf16.msra.mxu0 %v8595_v20  ;;  %972 = vmatpush1.bf16.msra.mxu1 %v8598_v21  ;;  %v1726_v20 = vld [vmem:[#allocation7 + $0xca0] sm:$0xff]  ;;  %v7683_v21 = vcombine.low %v1594_v16, %v1598_v17 }
  0x83   :  { %920 = vmatprep.subr.bf16.mxu0 %v8603_v22  ;;  %973 = vmatprep.subr.bf16.mxu1 %v8606_v23  ;;  %v7811_v22 = vcombine.low %v1722_v18, %v1726_v20  ;;  %v7812_v23 = vcombine.high %v1722_v18, %v1726_v20  ;;  %v1798_v12 = vld [vmem:[#allocation7 + $0xee0] sm:$0xff] }
  0x84   :  { %v1658_v16 = vld [vmem:[#allocation7 + $0xa80] sm:$0xff] }
  0x85   :  { %v1662_v17 = vld [vmem:[#allocation7 + $0xaa0] sm:$0xff] }
  0x86   :  { %921 = vmatpush1.bf16.msra.mxu0 %v8601_v24  ;;  %974 = vmatpush1.bf16.msra.mxu1 %v8604_v25  ;;  %v1586_v24 = vld [vmem:[#allocation7 + $0x840] sm:$0xff] }
  0x87   :  { %922 = vmatprep.subr.bf16.mxu0 %v8609_v26  ;;  %975 = vmatprep.subr.bf16.mxu1 %v8612_v27  ;;  %v1590_v25 = vld [vmem:[#allocation7 + $0x860] sm:$0xff] }
  0x88   :  { %v1714_v26 = vld [vmem:[#allocation7 + $0xc40] sm:$0xff]  ;;  %v7676_v27 = vcombine.high %v1586_v24, %v1590_v25 }
  0x89   :  { %v1786_v18 = vld [vmem:[#allocation7 + $0xe80] sm:$0xff] }
  0x8a   :  { %923 = vmatpush1.bf16.msra.mxu0 %v8607_v28  ;;  %976 = vmatpush1.bf16.msra.mxu1 %v8610_v29  ;;  %v1718_v28 = vld [vmem:[#allocation7 + $0xc60] sm:$0xff] }
  0x8b   :  { %924 = vmatprep.subr.bf16.mxu0 %v8615_v30  ;;  %977 = vmatprep.subr.bf16.mxu1 %v8618_v31  ;;  %v1578_v29 = vld [vmem:[#allocation7 + $0x800] sm:$0xff]  ;;  %v7675_v31 = vcombine.low %v1586_v24, %v1590_v25 }
  0x8c   :  { %v1582_v30 = vld [vmem:[#allocation7 + $0x820] sm:$0xff] }
  0x8d   :  { %v7667_v42 = vcombine.low %v1578_v29, %v1582_v30  ;;  %v1790_v20 = vld [vmem:[#allocation7 + $0xea0] sm:$0xff] }
  0x8e   :  { %925 = vmatpush1.bf16.msra.mxu0 %v8613_v32  ;;  %978 = vmatpush1.bf16.msra.mxu1 %v8616_v33  ;;  %v7804_v32 = vcombine.high %v1714_v26, %v1718_v28  ;;  %v1706_v33 = vld [vmem:[#allocation7 + $0xc00] sm:$0xff]  ;;  %v7876_v24 = vcombine.high %v1786_v18, %v1790_v20 }
  0x8f   :  { %926 = vmatprep.subr.bf16.mxu0 %v8621_v34  ;;  %979 = vmatprep.subr.bf16.mxu1 %v8624_v35  ;;  %v1710_v34 = vld [vmem:[#allocation7 + $0xc20] sm:$0xff]  ;;  %v7803_v35 = vcombine.low %v1714_v26, %v1718_v28 }
  0x90   :  { %v1650_v25 = vld [vmem:[#allocation7 + $0xa40] sm:$0xff] }
  0x91   :  { %v1654_v26 = vld [vmem:[#allocation7 + $0xa60] sm:$0xff] }
  0x92   :  { %927 = vmatpush1.bf16.msra.mxu0 %v8619_v36  ;;  %980 = vmatpush1.bf16.msra.mxu1 %v8622_v37  ;;  %v7668_v36 = vcombine.high %v1578_v29, %v1582_v30  ;;  %v7796_v37 = vcombine.high %v1706_v33, %v1710_v34  ;;  %v7740_v28 = vcombine.high %v1650_v25, %v1654_v26  ;;  %v1782_v29 = vld [vmem:[#allocation7 + $0xe60] sm:$0xff]  ;;  %v8736_v30 = vmov 0.0  }
  0x93   :  { %3114 = vmatprep.subr.bf16.mxu0 %v7724_v44  ;;  %3167 = vmatprep.subr.bf16.mxu1 %v7852_v47  ;;  %v7915_v47 = vcombine.low %v1826_v40, %v1830_v41 }
  0x95   :  { %945 = vmatmul.mubr.bf16.vlgmr.msra.gmra.mxu0 %v8625_v38  ;;  %998 = vmatmul.mubr.bf16.vlgmr.msra.gmra.mxu1 %v8625_v38  ;;  %v1698_v38 = vld [vmem:[#allocation7 + $0xbc0] sm:$0xff] }
  0x96   :  { %954 = vmatprep.mubr.bf16.mxu0 %v8735_v0  ;;  %1007 = vmatprep.mubr.bf16.mxu1 %v8735_v0  ;;  %v1630_v0 = vld [vmem:[#allocation7 + $0x9a0] sm:$0xff] }
  0x97   :  { %3115 = vmatpush1.bf16.msra.mxu0 %v7723_v43  ;;  %3168 = vmatpush1.bf16.msra.mxu1 %v7851_v46  ;;  %v7716_v50 = vcombine.high %v1626_v48, %v1630_v0  ;;  %v7715_v52 = vcombine.low %v1626_v48, %v1630_v0  ;;  %v7795_v43 = vcombine.low %v1706_v33, %v1710_v34  ;;  %v1690_v48 = vld [vmem:[#allocation7 + $0xb80] sm:$0xff] }
  0x98   :  { %3169 = vmatprep.subr.bf16.mxu1 %v7844_v54  ;;  %v1694_v0 = vld [vmem:[#allocation7 + $0xba0] sm:$0xff]  ;;  %v7908_v54 = vcombine.high %v1818_v49, %v1822_v51 }
  0x99   :  { %3116 = vmatprep.subr.bf16.mxu0 %v7716_v50  ;;  %v7780_v50 = vcombine.high %v1690_v48, %v1694_v0  ;;  %v1642_v34 = vld [vmem:[#allocation7 + $0xa00] sm:$0xff] }
  0x9b   :  { %3117 = vmatpush1.bf16.msra.mxu0 %v7715_v52  ;;  %3170 = vmatpush1.bf16.msra.mxu1 %v7843_v53  ;;  %v7779_v52 = vcombine.low %v1690_v48, %v1694_v0  ;;  %v7907_v53 = vcombine.low %v1818_v49, %v1822_v51 }
  0x9c   :  { %3118 = vmatprep.subr.bf16.mxu0 %v7708_v58  ;;  %3171 = vmatprep.subr.bf16.mxu1 %v7836_v62  ;;  %v7772_v58 = vcombine.high %v1682_v55, %v1686_v56  ;;  %v7900_v62 = vcombine.high %v1810_v57, %v1814_v59 }
  0x9d   :  { %955 = vmatmul.mubr.bf16.gmra.mxu0 %v8626_v39  ;;  %1008 = vmatmul.mubr.bf16.gmra.mxu1 %v8626_v39  ;;  %v1702_v39 = vld [vmem:[#allocation7 + $0xbe0] sm:$0xff] }
  0x9e   :  { %v7788_v44 = vcombine.high %v1698_v38, %v1702_v39  ;;  %v7787_v46 = vcombine.low %v1698_v38, %v1702_v39  ;;  %v1774_v38 = vld [vmem:[#allocation7 + $0xe20] sm:$0xff] }
  0x9f   :  { %3119 = vmatpush1.bf16.msra.mxu0 %v7707_v60  ;;  %3172 = vmatpush1.bf16.msra.mxu1 %v7835_v61  ;;  %v7771_v60 = vcombine.low %v1682_v55, %v1686_v56  ;;  %v7899_v61 = vcombine.low %v1810_v57, %v1814_v59 }
  0xa0   :  { %3120 = vmatprep.subr.bf16.mxu0 %v7700_v3  ;;  %3173 = vmatprep.subr.bf16.mxu1 %v7828_v7  ;;  %v7764_v3 = vcombine.high %v1674_v63, %v1678_v1  ;;  %v7892_v7 = vcombine.high %v1802_v2, %v1806_v4 }
  0xa3   :  { %3121 = vmatpush1.bf16.msra.mxu0 %v7699_v5  ;;  %3174 = vmatpush1.bf16.msra.mxu1 %v7827_v6  ;;  %v7763_v5 = vcombine.low %v1674_v63, %v1678_v1  ;;  %v7891_v6 = vcombine.low %v1802_v2, %v1806_v4 }
  0xa4   :  { %3122 = vmatprep.subr.bf16.mxu0 %v7692_v11  ;;  %3175 = vmatprep.subr.bf16.mxu1 %v7820_v15  ;;  %v7756_v11 = vcombine.high %v1666_v8, %v1670_v9  ;;  %v7884_v15 = vcombine.high %v1794_v10, %v1798_v12 }
  0xa7   :  { %3123 = vmatpush1.bf16.msra.mxu0 %v7691_v13  ;;  %3176 = vmatpush1.bf16.msra.mxu1 %v7819_v14  ;;  %v7755_v13 = vcombine.low %v1666_v8, %v1670_v9  ;;  %v7883_v14 = vcombine.low %v1794_v10, %v1798_v12 }
  0xa8   :  { %3124 = vmatprep.subr.bf16.mxu0 %v7684_v19  ;;  %3177 = vmatprep.subr.bf16.mxu1 %v7812_v23  ;;  %v7748_v19 = vcombine.high %v1658_v16, %v1662_v17  ;;  %v7875_v23 = vcombine.low %v1786_v18, %v1790_v20 }
  0xab   :  { %3125 = vmatpush1.bf16.msra.mxu0 %v7683_v21  ;;  %3178 = vmatpush1.bf16.msra.mxu1 %v7811_v22  ;;  %v1036_v21 = vlaneseq  ;;  %v7747_v22 = vcombine.low %v1658_v16, %v1662_v17 }
  0xac   :  { %3126 = vmatprep.subr.bf16.mxu0 %v7676_v27  ;;  %3179 = vmatprep.subr.bf16.mxu1 %v7804_v32  ;;  %v1778_v27 = vld [vmem:[#allocation7 + $0xe40] sm:$0xff] }
  0xad   :  { %vm1090_vm0 = vcmp.lt.s32.totalorder %v1036_v21, 512  ;;  %v7867_v32 = vcombine.low %v1778_v27, %v1782_v29  ;;  %v7868_v33 = vcombine.high %v1778_v27, %v1782_v29 }
  0xae   :  { %1092 = vst.msk [vmem:[#allocation2] ss:$8 sm:$0xf] %vm1090_vm0, %v8736_v30  ;;  %1095 = vst.msk [vmem:[#allocation2 + $0x60] ss:$8 sm:$0xf] %vm1090_vm0, %v8736_v30 }
  0xaf   :  { %3127 = vmatpush1.bf16.msra.mxu0 %v7675_v31  ;;  %3180 = vmatpush1.bf16.msra.mxu1 %v7803_v35  ;;  %1098 = vst.msk [vmem:[#allocation2 + $0x41] ss:$8 sm:$0xf] %vm1090_vm0, %v8736_v30  ;;  %1101 = vst.msk [vmem:[#allocation2 + $0xa1] ss:$8 sm:$0xf] %vm1090_vm0, %v8736_v30  ;;  %v7739_v31 = vcombine.low %v1650_v25, %v1654_v26 }
  0xb0   :  { %3128 = vmatprep.subr.bf16.mxu0 %v7668_v36  ;;  %3181 = vmatprep.subr.bf16.mxu1 %v7796_v37  ;;  %v1646_v35 = vld [vmem:[#allocation7 + $0xa20] sm:$0xff] }
  0xb1   :  { %v1770_v36 = vld [vmem:[#allocation7 + $0xe00] sm:$0xff]  ;;  %v7732_v37 = vcombine.high %v1642_v34, %v1646_v35  ;;  %v7731_v39 = vcombine.low %v1642_v34, %v1646_v35 }
  0xb2   :  { %v7859_v40 = vcombine.low %v1770_v36, %v1774_v38  ;;  %v7860_v41 = vcombine.high %v1770_v36, %v1774_v38 }
  0xb3   :  { %3129 = vmatpush1.bf16.msra.mxu0 %v7667_v42  ;;  %3182 = vmatpush1.bf16.msra.mxu1 %v7795_v43  ;;  %v8810_v42 = vld [vmem:[#allocation7 + $0x9c8] sm:$0xff] }
  0xb4   :  { %3130 = vmatprep.subr.bf16.mxu0 %v7788_v44  ;;  %3183 = vmatprep.subr.bf16.mxu1 %v7916_v45  ;;  %v8812_v43 = vld [vmem:[#allocation7 + $0x9e8] sm:$0xff] }
  0xb5   :  { %v8814_v44 = vld [vmem:[#allocation7 + $0xdc8] sm:$0xff]  ;;  %v7725_v45 = vcombine.low %v8810_v42, %v8812_v43 }
  0xb7   :  { %3131 = vmatpush2.bf16.msra.mxu0 %v7787_v46  ;;  %3184 = vmatpush2.bf16.msra.mxu1 %v7915_v47  ;;  %v7726_v46 = vcombine.high %v8810_v42, %v8812_v43  ;;  %v8820_v47 = vld [vmem:[#allocation7 + $0xde8] sm:$0xff] }
  0xb8   :  { %3132 = vmatprep.subr.bf16.mxu0 %v7780_v50  ;;  %3185 = vmatprep.subr.bf16.mxu1 %v7908_v54  ;;  %v7853_v48 = vcombine.low %v8814_v44, %v8820_v47  ;;  %v7854_v0 = vcombine.high %v8814_v44, %v8820_v47 }
  0xbb   :  { %3133 = vmatpush2.bf16.msra.mxu0 %v7779_v52  ;;  %3186 = vmatpush2.bf16.msra.mxu1 %v7907_v53 }
  0xbc   :  { %3134 = vmatprep.subr.bf16.mxu0 %v7772_v58  ;;  %3187 = vmatprep.subr.bf16.mxu1 %v7900_v62 }
  0xbf   :  { %3135 = vmatpush2.bf16.msra.mxu0 %v7771_v60  ;;  %3188 = vmatpush2.bf16.msra.mxu1 %v7899_v61 }
  0xc0   :  { %3136 = vmatprep.subr.bf16.mxu0 %v7764_v3  ;;  %3189 = vmatprep.subr.bf16.mxu1 %v7892_v7 }
  0xc3   :  { %3137 = vmatpush2.bf16.msra.mxu0 %v7763_v5  ;;  %3190 = vmatpush2.bf16.msra.mxu1 %v7891_v6 }
  0xc4   :  { %3138 = vmatprep.subr.bf16.mxu0 %v7756_v11  ;;  %3191 = vmatprep.subr.bf16.mxu1 %v7884_v15 }
  0xc7   :  { %3139 = vmatpush2.bf16.msra.mxu0 %v7755_v13  ;;  %3192 = vmatpush2.bf16.msra.mxu1 %v7883_v14  ;;  %v8827_v14 = vshrl.u32 %v1036_v21, 7 }
  0xc8   :  { %3140 = vmatprep.subr.bf16.mxu0 %v7748_v19  ;;  %3193 = vmatprep.subr.bf16.mxu1 %v7876_v24  ;;  %v1034_v19 = vld [vmem:[#allocation5] sm:$0xf] }
  0xc9   :  { %9415 = vst [vmem:[#allocation13_spill] sm:$0xff] %v8827_v14  ;;  %v9412_v17 = vsub.s32 0, %v8827_v14  ;;  %v9410_v18 = vsub.s32 2, %v8827_v14  ;;  %v9411_v20 = vsub.s32 1, %v8827_v14 }
  0xcb   :  { %3141 = vmatpush2.bf16.msra.mxu0 %v7747_v22  ;;  %3194 = vmatpush2.bf16.msra.mxu1 %v7875_v23  ;;  %v9409_v22 = vsub.s32 3, %v8827_v14  ;;  %v8835_v27 = vrot.slane %v1034_v19, %v9412_v17  ;;  %v8839_v21 = vrot.slane %v1034_v19, %v9410_v18  ;;  %v1383_v17 = vld [vmem:[#allocation7 + $0x538] sm:$0xff] }
  0xcc   :  { %3142 = vmatprep.subr.bf16.mxu0 %v7740_v28  ;;  %3195 = vmatprep.subr.bf16.mxu1 %v7868_v33  ;;  %v1363_v14 = vld [vmem:[#allocation7 + $0x498] sm:$0xff] }
  0xcd   :  { %v8847_v33 = vrot.slane %v1034_v19, %v9409_v22 }
  0xcf   :  { %3143 = vmatpush2.bf16.msra.mxu0 %v7739_v31  ;;  %3196 = vmatpush2.bf16.msra.mxu1 %v7867_v32  ;;  %v8843_v32 = vrot.slane %v1034_v19, %v9411_v20  ;;  %v1379_v20 = vld [vmem:[#allocation7 + $0x518] sm:$0xff] }
  0xd0   :  { %3144 = vmatprep.subr.bf16.mxu0 %v7732_v37  ;;  %3197 = vmatprep.subr.bf16.mxu1 %v7860_v41 }
  0xd3   :  { %3145 = vmatpush2.bf16.msra.mxu0 %v7731_v39  ;;  %3198 = vmatpush2.bf16.msra.mxu1 %v7859_v40 }
  0xd4   :  { %3220 = vmatprep.subr.bf16.mxu0 %v7726_v46  ;;  %3273 = vmatprep.subr.bf16.mxu1 %v7854_v0 }
 0x115   :  { %v352_v49 = vpop.f32.mrf.mxu0  ;;  %v405_v50 = vpop.f32.mrf.mxu1 }
 0x117   :  { %v354_v51 = vpop.f32.mrf.mxu0  ;;  %v407_v52 = vpop.f32.mrf.mxu1 }
 0x119   :  { %v356_v53 = vpop.f32.mrf.mxu0  ;;  %v409_v54 = vpop.f32.mrf.mxu1 }
 0x11b   :  { %v358_v55 = vpop.f32.mrf.mxu0  ;;  %v411_v56 = vpop.f32.mrf.mxu1 }
 0x11d   :  { %v362_v57 = vpop.f32.mrf.mxu0  ;;  %v415_v58 = vpop.f32.mrf.mxu1 }
 0x11f   :  { %v364_v59 = vpop.f32.mrf.mxu0  ;;  %v417_v60 = vpop.f32.mrf.mxu1 }
 0x121   :  { %v366_v61 = vpop.f32.mrf.mxu0  ;;  %v419_v62 = vpop.f32.mrf.mxu1 }
 0x123   :  { %v368_v63 = vpop.f32.mrf.mxu0  ;;  %v421_v1 = vpop.f32.mrf.mxu1 }
 0x135   :  { %v630_v2 = vpop.f32.mrf.mxu0  ;;  %v683_v3 = vpop.f32.mrf.mxu1 }
 0x136   :  { %v631_v25 = vadd.f32 %v630_v2, %v352_v49  ;;  %v684_v26 = vadd.f32 %v683_v3, %v405_v50 }
 0x137   :  { %v632_v4 = vpop.f32.mrf.mxu0  ;;  %v685_v5 = vpop.f32.mrf.mxu1 }
 0x138   :  { %v633_v28 = vadd.f32 %v632_v4, %v354_v51  ;;  %v686_v29 = vadd.f32 %v685_v5, %v407_v52 }
 0x139   :  { %v634_v6 = vpop.f32.mrf.mxu0  ;;  %v687_v7 = vpop.f32.mrf.mxu1 }
 0x13a   :  { %v635_v34 = vadd.f32 %v634_v6, %v356_v53  ;;  %v688_v35 = vadd.f32 %v687_v7, %v409_v54 }
 0x13b   :  { %v636_v8 = vpop.f32.mrf.mxu0  ;;  %v689_v9 = vpop.f32.mrf.mxu1 }
 0x13c   :  { %v637_v38 = vadd.f32 %v636_v8, %v358_v55  ;;  %v690_v39 = vadd.f32 %v689_v9, %v411_v56 }
 0x13d   :  { %v640_v10 = vpop.f32.mrf.mxu0  ;;  %v693_v11 = vpop.f32.mrf.mxu1 }
 0x13e   :  { %v641_v40 = vadd.f32 %v640_v10, %v362_v57  ;;  %v694_v41 = vadd.f32 %v693_v11, %v415_v58 }
 0x13f   :  { %v642_v12 = vpop.f32.mrf.mxu0  ;;  %v695_v13 = vpop.f32.mrf.mxu1 }
 0x140   :  { %v643_v2 = vadd.f32 %v642_v12, %v364_v59  ;;  %v696_v3 = vadd.f32 %v695_v13, %v417_v60 }
 0x141   :  { %v644_v15 = vpop.f32.mrf.mxu0  ;;  %v697_v16 = vpop.f32.mrf.mxu1 }
 0x142   :  { %v8851_v4 = vadd.f32 %v644_v15, %v366_v61  ;;  %v8853_v53 = vadd.f32 %v697_v16, %v419_v62 }
 0x143   :  { %v646_v23 = vpop.f32.mrf.mxu0  ;;  %v699_v24 = vpop.f32.mrf.mxu1 }
 0x144   :  { %v8857_v6 = vadd.f32 %v646_v23, %v368_v63  ;;  %v8859_v7 = vadd.f32 %v699_v24, %v421_v1 }
 0x155   :  { %v946_v30 = vpop.f32.mrf.mxu0  ;;  %v999_v31 = vpop.f32.mrf.mxu1 }
 0x156   :  { %v1018_v36 = vadd.f32 %v946_v30, %v631_v25  ;;  %v1020_v37 = vadd.f32 %v999_v31, %v684_v26 }
 0x157   :  { %v948_v46 = vpop.f32.mrf.mxu0  ;;  %v1001_v0 = vpop.f32.mrf.mxu1 }
 0x158   :  { %v1056_v49 = vadd.f32 %v8835_v27, %v1018_v36  ;;  %v1058_v50 = vadd.f32 %v8839_v21, %v1020_v37  ;;  %v1019_v51 = vadd.f32 %v948_v46, %v633_v28  ;;  %v1021_v52 = vadd.f32 %v1001_v0, %v686_v29 }
 0x159   :  { %v950_v54 = vpop.f32.mrf.mxu0  ;;  %v1003_v55 = vpop.f32.mrf.mxu1 }
 0x15a   :  { %v1072_v56 = vmax.f32 %v1056_v49, 0.0  ;;  %v1074_v57 = vmax.f32 %v1058_v50, 0.0  ;;  %v1057_v58 = vadd.f32 %v8843_v32, %v1019_v51  ;;  %v1059_v5 = vadd.f32 %v8847_v33, %v1021_v52 }
 0x15b   :  { %v1022_v8 = vadd.f32 %v950_v54, %v635_v34  ;;  %v1024_v9 = vadd.f32 %v1003_v55, %v688_v35  ;;  %v952_v59 = vpop.f32.mrf.mxu0  ;;  %v1005_v60 = vpop.f32.mrf.mxu1 }
 0x15c   :  { %v1120_v61 = vrot.slane %v1072_v56, 7  ;;  %v1122_v10 = vrot.slane %v1074_v57, 7  ;;  %v1073_v62 = vmax.f32 %v1057_v58, 0.0  ;;  %v1075_v11 = vmax.f32 %v1059_v5, 0.0 }
 0x15d   :  { %v1060_v12 = vadd.f32 %v8835_v27, %v1022_v8  ;;  %v1062_v13 = vadd.f32 %v8839_v21, %v1024_v9  ;;  %v1023_v15 = vadd.f32 %v952_v59, %v637_v38  ;;  %v1025_v16 = vadd.f32 %v1005_v60, %v690_v39  ;;  %v956_v19 = vpop.f32.mrf.mxu0  ;;  %v1009_v25 = vpop.f32.mrf.mxu1 }
 0x15e   :  { %1168 = vst [vmem:[#allocation2] sm:$0xfe] %v1120_v61  ;;  %1170 = vst [vmem:[#allocation2 + $0x10] sm:$0xfe] %v1122_v10  ;;  %v1121_v63 = vrot.slane %v1073_v62, 7  ;;  %v1123_v1 = vrot.slane %v1075_v11, 7  ;;  %v1026_v23 = vadd.f32 %v956_v19, %v641_v40  ;;  %v1028_v24 = vadd.f32 %v1009_v25, %v694_v41 }
 0x15f   :  { %v1076_v26 = vmax.f32 %v1060_v12, 0.0  ;;  %v1078_v28 = vmax.f32 %v1062_v13, 0.0  ;;  %v1061_v29 = vadd.f32 %v8843_v32, %v1023_v15  ;;  %v1063_v30 = vadd.f32 %v8847_v33, %v1025_v16  ;;  %v958_v31 = vpop.f32.mrf.mxu0  ;;  %v1011_v34 = vpop.f32.mrf.mxu1 }
 0x160   :  { %1169 = vst [vmem:[#allocation2 + $0x8] sm:$0xfe] %v1121_v63  ;;  %1171 = vst [vmem:[#allocation2 + $0x18] sm:$0xfe] %v1123_v1  ;;  %v1064_v35 = vadd.f32 %v8835_v27, %v1026_v23  ;;  %v1066_v36 = vadd.f32 %v8839_v21, %v1028_v24  ;;  %v1027_v37 = vadd.f32 %v958_v31, %v643_v2 }
 0x161   :  { %v1029_v38 = vadd.f32 %v1011_v34, %v696_v3  ;;  %v1124_v39 = vrot.slane %v1076_v26, 7  ;;  %v1128_v46 = vrot.slane %v1078_v28, 7  ;;  %v1077_v40 = vmax.f32 %v1061_v29, 0.0  ;;  %v960_v0 = vpop.f32.mrf.mxu0  ;;  %v1013_v49 = vpop.f32.mrf.mxu1 }
 0x162   :  { %v1079_v41 = vmax.f32 %v1063_v30, 0.0  ;;  %v1080_v50 = vmax.f32 %v1064_v35, 0.0  ;;  %v1082_v51 = vmax.f32 %v1066_v36, 0.0  ;;  %v1065_v52 = vadd.f32 %v8843_v32, %v1027_v37 }
 0x163   :  { %v1067_v54 = vadd.f32 %v8847_v33, %v1029_v38  ;;  %v8870_v55 = vsel %vm1119_vm1, %v1120_v61, %v1124_v39  ;;  %1176 = vst [vmem:[#allocation2 + $0x40] sm:$0x1] %v1124_v39  ;;  %v8873_v56 = vsel %vm1119_vm1, %v1122_v10, %v1128_v46  ;;  %1178 = vst [vmem:[#allocation2 + $0x50] sm:$0x1] %v1128_v46  ;;  %v1126_v2 = vrot.slane %v1077_v40, 7  ;;  %v962_v57 = vpop.f32.mrf.mxu0  ;;  %v1015_v58 = vpop.f32.mrf.mxu1 }
 0x164   :  { %v1130_v3 = vrot.slane %v1079_v41, 7  ;;  %1172 = vst [vmem:[#allocation2 + $0x20] sm:$0xff] %v8870_v55  ;;  %1174 = vst [vmem:[#allocation2 + $0x30] sm:$0xff] %v8873_v56  ;;  %v1132_v5 = vrot.slane %v1080_v50, 7  ;;  %v1134_v8 = vrot.slane %v1082_v51, 7  ;;  %v1081_v9 = vmax.f32 %v1065_v52, 0.0 }
 0x165   :  { %v1083_v59 = vmax.f32 %v1067_v54, 0.0  ;;  %v8878_v60 = vsel %vm1119_vm1, %v1121_v63, %v1126_v2  ;;  %1177 = vst [vmem:[#allocation2 + $0x48] sm:$0x1] %v1126_v2  ;;  %v1030_v10 = vadd.f32 %v960_v0, %v8851_v4  ;;  %v1032_v62 = vadd.f32 %v1013_v49, %v8853_v53  ;;  %v1472_v63 = vld [vmem:[#allocation2] sm:$0xfe]  ;;  %v1627_v2 = vld [vmem:[#allocation7 + $0x988] sm:$0xff] }
 0x166   :  { %v8881_v61 = vsel %vm1119_vm1, %v1123_v1, %v1130_v3  ;;  %1179 = vst [vmem:[#allocation2 + $0x58] sm:$0x1] %v1130_v3  ;;  %1173 = vst [vmem:[#allocation2 + $0x28] sm:$0xff] %v8878_v60  ;;  %v1133_v11 = vrot.slane %v1081_v9, 7  ;;  %v1031_v13 = vadd.f32 %v962_v57, %v8857_v6  ;;  %v1033_v15 = vadd.f32 %v1015_v58, %v8859_v7  ;;  %v1474_v36 = vld [vmem:[#allocation2 + $0x10] sm:$0xfe] }
 0x167   :  { %1175 = vst [vmem:[#allocation2 + $0x38] sm:$0xff] %v8881_v61  ;;  %1180 = vst [vmem:[#allocation2 + $0x60] sm:$0xfe] %v1132_v5  ;;  %v1135_v12 = vrot.slane %v1083_v59, 7  ;;  %v1068_v16 = vadd.f32 %v8835_v27, %v1030_v10  ;;  %v1070_v19 = vadd.f32 %v8839_v21, %v1032_v62  ;;  %v1473_v25 = vld [vmem:[#allocation2 + $0x8] sm:$0xfe] }
 0x168   :  { %1182 = vst [vmem:[#allocation2 + $0x70] sm:$0xfe] %v1134_v8  ;;  %v1475_v4 = vld [vmem:[#allocation2 + $0x18] sm:$0xfe]  ;;  %1181 = vst [vmem:[#allocation2 + $0x68] sm:$0xfe] %v1133_v11  ;;  %v1069_v53 = vadd.f32 %v8843_v32, %v1031_v13  ;;  %v1071_v1 = vadd.f32 %v8847_v33, %v1033_v15 }
 0x169   :  { %1183 = vst [vmem:[#allocation2 + $0x78] sm:$0xfe] %v1135_v12  ;;  %v1516_v23 = vrot.slane %v1473_v25, 1  ;;  %v1084_v24 = vmax.f32 %v1068_v16, 0.0  ;;  %v1086_v26 = vmax.f32 %v1070_v19, 0.0  ;;  %v1517_v6 = vrot.slane %v8878_v60, 1 }
 0x16a   :  { %v1523_v7 = vrot.slane %v8881_v61, 1  ;;  %v1085_v27 = vmax.f32 %v1069_v53, 0.0  ;;  %v1087_v28 = vmax.f32 %v1071_v1, 0.0  ;;  %v1522_v21 = vrot.slane %v1475_v4, 1  ;;  %v1476_v29 = vld [vmem:[#allocation2 + $0x40] sm:$0x1] }
 0x16b   :  { %v1513_v30 = vrot.slane %v1472_v63, 1  ;;  %v1136_v31 = vrot.slane %v1084_v24, 7  ;;  %v1140_v34 = vrot.slane %v1086_v26, 7  ;;  %v1514_v35 = vrot.slane %v8870_v55, 1  ;;  %v1478_v50 = vld [vmem:[#allocation2 + $0x50] sm:$0x1] }
 0x16c   :  { %v1525_v32 = vrot.slane %v1476_v29, 1  ;;  %v1138_v33 = vrot.slane %v1085_v27, 7  ;;  %v1142_v37 = vrot.slane %v1087_v28, 7  ;;  %v1477_v38 = vld [vmem:[#allocation2 + $0x48] sm:$0x1]  ;;  %v1518_v39 = vsel %vm1512_vm2, %v1516_v23, %v1517_v6  ;;  %v1631_v3 = vld [vmem:[#allocation7 + $0x9a8] sm:$0xff] }
 0x16d   :  { %v1479_v46 = vld [vmem:[#allocation2 + $0x58] sm:$0x1]  ;;  %v8898_v40 = vsel %vm1119_vm1, %v1132_v5, %v1136_v31  ;;  %1188 = vst [vmem:[#allocation2 + $0xa0] sm:$0x1] %v1136_v31  ;;  %v8901_v41 = vsel %vm1119_vm1, %v1134_v8, %v1140_v34  ;;  %1190 = vst [vmem:[#allocation2 + $0xb0] sm:$0x1] %v1140_v34  ;;  %v1524_v58 = vsel %vm1512_vm2, %v1522_v21, %v1523_v7 }
 0x16e   :  { %v1527_v0 = vrot.slane %v1477_v38, 1  ;;  %v1531_v49 = vrot.slane %v1479_v46, 1  ;;  %1184 = vst [vmem:[#allocation2 + $0x80] sm:$0xff] %v8898_v40  ;;  %1186 = vst [vmem:[#allocation2 + $0x90] sm:$0xff] %v8901_v41  ;;  %v8906_v51 = vsel %vm1119_vm1, %v1133_v11, %v1138_v33  ;;  %v8909_v52 = vsel %vm1119_vm1, %v1135_v12, %v1142_v37  ;;  %v8918_v9 = vld [vmem:[#allocation7 + $0xd88] sm:$0xff] }
 0x16f   :  { %1189 = vst [vmem:[#allocation2 + $0xa8] sm:$0x1] %v1138_v33  ;;  %1191 = vst [vmem:[#allocation2 + $0xb8] sm:$0x1] %v1142_v37  ;;  %v1526_v54 = vsel %vm1512_vm2, %v1514_v35, %v1525_v32  ;;  %v1519_v55 = vrot.slane %v1474_v36, 1  ;;  %v1515_v8 = vsel %vm1512_vm2, %v1513_v30, %v1514_v35  ;;  %v8920_v59 = vld [vmem:[#allocation7 + $0xda8] sm:$0xff]  ;;  %v7718_v15 = vcombine.high %v1627_v2, %v1631_v3 }
 0x170   :  { %1185 = vst [vmem:[#allocation2 + $0x88] sm:$0xff] %v8906_v51  ;;  %1187 = vst [vmem:[#allocation2 + $0x98] sm:$0xff] %v8909_v52  ;;  %v1528_v57 = vsel %vm1512_vm2, %v1517_v6, %v1527_v0  ;;  %v1532_v5 = vsel %vm1512_vm2, %v1523_v7, %v1531_v49  ;;  %v1481_v60 = vld [vmem:[#allocation2 + $0x68] sm:$0xfe]  ;;  %v1520_v62 = vrot.slane %v8873_v56, 1  ;;  %v1529_v11 = vrot.slane %v1478_v50, 1 }
 0x171   :  { %v8922_v61 = vpack.c.bf16 %v1528_v57, %v1518_v39  ;;  %v8924_v10 = vpack.c.bf16 %v1532_v5, %v1524_v58  ;;  %v1483_v12 = vld [vmem:[#allocation2 + $0x78] sm:$0xfe]  ;;  %v8927_v13 = vpack.c.bf16 %v1526_v54, %v1515_v8  ;;  %v1480_v16 = vld [vmem:[#allocation2 + $0x60] sm:$0xfe]  ;;  %v7846_v4 = vcombine.high %v8918_v9, %v8920_v59  ;;  %v8935_v53 = vld [vmem:[#allocation7 + $0x948] sm:$0xff] }
 0x172   :  { %v1521_v19 = vsel %vm1512_vm2, %v1519_v55, %v1520_v62  ;;  %v1530_v25 = vsel %vm1512_vm2, %v1520_v62, %v1529_v11  ;;  %v1536_v63 = vrot.slane %v1481_v60, 1  ;;  %v1623_v56 = vld [vmem:[#allocation7 + $0x968] sm:$0xff]  ;;  %v1537_v24 = vrot.slane %v8906_v51, 1 }
 0x173   :  { %3146 = vmatprep.mubr.bf16.mxu0 %v8922_v61  ;;  %3199 = vmatprep.mubr.bf16.mxu1 %v8924_v10  ;;  %v8937_v1 = vld [vmem:[#allocation7 + $0xd48] sm:$0xff]  ;;  %v8940_v23 = vpack.c.bf16 %v1530_v25, %v1521_v19  ;;  %v1542_v26 = vrot.slane %v1483_v12, 1  ;;  %v1543_v6 = vrot.slane %v8909_v52, 1  ;;  %v7717_v28 = vcombine.low %v1627_v2, %v1631_v3 }
 0x174   :  { %3147 = vmatmul.mubr.bf16.vlgmr.msra.gmra.mxu0 %v8927_v13  ;;  %v1751_v7 = vld [vmem:[#allocation7 + $0xd68] sm:$0xff]  ;;  %v1484_v21 = vld [vmem:[#allocation2 + $0xa0] sm:$0x1]  ;;  %v1533_v29 = vrot.slane %v1480_v16, 1  ;;  %v1534_v30 = vrot.slane %v8898_v40, 1  ;;  %v7845_v34 = vcombine.low %v8918_v9, %v8920_v59  ;;  %v7710_v36 = vcombine.high %v8935_v53, %v1623_v56 }
 0x175   :  { %v1482_v27 = vld [vmem:[#allocation2 + $0x70] sm:$0xfe]  ;;  %3221 = vmatpush1.bf16.msra.mxu0 %v7725_v45  ;;  %v1486_v31 = vld [vmem:[#allocation2 + $0xb0] sm:$0x1]  ;;  %3200 = vmatmul.mubr.bf16.vlgmr.msra.gmra.mxu1 %v8940_v23  ;;  %v1545_v33 = vrot.slane %v1484_v21, 1  ;;  %v1540_v38 = vrot.slane %v8901_v41, 1  ;;  %v1538_v39 = vsel %vm1512_vm2, %v1536_v63, %v1537_v24  ;;  %v7838_v46 = vcombine.high %v8937_v1, %v1751_v7 }
 0x176   :  { %3222 = vmatprep.subr.bf16.mxu0 %v7718_v15  ;;  %v1485_v35 = vld [vmem:[#allocation2 + $0xa8] sm:$0x1]  ;;  %v1487_v32 = vld [vmem:[#allocation2 + $0xb8] sm:$0x1]  ;;  %v1549_v37 = vrot.slane %v1486_v31, 1  ;;  %3274 = vmatpush1.bf16.msra.mxu1 %v7853_v48  ;;  %v1539_v45 = vrot.slane %v1482_v27, 1  ;;  %v1544_v50 = vsel %vm1512_vm2, %v1542_v26, %v1543_v6  ;;  %v7709_v55 = vcombine.low %v8935_v53, %v1623_v56 }
 0x177   :  { %v1547_v42 = vrot.slane %v1485_v35, 1  ;;  %v1551_v43 = vrot.slane %v1487_v32, 1  ;;  %3275 = vmatprep.subr.bf16.mxu1 %v7846_v4  ;;  %v1546_v0 = vsel %vm1512_vm2, %v1534_v30, %v1545_v33  ;;  %v1611_v48 = vld [vmem:[#allocation7 + $0x908] sm:$0xff]  ;;  %v1535_v2 = vsel %vm1512_vm2, %v1533_v29, %v1534_v30 }
 0x178   :  { %v1550_v47 = vsel %vm1512_vm2, %v1540_v38, %v1549_v37  ;;  %v1615_v51 = vld [vmem:[#allocation7 + $0x928] sm:$0xff]  ;;  %v7837_v58 = vcombine.low %v8937_v1, %v1751_v7  ;;  %v8970_v5 = vpack.c.bf16 %v1546_v0, %v1535_v2  ;;  %v1541_v8 = vsel %vm1512_vm2, %v1539_v45, %v1540_v38  ;;  %v5250_v38 = vld [vmem:[#allocation2 + $0x60] sm:$0xfc] }
 0x179   :  { %3223 = vmatpush1.bf16.msra.mxu0 %v7717_v28  ;;  %v1548_v49 = vsel %vm1512_vm2, %v1537_v24, %v1547_v42  ;;  %v1552_v44 = vsel %vm1512_vm2, %v1543_v6, %v1551_v43  ;;  %v1739_v3 = vld [vmem:[#allocation7 + $0xd08] sm:$0xff]  ;;  %v8975_v9 = vpack.c.bf16 %v1550_v47, %v1541_v8  ;;  %v7702_v59 = vcombine.high %v1611_v48, %v1615_v51 }
 0x17a   :  { %v8963_v52 = vpack.c.bf16 %v1548_v49, %v1538_v39  ;;  %v8965_v54 = vpack.c.bf16 %v1552_v44, %v1544_v50  ;;  %3224 = vmatprep.subr.bf16.mxu0 %v7710_v36  ;;  %v1743_v57 = vld [vmem:[#allocation7 + $0xd28] sm:$0xff]  ;;  %3276 = vmatpush1.bf16.msra.mxu1 %v7845_v34  ;;  %v7701_v16 = vcombine.low %v1611_v48, %v1615_v51  ;;  %v5254_v44 = vld [vmem:[#allocation2 + $0xa0] sm:$0x3]  ;;  %v5295_v51 = vrot.slane %v5250_v38, 2 }
 0x17b   :  { %v1603_v60 = vld [vmem:[#allocation7 + $0x8c8] sm:$0xff]  ;;  %3277 = vmatprep.subr.bf16.mxu1 %v7838_v46  ;;  %v7830_v11 = vcombine.high %v1739_v3, %v1743_v57  ;;  %v7829_v19 = vcombine.low %v1739_v3, %v1743_v57  ;;  %v5296_v57 = vrot.slane %v8898_v40, 2 }
 0x17c   :  { %3156 = vmatprep.mubr.bf16.mxu0 %v8963_v52  ;;  %3209 = vmatprep.mubr.bf16.mxu1 %v8965_v54  ;;  %v1607_v62 = vld [vmem:[#allocation7 + $0x8e8] sm:$0xff] }
 0x17d   :  { %3157 = vmatmul.mubr.bf16.gmra.mxu0 %v8970_v5  ;;  %v1731_v12 = vld [vmem:[#allocation7 + $0xcc8] sm:$0xff]  ;;  %3210 = vmatmul.mubr.bf16.gmra.mxu1 %v8975_v9  ;;  %v7694_v25 = vcombine.high %v1603_v60, %v1607_v62  ;;  %v7693_v24 = vcombine.low %v1603_v60, %v1607_v62  ;;  %v5307_v60 = vrot.slane %v5254_v44, 2 }
 0x17e   :  { %v1735_v15 = vld [vmem:[#allocation7 + $0xce8] sm:$0xff]  ;;  %3225 = vmatpush1.bf16.msra.mxu0 %v7709_v55  ;;  %3278 = vmatpush1.bf16.msra.mxu1 %v7837_v58 }
 0x17f   :  { %3252 = vmatprep.mubr.bf16.mxu0 %v8922_v61  ;;  %3305 = vmatprep.mubr.bf16.mxu1 %v8924_v10  ;;  %v7822_v4 = vcombine.high %v1731_v12, %v1735_v15  ;;  %v1595_v63 = vld [vmem:[#allocation7 + $0x888] sm:$0xff]  ;;  %v7821_v26 = vcombine.low %v1731_v12, %v1735_v15  ;;  %v5297_v15 = vsel %vm5274_vm3, %v5295_v51, %v5296_v57 }
 0x180   :  { %3226 = vmatprep.subr.bf16.mxu0 %v7702_v59  ;;  %v1599_v53 = vld [vmem:[#allocation7 + $0x8a8] sm:$0xff]  ;;  %3279 = vmatprep.subr.bf16.mxu1 %v7830_v11 }
 0x181   :  { %v1723_v56 = vld [vmem:[#allocation7 + $0xc88] sm:$0xff]  ;;  %v7686_v6 = vcombine.high %v1595_v63, %v1599_v53  ;;  %v7685_v30 = vcombine.low %v1595_v63, %v1599_v53 }
 0x182   :  { %v1727_v1 = vld [vmem:[#allocation7 + $0xca8] sm:$0xff]  ;;  %3227 = vmatpush1.bf16.msra.mxu0 %v7701_v16  ;;  %3280 = vmatpush1.bf16.msra.mxu1 %v7829_v19 }
 0x183   :  { %3228 = vmatprep.subr.bf16.mxu0 %v7694_v25  ;;  %3281 = vmatprep.subr.bf16.mxu1 %v7822_v4  ;;  %v7814_v7 = vcombine.high %v1723_v56, %v1727_v1  ;;  %v1587_v27 = vld [vmem:[#allocation7 + $0x848] sm:$0xff]  ;;  %v7813_v31 = vcombine.low %v1723_v56, %v1727_v1  ;;  %v5308_v25 = vsel %vm5274_vm3, %v5296_v57, %v5307_v60  ;;  %v5302_v4 = vrot.slane %v8901_v41, 2 }
 0x184   :  { %v1591_v28 = vld [vmem:[#allocation7 + $0x868] sm:$0xff]  ;;  %v8985_v53 = vpack.c.bf16 %v5308_v25, %v5297_v15 }
 0x185   :  { %v1715_v21 = vld [vmem:[#allocation7 + $0xc48] sm:$0xff]  ;;  %v7678_v34 = vcombine.high %v1587_v27, %v1591_v28  ;;  %v7677_v42 = vcombine.low %v1587_v27, %v1591_v28 }
 0x186   :  { %v1719_v29 = vld [vmem:[#allocation7 + $0xc68] sm:$0xff]  ;;  %3229 = vmatpush1.bf16.msra.mxu0 %v7693_v24  ;;  %3282 = vmatpush1.bf16.msra.mxu1 %v7821_v26 }
 0x187   :  { %3230 = vmatprep.subr.bf16.mxu0 %v7686_v6  ;;  %3283 = vmatprep.subr.bf16.mxu1 %v7814_v7  ;;  %v7806_v35 = vcombine.high %v1715_v21, %v1719_v29  ;;  %v1579_v32 = vld [vmem:[#allocation7 + $0x808] sm:$0xff]  ;;  %v7805_v43 = vcombine.low %v1715_v21, %v1719_v29 }
 0x188   :  { %v1583_v36 = vld [vmem:[#allocation7 + $0x828] sm:$0xff] }
 0x189   :  { %v1707_v33 = vld [vmem:[#allocation7 + $0xc08] sm:$0xff]  ;;  %v7670_v45 = vcombine.high %v1579_v32, %v1583_v36  ;;  %v7669_v48 = vcombine.low %v1579_v32, %v1583_v36 }
 0x18a   :  { %v1711_v37 = vld [vmem:[#allocation7 + $0xc28] sm:$0xff]  ;;  %3231 = vmatpush1.bf16.msra.mxu0 %v7685_v30  ;;  %3284 = vmatpush1.bf16.msra.mxu1 %v7813_v31 }
 0x18b   :  { %3232 = vmatprep.subr.bf16.mxu0 %v7678_v34  ;;  %3285 = vmatprep.subr.bf16.mxu1 %v7806_v35  ;;  %v7798_v39 = vcombine.high %v1707_v33, %v1711_v37  ;;  %v1699_v46 = vld [vmem:[#allocation7 + $0xbc8] sm:$0xff]  ;;  %v7797_v2 = vcombine.low %v1707_v33, %v1711_v37 }
 0x18c   :  { %v1703_v0 = vld [vmem:[#allocation7 + $0xbe8] sm:$0xff] }
 0x18d   :  { %v1827_v49 = vld [vmem:[#allocation7 + $0xfc8] sm:$0xff]  ;;  %v7790_v3 = vcombine.high %v1699_v46, %v1703_v0  ;;  %v7789_v19 = vcombine.low %v1699_v46, %v1703_v0 }
 0x18e   :  { %v1831_v50 = vld [vmem:[#allocation7 + $0xfe8] sm:$0xff]  ;;  %3233 = vmatpush1.bf16.msra.mxu0 %v7677_v42  ;;  %3286 = vmatpush1.bf16.msra.mxu1 %v7805_v43 }
 0x18f   :  { %v5252_v47 = vld [vmem:[#allocation2 + $0x70] sm:$0xfc]  ;;  %v5256_v55 = vld [vmem:[#allocation2 + $0xb0] sm:$0x3]  ;;  %3234 = vmatprep.subr.bf16.mxu0 %v7670_v45  ;;  %3287 = vmatprep.subr.bf16.mxu1 %v7798_v39  ;;  %v7918_v58 = vcombine.high %v1827_v49, %v1831_v50  ;;  %v7917_v40 = vcombine.low %v1827_v49, %v1831_v50 }
 0x190   :  { %v1691_v8 = vld [vmem:[#allocation7 + $0xb88] sm:$0xff]  ;;  %v5301_v62 = vrot.slane %v5252_v47, 2  ;;  %v5311_v16 = vrot.slane %v5256_v55, 2 }
 0x191   :  { %v1695_v59 = vld [vmem:[#allocation7 + $0xba8] sm:$0xff] }
 0x192   :  { %v1819_v11 = vld [vmem:[#allocation7 + $0xf88] sm:$0xff]  ;;  %3235 = vmatpush1.bf16.msra.mxu0 %v7669_v48  ;;  %3288 = vmatpush1.bf16.msra.mxu1 %v7797_v2  ;;  %v7782_v63 = vcombine.high %v1691_v8, %v1695_v59  ;;  %v5303_v26 = vsel %vm5274_vm3, %v5301_v62, %v5302_v4  ;;  %v5312_v6 = vsel %vm5274_vm3, %v5302_v4, %v5311_v16 }
 0x193   :  { %v1823_v12 = vld [vmem:[#allocation7 + $0xfa8] sm:$0xff]  ;;  %3236 = vmatprep.subr.bf16.mxu0 %v7790_v3  ;;  %3289 = vmatprep.subr.bf16.mxu1 %v7918_v58  ;;  %v8989_v28 = vpack.c.bf16 %v5312_v6, %v5303_v26  ;;  %v7781_v41 = vcombine.low %v1691_v8, %v1695_v59  ;;  %v1640_v26 = vld [vmem:[#allocation7 + $0x9f0] sm:$0xff] }
 0x194   :  { %v7910_v56 = vcombine.high %v1819_v11, %v1823_v12  ;;  %v1683_v1 = vld [vmem:[#allocation7 + $0xb48] sm:$0xff]  ;;  %v7909_v21 = vcombine.low %v1819_v11, %v1823_v12  ;;  %v1764_v6 = vld [vmem:[#allocation7 + $0xdd0] sm:$0xff] }
 0x195   :  { %v1687_v24 = vld [vmem:[#allocation7 + $0xb68] sm:$0xff] }
 0x196   :  { %v1811_v7 = vld [vmem:[#allocation7 + $0xf48] sm:$0xff]  ;;  %3237 = vmatpush2.bf16.msra.mxu0 %v7789_v19  ;;  %3290 = vmatpush2.bf16.msra.mxu1 %v7917_v40  ;;  %v7774_v29 = vcombine.high %v1683_v1, %v1687_v24  ;;  %v7773_v36 = vcombine.low %v1683_v1, %v1687_v24  ;;  %v1636_v24 = vld [vmem:[#allocation7 + $0x9d0] sm:$0xff] }
 0x197   :  { %v1815_v27 = vld [vmem:[#allocation7 + $0xf68] sm:$0xff]  ;;  %3238 = vmatprep.subr.bf16.mxu0 %v7782_v63  ;;  %3291 = vmatprep.subr.bf16.mxu1 %v7910_v56 }
 0x198   :  { %v7902_v30 = vcombine.high %v1811_v7, %v1815_v27  ;;  %v1675_v31 = vld [vmem:[#allocation7 + $0xb08] sm:$0xff]  ;;  %v7901_v33 = vcombine.low %v1811_v7, %v1815_v27  ;;  %v1768_v7 = vld [vmem:[#allocation7 + $0xdf0] sm:$0xff] }
 0x199   :  { %v1679_v34 = vld [vmem:[#allocation7 + $0xb28] sm:$0xff] }
 0x19a   :  { %v1803_v35 = vld [vmem:[#allocation7 + $0xf08] sm:$0xff]  ;;  %3239 = vmatpush2.bf16.msra.mxu0 %v7781_v41  ;;  %3292 = vmatpush2.bf16.msra.mxu1 %v7909_v21  ;;  %v7766_v37 = vcombine.high %v1675_v31, %v1679_v34  ;;  %v7765_v46 = vcombine.low %v1675_v31, %v1679_v34  ;;  %v7728_v21 = vcombine.high %v1636_v24, %v1640_v26  ;;  %v1632_v31 = vld [vmem:[#allocation7 + $0x9b0] sm:$0xff] }
 0x19b   :  { %v1807_v32 = vld [vmem:[#allocation7 + $0xf28] sm:$0xff]  ;;  %3240 = vmatprep.subr.bf16.mxu0 %v7774_v29  ;;  %3293 = vmatprep.subr.bf16.mxu1 %v7902_v30  ;;  %v7856_v29 = vcombine.high %v1764_v6, %v1768_v7  ;;  %v1628_v30 = vld [vmem:[#allocation7 + $0x990] sm:$0xff] }
 0x19c   :  { %v7894_v42 = vcombine.high %v1803_v35, %v1807_v32  ;;  %v1667_v43 = vld [vmem:[#allocation7 + $0xac8] sm:$0xff]  ;;  %v7893_v0 = vcombine.low %v1803_v35, %v1807_v32  ;;  %v1756_v34 = vld [vmem:[#allocation7 + $0xd90] sm:$0xff]  ;;  %v7727_v32 = vcombine.low %v1636_v24, %v1640_v26 }
 0x19d   :  { %v1671_v45 = vld [vmem:[#allocation7 + $0xae8] sm:$0xff]  ;;  %v1760_v35 = vld [vmem:[#allocation7 + $0xdb0] sm:$0xff] }
 0x19e   :  { %v1795_v38 = vld [vmem:[#allocation7 + $0xec8] sm:$0xff]  ;;  %3241 = vmatpush2.bf16.msra.mxu0 %v7773_v36  ;;  %3294 = vmatpush2.bf16.msra.mxu1 %v7901_v33  ;;  %v7758_v49 = vcombine.high %v1667_v43, %v1671_v45  ;;  %v7757_v55 = vcombine.low %v1667_v43, %v1671_v45  ;;  %v7855_v36 = vcombine.low %v1764_v6, %v1768_v7  ;;  %v1624_v43 = vld [vmem:[#allocation7 + $0x970] sm:$0xff] }
 0x19f   :  { %v1799_v39 = vld [vmem:[#allocation7 + $0xee8] sm:$0xff]  ;;  %3242 = vmatprep.subr.bf16.mxu0 %v7766_v37  ;;  %3295 = vmatprep.subr.bf16.mxu1 %v7894_v42  ;;  %v7720_v33 = vcombine.high %v1628_v30, %v1632_v31  ;;  %v7848_v37 = vcombine.high %v1756_v34, %v1760_v35  ;;  %v1620_v42 = vld [vmem:[#allocation7 + $0x950] sm:$0xff] }
 0x1a0   :  { %v7886_v50 = vcombine.high %v1795_v38, %v1799_v39  ;;  %v1659_v44 = vld [vmem:[#allocation7 + $0xa88] sm:$0xff]  ;;  %v7885_v2 = vcombine.low %v1795_v38, %v1799_v39  ;;  %v1748_v45 = vld [vmem:[#allocation7 + $0xd50] sm:$0xff]  ;;  %v7719_v39 = vcombine.low %v1628_v30, %v1632_v31 }
 0x1a1   :  { %v1663_v47 = vld [vmem:[#allocation7 + $0xaa8] sm:$0xff]  ;;  %v1752_v38 = vld [vmem:[#allocation7 + $0xd70] sm:$0xff] }
 0x1a2   :  { %v1787_v48 = vld [vmem:[#allocation7 + $0xe88] sm:$0xff]  ;;  %3243 = vmatpush2.bf16.msra.mxu0 %v7765_v46  ;;  %3296 = vmatpush2.bf16.msra.mxu1 %v7893_v0  ;;  %v7750_v3 = vcombine.high %v1659_v44, %v1663_v47  ;;  %v7749_v62 = vcombine.low %v1659_v44, %v1663_v47  ;;  %v7847_v46 = vcombine.low %v1756_v34, %v1760_v35  ;;  %v1616_v44 = vld [vmem:[#allocation7 + $0x930] sm:$0xff] }
 0x1a3   :  { %v1791_v51 = vld [vmem:[#allocation7 + $0xea8] sm:$0xff]  ;;  %3244 = vmatprep.subr.bf16.mxu0 %v7758_v49  ;;  %3297 = vmatprep.subr.bf16.mxu1 %v7886_v50  ;;  %v7712_v0 = vcombine.high %v1620_v42, %v1624_v43  ;;  %v7840_v49 = vcombine.high %v1748_v45, %v1752_v38  ;;  %v1612_v50 = vld [vmem:[#allocation7 + $0x910] sm:$0xff] }
 0x1a4   :  { %v7878_v57 = vcombine.high %v1787_v48, %v1791_v51  ;;  %v1651_v58 = vld [vmem:[#allocation7 + $0xa48] sm:$0xff]  ;;  %v7877_v11 = vcombine.low %v1787_v48, %v1791_v51  ;;  %v1740_v47 = vld [vmem:[#allocation7 + $0xd10] sm:$0xff]  ;;  %v7711_v51 = vcombine.low %v1620_v42, %v1624_v43 }
 0x1a5   :  { %v1655_v8 = vld [vmem:[#allocation7 + $0xa68] sm:$0xff]  ;;  %v1744_v48 = vld [vmem:[#allocation7 + $0xd30] sm:$0xff] }
 0x1a6   :  { %v1779_v59 = vld [vmem:[#allocation7 + $0xe48] sm:$0xff]  ;;  %3245 = vmatpush2.bf16.msra.mxu0 %v7757_v55  ;;  %3298 = vmatpush2.bf16.msra.mxu1 %v7885_v2  ;;  %v7742_v12 = vcombine.high %v1651_v58, %v1655_v8  ;;  %v7741_v40 = vcombine.low %v1651_v58, %v1655_v8  ;;  %v7839_v55 = vcombine.low %v1748_v45, %v1752_v38  ;;  %v1608_v58 = vld [vmem:[#allocation7 + $0x8f0] sm:$0xff] }
 0x1a7   :  { %v1783_v60 = vld [vmem:[#allocation7 + $0xe68] sm:$0xff]  ;;  %3246 = vmatprep.subr.bf16.mxu0 %v7750_v3  ;;  %3299 = vmatprep.subr.bf16.mxu1 %v7878_v57  ;;  %v7704_v2 = vcombine.high %v1612_v50, %v1616_v44  ;;  %v7832_v3 = vcombine.high %v1740_v47, %v1744_v48  ;;  %v1604_v57 = vld [vmem:[#allocation7 + $0x8d0] sm:$0xff] }
 0x1a8   :  { %v7870_v15 = vcombine.high %v1779_v59, %v1783_v60  ;;  %v1643_v16 = vld [vmem:[#allocation7 + $0xa08] sm:$0xff]  ;;  %v7869_v63 = vcombine.low %v1779_v59, %v1783_v60  ;;  %v1732_v8 = vld [vmem:[#allocation7 + $0xcd0] sm:$0xff]  ;;  %v7703_v60 = vcombine.low %v1612_v50, %v1616_v44 }
 0x1a9   :  { %v1647_v19 = vld [vmem:[#allocation7 + $0xa28] sm:$0xff]  ;;  %v1736_v59 = vld [vmem:[#allocation7 + $0xcf0] sm:$0xff] }
 0x1aa   :  { %v1771_v25 = vld [vmem:[#allocation7 + $0xe08] sm:$0xff]  ;;  %3247 = vmatpush2.bf16.msra.mxu0 %v7749_v62  ;;  %3300 = vmatpush2.bf16.msra.mxu1 %v7877_v11  ;;  %v7734_v56 = vcombine.high %v1643_v16, %v1647_v19  ;;  %v7733_v27 = vcombine.low %v1643_v16, %v1647_v19  ;;  %v7831_v62 = vcombine.low %v1740_v47, %v1744_v48  ;;  %v1600_v16 = vld [vmem:[#allocation7 + $0x8b0] sm:$0xff] }
 0x1ab   :  { %v1775_v4 = vld [vmem:[#allocation7 + $0xe28] sm:$0xff]  ;;  %3248 = vmatprep.subr.bf16.mxu0 %v7742_v12  ;;  %3301 = vmatprep.subr.bf16.mxu1 %v7870_v15  ;;  %v7696_v11 = vcombine.high %v1604_v57, %v1608_v58  ;;  %v7824_v12 = vcombine.high %v1732_v8, %v1736_v59  ;;  %v1596_v15 = vld [vmem:[#allocation7 + $0x890] sm:$0xff] }
 0x1ac   :  { %v7862_v1 = vcombine.high %v1771_v25, %v1775_v4  ;;  %v7861_v41 = vcombine.low %v1771_v25, %v1775_v4  ;;  %v1724_v19 = vld [vmem:[#allocation7 + $0xc90] sm:$0xff]  ;;  %v7695_v4 = vcombine.low %v1604_v57, %v1608_v58  ;;  %v7687_v7 = vcombine.low %v1596_v15, %v1600_v16 }
 0x1ad   :  { %v1728_v25 = vld [vmem:[#allocation7 + $0xcb0] sm:$0xff] }
 0x1ae   :  { %3249 = vmatpush2.bf16.msra.mxu0 %v7741_v40  ;;  %3302 = vmatpush2.bf16.msra.mxu1 %v7869_v63  ;;  %v7823_v40 = vcombine.low %v1732_v8, %v1736_v59  ;;  %v7688_v63 = vcombine.high %v1596_v15, %v1600_v16  ;;  %v1592_v24 = vld [vmem:[#allocation7 + $0x870] sm:$0xff] }
 0x1af   :  { %3250 = vmatprep.subr.bf16.mxu0 %v7734_v56  ;;  %3303 = vmatprep.subr.bf16.mxu1 %v7862_v1  ;;  %v7816_v56 = vcombine.high %v1724_v19, %v1728_v25  ;;  %v1588_v1 = vld [vmem:[#allocation7 + $0x850] sm:$0xff] }
 0x1b0   :  { %v1716_v26 = vld [vmem:[#allocation7 + $0xc50] sm:$0xff]  ;;  %v7679_v35 = vcombine.low %v1588_v1, %v1592_v24 }
 0x1b1   :  { %v1720_v6 = vld [vmem:[#allocation7 + $0xc70] sm:$0xff] }
 0x1b2   :  { %3251 = vmatpush2.bf16.msra.mxu0 %v7733_v27  ;;  %3304 = vmatpush2.bf16.msra.mxu1 %v7861_v41  ;;  %v7815_v27 = vcombine.low %v1724_v19, %v1728_v25  ;;  %v7680_v41 = vcombine.high %v1588_v1, %v1592_v24  ;;  %v1584_v30 = vld [vmem:[#allocation7 + $0x830] sm:$0xff] }
 0x1b3   :  { %3326 = vmatprep.subr.bf16.mxu0 %v7728_v21  ;;  %3379 = vmatprep.subr.bf16.mxu1 %v7856_v29  ;;  %v7808_v21 = vcombine.high %v1716_v26, %v1720_v6  ;;  %v1580_v29 = vld [vmem:[#allocation7 + $0x810] sm:$0xff] }
 0x1b4   :  { %v1708_v31 = vld [vmem:[#allocation7 + $0xc10] sm:$0xff]  ;;  %v7671_v38 = vcombine.low %v1580_v29, %v1584_v30 }
 0x1b5   :  { %3253 = vmatmul.mubr.bf16.vlgmr.msra.gmra.mxu0 %v8927_v13  ;;  %3306 = vmatmul.mubr.bf16.vlgmr.msra.gmra.mxu1 %v8940_v23  ;;  %v1712_v34 = vld [vmem:[#allocation7 + $0xc30] sm:$0xff] }
 0x1b6   :  { %3262 = vmatprep.mubr.bf16.mxu0 %v8963_v52  ;;  %3315 = vmatprep.mubr.bf16.mxu1 %v8965_v54  ;;  %v1704_v42 = vld [vmem:[#allocation7 + $0xbf0] sm:$0xff] }
 0x1b7   :  { %3327 = vmatpush1.bf16.msra.mxu0 %v7727_v32  ;;  %3380 = vmatpush1.bf16.msra.mxu1 %v7855_v36  ;;  %v7807_v32 = vcombine.low %v1716_v26, %v1720_v6  ;;  %v7672_v36 = vcombine.high %v1580_v29, %v1584_v30  ;;  %v1828_v43 = vld [vmem:[#allocation7 + $0xfd0] sm:$0xff] }
 0x1b8   :  { %3328 = vmatprep.subr.bf16.mxu0 %v7720_v33  ;;  %3381 = vmatprep.subr.bf16.mxu1 %v7848_v37  ;;  %v7800_v33 = vcombine.high %v1708_v31, %v1712_v34  ;;  %v1700_v37 = vld [vmem:[#allocation7 + $0xbd0] sm:$0xff] }
 0x1b9   :  { %v1832_v45 = vld [vmem:[#allocation7 + $0xff0] sm:$0xff]  ;;  %v7791_v48 = vcombine.low %v1700_v37, %v1704_v42 }
 0x1ba   :  { %v1696_v50 = vld [vmem:[#allocation7 + $0xbb0] sm:$0xff] }
 0x1bb   :  { %3329 = vmatpush1.bf16.msra.mxu0 %v7719_v39  ;;  %3382 = vmatpush1.bf16.msra.mxu1 %v7847_v46  ;;  %v7799_v39 = vcombine.low %v1708_v31, %v1712_v34  ;;  %v7792_v46 = vcombine.high %v1700_v37, %v1704_v42  ;;  %v1820_v44 = vld [vmem:[#allocation7 + $0xf90] sm:$0xff] }
 0x1bc   :  { %3330 = vmatprep.subr.bf16.mxu0 %v7712_v0  ;;  %3383 = vmatprep.subr.bf16.mxu1 %v7840_v49  ;;  %v7920_v0 = vcombine.high %v1828_v43, %v1832_v45  ;;  %v1692_v49 = vld [vmem:[#allocation7 + $0xb90] sm:$0xff] }
 0x1bd   :  { %3263 = vmatmul.mubr.bf16.gmra.mxu0 %v8970_v5  ;;  %3316 = vmatmul.mubr.bf16.gmra.mxu1 %v8975_v9  ;;  %v1824_v47 = vld [vmem:[#allocation7 + $0xfb0] sm:$0xff]  ;;  %v7783_v59 = vcombine.low %v1692_v49, %v1696_v50 }
 0x1be   :  { %3358 = vmatprep.mubr.bf16.mxu0 %v8922_v61  ;;  %3411 = vmatprep.mubr.bf16.mxu1 %v8924_v10  ;;  %v1688_v57 = vld [vmem:[#allocation7 + $0xb70] sm:$0xff] }
 0x1bf   :  { %3331 = vmatpush1.bf16.msra.mxu0 %v7711_v51  ;;  %3384 = vmatpush1.bf16.msra.mxu1 %v7839_v55  ;;  %v7919_v51 = vcombine.low %v1828_v43, %v1832_v45  ;;  %v7784_v55 = vcombine.high %v1692_v49, %v1696_v50  ;;  %v1812_v58 = vld [vmem:[#allocation7 + $0xf50] sm:$0xff] }
 0x1c0   :  { %3332 = vmatprep.subr.bf16.mxu0 %v7704_v2  ;;  %3385 = vmatprep.subr.bf16.mxu1 %v7832_v3  ;;  %v7912_v2 = vcombine.high %v1820_v44, %v1824_v47  ;;  %v1684_v3 = vld [vmem:[#allocation7 + $0xb50] sm:$0xff] }
 0x1c1   :  { %v1816_v8 = vld [vmem:[#allocation7 + $0xf70] sm:$0xff]  ;;  %v7775_v25 = vcombine.low %v1684_v3, %v1688_v57 }
 0x1c2   :  { %v1680_v15 = vld [vmem:[#allocation7 + $0xb30] sm:$0xff] }
 0x1c3   :  { %3333 = vmatpush1.bf16.msra.mxu0 %v7703_v60  ;;  %3386 = vmatpush1.bf16.msra.mxu1 %v7831_v62  ;;  %v7911_v60 = vcombine.low %v1820_v44, %v1824_v47  ;;  %v7776_v62 = vcombine.high %v1684_v3, %v1688_v57  ;;  %v1804_v16 = vld [vmem:[#allocation7 + $0xf10] sm:$0xff]  ;;  %v1641_v3 = vld [vmem:[#allocation7 + $0x9f8] sm:$0xff] }
 0x1c4   :  { %3334 = vmatprep.subr.bf16.mxu0 %v7696_v11  ;;  %3387 = vmatprep.subr.bf16.mxu1 %v7824_v12  ;;  %v7904_v11 = vcombine.high %v1812_v58, %v1816_v8  ;;  %v1676_v12 = vld [vmem:[#allocation7 + $0xb10] sm:$0xff]  ;;  %v1765_v57 = vld [vmem:[#allocation7 + $0xdd8] sm:$0xff] }
 0x1c5   :  { %v1808_v19 = vld [vmem:[#allocation7 + $0xf30] sm:$0xff]  ;;  %v7767_v6 = vcombine.low %v1676_v12, %v1680_v15 }
 0x1c6   :  { %v1672_v1 = vld [vmem:[#allocation7 + $0xaf0] sm:$0xff] }
 0x1c7   :  { %3335 = vmatpush1.bf16.msra.mxu0 %v7695_v4  ;;  %3388 = vmatpush1.bf16.msra.mxu1 %v7823_v40  ;;  %v7903_v4 = vcombine.low %v1812_v58, %v1816_v8  ;;  %v7768_v40 = vcombine.high %v1676_v12, %v1680_v15  ;;  %v1796_v24 = vld [vmem:[#allocation7 + $0xed0] sm:$0xff]  ;;  %v1769_v58 = vld [vmem:[#allocation7 + $0xdf8] sm:$0xff] }
 0x1c8   :  { %3336 = vmatprep.subr.bf16.mxu0 %v7688_v63  ;;  %3389 = vmatprep.subr.bf16.mxu1 %v7816_v56  ;;  %v7896_v63 = vcombine.high %v1804_v16, %v1808_v19  ;;  %v1668_v56 = vld [vmem:[#allocation7 + $0xad0] sm:$0xff]  ;;  %v1633_v12 = vld [vmem:[#allocation7 + $0x9b8] sm:$0xff] }
 0x1c9   :  { %v1800_v26 = vld [vmem:[#allocation7 + $0xef0] sm:$0xff]  ;;  %v7759_v34 = vcombine.low %v1668_v56, %v1672_v1  ;;  %v1757_v15 = vld [vmem:[#allocation7 + $0xd98] sm:$0xff] }
 0x1ca   :  { %v1664_v29 = vld [vmem:[#allocation7 + $0xab0] sm:$0xff] }
 0x1cb   :  { %3337 = vmatpush1.bf16.msra.mxu0 %v7687_v7  ;;  %3390 = vmatpush1.bf16.msra.mxu1 %v7815_v27  ;;  %v7895_v7 = vcombine.low %v1804_v16, %v1808_v19  ;;  %v7760_v27 = vcombine.high %v1668_v56, %v1672_v1  ;;  %v1788_v30 = vld [vmem:[#allocation7 + $0xe90] sm:$0xff]  ;;  %v1761_v16 = vld [vmem:[#allocation7 + $0xdb8] sm:$0xff] }
 0x1cc   :  { %3338 = vmatprep.subr.bf16.mxu0 %v7680_v41  ;;  %3391 = vmatprep.subr.bf16.mxu1 %v7808_v21  ;;  %v7888_v41 = vcombine.high %v1796_v24, %v1800_v26  ;;  %v1660_v21 = vld [vmem:[#allocation7 + $0xa90] sm:$0xff]  ;;  %v1625_v56 = vld [vmem:[#allocation7 + $0x978] sm:$0xff] }
 0x1cd   :  { %v1792_v31 = vld [vmem:[#allocation7 + $0xeb0] sm:$0xff]  ;;  %v7751_v45 = vcombine.low %v1660_v21, %v1664_v29  ;;  %v1749_v1 = vld [vmem:[#allocation7 + $0xd58] sm:$0xff] }
 0x1ce   :  { %v1656_v37 = vld [vmem:[#allocation7 + $0xa70] sm:$0xff] }
 0x1cf   :  { %3339 = vmatpush1.bf16.msra.mxu0 %v7679_v35  ;;  %3392 = vmatpush1.bf16.msra.mxu1 %v7807_v32  ;;  %v7887_v35 = vcombine.low %v1796_v24, %v1800_v26  ;;  %v7752_v32 = vcombine.high %v1660_v21, %v1664_v29  ;;  %v1780_v42 = vld [vmem:[#allocation7 + $0xe50] sm:$0xff]  ;;  %v1753_v24 = vld [vmem:[#allocation7 + $0xd78] sm:$0xff] }
 0x1d0   :  { %3340 = vmatprep.subr.bf16.mxu0 %v7672_v36  ;;  %3393 = vmatprep.subr.bf16.mxu1 %v7800_v33  ;;  %v7880_v36 = vcombine.high %v1788_v30, %v1792_v31  ;;  %v1652_v33 = vld [vmem:[#allocation7 + $0xa50] sm:$0xff]  ;;  %v1617_v21 = vld [vmem:[#allocation7 + $0x938] sm:$0xff] }
 0x1d1   :  { %v1784_v43 = vld [vmem:[#allocation7 + $0xe70] sm:$0xff]  ;;  %v7743_v47 = vcombine.low %v1652_v33, %v1656_v37  ;;  %v1741_v29 = vld [vmem:[#allocation7 + $0xd18] sm:$0xff] }
 0x1d2   :  { %v1648_v49 = vld [vmem:[#allocation7 + $0xa30] sm:$0xff] }
 0x1d3   :  { %3341 = vmatpush1.bf16.msra.mxu0 %v7671_v38  ;;  %3394 = vmatpush1.bf16.msra.mxu1 %v7799_v39  ;;  %v7879_v38 = vcombine.low %v1788_v30, %v1792_v31  ;;  %v7744_v39 = vcombine.high %v1652_v33, %v1656_v37  ;;  %v1772_v50 = vld [vmem:[#allocation7 + $0xe10] sm:$0xff]  ;;  %v1745_v30 = vld [vmem:[#allocation7 + $0xd38] sm:$0xff] }
 0x1d4   :  { %3342 = vmatprep.subr.bf16.mxu0 %v7792_v46  ;;  %3395 = vmatprep.subr.bf16.mxu1 %v7920_v0  ;;  %v7872_v46 = vcombine.high %v1780_v42, %v1784_v43  ;;  %v1644_v0 = vld [vmem:[#allocation7 + $0xa10] sm:$0xff]  ;;  %v1609_v33 = vld [vmem:[#allocation7 + $0x8f8] sm:$0xff] }
 0x1d5   :  { %v1776_v44 = vld [vmem:[#allocation7 + $0xe30] sm:$0xff]  ;;  %v7735_v8 = vcombine.low %v1644_v0, %v1648_v49  ;;  %v1733_v37 = vld [vmem:[#allocation7 + $0xcd8] sm:$0xff] }
 0x1d7   :  { %3343 = vmatpush2.bf16.msra.mxu0 %v7791_v48  ;;  %3396 = vmatpush2.bf16.msra.mxu1 %v7919_v51  ;;  %v7871_v48 = vcombine.low %v1780_v42, %v1784_v43  ;;  %v7736_v51 = vcombine.high %v1644_v0, %v1648_v49  ;;  %v1737_v42 = vld [vmem:[#allocation7 + $0xcf8] sm:$0xff] }
 0x1d8   :  { %3344 = vmatprep.subr.bf16.mxu0 %v7784_v55  ;;  %3397 = vmatprep.subr.bf16.mxu1 %v7912_v2  ;;  %v7864_v55 = vcombine.high %v1772_v50, %v1776_v44  ;;  %v1637_v2 = vld [vmem:[#allocation7 + $0x9d8] sm:$0xff] }
 0x1d9   :  { %v7729_v19 = vcombine.low %v1637_v2, %v1641_v3  ;;  %v1601_v0 = vld [vmem:[#allocation7 + $0x8b8] sm:$0xff] }
 0x1da   :  { %v1725_v49 = vld [vmem:[#allocation7 + $0xc98] sm:$0xff] }
 0x1db   :  { %3345 = vmatpush2.bf16.msra.mxu0 %v7783_v59  ;;  %3398 = vmatpush2.bf16.msra.mxu1 %v7911_v60  ;;  %v7863_v59 = vcombine.low %v1772_v50, %v1776_v44  ;;  %v7730_v60 = vcombine.high %v1637_v2, %v1641_v3  ;;  %v1729_v50 = vld [vmem:[#allocation7 + $0xcb8] sm:$0xff] }
 0x1dc   :  { %3346 = vmatprep.subr.bf16.mxu0 %v7776_v62  ;;  %3399 = vmatprep.subr.bf16.mxu1 %v7904_v11  ;;  %v7858_v62 = vcombine.high %v1765_v57, %v1769_v58  ;;  %v1629_v11 = vld [vmem:[#allocation7 + $0x998] sm:$0xff] }
 0x1dd   :  { %v7721_v26 = vcombine.low %v1629_v11, %v1633_v12  ;;  %v1721_v2 = vld [vmem:[#allocation7 + $0xc78] sm:$0xff] }
 0x1df   :  { %3347 = vmatpush2.bf16.msra.mxu0 %v7775_v25  ;;  %3400 = vmatpush2.bf16.msra.mxu1 %v7903_v4  ;;  %v7857_v25 = vcombine.low %v1765_v57, %v1769_v58  ;;  %v7722_v4 = vcombine.high %v1629_v11, %v1633_v12  ;;  %v7817_v57 = vcombine.low %v1725_v49, %v1729_v50  ;;  %v1713_v11 = vld [vmem:[#allocation7 + $0xc38] sm:$0xff] }
 0x1e0   :  { %3348 = vmatprep.subr.bf16.mxu0 %v7768_v40  ;;  %3401 = vmatprep.subr.bf16.mxu1 %v7896_v63  ;;  %v7850_v40 = vcombine.high %v1757_v15, %v1761_v16  ;;  %v1621_v63 = vld [vmem:[#allocation7 + $0x958] sm:$0xff] }
 0x1e1   :  { %v7713_v31 = vcombine.low %v1621_v63, %v1625_v56 }
 0x1e3   :  { %3349 = vmatpush2.bf16.msra.mxu0 %v7767_v6  ;;  %3402 = vmatpush2.bf16.msra.mxu1 %v7895_v7  ;;  %v7849_v6 = vcombine.low %v1757_v15, %v1761_v16  ;;  %v7714_v7 = vcombine.high %v1621_v63, %v1625_v56  ;;  %v1833_v63 = vld [vmem:[#allocation7 + $0xff8] sm:$0xff] }
 0x1e4   :  { %3350 = vmatprep.subr.bf16.mxu0 %v7760_v27  ;;  %3403 = vmatprep.subr.bf16.mxu1 %v7888_v41  ;;  %v7842_v27 = vcombine.high %v1749_v1, %v1753_v24  ;;  %v1613_v41 = vld [vmem:[#allocation7 + $0x918] sm:$0xff] }
 0x1e5   :  { %v7705_v43 = vcombine.low %v1613_v41, %v1617_v21 }
 0x1e7   :  { %3351 = vmatpush2.bf16.msra.mxu0 %v7759_v34  ;;  %3404 = vmatpush2.bf16.msra.mxu1 %v7887_v35  ;;  %v7841_v34 = vcombine.low %v1749_v1, %v1753_v24  ;;  %v7706_v35 = vcombine.high %v1613_v41, %v1617_v21  ;;  %v1825_v41 = vld [vmem:[#allocation7 + $0xfb8] sm:$0xff] }
 0x1e8   :  { %3352 = vmatprep.subr.bf16.mxu0 %v7752_v32  ;;  %3405 = vmatprep.subr.bf16.mxu1 %v7880_v36  ;;  %v7834_v32 = vcombine.high %v1741_v29, %v1745_v30  ;;  %v1605_v36 = vld [vmem:[#allocation7 + $0x8d8] sm:$0xff] }
 0x1e9   :  { %v7697_v44 = vcombine.low %v1605_v36, %v1609_v33 }
 0x1eb   :  { %3353 = vmatpush2.bf16.msra.mxu0 %v7751_v45  ;;  %3406 = vmatpush2.bf16.msra.mxu1 %v7879_v38  ;;  %v7833_v45 = vcombine.low %v1741_v29, %v1745_v30  ;;  %v7698_v38 = vcombine.high %v1605_v36, %v1609_v33  ;;  %v1817_v36 = vld [vmem:[#allocation7 + $0xf78] sm:$0xff] }
 0x1ec   :  { %3354 = vmatprep.subr.bf16.mxu0 %v7744_v39  ;;  %3407 = vmatprep.subr.bf16.mxu1 %v7872_v46  ;;  %v7826_v39 = vcombine.high %v1733_v37, %v1737_v42  ;;  %v1597_v46 = vld [vmem:[#allocation7 + $0x898] sm:$0xff] }
 0x1ed   :  { %v7689_v3 = vcombine.low %v1597_v46, %v1601_v0 }
 0x1ef   :  { %3355 = vmatpush2.bf16.msra.mxu0 %v7743_v47  ;;  %3408 = vmatpush2.bf16.msra.mxu1 %v7871_v48  ;;  %v7690_v47 = vcombine.high %v1597_v46, %v1601_v0  ;;  %v7818_v48 = vcombine.high %v1725_v49, %v1729_v50  ;;  %v1809_v46 = vld [vmem:[#allocation7 + $0xf38] sm:$0xff] }
 0x1f0   :  { %3356 = vmatprep.subr.bf16.mxu0 %v7736_v51  ;;  %3409 = vmatprep.subr.bf16.mxu1 %v7864_v55  ;;  %v1593_v51 = vld [vmem:[#allocation7 + $0x878] sm:$0xff] }
 0x1f1   :  { %v1717_v55 = vld [vmem:[#allocation7 + $0xc58] sm:$0xff] }
 0x1f2   :  { %v7809_v15 = vcombine.low %v1717_v55, %v1721_v2 }
 0x1f3   :  { %3357 = vmatpush2.bf16.msra.mxu0 %v7735_v8  ;;  %3410 = vmatpush2.bf16.msra.mxu1 %v7863_v59  ;;  %v7810_v8 = vcombine.high %v1717_v55, %v1721_v2  ;;  %v1581_v59 = vld [vmem:[#allocation7 + $0x818] sm:$0xff] }
 0x1f4   :  { %3432 = vmatprep.subr.bf16.mxu0 %v7730_v60  ;;  %3485 = vmatprep.subr.bf16.mxu1 %v7858_v62  ;;  %v1585_v60 = vld [vmem:[#allocation7 + $0x838] sm:$0xff] }
 0x1f5   :  { %v1709_v62 = vld [vmem:[#allocation7 + $0xc18] sm:$0xff]  ;;  %v7674_v16 = vcombine.high %v1581_v59, %v1585_v60  ;;  %v7673_v56 = vcombine.low %v1581_v59, %v1585_v60 }
 0x1f6   :  { %3359 = vmatmul.mubr.bf16.vlgmr.msra.gmra.mxu0 %v8927_v13  ;;  %3412 = vmatmul.mubr.bf16.vlgmr.msra.gmra.mxu1 %v8940_v23  ;;  %v7801_v1 = vcombine.low %v1709_v62, %v1713_v11  ;;  %v1793_v59 = vld [vmem:[#allocation7 + $0xeb8] sm:$0xff] }
 0x1f7   :  { %3368 = vmatprep.mubr.bf16.mxu0 %v8963_v52  ;;  %3421 = vmatprep.mubr.bf16.mxu1 %v8965_v54 }
 0x1f8   :  { %3433 = vmatpush1.bf16.msra.mxu0 %v7729_v19  ;;  %3486 = vmatpush1.bf16.msra.mxu1 %v7857_v25  ;;  %v7802_v19 = vcombine.high %v1709_v62, %v1713_v11  ;;  %v1701_v25 = vld [vmem:[#allocation7 + $0xbd8] sm:$0xff] }
 0x1f9   :  { %3434 = vmatprep.subr.bf16.mxu0 %v7722_v4  ;;  %3487 = vmatprep.subr.bf16.mxu1 %v7850_v40  ;;  %v1705_v4 = vld [vmem:[#allocation7 + $0xbf8] sm:$0xff] }
 0x1fa   :  { %v1829_v40 = vld [vmem:[#allocation7 + $0xfd8] sm:$0xff]  ;;  %v7794_v24 = vcombine.high %v1701_v25, %v1705_v4  ;;  %v7793_v21 = vcombine.low %v1701_v25, %v1705_v4 }
 0x1fb   :  { %v7921_v29 = vcombine.low %v1829_v40, %v1833_v63  ;;  %v1785_v25 = vld [vmem:[#allocation7 + $0xe78] sm:$0xff] }
 0x1fc   :  { %3435 = vmatpush1.bf16.msra.mxu0 %v7721_v26  ;;  %3488 = vmatpush1.bf16.msra.mxu1 %v7849_v6  ;;  %v7922_v26 = vcombine.high %v1829_v40, %v1833_v63  ;;  %v1693_v6 = vld [vmem:[#allocation7 + $0xb98] sm:$0xff] }
 0x1fd   :  { %3436 = vmatprep.subr.bf16.mxu0 %v7714_v7  ;;  %3489 = vmatprep.subr.bf16.mxu1 %v7842_v27  ;;  %v1697_v7 = vld [vmem:[#allocation7 + $0xbb8] sm:$0xff] }
 0x1fe   :  { %3369 = vmatmul.mubr.bf16.gmra.mxu0 %v8970_v5  ;;  %3422 = vmatmul.mubr.bf16.gmra.mxu1 %v8975_v9  ;;  %v1821_v27 = vld [vmem:[#allocation7 + $0xf98] sm:$0xff]  ;;  %v7786_v30 = vcombine.high %v1693_v6, %v1697_v7  ;;  %v7785_v33 = vcombine.low %v1693_v6, %v1697_v7 }
 0x1ff   :  { %3464 = vmatprep.mubr.bf16.mxu0 %v8922_v61  ;;  %3517 = vmatprep.mubr.bf16.mxu1 %v8924_v10  ;;  %v7825_v61 = vcombine.low %v1733_v37, %v1737_v42  ;;  %v1589_v10 = vld [vmem:[#allocation7 + $0x858] sm:$0xff]  ;;  %v7913_v37 = vcombine.low %v1821_v27, %v1825_v41 }
 0x200   :  { %3437 = vmatpush1.bf16.msra.mxu0 %v7713_v31  ;;  %3490 = vmatpush1.bf16.msra.mxu1 %v7841_v34  ;;  %v7682_v58 = vcombine.high %v1589_v10, %v1593_v51  ;;  %v7681_v12 = vcombine.low %v1589_v10, %v1593_v51  ;;  %v7914_v31 = vcombine.high %v1821_v27, %v1825_v41  ;;  %v1685_v34 = vld [vmem:[#allocation7 + $0xb58] sm:$0xff] }
 0x201   :  { %3438 = vmatprep.subr.bf16.mxu0 %v7706_v35  ;;  %3491 = vmatprep.subr.bf16.mxu1 %v7834_v32  ;;  %v1689_v35 = vld [vmem:[#allocation7 + $0xb78] sm:$0xff] }
 0x202   :  { %v1813_v32 = vld [vmem:[#allocation7 + $0xf58] sm:$0xff]  ;;  %v7778_v42 = vcombine.high %v1685_v34, %v1689_v35  ;;  %v7777_v0 = vcombine.low %v1685_v34, %v1689_v35  ;;  %v1404_v34 = vld [vmem:[#allocation7 + $0x5e0] sm:$0xff] }
 0x203   :  { %v7905_v49 = vcombine.low %v1813_v32, %v1817_v36  ;;  %v1801_v10 = vld [vmem:[#allocation7 + $0xef8] sm:$0xff] }
 0x204   :  { %3439 = vmatpush1.bf16.msra.mxu0 %v7705_v43  ;;  %3492 = vmatpush1.bf16.msra.mxu1 %v7833_v45  ;;  %v7906_v43 = vcombine.high %v1813_v32, %v1817_v36  ;;  %v1677_v45 = vld [vmem:[#allocation7 + $0xb18] sm:$0xff] }
 0x205   :  { %3440 = vmatprep.subr.bf16.mxu0 %v7698_v38  ;;  %3493 = vmatprep.subr.bf16.mxu1 %v7826_v39  ;;  %v1681_v38 = vld [vmem:[#allocation7 + $0xb38] sm:$0xff] }
 0x206   :  { %v1805_v39 = vld [vmem:[#allocation7 + $0xf18] sm:$0xff]  ;;  %v7770_v50 = vcombine.high %v1677_v45, %v1681_v38  ;;  %v7769_v51 = vcombine.low %v1677_v45, %v1681_v38  ;;  %v1392_v45 = vld [vmem:[#allocation7 + $0x580] sm:$0xff] }
 0x207   :  { %v7897_v55 = vcombine.low %v1805_v39, %v1809_v46  ;;  %v1777_v6 = vld [vmem:[#allocation7 + $0xe38] sm:$0xff]  ;;  %v1396_v38 = vld [vmem:[#allocation7 + $0x5a0] sm:$0xff] }
 0x208   :  { %3441 = vmatpush1.bf16.msra.mxu0 %v7697_v44  ;;  %3494 = vmatpush1.bf16.msra.mxu1 %v7825_v61  ;;  %v7898_v44 = vcombine.high %v1805_v39, %v1809_v46  ;;  %v1669_v61 = vld [vmem:[#allocation7 + $0xad8] sm:$0xff] }
 0x209   :  { %3442 = vmatprep.subr.bf16.mxu0 %v7690_v47  ;;  %3495 = vmatprep.subr.bf16.mxu1 %v7818_v48  ;;  %v1673_v47 = vld [vmem:[#allocation7 + $0xaf8] sm:$0xff] }
 0x20a   :  { %v1797_v48 = vld [vmem:[#allocation7 + $0xed8] sm:$0xff]  ;;  %v7762_v2 = vcombine.high %v1669_v61, %v1673_v47  ;;  %v7761_v60 = vcombine.low %v1669_v61, %v1673_v47  ;;  %v8100_v61 = vcombine.high %v1392_v45, %v1396_v38  ;;  %v1256_v47 = vld [vmem:[#allocation7 + $0x140] sm:$0xff] }
 0x20b   :  { %v7889_v62 = vcombine.low %v1797_v48, %v1801_v10 }
 0x20c   :  { %3443 = vmatpush1.bf16.msra.mxu0 %v7689_v3  ;;  %3496 = vmatpush1.bf16.msra.mxu1 %v7817_v57  ;;  %v7890_v3 = vcombine.high %v1797_v48, %v1801_v10  ;;  %v1661_v57 = vld [vmem:[#allocation7 + $0xa98] sm:$0xff]  ;;  %v1260_v48 = vld [vmem:[#allocation7 + $0x160] sm:$0xff] }
 0x20d   :  { %3444 = vmatprep.subr.bf16.mxu0 %v7682_v58  ;;  %3497 = vmatprep.subr.bf16.mxu1 %v7810_v8  ;;  %v1665_v58 = vld [vmem:[#allocation7 + $0xab8] sm:$0xff] }
 0x20e   :  { %v1789_v8 = vld [vmem:[#allocation7 + $0xe98] sm:$0xff]  ;;  %v7754_v11 = vcombine.high %v1661_v57, %v1665_v58  ;;  %v7753_v4 = vcombine.low %v1661_v57, %v1665_v58 }
 0x20f   :  { %v7881_v40 = vcombine.low %v1789_v8, %v1793_v59 }
 0x210   :  { %3445 = vmatpush1.bf16.msra.mxu0 %v7681_v12  ;;  %3498 = vmatpush1.bf16.msra.mxu1 %v7809_v15  ;;  %v7882_v12 = vcombine.high %v1789_v8, %v1793_v59  ;;  %v1653_v15 = vld [vmem:[#allocation7 + $0xa58] sm:$0xff]  ;;  %v7964_v59 = vcombine.high %v1256_v47, %v1260_v48 }
 0x211   :  { %3446 = vmatprep.subr.bf16.mxu0 %v7674_v16  ;;  %3499 = vmatprep.subr.bf16.mxu1 %v7802_v19  ;;  %v1657_v16 = vld [vmem:[#allocation7 + $0xa78] sm:$0xff] }
 0x212   :  { %v1781_v19 = vld [vmem:[#allocation7 + $0xe58] sm:$0xff]  ;;  %v7746_v63 = vcombine.high %v1653_v15, %v1657_v16  ;;  %v7745_v7 = vcombine.low %v1653_v15, %v1657_v16  ;;  %v1380_v16 = vld [vmem:[#allocation7 + $0x520] sm:$0xff] }
 0x213   :  { %v7873_v27 = vcombine.low %v1781_v19, %v1785_v25  ;;  %v1195_v15 = vld [vmem:[#allocation2 + $0x18] sm:$0xff] }
 0x214   :  { %3447 = vmatpush1.bf16.msra.mxu0 %v7673_v56  ;;  %3500 = vmatpush1.bf16.msra.mxu1 %v7801_v1  ;;  %v7874_v56 = vcombine.high %v1781_v19, %v1785_v25  ;;  %v1645_v1 = vld [vmem:[#allocation7 + $0xa18] sm:$0xff]  ;;  %v7963_v25 = vcombine.low %v1256_v47, %v1260_v48 }
 0x215   :  { %3448 = vmatprep.subr.bf16.mxu0 %v7794_v24  ;;  %3501 = vmatprep.subr.bf16.mxu1 %v7922_v26  ;;  %v1649_v24 = vld [vmem:[#allocation7 + $0xa38] sm:$0xff] }
 0x216   :  { %v1773_v26 = vld [vmem:[#allocation7 + $0xe18] sm:$0xff]  ;;  %v7738_v41 = vcombine.high %v1645_v1, %v1649_v24  ;;  %v7737_v35 = vcombine.low %v1645_v1, %v1649_v24 }
 0x217   :  { %v7865_v32 = vcombine.low %v1773_v26, %v1777_v6 }
 0x218   :  { %3449 = vmatpush2.bf16.msra.mxu0 %v7793_v21  ;;  %3502 = vmatpush2.bf16.msra.mxu1 %v7921_v29  ;;  %v7866_v21 = vcombine.high %v1773_v26, %v1777_v6  ;;  %v1272_v29 = vld [vmem:[#allocation7 + $0x1c0] sm:$0xff]  ;;  %v8628_v6 = vld [vmem:[#allocation2 + $0x38] sm:$0xff] }
 0x219   :  { %3450 = vmatprep.subr.bf16.mxu0 %v7786_v30  ;;  %3503 = vmatprep.subr.bf16.mxu1 %v7914_v31  ;;  %v1276_v30 = vld [vmem:[#allocation7 + $0x1e0] sm:$0xff] }
 0x21a   :  { %v1400_v31 = vld [vmem:[#allocation7 + $0x5c0] sm:$0xff]  ;;  %v7980_v36 = vcombine.high %v1272_v29, %v1276_v30  ;;  %v7979_v39 = vcombine.low %v1272_v29, %v1276_v30 }
 0x21b   :  { %v8107_v46 = vcombine.low %v1400_v31, %v1404_v34  ;;  %v1244_v29 = vld [vmem:[#allocation7 + $0xe0] sm:$0xff] }
 0x21c   :  { %3451 = vmatpush2.bf16.msra.mxu0 %v7785_v33  ;;  %3504 = vmatpush2.bf16.msra.mxu1 %v7913_v37  ;;  %v8108_v33 = vcombine.high %v1400_v31, %v1404_v34  ;;  %v1264_v37 = vld [vmem:[#allocation7 + $0x180] sm:$0xff] }
 0x21d   :  { %3452 = vmatprep.subr.bf16.mxu0 %v7778_v42  ;;  %3505 = vmatprep.subr.bf16.mxu1 %v7906_v43  ;;  %v1268_v42 = vld [vmem:[#allocation7 + $0x1a0] sm:$0xff] }
 0x21e   :  { %v7971_v57 = vcombine.low %v1264_v37, %v1268_v42  ;;  %v1368_v31 = vld [vmem:[#allocation7 + $0x4c0] sm:$0xff] }
 0x21f   :  { %v1372_v34 = vld [vmem:[#allocation7 + $0x4e0] sm:$0xff] }
 0x220   :  { %3453 = vmatpush2.bf16.msra.mxu0 %v7777_v0  ;;  %3506 = vmatpush2.bf16.msra.mxu1 %v7905_v49 }
 0x221   :  { %3454 = vmatprep.subr.bf16.mxu0 %v7770_v50  ;;  %3507 = vmatprep.subr.bf16.mxu1 %v7898_v44  ;;  %v7972_v50 = vcombine.high %v1264_v37, %v1268_v42 }
 0x224   :  { %3455 = vmatpush2.bf16.msra.mxu0 %v7769_v51  ;;  %3508 = vmatpush2.bf16.msra.mxu1 %v7897_v55  ;;  %v1384_v55 = vld [vmem:[#allocation7 + $0x540] sm:$0xff] }
 0x225   :  { %3456 = vmatprep.subr.bf16.mxu0 %v7762_v2  ;;  %3509 = vmatprep.subr.bf16.mxu1 %v7890_v3  ;;  %v1388_v2 = vld [vmem:[#allocation7 + $0x560] sm:$0xff] }
 0x228   :  { %3457 = vmatpush2.bf16.msra.mxu0 %v7761_v60  ;;  %3510 = vmatpush2.bf16.msra.mxu1 %v7889_v62  ;;  %v1193_v60 = vld [vmem:[#allocation2 + $0x8] sm:$0xff] }
 0x229   :  { %3458 = vmatprep.subr.bf16.mxu0 %v7754_v11  ;;  %3511 = vmatprep.subr.bf16.mxu1 %v7882_v12  ;;  %v1248_v62 = vld [vmem:[#allocation7 + $0x100] sm:$0xff] }
 0x22a   :  { %v1252_v11 = vld [vmem:[#allocation7 + $0x120] sm:$0xff] }
 0x22b   :  { %v7956_v24 = vcombine.high %v1248_v62, %v1252_v11 }
 0x22c   :  { %3459 = vmatpush2.bf16.msra.mxu0 %v7753_v4  ;;  %3512 = vmatpush2.bf16.msra.mxu1 %v7881_v40  ;;  %v8091_v40 = vcombine.low %v1384_v55, %v1388_v2 }
 0x22d   :  { %3460 = vmatprep.subr.bf16.mxu0 %v7746_v63  ;;  %3513 = vmatprep.subr.bf16.mxu1 %v7874_v56  ;;  %v8627_v56 = vld [vmem:[#allocation2 + $0x28] sm:$0xff] }
 0x22e   :  { %v9019_v1 = vpack.c.bf16 %v8627_v56, %v1193_v60  ;;  %v1344_v60 = vld [vmem:[#allocation7 + $0x400] sm:$0xff] }
 0x230   :  { %3461 = vmatpush2.bf16.msra.mxu0 %v7745_v7  ;;  %3514 = vmatpush2.bf16.msra.mxu1 %v7873_v27  ;;  %v9024_v7 = vpack.c.bf16 %v8628_v6, %v1195_v15 }
 0x231   :  { %3462 = vmatprep.subr.bf16.mxu0 %v7738_v41  ;;  %3515 = vmatprep.subr.bf16.mxu1 %v7866_v21  ;;  %v1240_v21 = vld [vmem:[#allocation7 + $0xc0] sm:$0xff] }
 0x232   :  { %v7948_v37 = vcombine.high %v1240_v21, %v1244_v29 }
 0x234   :  { %3463 = vmatpush2.bf16.msra.mxu0 %v7737_v35  ;;  %v3148_v43 = vpop.f32.mrf.mxu0  ;;  %3516 = vmatpush2.bf16.msra.mxu1 %v7865_v32  ;;  %v7955_v35 = vcombine.low %v1248_v62, %v1252_v11  ;;  %v1348_v62 = vld [vmem:[#allocation7 + $0x420] sm:$0xff] }
 0x235   :  { %4818 = vmatprep.subr.bf16.mxu0 %v7980_v36  ;;  %4871 = vmatprep.subr.bf16.mxu1 %v8108_v33  ;;  %v3201_v0 = vpop.f32.mrf.mxu1  ;;  %v8051_v56 = vcombine.low %v1344_v60, %v1348_v62 }
 0x236   :  { %v3150_v49 = vpop.f32.mrf.mxu0  ;;  %v9008_v44 = vadd.f32 %v3201_v0, %v3148_v43  ;;  %v8076_v43 = vcombine.high %v1368_v31, %v1372_v34  ;;  %v1364_v0 = vld [vmem:[#allocation7 + $0x4a0] sm:$0xff] }
 0x237   :  { %3465 = vmatmul.mubr.bf16.vlgmr.msra.gmra.mxu0 %v8927_v13  ;;  %3518 = vmatmul.mubr.bf16.vlgmr.msra.gmra.mxu1 %v8940_v23  ;;  %v3203_v10 = vpop.f32.mrf.mxu1  ;;  %v8099_v13 = vcombine.low %v1392_v45, %v1396_v38  ;;  %v1232_v45 = vld [vmem:[#allocation7 + $0x80] sm:$0xff] }
 0x238   :  { %3474 = vmatprep.mubr.bf16.mxu0 %v8963_v52  ;;  %v3152_v51 = vpop.f32.mrf.mxu0  ;;  %3527 = vmatprep.mubr.bf16.mxu1 %v8965_v54  ;;  %v9013_v3 = vadd.f32 %v3203_v10, %v3150_v49  ;;  %v8092_v52 = vcombine.high %v1384_v55, %v1388_v2  ;;  %v1376_v54 = vld [vmem:[#allocation7 + $0x500] sm:$0xff] }
 0x239   :  { %4819 = vmatpush1.bf16.msra.mxu0 %v7979_v39  ;;  %4872 = vmatpush1.bf16.msra.mxu1 %v8107_v46  ;;  %v3205_v58 = vpop.f32.mrf.mxu1  ;;  %v8084_v41 = vcombine.high %v1376_v54, %v1380_v16  ;;  %v8083_v36 = vcombine.low %v1376_v54, %v1380_v16  ;;  %v1236_v38 = vld [vmem:[#allocation7 + $0xa0] sm:$0xff]  ;;  %v8052_v54 = vcombine.high %v1344_v60, %v1348_v62 }
 0x23a   :  { %4820 = vmatprep.subr.bf16.mxu0 %v7972_v50  ;;  %v3154_v8 = vpop.f32.mrf.mxu0  ;;  %4873 = vmatprep.subr.bf16.mxu1 %v8100_v61  ;;  %v9015_v23 = vadd.f32 %v3205_v58, %v3152_v51  ;;  %v1360_v46 = vld [vmem:[#allocation7 + $0x480] sm:$0xff]  ;;  %v7947_v50 = vcombine.low %v1240_v21, %v1244_v29  ;;  %v8075_v61 = vcombine.low %v1368_v31, %v1372_v34 }
 0x23b   :  { %v3207_v12 = vpop.f32.mrf.mxu1  ;;  %v7940_v47 = vcombine.high %v1232_v45, %v1236_v38  ;;  %v8068_v48 = vcombine.high %v1360_v46, %v1364_v0  ;;  %v1224_v10 = vld [vmem:[#allocation7 + $0x40] sm:$0xff] }
 0x23c   :  { %v9017_v19 = vadd.f32 %v3207_v12, %v3154_v8  ;;  %v1228_v51 = vld [vmem:[#allocation7 + $0x60] sm:$0xff] }
 0x23d   :  { %4821 = vmatpush1.bf16.msra.mxu0 %v7971_v57  ;;  %v3158_v4 = vpop.f32.mrf.mxu0  ;;  %4874 = vmatpush1.bf16.msra.mxu1 %v8099_v13  ;;  %v3211_v63 = vpop.f32.mrf.mxu1  ;;  %v1352_v55 = vld [vmem:[#allocation7 + $0x440] sm:$0xff]  ;;  %v7939_v57 = vcombine.low %v1232_v45, %v1236_v38  ;;  %v8067_v13 = vcombine.low %v1360_v46, %v1364_v0  ;;  %v7932_v58 = vcombine.high %v1224_v10, %v1228_v51 }
 0x23e   :  { %4822 = vmatprep.subr.bf16.mxu0 %v7964_v59  ;;  %4875 = vmatprep.subr.bf16.mxu1 %v8092_v52  ;;  %v9022_v26 = vadd.f32 %v3211_v63, %v3158_v4  ;;  %v1356_v2 = vld [vmem:[#allocation7 + $0x460] sm:$0xff]  ;;  %v7931_v11 = vcombine.low %v1224_v10, %v1228_v51 }
 0x23f   :  { %3475 = vmatmul.mubr.bf16.gmra.mxu0 %v8970_v5  ;;  %v3160_v27 = vpop.f32.mrf.mxu0  ;;  %3528 = vmatmul.mubr.bf16.gmra.mxu1 %v8975_v9  ;;  %v3213_v30 = vpop.f32.mrf.mxu1  ;;  %v8060_v8 = vcombine.high %v1352_v55, %v1356_v2  ;;  %v1216_v59 = vld [vmem:[#allocation7] sm:$0xff]  ;;  %v8059_v12 = vcombine.low %v1352_v55, %v1356_v2 }
 0x240   :  { %4850 = vmatprep.mubr.bf16.mxu0 %v9019_v1  ;;  %4903 = vmatprep.mubr.bf16.mxu1 %v9024_v7  ;;  %v9029_v5 = vadd.f32 %v3213_v30, %v3160_v27  ;;  %v1220_v52 = vld [vmem:[#allocation7 + $0x20] sm:$0xff] }
 0x241   :  { %4823 = vmatpush1.bf16.msra.mxu0 %v7963_v25  ;;  %v3162_v32 = vpop.f32.mrf.mxu0  ;;  %4876 = vmatpush1.bf16.msra.mxu1 %v8091_v40  ;;  %v3215_v33 = vpop.f32.mrf.mxu1  ;;  %v7924_v15 = vcombine.high %v1216_v59, %v1220_v52  ;;  %v1336_v16 = vld [vmem:[#allocation7 + $0x3c0] sm:$0xff]  ;;  %v7923_v63 = vcombine.low %v1216_v59, %v1220_v52 }
 0x242   :  { %4824 = vmatprep.subr.bf16.mxu0 %v7956_v24  ;;  %4877 = vmatprep.subr.bf16.mxu1 %v8084_v41  ;;  %v9031_v42 = vadd.f32 %v3215_v33, %v3162_v32  ;;  %v1340_v25 = vld [vmem:[#allocation7 + $0x3e0] sm:$0xff] }
 0x243   :  { %v3164_v9 = vpop.f32.mrf.mxu0  ;;  %v3217_v39 = vpop.f32.mrf.mxu1  ;;  %v1464_v4 = vld [vmem:[#allocation7 + $0x7c0] sm:$0xff]  ;;  %v8044_v24 = vcombine.high %v1336_v16, %v1340_v25  ;;  %v8043_v30 = vcombine.low %v1336_v16, %v1340_v25 }
 0x244   :  { %v9033_v49 = vadd.f32 %v3217_v39, %v3164_v9  ;;  %v1468_v40 = vld [vmem:[#allocation7 + $0x7e0] sm:$0xff] }
 0x245   :  { %4825 = vmatpush1.bf16.msra.mxu0 %v7955_v35  ;;  %4878 = vmatpush1.bf16.msra.mxu1 %v8083_v36  ;;  %v8172_v6 = vcombine.high %v1464_v4, %v1468_v40  ;;  %v1328_v27 = vld [vmem:[#allocation7 + $0x380] sm:$0xff]  ;;  %v8171_v31 = vcombine.low %v1464_v4, %v1468_v40 }
 0x246   :  { %4826 = vmatprep.subr.bf16.mxu0 %v7948_v37  ;;  %4879 = vmatprep.subr.bf16.mxu1 %v8076_v43  ;;  %v1332_v41 = vld [vmem:[#allocation7 + $0x3a0] sm:$0xff] }
 0x247   :  { %v1456_v21 = vld [vmem:[#allocation7 + $0x780] sm:$0xff]  ;;  %v8036_v34 = vcombine.high %v1328_v27, %v1332_v41  ;;  %v8035_v9 = vcombine.low %v1328_v27, %v1332_v41 }
 0x248   :  { %v1460_v29 = vld [vmem:[#allocation7 + $0x7a0] sm:$0xff] }
 0x249   :  { %4827 = vmatpush1.bf16.msra.mxu0 %v7947_v50  ;;  %4880 = vmatpush1.bf16.msra.mxu1 %v8075_v61  ;;  %v8164_v35 = vcombine.high %v1456_v21, %v1460_v29  ;;  %v1320_v32 = vld [vmem:[#allocation7 + $0x340] sm:$0xff]  ;;  %v8163_v43 = vcombine.low %v1456_v21, %v1460_v29 }
 0x24a   :  { %4828 = vmatprep.subr.bf16.mxu0 %v7940_v47  ;;  %4881 = vmatprep.subr.bf16.mxu1 %v8068_v48  ;;  %v1324_v36 = vld [vmem:[#allocation7 + $0x360] sm:$0xff] }
 0x24b   :  { %v1448_v33 = vld [vmem:[#allocation7 + $0x740] sm:$0xff]  ;;  %v8028_v45 = vcombine.high %v1320_v32, %v1324_v36  ;;  %v8027_v61 = vcombine.low %v1320_v32, %v1324_v36  ;;  %v1273_v36 = vld [vmem:[#allocation7 + $0x1c8] sm:$0xff] }
 0x24c   :  { %v1452_v37 = vld [vmem:[#allocation7 + $0x760] sm:$0xff] }
 0x24d   :  { %4829 = vmatpush1.bf16.msra.mxu0 %v7939_v57  ;;  %4882 = vmatpush1.bf16.msra.mxu1 %v8067_v13  ;;  %v8156_v38 = vcombine.high %v1448_v33, %v1452_v37  ;;  %v1312_v39 = vld [vmem:[#allocation7 + $0x300] sm:$0xff]  ;;  %v8155_v47 = vcombine.low %v1448_v33, %v1452_v37  ;;  %v1277_v33 = vld [vmem:[#allocation7 + $0x1e8] sm:$0xff] }
 0x24e   :  { %4830 = vmatprep.subr.bf16.mxu0 %v7932_v58  ;;  %4883 = vmatprep.subr.bf16.mxu1 %v8060_v8  ;;  %v1316_v46 = vld [vmem:[#allocation7 + $0x320] sm:$0xff]  ;;  %v1401_v37 = vld [vmem:[#allocation7 + $0x5c8] sm:$0xff] }
 0x24f   :  { %v1440_v0 = vld [vmem:[#allocation7 + $0x700] sm:$0xff]  ;;  %v8020_v48 = vcombine.high %v1312_v39, %v1316_v46  ;;  %v8019_v13 = vcombine.low %v1312_v39, %v1316_v46  ;;  %v1194_v46 = vld [vmem:[#allocation2 + $0x10] sm:$0xff] }
 0x250   :  { %v1444_v50 = vld [vmem:[#allocation7 + $0x720] sm:$0xff] }
 0x251   :  { %4831 = vmatpush1.bf16.msra.mxu0 %v7931_v11  ;;  %4884 = vmatpush1.bf16.msra.mxu1 %v8059_v12  ;;  %v8148_v10 = vcombine.high %v1440_v0, %v1444_v50  ;;  %v1304_v51 = vld [vmem:[#allocation7 + $0x2c0] sm:$0xff]  ;;  %v8147_v58 = vcombine.low %v1440_v0, %v1444_v50 }
 0x252   :  { %4832 = vmatprep.subr.bf16.mxu0 %v7924_v15  ;;  %4885 = vmatprep.subr.bf16.mxu1 %v8052_v54  ;;  %v1308_v55 = vld [vmem:[#allocation7 + $0x2e0] sm:$0xff] }
 0x253   :  { %v1432_v2 = vld [vmem:[#allocation7 + $0x6c0] sm:$0xff]  ;;  %v8012_v8 = vcombine.high %v1304_v51, %v1308_v55  ;;  %v8011_v12 = vcombine.low %v1304_v51, %v1308_v55  ;;  %v1393_v51 = vld [vmem:[#allocation7 + $0x588] sm:$0xff] }
 0x254   :  { %v1436_v57 = vld [vmem:[#allocation7 + $0x6e0] sm:$0xff]  ;;  %v1397_v55 = vld [vmem:[#allocation7 + $0x5a8] sm:$0xff] }
 0x255   :  { %4833 = vmatpush1.bf16.msra.mxu0 %v7923_v63  ;;  %4886 = vmatpush1.bf16.msra.mxu1 %v8051_v56  ;;  %v8140_v59 = vcombine.high %v1432_v2, %v1436_v57  ;;  %v1296_v52 = vld [vmem:[#allocation7 + $0x280] sm:$0xff]  ;;  %v8139_v15 = vcombine.low %v1432_v2, %v1436_v57 }
 0x256   :  { %4834 = vmatprep.subr.bf16.mxu0 %v8044_v24  ;;  %4887 = vmatprep.subr.bf16.mxu1 %v8172_v6  ;;  %v1300_v60 = vld [vmem:[#allocation7 + $0x2a0] sm:$0xff] }
 0x257   :  { %v1424_v62 = vld [vmem:[#allocation7 + $0x680] sm:$0xff]  ;;  %v8004_v54 = vcombine.high %v1296_v52, %v1300_v60  ;;  %v8003_v56 = vcombine.low %v1296_v52, %v1300_v60 }
 0x258   :  { %v1428_v11 = vld [vmem:[#allocation7 + $0x6a0] sm:$0xff] }
 0x259   :  { %4835 = vmatpush2.bf16.msra.mxu0 %v8043_v30  ;;  %4888 = vmatpush2.bf16.msra.mxu1 %v8171_v31  ;;  %v8132_v16 = vcombine.high %v1424_v62, %v1428_v11  ;;  %v1288_v25 = vld [vmem:[#allocation7 + $0x240] sm:$0xff]  ;;  %v8131_v24 = vcombine.low %v1424_v62, %v1428_v11 }
 0x25a   :  { %4836 = vmatprep.subr.bf16.mxu0 %v8036_v34  ;;  %4889 = vmatprep.subr.bf16.mxu1 %v8164_v35  ;;  %v1292_v4 = vld [vmem:[#allocation7 + $0x260] sm:$0xff] }
 0x25b   :  { %v1416_v40 = vld [vmem:[#allocation7 + $0x640] sm:$0xff]  ;;  %v7996_v6 = vcombine.high %v1288_v25, %v1292_v4  ;;  %v7995_v31 = vcombine.low %v1288_v25, %v1292_v4  ;;  %v8102_v4 = vcombine.high %v1393_v51, %v1397_v55 }
 0x25c   :  { %v1420_v63 = vld [vmem:[#allocation7 + $0x660] sm:$0xff] }
 0x25d   :  { %4837 = vmatpush2.bf16.msra.mxu0 %v8035_v9  ;;  %4890 = vmatpush2.bf16.msra.mxu1 %v8163_v43  ;;  %v8124_v27 = vcombine.high %v1416_v40, %v1420_v63  ;;  %v1280_v41 = vld [vmem:[#allocation7 + $0x200] sm:$0xff]  ;;  %v8123_v34 = vcombine.low %v1416_v40, %v1420_v63  ;;  %v1405_v9 = vld [vmem:[#allocation7 + $0x5e8] sm:$0xff] }
 0x25e   :  { %4838 = vmatprep.subr.bf16.mxu0 %v8028_v45  ;;  %4891 = vmatprep.subr.bf16.mxu1 %v8156_v38  ;;  %v1284_v21 = vld [vmem:[#allocation7 + $0x220] sm:$0xff]  ;;  %v7982_v38 = vcombine.high %v1273_v36, %v1277_v33  ;;  %v8110_v0 = vcombine.high %v1401_v37, %v1405_v9  ;;  %v8109_v60 = vcombine.low %v1401_v37, %v1405_v9  ;;  %v1257_v40 = vld [vmem:[#allocation7 + $0x148] sm:$0xff] }
 0x25f   :  { %v1408_v29 = vld [vmem:[#allocation7 + $0x600] sm:$0xff]  ;;  %v7988_v35 = vcombine.high %v1280_v41, %v1284_v21  ;;  %v7987_v43 = vcombine.low %v1280_v41, %v1284_v21  ;;  %v1261_v63 = vld [vmem:[#allocation7 + $0x168] sm:$0xff] }
 0x260   :  { %v1412_v30 = vld [vmem:[#allocation7 + $0x620] sm:$0xff]  ;;  %v1249_v37 = vld [vmem:[#allocation7 + $0x108] sm:$0xff] }
 0x261   :  { %4839 = vmatpush2.bf16.msra.mxu0 %v8027_v61  ;;  %4892 = vmatpush2.bf16.msra.mxu1 %v8155_v47  ;;  %v8116_v32 = vcombine.high %v1408_v29, %v1412_v30  ;;  %v8115_v45 = vcombine.low %v1408_v29, %v1412_v30  ;;  %v1192_v39 = vld [vmem:[#allocation2] sm:$0xff]  ;;  %v1201_v50 = vld [vmem:[#allocation2 + $0x68] sm:$0xff]  ;;  %v8101_v30 = vcombine.low %v1393_v51, %v1397_v55 }
 0x262   :  { %4840 = vmatprep.subr.bf16.mxu0 %v8020_v48  ;;  %4893 = vmatprep.subr.bf16.mxu1 %v8148_v10  ;;  %v1265_v61 = vld [vmem:[#allocation7 + $0x188] sm:$0xff]  ;;  %v1203_v10 = vld [vmem:[#allocation2 + $0x78] sm:$0xff]  ;;  %v8629_v57 = vld [vmem:[#allocation2 + $0x20] sm:$0xff] }
 0x263   :  { %v1269_v47 = vld [vmem:[#allocation7 + $0x1a8] sm:$0xff] }
 0x264   :  { %v8631_v62 = vld [vmem:[#allocation2 + $0x88] sm:$0xff]  ;;  %v7973_v21 = vcombine.low %v1265_v61, %v1269_v47 }
 0x265   :  { %4841 = vmatpush2.bf16.msra.mxu0 %v8019_v13  ;;  %4894 = vmatpush2.bf16.msra.mxu1 %v8147_v58  ;;  %v9035_v13 = vpack.c.bf16 %v8629_v57, %v1192_v39  ;;  %v8630_v58 = vld [vmem:[#allocation2 + $0x30] sm:$0xff]  ;;  %v9041_v11 = vpack.c.bf16 %v8631_v62, %v1201_v50 }
 0x266   :  { %4842 = vmatprep.subr.bf16.mxu0 %v8012_v8  ;;  %4895 = vmatprep.subr.bf16.mxu1 %v8140_v59  ;;  %v9037_v8 = vpack.c.bf16 %v8630_v58, %v1194_v46  ;;  %v7981_v59 = vcombine.low %v1273_v36, %v1277_v33  ;;  %v1253_v9 = vld [vmem:[#allocation7 + $0x128] sm:$0xff] }
 0x267   :  { %v1381_v39 = vld [vmem:[#allocation7 + $0x528] sm:$0xff] }
 0x269   :  { %4843 = vmatpush2.bf16.msra.mxu0 %v8011_v12  ;;  %4896 = vmatpush2.bf16.msra.mxu1 %v8139_v15  ;;  %v7974_v15 = vcombine.high %v1265_v61, %v1269_v47  ;;  %v8634_v61 = vld [vmem:[#allocation2 + $0x90] sm:$0xff] }
 0x26a   :  { %4844 = vmatprep.subr.bf16.mxu0 %v8004_v54  ;;  %4897 = vmatprep.subr.bf16.mxu1 %v8132_v16  ;;  %v8632_v54 = vld [vmem:[#allocation2 + $0x98] sm:$0xff] }
 0x26b   :  { %v9044_v16 = vpack.c.bf16 %v8632_v54, %v1203_v10  ;;  %v1373_v54 = vld [vmem:[#allocation7 + $0x4e8] sm:$0xff] }
 0x26d   :  { %4845 = vmatpush2.bf16.msra.mxu0 %v8003_v56  ;;  %4898 = vmatpush2.bf16.msra.mxu1 %v8131_v24 }
 0x26e   :  { %4846 = vmatprep.subr.bf16.mxu0 %v7996_v6  ;;  %4899 = vmatprep.subr.bf16.mxu1 %v8124_v27  ;;  %v1385_v6 = vld [vmem:[#allocation7 + $0x548] sm:$0xff] }
 0x26f   :  { %v1389_v27 = vld [vmem:[#allocation7 + $0x568] sm:$0xff] }
 0x270   :  { %v8094_v33 = vcombine.high %v1385_v6, %v1389_v27  ;;  %v8093_v51 = vcombine.low %v1385_v6, %v1389_v27 }
 0x271   :  { %4847 = vmatpush2.bf16.msra.mxu0 %v7995_v31  ;;  %4900 = vmatpush2.bf16.msra.mxu1 %v8123_v34  ;;  %v1200_v34 = vld [vmem:[#allocation2 + $0x60] sm:$0xff] }
 0x272   :  { %4848 = vmatprep.subr.bf16.mxu0 %v7988_v35  ;;  %4901 = vmatprep.subr.bf16.mxu1 %v8116_v32  ;;  %v1202_v35 = vld [vmem:[#allocation2 + $0x70] sm:$0xff]  ;;  %v7966_v32 = vcombine.high %v1257_v40, %v1261_v63 }
 0x273   :  { %v9057_v47 = vpack.c.bf16 %v8634_v61, %v1202_v35  ;;  %v1365_v35 = vld [vmem:[#allocation7 + $0x4a8] sm:$0xff] }
 0x275   :  { %4849 = vmatpush2.bf16.msra.mxu0 %v7987_v43  ;;  %v3254_v48 = vpop.f32.mrf.mxu0  ;;  %4902 = vmatpush2.bf16.msra.mxu1 %v8115_v45  ;;  %v3307_v2 = vpop.f32.mrf.mxu1 }
 0x276   :  { %4924 = vmatprep.subr.bf16.mxu0 %v7982_v38  ;;  %v9039_v52 = vadd.f32 %v3307_v2, %v3254_v48  ;;  %4977 = vmatprep.subr.bf16.mxu1 %v8110_v0  ;;  %v1377_v38 = vld [vmem:[#allocation7 + $0x508] sm:$0xff]  ;;  %v8633_v0 = vld [vmem:[#allocation2 + $0x80] sm:$0xff]  ;;  %v7965_v48 = vcombine.low %v1257_v40, %v1261_v63  ;;  %v7958_v2 = vcombine.high %v1249_v37, %v1253_v9 }
 0x277   :  { %v3256_v12 = vpop.f32.mrf.mxu0  ;;  %v3309_v25 = vpop.f32.mrf.mxu1  ;;  %v9055_v50 = vpack.c.bf16 %v8633_v0, %v1200_v34  ;;  %v8086_v58 = vcombine.high %v1377_v38, %v1381_v39  ;;  %v8085_v63 = vcombine.low %v1377_v38, %v1381_v39  ;;  %v1361_v34 = vld [vmem:[#allocation7 + $0x488] sm:$0xff] }
 0x278   :  { %4851 = vmatmul.mubr.bf16.vlgmr.msra.gmra.mxu0 %v9035_v13  ;;  %4904 = vmatmul.mubr.bf16.vlgmr.msra.gmra.mxu1 %v9037_v8  ;;  %v9048_v56 = vadd.f32 %v3309_v25, %v3256_v12  ;;  %v1353_v38 = vld [vmem:[#allocation7 + $0x448] sm:$0xff]  ;;  %v8069_v0 = vcombine.low %v1361_v34, %v1365_v35 }
 0x279   :  { %4860 = vmatprep.mubr.bf16.mxu0 %v9041_v11  ;;  %v3258_v24 = vpop.f32.mrf.mxu0  ;;  %4913 = vmatprep.mubr.bf16.mxu1 %v9044_v16  ;;  %v3311_v41 = vpop.f32.mrf.mxu1  ;;  %v1357_v39 = vld [vmem:[#allocation7 + $0x468] sm:$0xff] }
 0x27a   :  { %4925 = vmatpush1.bf16.msra.mxu0 %v7981_v59  ;;  %4978 = vmatpush1.bf16.msra.mxu1 %v8109_v60  ;;  %v9051_v29 = vadd.f32 %v3311_v41, %v3258_v24  ;;  %v1241_v59 = vld [vmem:[#allocation7 + $0xc8] sm:$0xff] }
 0x27b   :  { %4926 = vmatprep.subr.bf16.mxu0 %v7974_v15  ;;  %v3260_v31 = vpop.f32.mrf.mxu0  ;;  %4979 = vmatprep.subr.bf16.mxu1 %v8102_v4  ;;  %v3313_v36 = vpop.f32.mrf.mxu1  ;;  %v1245_v60 = vld [vmem:[#allocation7 + $0xe8] sm:$0xff]  ;;  %v7957_v4 = vcombine.low %v1249_v37, %v1253_v9  ;;  %v8070_v37 = vcombine.high %v1361_v34, %v1365_v35 }
 0x27c   :  { %v9053_v43 = vadd.f32 %v3313_v36, %v3260_v31  ;;  %v1369_v15 = vld [vmem:[#allocation7 + $0x4c8] sm:$0xff]  ;;  %v7950_v6 = vcombine.high %v1241_v59, %v1245_v60 }
 0x27d   :  { %v3264_v45 = vpop.f32.mrf.mxu0  ;;  %v3317_v46 = vpop.f32.mrf.mxu1  ;;  %v8078_v41 = vcombine.high %v1369_v15, %v1373_v54  ;;  %v8077_v36 = vcombine.low %v1369_v15, %v1373_v54  ;;  %v1225_v9 = vld [vmem:[#allocation7 + $0x48] sm:$0xff] }
 0x27e   :  { %4927 = vmatpush1.bf16.msra.mxu0 %v7973_v21  ;;  %4980 = vmatpush1.bf16.msra.mxu1 %v8101_v30  ;;  %v9059_v10 = vadd.f32 %v3317_v46, %v3264_v45  ;;  %v1233_v21 = vld [vmem:[#allocation7 + $0x88] sm:$0xff] }
 0x27f   :  { %4928 = vmatprep.subr.bf16.mxu0 %v7966_v32  ;;  %v3266_v55 = vpop.f32.mrf.mxu0  ;;  %4981 = vmatprep.subr.bf16.mxu1 %v8094_v33  ;;  %v3319_v57 = vpop.f32.mrf.mxu1  ;;  %v1237_v30 = vld [vmem:[#allocation7 + $0xa8] sm:$0xff]  ;;  %v7949_v32 = vcombine.low %v1241_v59, %v1245_v60  ;;  %v8061_v59 = vcombine.low %v1353_v38, %v1357_v39 }
 0x280   :  { %4861 = vmatmul.mubr.bf16.gmra.mxu0 %v9055_v50  ;;  %4914 = vmatmul.mubr.bf16.gmra.mxu1 %v9057_v47  ;;  %v9064_v62 = vadd.f32 %v3319_v57, %v3266_v55  ;;  %v7942_v33 = vcombine.high %v1233_v21, %v1237_v30  ;;  %v1229_v45 = vld [vmem:[#allocation7 + $0x68] sm:$0xff]  ;;  %v7941_v46 = vcombine.low %v1233_v21, %v1237_v30 }
 0x281   :  { %4956 = vmatprep.mubr.bf16.mxu0 %v9019_v1  ;;  %v3268_v12 = vpop.f32.mrf.mxu0  ;;  %5009 = vmatprep.mubr.bf16.mxu1 %v9024_v7  ;;  %v3321_v25 = vpop.f32.mrf.mxu1  ;;  %v7934_v61 = vcombine.high %v1225_v9, %v1229_v45  ;;  %v1221_v55 = vld [vmem:[#allocation7 + $0x28] sm:$0xff] }
 0x282   :  { %4929 = vmatpush1.bf16.msra.mxu0 %v7965_v48  ;;  %4982 = vmatpush1.bf16.msra.mxu1 %v8093_v51  ;;  %v9067_v40 = vadd.f32 %v3321_v25, %v3268_v12  ;;  %v8062_v48 = vcombine.high %v1353_v38, %v1357_v39  ;;  %v1217_v51 = vld [vmem:[#allocation7 + $0x8] sm:$0xff] }
 0x283   :  { %4930 = vmatprep.subr.bf16.mxu0 %v7958_v2  ;;  %v3270_v24 = vpop.f32.mrf.mxu0  ;;  %4983 = vmatprep.subr.bf16.mxu1 %v8086_v58  ;;  %v3323_v27 = vpop.f32.mrf.mxu1  ;;  %v1345_v2 = vld [vmem:[#allocation7 + $0x408] sm:$0xff]  ;;  %v7933_v58 = vcombine.low %v1225_v9, %v1229_v45  ;;  %v7926_v60 = vcombine.high %v1217_v51, %v1221_v55 }
 0x284   :  { %v9069_v31 = vadd.f32 %v3323_v27, %v3270_v24  ;;  %v1349_v57 = vld [vmem:[#allocation7 + $0x428] sm:$0xff] }
 0x285   :  { %v8054_v12 = vcombine.high %v1345_v2, %v1349_v57  ;;  %v1337_v15 = vld [vmem:[#allocation7 + $0x3c8] sm:$0xff]  ;;  %v8053_v24 = vcombine.low %v1345_v2, %v1349_v57 }
 0x286   :  { %4931 = vmatpush1.bf16.msra.mxu0 %v7957_v4  ;;  %4984 = vmatpush1.bf16.msra.mxu1 %v8085_v63  ;;  %v1341_v54 = vld [vmem:[#allocation7 + $0x3e8] sm:$0xff]  ;;  %v7925_v63 = vcombine.low %v1217_v51, %v1221_v55 }
 0x287   :  { %4932 = vmatprep.subr.bf16.mxu0 %v7950_v6  ;;  %4985 = vmatprep.subr.bf16.mxu1 %v8078_v41  ;;  %v1465_v25 = vld [vmem:[#allocation7 + $0x7c8] sm:$0xff]  ;;  %v8046_v6 = vcombine.high %v1337_v15, %v1341_v54  ;;  %v8045_v35 = vcombine.low %v1337_v15, %v1341_v54 }
 0x288   :  { %v1469_v4 = vld [vmem:[#allocation7 + $0x7e8] sm:$0xff] }
 0x289   :  { %v8174_v27 = vcombine.high %v1465_v25, %v1469_v4  ;;  %v1329_v41 = vld [vmem:[#allocation7 + $0x388] sm:$0xff] }
 0x28a   :  { %4933 = vmatpush1.bf16.msra.mxu0 %v7949_v32  ;;  %4986 = vmatpush1.bf16.msra.mxu1 %v8077_v36  ;;  %v1333_v21 = vld [vmem:[#allocation7 + $0x3a8] sm:$0xff]  ;;  %v8173_v32 = vcombine.low %v1465_v25, %v1469_v4 }
 0x28b   :  { %4934 = vmatprep.subr.bf16.mxu0 %v7942_v33  ;;  %4987 = vmatprep.subr.bf16.mxu1 %v8070_v37  ;;  %v1457_v30 = vld [vmem:[#allocation7 + $0x788] sm:$0xff]  ;;  %v8038_v36 = vcombine.high %v1329_v41, %v1333_v21  ;;  %v8037_v39 = vcombine.low %v1329_v41, %v1333_v21 }
 0x28c   :  { %v1461_v34 = vld [vmem:[#allocation7 + $0x7a8] sm:$0xff] }
 0x28d   :  { %v8166_v33 = vcombine.high %v1457_v30, %v1461_v34  ;;  %v1321_v37 = vld [vmem:[#allocation7 + $0x348] sm:$0xff] }
 0x28e   :  { %4935 = vmatpush1.bf16.msra.mxu0 %v7941_v46  ;;  %4988 = vmatpush1.bf16.msra.mxu1 %v8069_v0  ;;  %v1325_v9 = vld [vmem:[#allocation7 + $0x368] sm:$0xff]  ;;  %v8165_v46 = vcombine.low %v1457_v30, %v1461_v34 }
 0x28f   :  { %4936 = vmatprep.subr.bf16.mxu0 %v7934_v61  ;;  %4989 = vmatprep.subr.bf16.mxu1 %v8062_v48  ;;  %v1449_v45 = vld [vmem:[#allocation7 + $0x748] sm:$0xff]  ;;  %v8030_v0 = vcombine.high %v1321_v37, %v1325_v9  ;;  %v8029_v57 = vcombine.low %v1321_v37, %v1325_v9 }
 0x290   :  { %v1453_v38 = vld [vmem:[#allocation7 + $0x768] sm:$0xff] }
 0x291   :  { %v8158_v61 = vcombine.high %v1449_v45, %v1453_v38  ;;  %v1313_v48 = vld [vmem:[#allocation7 + $0x308] sm:$0xff] }
 0x292   :  { %4937 = vmatpush1.bf16.msra.mxu0 %v7933_v58  ;;  %4990 = vmatpush1.bf16.msra.mxu1 %v8061_v59  ;;  %v1317_v51 = vld [vmem:[#allocation7 + $0x328] sm:$0xff]  ;;  %v8157_v58 = vcombine.low %v1449_v45, %v1453_v38 }
 0x293   :  { %4938 = vmatprep.subr.bf16.mxu0 %v7926_v60  ;;  %4991 = vmatprep.subr.bf16.mxu1 %v8054_v12  ;;  %v1441_v55 = vld [vmem:[#allocation7 + $0x708] sm:$0xff]  ;;  %v8022_v59 = vcombine.high %v1313_v48, %v1317_v51  ;;  %v8021_v4 = vcombine.low %v1313_v48, %v1317_v51 }
 0x294   :  { %v1445_v2 = vld [vmem:[#allocation7 + $0x728] sm:$0xff] }
 0x295   :  { %v8150_v60 = vcombine.high %v1441_v55, %v1445_v2  ;;  %v1305_v12 = vld [vmem:[#allocation7 + $0x2c8] sm:$0xff] }
 0x296   :  { %4939 = vmatpush1.bf16.msra.mxu0 %v7925_v63  ;;  %4992 = vmatpush1.bf16.msra.mxu1 %v8053_v24  ;;  %v1309_v15 = vld [vmem:[#allocation7 + $0x2e8] sm:$0xff]  ;;  %v8149_v63 = vcombine.low %v1441_v55, %v1445_v2 }
 0x297   :  { %4940 = vmatprep.subr.bf16.mxu0 %v8046_v6  ;;  %4993 = vmatprep.subr.bf16.mxu1 %v8174_v27  ;;  %v1433_v54 = vld [vmem:[#allocation7 + $0x6c8] sm:$0xff]  ;;  %v8014_v24 = vcombine.high %v1305_v12, %v1309_v15  ;;  %v8013_v34 = vcombine.low %v1305_v12, %v1309_v15  ;;  %v1278_v12 = vld [vmem:[#allocation7 + $0x1f0] sm:$0xff] }
 0x298   :  { %v1437_v25 = vld [vmem:[#allocation7 + $0x6e8] sm:$0xff]  ;;  %v1402_v15 = vld [vmem:[#allocation7 + $0x5d0] sm:$0xff] }
 0x299   :  { %v8142_v6 = vcombine.high %v1433_v54, %v1437_v25  ;;  %v1297_v27 = vld [vmem:[#allocation7 + $0x288] sm:$0xff] }
 0x29a   :  { %4941 = vmatpush2.bf16.msra.mxu0 %v8045_v35  ;;  %4994 = vmatpush2.bf16.msra.mxu1 %v8173_v32  ;;  %v1301_v41 = vld [vmem:[#allocation7 + $0x2a8] sm:$0xff]  ;;  %v8141_v35 = vcombine.low %v1433_v54, %v1437_v25  ;;  %v1406_v54 = vld [vmem:[#allocation7 + $0x5f0] sm:$0xff] }
 0x29b   :  { %4942 = vmatprep.subr.bf16.mxu0 %v8038_v36  ;;  %4995 = vmatprep.subr.bf16.mxu1 %v8166_v33  ;;  %v1425_v21 = vld [vmem:[#allocation7 + $0x688] sm:$0xff]  ;;  %v8006_v32 = vcombine.high %v1297_v27, %v1301_v41  ;;  %v8005_v38 = vcombine.low %v1297_v27, %v1301_v41  ;;  %v1270_v27 = vld [vmem:[#allocation7 + $0x1b0] sm:$0xff] }
 0x29c   :  { %v1429_v30 = vld [vmem:[#allocation7 + $0x6a8] sm:$0xff] }
 0x29d   :  { %v8134_v36 = vcombine.high %v1425_v21, %v1429_v30  ;;  %v1289_v33 = vld [vmem:[#allocation7 + $0x248] sm:$0xff] }
 0x29e   :  { %4943 = vmatpush2.bf16.msra.mxu0 %v8037_v39  ;;  %4996 = vmatpush2.bf16.msra.mxu1 %v8165_v46  ;;  %v1293_v37 = vld [vmem:[#allocation7 + $0x268] sm:$0xff]  ;;  %v8133_v39 = vcombine.low %v1425_v21, %v1429_v30  ;;  %v1394_v21 = vld [vmem:[#allocation7 + $0x590] sm:$0xff] }
 0x29f   :  { %4944 = vmatprep.subr.bf16.mxu0 %v8030_v0  ;;  %4997 = vmatprep.subr.bf16.mxu1 %v8158_v61  ;;  %v1417_v9 = vld [vmem:[#allocation7 + $0x648] sm:$0xff]  ;;  %v7998_v46 = vcombine.high %v1289_v33, %v1293_v37  ;;  %v7997_v2 = vcombine.low %v1289_v33, %v1293_v37  ;;  %v1398_v30 = vld [vmem:[#allocation7 + $0x5b0] sm:$0xff] }
 0x2a0   :  { %v1421_v45 = vld [vmem:[#allocation7 + $0x668] sm:$0xff] }
 0x2a1   :  { %v8126_v0 = vcombine.high %v1417_v9, %v1421_v45  ;;  %v1281_v61 = vld [vmem:[#allocation7 + $0x208] sm:$0xff] }
 0x2a2   :  { %4945 = vmatpush2.bf16.msra.mxu0 %v8029_v57  ;;  %4998 = vmatpush2.bf16.msra.mxu1 %v8157_v58  ;;  %v1285_v48 = vld [vmem:[#allocation7 + $0x228] sm:$0xff]  ;;  %v8125_v57 = vcombine.low %v1417_v9, %v1421_v45  ;;  %v8104_v45 = vcombine.high %v1394_v21, %v1398_v30 }
 0x2a3   :  { %4946 = vmatprep.subr.bf16.mxu0 %v8022_v59  ;;  %4999 = vmatprep.subr.bf16.mxu1 %v8150_v60  ;;  %v1409_v51 = vld [vmem:[#allocation7 + $0x608] sm:$0xff]  ;;  %v7990_v58 = vcombine.high %v1281_v61, %v1285_v48  ;;  %v1274_v60 = vld [vmem:[#allocation7 + $0x1d0] sm:$0xff]  ;;  %v7989_v25 = vcombine.low %v1281_v61, %v1285_v48 }
 0x2a4   :  { %v1413_v55 = vld [vmem:[#allocation7 + $0x628] sm:$0xff]  ;;  %v1386_v61 = vld [vmem:[#allocation7 + $0x550] sm:$0xff] }
 0x2a5   :  { %v8118_v59 = vcombine.high %v1409_v51, %v1413_v55  ;;  %v1390_v48 = vld [vmem:[#allocation7 + $0x570] sm:$0xff] }
 0x2a6   :  { %4947 = vmatpush2.bf16.msra.mxu0 %v8021_v4  ;;  %5000 = vmatpush2.bf16.msra.mxu1 %v8149_v63  ;;  %v8117_v4 = vcombine.low %v1409_v51, %v1413_v55  ;;  %v7984_v63 = vcombine.high %v1274_v60, %v1278_v12 }
 0x2a7   :  { %4948 = vmatprep.subr.bf16.mxu0 %v8014_v24  ;;  %5001 = vmatprep.subr.bf16.mxu1 %v8142_v6  ;;  %v8112_v24 = vcombine.high %v1402_v15, %v1406_v54  ;;  %v1266_v6 = vld [vmem:[#allocation7 + $0x190] sm:$0xff] }
 0x2a8   :  { %v7976_v37 = vcombine.high %v1266_v6, %v1270_v27  ;;  %v7975_v55 = vcombine.low %v1266_v6, %v1270_v27 }
 0x2aa   :  { %4949 = vmatpush2.bf16.msra.mxu0 %v8013_v34  ;;  %5002 = vmatpush2.bf16.msra.mxu1 %v8141_v35  ;;  %v7983_v35 = vcombine.low %v1274_v60, %v1278_v12  ;;  %v8096_v12 = vcombine.high %v1386_v61, %v1390_v48 }
 0x2ab   :  { %4950 = vmatprep.subr.bf16.mxu0 %v8006_v32  ;;  %5003 = vmatprep.subr.bf16.mxu1 %v8134_v36  ;;  %v8111_v36 = vcombine.low %v1402_v15, %v1406_v54  ;;  %v1250_v15 = vld [vmem:[#allocation7 + $0x110] sm:$0xff] }
 0x2ac   :  { %v1254_v54 = vld [vmem:[#allocation7 + $0x130] sm:$0xff] }
 0x2ae   :  { %4951 = vmatpush2.bf16.msra.mxu0 %v8005_v38  ;;  %5004 = vmatpush2.bf16.msra.mxu1 %v8133_v39  ;;  %v1258_v38 = vld [vmem:[#allocation7 + $0x150] sm:$0xff] }
 0x2af   :  { %4952 = vmatprep.subr.bf16.mxu0 %v7998_v46  ;;  %5005 = vmatprep.subr.bf16.mxu1 %v8126_v0  ;;  %v1262_v39 = vld [vmem:[#allocation7 + $0x170] sm:$0xff] }
 0x2b0   :  { %v7967_v6 = vcombine.low %v1258_v38, %v1262_v39 }
 0x2b2   :  { %4953 = vmatpush2.bf16.msra.mxu0 %v7997_v2  ;;  %5006 = vmatpush2.bf16.msra.mxu1 %v8125_v57  ;;  %v8103_v57 = vcombine.low %v1394_v21, %v1398_v30  ;;  %v8095_v21 = vcombine.low %v1386_v61, %v1390_v48  ;;  %v7959_v61 = vcombine.low %v1250_v15, %v1254_v54 }
 0x2b3   :  { %4954 = vmatprep.subr.bf16.mxu0 %v7990_v58  ;;  %5007 = vmatprep.subr.bf16.mxu1 %v8118_v59  ;;  %v7968_v59 = vcombine.high %v1258_v38, %v1262_v39  ;;  %v1370_v38 = vld [vmem:[#allocation7 + $0x4d0] sm:$0xff] }
 0x2b4   :  { %v1374_v39 = vld [vmem:[#allocation7 + $0x4f0] sm:$0xff] }
 0x2b6   :  { %4955 = vmatpush2.bf16.msra.mxu0 %v7989_v25  ;;  %v3360_v41 = vpop.f32.mrf.mxu0  ;;  %5008 = vmatpush2.bf16.msra.mxu1 %v8117_v4  ;;  %v3413_v34 = vpop.f32.mrf.mxu1 }
 0x2b7   :  { %5030 = vmatprep.subr.bf16.mxu0 %v7984_v63  ;;  %v9071_v32 = vadd.f32 %v3413_v34, %v3360_v41  ;;  %5083 = vmatprep.subr.bf16.mxu1 %v8112_v24  ;;  %v1378_v63 = vld [vmem:[#allocation7 + $0x510] sm:$0xff]  ;;  %v7960_v34 = vcombine.high %v1250_v15, %v1254_v54  ;;  %v8079_v15 = vcombine.low %v1370_v38, %v1374_v39 }
 0x2b8   :  { %v3362_v33 = vpop.f32.mrf.mxu0  ;;  %v3415_v9 = vpop.f32.mrf.mxu1  ;;  %v1382_v24 = vld [vmem:[#allocation7 + $0x530] sm:$0xff] }
 0x2b9   :  { %4957 = vmatmul.mubr.bf16.vlgmr.msra.gmra.mxu0 %v9035_v13  ;;  %5010 = vmatmul.mubr.bf16.vlgmr.msra.gmra.mxu1 %v9037_v8  ;;  %v9076_v46 = vadd.f32 %v3415_v9, %v3362_v33  ;;  %v1242_v33 = vld [vmem:[#allocation7 + $0xd0] sm:$0xff] }
 0x2ba   :  { %4966 = vmatprep.mubr.bf16.mxu0 %v9041_v11  ;;  %v3364_v0 = vpop.f32.mrf.mxu0  ;;  %5019 = vmatprep.mubr.bf16.mxu1 %v9044_v16  ;;  %v3417_v51 = vpop.f32.mrf.mxu1 }
 0x2bb   :  { %5031 = vmatpush1.bf16.msra.mxu0 %v7983_v35  ;;  %5084 = vmatpush1.bf16.msra.mxu1 %v8111_v36  ;;  %v9079_v2 = vadd.f32 %v3417_v51, %v3364_v0  ;;  %v8088_v36 = vcombine.high %v1378_v63, %v1382_v24  ;;  %v8087_v51 = vcombine.low %v1378_v63, %v1382_v24  ;;  %v1226_v63 = vld [vmem:[#allocation7 + $0x50] sm:$0xff] }
 0x2bc   :  { %5032 = vmatprep.subr.bf16.mxu0 %v7976_v37  ;;  %v3366_v58 = vpop.f32.mrf.mxu0  ;;  %5085 = vmatprep.subr.bf16.mxu1 %v8104_v45  ;;  %v3419_v60 = vpop.f32.mrf.mxu1  ;;  %v1246_v37 = vld [vmem:[#allocation7 + $0xf0] sm:$0xff] }
 0x2bd   :  { %v9081_v25 = vadd.f32 %v3419_v60, %v3366_v58  ;;  %v1234_v60 = vld [vmem:[#allocation7 + $0x90] sm:$0xff] }
 0x2be   :  { %v3370_v4 = vpop.f32.mrf.mxu0  ;;  %v3423_v41 = vpop.f32.mrf.mxu1  ;;  %v1230_v24 = vld [vmem:[#allocation7 + $0x70] sm:$0xff] }
 0x2bf   :  { %5033 = vmatpush1.bf16.msra.mxu0 %v7975_v55  ;;  %5086 = vmatpush1.bf16.msra.mxu1 %v8103_v57  ;;  %v9083_v27 = vadd.f32 %v3423_v41, %v3370_v4  ;;  %v7952_v57 = vcombine.high %v1242_v33, %v1246_v37  ;;  %v1362_v41 = vld [vmem:[#allocation7 + $0x490] sm:$0xff] }
 0x2c0   :  { %5034 = vmatprep.subr.bf16.mxu0 %v7968_v59  ;;  %v3372_v30 = vpop.f32.mrf.mxu0  ;;  %5087 = vmatprep.subr.bf16.mxu1 %v8096_v12  ;;  %v3425_v35 = vpop.f32.mrf.mxu1  ;;  %v8080_v59 = vcombine.high %v1370_v38, %v1374_v39  ;;  %v1238_v12 = vld [vmem:[#allocation7 + $0xb0] sm:$0xff]  ;;  %v7935_v38 = vcombine.low %v1226_v63, %v1230_v24 }
 0x2c1   :  { %4967 = vmatmul.mubr.bf16.gmra.mxu0 %v9055_v50  ;;  %5020 = vmatmul.mubr.bf16.gmra.mxu1 %v9057_v47  ;;  %v9088_v9 = vadd.f32 %v3425_v35, %v3372_v30  ;;  %v7951_v30 = vcombine.low %v1242_v33, %v1246_v37  ;;  %v7944_v54 = vcombine.high %v1234_v60, %v1238_v12  ;;  %v1358_v35 = vld [vmem:[#allocation7 + $0x470] sm:$0xff] }
 0x2c2   :  { %5062 = vmatprep.mubr.bf16.mxu0 %v9019_v1  ;;  %v3374_v45 = vpop.f32.mrf.mxu0  ;;  %5115 = vmatprep.mubr.bf16.mxu1 %v9024_v7  ;;  %v3427_v0 = vpop.f32.mrf.mxu1  ;;  %v1222_v33 = vld [vmem:[#allocation7 + $0x30] sm:$0xff] }
 0x2c3   :  { %5035 = vmatpush1.bf16.msra.mxu0 %v7967_v6  ;;  %5088 = vmatpush1.bf16.msra.mxu1 %v8095_v21  ;;  %v9091_v48 = vadd.f32 %v3427_v0, %v3374_v45  ;;  %v1366_v6 = vld [vmem:[#allocation7 + $0x4b0] sm:$0xff]  ;;  %v7936_v0 = vcombine.high %v1226_v63, %v1230_v24 }
 0x2c4   :  { %5036 = vmatprep.subr.bf16.mxu0 %v7960_v34  ;;  %v3376_v55 = vpop.f32.mrf.mxu0  ;;  %5089 = vmatprep.subr.bf16.mxu1 %v8088_v36  ;;  %v3429_v58 = vpop.f32.mrf.mxu1  ;;  %v8072_v21 = vcombine.high %v1362_v41, %v1366_v6  ;;  %v1354_v34 = vld [vmem:[#allocation7 + $0x450] sm:$0xff]  ;;  %v7943_v36 = vcombine.low %v1234_v60, %v1238_v12  ;;  %v8071_v45 = vcombine.low %v1362_v41, %v1366_v6 }
 0x2c5   :  { %v9093_v4 = vadd.f32 %v3429_v58, %v3376_v55  ;;  %v8064_v55 = vcombine.high %v1354_v34, %v1358_v35  ;;  %v1346_v37 = vld [vmem:[#allocation7 + $0x410] sm:$0xff]  ;;  %v8063_v39 = vcombine.low %v1354_v34, %v1358_v35 }
 0x2c6   :  { %v1342_v60 = vld [vmem:[#allocation7 + $0x3f0] sm:$0xff] }
 0x2c7   :  { %5037 = vmatpush1.bf16.msra.mxu0 %v7959_v61  ;;  %5090 = vmatpush1.bf16.msra.mxu1 %v8087_v51  ;;  %v1218_v61 = vld [vmem:[#allocation7 + $0x10] sm:$0xff] }
 0x2c8   :  { %5038 = vmatprep.subr.bf16.mxu0 %v7952_v57  ;;  %5091 = vmatprep.subr.bf16.mxu1 %v8080_v59  ;;  %v1350_v51 = vld [vmem:[#allocation7 + $0x430] sm:$0xff]  ;;  %v7928_v57 = vcombine.high %v1218_v61, %v1222_v33  ;;  %v7927_v41 = vcombine.low %v1218_v61, %v1222_v33 }
 0x2c9   :  { %v8056_v58 = vcombine.high %v1346_v37, %v1350_v51  ;;  %v1338_v59 = vld [vmem:[#allocation7 + $0x3d0] sm:$0xff]  ;;  %v8055_v6 = vcombine.low %v1346_v37, %v1350_v51 }
 0x2ca   :  { %v1466_v12 = vld [vmem:[#allocation7 + $0x7d0] sm:$0xff]  ;;  %v8047_v34 = vcombine.low %v1338_v59, %v1342_v60 }
 0x2cb   :  { %5039 = vmatpush1.bf16.msra.mxu0 %v7951_v30  ;;  %5092 = vmatpush1.bf16.msra.mxu1 %v8079_v15  ;;  %v1470_v30 = vld [vmem:[#allocation7 + $0x7f0] sm:$0xff]  ;;  %v8048_v15 = vcombine.high %v1338_v59, %v1342_v60 }
 0x2cc   :  { %5040 = vmatprep.subr.bf16.mxu0 %v7944_v54  ;;  %5093 = vmatprep.subr.bf16.mxu1 %v8072_v21  ;;  %v8176_v54 = vcombine.high %v1466_v12, %v1470_v30  ;;  %v1330_v21 = vld [vmem:[#allocation7 + $0x390] sm:$0xff]  ;;  %v8175_v35 = vcombine.low %v1466_v12, %v1470_v30 }
 0x2cd   :  { %v1334_v63 = vld [vmem:[#allocation7 + $0x3b0] sm:$0xff] }
 0x2ce   :  { %v1458_v24 = vld [vmem:[#allocation7 + $0x790] sm:$0xff]  ;;  %v8039_v37 = vcombine.low %v1330_v21, %v1334_v63 }
 0x2cf   :  { %5041 = vmatpush1.bf16.msra.mxu0 %v7943_v36  ;;  %5094 = vmatpush1.bf16.msra.mxu1 %v8071_v45  ;;  %v1462_v36 = vld [vmem:[#allocation7 + $0x7b0] sm:$0xff]  ;;  %v8040_v45 = vcombine.high %v1330_v21, %v1334_v63 }
 0x2d0   :  { %5042 = vmatprep.subr.bf16.mxu0 %v7936_v0  ;;  %5095 = vmatprep.subr.bf16.mxu1 %v8064_v55  ;;  %v8168_v0 = vcombine.high %v1458_v24, %v1462_v36  ;;  %v1322_v55 = vld [vmem:[#allocation7 + $0x350] sm:$0xff]  ;;  %v8167_v51 = vcombine.low %v1458_v24, %v1462_v36 }
 0x2d1   :  { %v1326_v61 = vld [vmem:[#allocation7 + $0x370] sm:$0xff] }
 0x2d2   :  { %v1450_v33 = vld [vmem:[#allocation7 + $0x750] sm:$0xff]  ;;  %v8031_v12 = vcombine.low %v1322_v55, %v1326_v61 }
 0x2d3   :  { %5043 = vmatpush1.bf16.msra.mxu0 %v7935_v38  ;;  %5096 = vmatpush1.bf16.msra.mxu1 %v8063_v39  ;;  %v1454_v38 = vld [vmem:[#allocation7 + $0x770] sm:$0xff]  ;;  %v8032_v39 = vcombine.high %v1322_v55, %v1326_v61 }
 0x2d4   :  { %5044 = vmatprep.subr.bf16.mxu0 %v7928_v57  ;;  %5097 = vmatprep.subr.bf16.mxu1 %v8056_v58  ;;  %v8160_v57 = vcombine.high %v1450_v33, %v1454_v38  ;;  %v1314_v58 = vld [vmem:[#allocation7 + $0x310] sm:$0xff]  ;;  %v8159_v30 = vcombine.low %v1450_v33, %v1454_v38 }
 0x2d5   :  { %v1318_v59 = vld [vmem:[#allocation7 + $0x330] sm:$0xff] }
 0x2d6   :  { %v1442_v60 = vld [vmem:[#allocation7 + $0x710] sm:$0xff]  ;;  %v8023_v24 = vcombine.low %v1314_v58, %v1318_v59 }
 0x2d7   :  { %5045 = vmatpush1.bf16.msra.mxu0 %v7927_v41  ;;  %5098 = vmatpush1.bf16.msra.mxu1 %v8055_v6  ;;  %v1446_v41 = vld [vmem:[#allocation7 + $0x730] sm:$0xff]  ;;  %v8024_v6 = vcombine.high %v1314_v58, %v1318_v59 }
 0x2d8   :  { %5046 = vmatprep.subr.bf16.mxu0 %v8048_v15  ;;  %5099 = vmatprep.subr.bf16.mxu1 %v8176_v54  ;;  %v8152_v15 = vcombine.high %v1442_v60, %v1446_v41  ;;  %v1306_v54 = vld [vmem:[#allocation7 + $0x2d0] sm:$0xff]  ;;  %v8151_v36 = vcombine.low %v1442_v60, %v1446_v41 }
 0x2d9   :  { %v1310_v21 = vld [vmem:[#allocation7 + $0x2f0] sm:$0xff] }
 0x2da   :  { %v1434_v63 = vld [vmem:[#allocation7 + $0x6d0] sm:$0xff]  ;;  %v8015_v33 = vcombine.low %v1306_v54, %v1310_v21 }
 0x2db   :  { %5047 = vmatpush2.bf16.msra.mxu0 %v8047_v34  ;;  %5100 = vmatpush2.bf16.msra.mxu1 %v8175_v35  ;;  %v1438_v34 = vld [vmem:[#allocation7 + $0x6f0] sm:$0xff]  ;;  %v8016_v35 = vcombine.high %v1306_v54, %v1310_v21 }
 0x2dc   :  { %5048 = vmatprep.subr.bf16.mxu0 %v8040_v45  ;;  %5101 = vmatprep.subr.bf16.mxu1 %v8168_v0  ;;  %v8144_v45 = vcombine.high %v1434_v63, %v1438_v34  ;;  %v1298_v0 = vld [vmem:[#allocation7 + $0x290] sm:$0xff]  ;;  %v8143_v38 = vcombine.low %v1434_v63, %v1438_v34 }
 0x2dd   :  { %v1302_v55 = vld [vmem:[#allocation7 + $0x2b0] sm:$0xff] }
 0x2de   :  { %v1426_v61 = vld [vmem:[#allocation7 + $0x690] sm:$0xff]  ;;  %v8007_v60 = vcombine.low %v1298_v0, %v1302_v55 }
 0x2df   :  { %5049 = vmatpush2.bf16.msra.mxu0 %v8039_v37  ;;  %5102 = vmatpush2.bf16.msra.mxu1 %v8167_v51  ;;  %v1430_v37 = vld [vmem:[#allocation7 + $0x6b0] sm:$0xff]  ;;  %v8008_v51 = vcombine.high %v1298_v0, %v1302_v55  ;;  %v1279_v0 = vld [vmem:[#allocation7 + $0x1f8] sm:$0xff] }
 0x2e0   :  { %5050 = vmatprep.subr.bf16.mxu0 %v8032_v39  ;;  %5103 = vmatprep.subr.bf16.mxu1 %v8160_v57  ;;  %v8136_v39 = vcombine.high %v1426_v61, %v1430_v37  ;;  %v1290_v57 = vld [vmem:[#allocation7 + $0x250] sm:$0xff]  ;;  %v8135_v41 = vcombine.low %v1426_v61, %v1430_v37  ;;  %v1403_v55 = vld [vmem:[#allocation7 + $0x5d8] sm:$0xff] }
 0x2e1   :  { %v1294_v58 = vld [vmem:[#allocation7 + $0x270] sm:$0xff] }
 0x2e2   :  { %v1418_v59 = vld [vmem:[#allocation7 + $0x650] sm:$0xff]  ;;  %v7999_v63 = vcombine.low %v1290_v57, %v1294_v58 }
 0x2e3   :  { %5051 = vmatpush2.bf16.msra.mxu0 %v8031_v12  ;;  %5104 = vmatpush2.bf16.msra.mxu1 %v8159_v30  ;;  %v1422_v12 = vld [vmem:[#allocation7 + $0x670] sm:$0xff]  ;;  %v8000_v30 = vcombine.high %v1290_v57, %v1294_v58  ;;  %v1271_v57 = vld [vmem:[#allocation7 + $0x1b8] sm:$0xff] }
 0x2e4   :  { %5052 = vmatprep.subr.bf16.mxu0 %v8024_v6  ;;  %5105 = vmatprep.subr.bf16.mxu1 %v8152_v15  ;;  %v8128_v6 = vcombine.high %v1418_v59, %v1422_v12  ;;  %v1282_v15 = vld [vmem:[#allocation7 + $0x210] sm:$0xff]  ;;  %v8127_v34 = vcombine.low %v1418_v59, %v1422_v12  ;;  %v1395_v59 = vld [vmem:[#allocation7 + $0x598] sm:$0xff] }
 0x2e5   :  { %v1286_v54 = vld [vmem:[#allocation7 + $0x230] sm:$0xff]  ;;  %v1399_v12 = vld [vmem:[#allocation7 + $0x5b8] sm:$0xff] }
 0x2e6   :  { %v1410_v21 = vld [vmem:[#allocation7 + $0x610] sm:$0xff]  ;;  %v7991_v61 = vcombine.low %v1282_v15, %v1286_v54 }
 0x2e7   :  { %5053 = vmatpush2.bf16.msra.mxu0 %v8023_v24  ;;  %5106 = vmatpush2.bf16.msra.mxu1 %v8151_v36  ;;  %v1414_v24 = vld [vmem:[#allocation7 + $0x630] sm:$0xff]  ;;  %v7992_v36 = vcombine.high %v1282_v15, %v1286_v54 }
 0x2e8   :  { %5054 = vmatprep.subr.bf16.mxu0 %v8016_v35  ;;  %5107 = vmatprep.subr.bf16.mxu1 %v8144_v45  ;;  %v8120_v35 = vcombine.high %v1410_v21, %v1414_v24  ;;  %v1275_v45 = vld [vmem:[#allocation7 + $0x1d8] sm:$0xff]  ;;  %v8119_v37 = vcombine.low %v1410_v21, %v1414_v24  ;;  %v8106_v24 = vcombine.high %v1395_v59, %v1399_v12 }
 0x2eb   :  { %5055 = vmatpush2.bf16.msra.mxu0 %v8015_v33  ;;  %5108 = vmatpush2.bf16.msra.mxu1 %v8143_v38  ;;  %v1407_v33 = vld [vmem:[#allocation7 + $0x5f8] sm:$0xff]  ;;  %v7986_v38 = vcombine.high %v1275_v45, %v1279_v0 }
 0x2ec   :  { %5056 = vmatprep.subr.bf16.mxu0 %v8008_v51  ;;  %5109 = vmatprep.subr.bf16.mxu1 %v8136_v39  ;;  %v8114_v51 = vcombine.high %v1403_v55, %v1407_v33  ;;  %v1267_v39 = vld [vmem:[#allocation7 + $0x198] sm:$0xff] }
 0x2ed   :  { %v7978_v54 = vcombine.high %v1267_v39, %v1271_v57 }
 0x2ef   :  { %5057 = vmatpush2.bf16.msra.mxu0 %v8007_v60  ;;  %5110 = vmatpush2.bf16.msra.mxu1 %v8135_v41  ;;  %v7985_v41 = vcombine.low %v1275_v45, %v1279_v0  ;;  %v1387_v45 = vld [vmem:[#allocation7 + $0x558] sm:$0xff] }
 0x2f0   :  { %5058 = vmatprep.subr.bf16.mxu0 %v8000_v30  ;;  %5111 = vmatprep.subr.bf16.mxu1 %v8128_v6  ;;  %v8113_v6 = vcombine.low %v1403_v55, %v1407_v33  ;;  %v1391_v0 = vld [vmem:[#allocation7 + $0x578] sm:$0xff]  ;;  %v7977_v33 = vcombine.low %v1267_v39, %v1271_v57 }
 0x2f3   :  { %5059 = vmatpush2.bf16.msra.mxu0 %v7999_v63  ;;  %5112 = vmatpush2.bf16.msra.mxu1 %v8127_v34  ;;  %v1259_v63 = vld [vmem:[#allocation7 + $0x158] sm:$0xff] }
 0x2f4   :  { %5060 = vmatprep.subr.bf16.mxu0 %v7992_v36  ;;  %5113 = vmatprep.subr.bf16.mxu1 %v8120_v35  ;;  %v1263_v34 = vld [vmem:[#allocation7 + $0x178] sm:$0xff] }
 0x2f5   :  { %v7969_v39 = vcombine.low %v1259_v63, %v1263_v34 }
 0x2f7   :  { %5061 = vmatpush2.bf16.msra.mxu0 %v7991_v61  ;;  %v3466_v58 = vpop.f32.mrf.mxu0  ;;  %5114 = vmatpush2.bf16.msra.mxu1 %v8119_v37  ;;  %v3519_v60 = vpop.f32.mrf.mxu1  ;;  %v8105_v37 = vcombine.low %v1395_v59, %v1399_v12  ;;  %v8097_v59 = vcombine.low %v1387_v45, %v1391_v0 }
 0x2f8   :  { %5136 = vmatprep.subr.bf16.mxu0 %v7986_v38  ;;  %v9095_v30 = vadd.f32 %v3519_v60, %v3466_v58  ;;  %5189 = vmatprep.subr.bf16.mxu1 %v8114_v51  ;;  %v7970_v51 = vcombine.high %v1259_v63, %v1263_v34  ;;  %v8098_v60 = vcombine.high %v1387_v45, %v1391_v0  ;;  %v1375_v34 = vld [vmem:[#allocation7 + $0x4f8] sm:$0xff] }
 0x2f9   :  { %v3468_v15 = vpop.f32.mrf.mxu0  ;;  %v3521_v21 = vpop.f32.mrf.mxu1 }
 0x2fa   :  { %5063 = vmatmul.mubr.bf16.vlgmr.msra.gmra.mxu0 %v9035_v13  ;;  %5116 = vmatmul.mubr.bf16.vlgmr.msra.gmra.mxu1 %v9037_v8  ;;  %v9100_v36 = vadd.f32 %v3521_v21, %v3468_v15  ;;  %v1251_v15 = vld [vmem:[#allocation7 + $0x118] sm:$0xff] }
 0x2fb   :  { %5072 = vmatprep.mubr.bf16.mxu0 %v9041_v11  ;;  %v3470_v35 = vpop.f32.mrf.mxu0  ;;  %5125 = vmatprep.mubr.bf16.mxu1 %v9044_v16  ;;  %v3523_v55 = vpop.f32.mrf.mxu1  ;;  %v1255_v21 = vld [vmem:[#allocation7 + $0x138] sm:$0xff] }
 0x2fc   :  { %5137 = vmatpush1.bf16.msra.mxu0 %v7985_v41  ;;  %5190 = vmatpush1.bf16.msra.mxu1 %v8113_v6  ;;  %v9103_v61 = vadd.f32 %v3523_v55, %v3470_v35  ;;  %v7962_v6 = vcombine.high %v1251_v15, %v1255_v21  ;;  %v1243_v35 = vld [vmem:[#allocation7 + $0xd8] sm:$0xff]  ;;  %v7961_v0 = vcombine.low %v1251_v15, %v1255_v21 }
 0x2fd   :  { %5138 = vmatprep.subr.bf16.mxu0 %v7978_v54  ;;  %v3472_v38 = vpop.f32.mrf.mxu0  ;;  %5191 = vmatprep.subr.bf16.mxu1 %v8106_v24  ;;  %v3525_v58 = vpop.f32.mrf.mxu1  ;;  %v8090_v24 = vcombine.high %v1379_v20, %v1383_v17  ;;  %v1247_v55 = vld [vmem:[#allocation7 + $0xf8] sm:$0xff] }
 0x2fe   :  { %v9105_v22 = vadd.f32 %v3525_v58, %v3472_v38  ;;  %v8089_v38 = vcombine.low %v1379_v20, %v1383_v17  ;;  %v7954_v58 = vcombine.high %v1243_v35, %v1247_v55  ;;  %v1227_v17 = vld [vmem:[#allocation7 + $0x58] sm:$0xff] }
 0x2ff   :  { %v3476_v18 = vpop.f32.mrf.mxu0  ;;  %v3529_v41 = vpop.f32.mrf.mxu1  ;;  %v1231_v20 = vld [vmem:[#allocation7 + $0x78] sm:$0xff] }
 0x300   :  { %5139 = vmatpush1.bf16.msra.mxu0 %v7977_v33  ;;  %5192 = vmatpush1.bf16.msra.mxu1 %v8105_v37  ;;  %v9107_v57 = vadd.f32 %v3529_v41, %v3476_v18  ;;  %v1371_v18 = vld [vmem:[#allocation7 + $0x4d8] sm:$0xff] }
 0x301   :  { %5140 = vmatprep.subr.bf16.mxu0 %v7970_v51  ;;  %v3478_v12 = vpop.f32.mrf.mxu0  ;;  %5193 = vmatprep.subr.bf16.mxu1 %v8098_v60  ;;  %v3531_v54 = vpop.f32.mrf.mxu1  ;;  %v1235_v41 = vld [vmem:[#allocation7 + $0x98] sm:$0xff]  ;;  %v8081_v15 = vcombine.low %v1371_v18, %v1375_v34 }
 0x302   :  { %5073 = vmatmul.mubr.bf16.gmra.mxu0 %v9055_v50  ;;  %5126 = vmatmul.mubr.bf16.gmra.mxu1 %v9057_v47  ;;  %v9112_v33 = vadd.f32 %v3531_v54, %v3478_v12  ;;  %v1239_v12 = vld [vmem:[#allocation7 + $0xb8] sm:$0xff] }
 0x303   :  { %5168 = vmatprep.mubr.bf16.mxu0 %v9019_v1  ;;  %v3480_v63 = vpop.f32.mrf.mxu0  ;;  %5221 = vmatprep.mubr.bf16.mxu1 %v9024_v7  ;;  %v3533_v45 = vpop.f32.mrf.mxu1  ;;  %v8082_v1 = vcombine.high %v1371_v18, %v1375_v34  ;;  %v7953_v7 = vcombine.low %v1243_v35, %v1247_v55  ;;  %v7946_v21 = vcombine.high %v1235_v41, %v1239_v12  ;;  %v1223_v35 = vld [vmem:[#allocation7 + $0x38] sm:$0xff] }
 0x304   :  { %9416 = vst [vmem:[#allocation14_spill] sm:$0xff] %v9112_v33  ;;  %5141 = vmatpush1.bf16.msra.mxu0 %v7969_v39  ;;  %5194 = vmatpush1.bf16.msra.mxu1 %v8097_v59  ;;  %v9115_v37 = vadd.f32 %v3533_v45, %v3480_v63  ;;  %v1367_v39 = vld [vmem:[#allocation7 + $0x4b8] sm:$0xff]  ;;  %v7945_v63 = vcombine.low %v1235_v41, %v1239_v12 }
 0x305   :  { %5142 = vmatprep.subr.bf16.mxu0 %v7962_v6  ;;  %v3482_v51 = vpop.f32.mrf.mxu0  ;;  %5195 = vmatprep.subr.bf16.mxu1 %v8090_v24  ;;  %v3535_v60 = vpop.f32.mrf.mxu1  ;;  %v8074_v59 = vcombine.high %v1363_v14, %v1367_v39  ;;  %v1355_v6 = vld [vmem:[#allocation7 + $0x458] sm:$0xff]  ;;  %v8073_v45 = vcombine.low %v1363_v14, %v1367_v39  ;;  %v7937_v18 = vcombine.low %v1227_v17, %v1231_v20 }
 0x306   :  { %9417 = vst [vmem:[#allocation15_spill] sm:$0xff] %v9115_v37  ;;  %v9117_v54 = vadd.f32 %v3535_v60, %v3482_v51  ;;  %v1359_v24 = vld [vmem:[#allocation7 + $0x478] sm:$0xff]  ;;  %v7938_v51 = vcombine.high %v1227_v17, %v1231_v20 }
 0x307   :  { %v8066_v60 = vcombine.high %v1355_v6, %v1359_v24  ;;  %v1347_v55 = vld [vmem:[#allocation7 + $0x418] sm:$0xff]  ;;  %v8065_v34 = vcombine.low %v1355_v6, %v1359_v24 }
 0x308   :  { %9418 = vst [vmem:[#allocation16_spill] sm:$0xff] %v9117_v54  ;;  %5143 = vmatpush1.bf16.msra.mxu0 %v7961_v0  ;;  %5196 = vmatpush1.bf16.msra.mxu1 %v8089_v38  ;;  %v1219_v0 = vld [vmem:[#allocation7 + $0x18] sm:$0xff]  ;;  %v8635_v54 = vld [vmem:[#allocation2 + $0x28] sm:$0xff] }
 0x309   :  { %5144 = vmatprep.subr.bf16.mxu0 %v7954_v58  ;;  %5197 = vmatprep.subr.bf16.mxu1 %v8082_v1  ;;  %v1351_v38 = vld [vmem:[#allocation7 + $0x438] sm:$0xff]  ;;  %v7930_v58 = vcombine.high %v1219_v0, %v1223_v35  ;;  %v7929_v14 = vcombine.low %v1219_v0, %v1223_v35  ;;  %v5279_v37 = vrot.slane %v8635_v54, 2  ;;  %v5512_v54 = vld [vmem:[#allocation7 + $0x1560] sm:$0xff] }
 0x30a   :  { %v8058_v1 = vcombine.high %v1347_v55, %v1351_v38  ;;  %v1343_v41 = vld [vmem:[#allocation7 + $0x3f8] sm:$0xff]  ;;  %v8057_v39 = vcombine.low %v1347_v55, %v1351_v38 }
 0x30b   :  { %v1467_v12 = vld [vmem:[#allocation7 + $0x7d8] sm:$0xff] }
 0x30c   :  { %5145 = vmatpush1.bf16.msra.mxu0 %v7953_v7  ;;  %5198 = vmatpush1.bf16.msra.mxu1 %v8081_v15  ;;  %v1339_v7 = vld [vmem:[#allocation7 + $0x3d8] sm:$0xff] }
 0x30d   :  { %5146 = vmatprep.subr.bf16.mxu0 %v7946_v21  ;;  %5199 = vmatprep.subr.bf16.mxu1 %v8074_v59  ;;  %v1471_v15 = vld [vmem:[#allocation7 + $0x7f8] sm:$0xff]  ;;  %v8050_v21 = vcombine.high %v1339_v7, %v1343_v41  ;;  %v8049_v6 = vcombine.low %v1339_v7, %v1343_v41 }
 0x30e   :  { %v8178_v59 = vcombine.high %v1467_v12, %v1471_v15  ;;  %v1335_v17 = vld [vmem:[#allocation7 + $0x3b8] sm:$0xff]  ;;  %v8177_v24 = vcombine.low %v1467_v12, %v1471_v15 }
 0x30f   :  { %v1459_v20 = vld [vmem:[#allocation7 + $0x798] sm:$0xff] }
 0x310   :  { %5147 = vmatpush1.bf16.msra.mxu0 %v7945_v63  ;;  %5200 = vmatpush1.bf16.msra.mxu1 %v8073_v45  ;;  %v1331_v63 = vld [vmem:[#allocation7 + $0x398] sm:$0xff] }
 0x311   :  { %5148 = vmatprep.subr.bf16.mxu0 %v7938_v51  ;;  %5201 = vmatprep.subr.bf16.mxu1 %v8066_v60  ;;  %v1463_v45 = vld [vmem:[#allocation7 + $0x7b8] sm:$0xff]  ;;  %v8042_v51 = vcombine.high %v1331_v63, %v1335_v17  ;;  %v8041_v55 = vcombine.low %v1331_v63, %v1335_v17 }
 0x312   :  { %v8170_v60 = vcombine.high %v1459_v20, %v1463_v45  ;;  %v1327_v0 = vld [vmem:[#allocation7 + $0x378] sm:$0xff]  ;;  %v8169_v38 = vcombine.low %v1459_v20, %v1463_v45 }
 0x313   :  { %v1451_v35 = vld [vmem:[#allocation7 + $0x758] sm:$0xff] }
 0x314   :  { %5149 = vmatpush1.bf16.msra.mxu0 %v7937_v18  ;;  %5202 = vmatpush1.bf16.msra.mxu1 %v8065_v34  ;;  %v1323_v18 = vld [vmem:[#allocation7 + $0x358] sm:$0xff] }
 0x315   :  { %5150 = vmatprep.subr.bf16.mxu0 %v7930_v58  ;;  %5203 = vmatprep.subr.bf16.mxu1 %v8058_v1  ;;  %v1455_v34 = vld [vmem:[#allocation7 + $0x778] sm:$0xff]  ;;  %v8034_v58 = vcombine.high %v1323_v18, %v1327_v0  ;;  %v8033_v12 = vcombine.low %v1323_v18, %v1327_v0 }
 0x316   :  { %v8162_v1 = vcombine.high %v1451_v35, %v1455_v34  ;;  %v1319_v7 = vld [vmem:[#allocation7 + $0x338] sm:$0xff]  ;;  %v8161_v15 = vcombine.low %v1451_v35, %v1455_v34 }
 0x317   :  { %v1443_v41 = vld [vmem:[#allocation7 + $0x718] sm:$0xff] }
 0x318   :  { %5151 = vmatpush1.bf16.msra.mxu0 %v7929_v14  ;;  %5204 = vmatpush1.bf16.msra.mxu1 %v8057_v39  ;;  %v1315_v14 = vld [vmem:[#allocation7 + $0x318] sm:$0xff] }
 0x319   :  { %5152 = vmatprep.subr.bf16.mxu0 %v8050_v21  ;;  %5205 = vmatprep.subr.bf16.mxu1 %v8178_v59  ;;  %v1447_v39 = vld [vmem:[#allocation7 + $0x738] sm:$0xff]  ;;  %v8026_v21 = vcombine.high %v1315_v14, %v1319_v7  ;;  %v8025_v20 = vcombine.low %v1315_v14, %v1319_v7 }
 0x31a   :  { %v8154_v59 = vcombine.high %v1443_v41, %v1447_v39  ;;  %v1311_v63 = vld [vmem:[#allocation7 + $0x2f8] sm:$0xff]  ;;  %v8153_v45 = vcombine.low %v1443_v41, %v1447_v39 }
 0x31b   :  { %v1435_v17 = vld [vmem:[#allocation7 + $0x6d8] sm:$0xff] }
 0x31c   :  { %5153 = vmatpush2.bf16.msra.mxu0 %v8049_v6  ;;  %5206 = vmatpush2.bf16.msra.mxu1 %v8177_v24  ;;  %v1307_v6 = vld [vmem:[#allocation7 + $0x2d8] sm:$0xff] }
 0x31d   :  { %5154 = vmatprep.subr.bf16.mxu0 %v8042_v51  ;;  %5207 = vmatprep.subr.bf16.mxu1 %v8170_v60  ;;  %v1439_v24 = vld [vmem:[#allocation7 + $0x6f8] sm:$0xff]  ;;  %v8018_v51 = vcombine.high %v1307_v6, %v1311_v63  ;;  %v8017_v35 = vcombine.low %v1307_v6, %v1311_v63 }
 0x31e   :  { %v8146_v60 = vcombine.high %v1435_v17, %v1439_v24  ;;  %v1303_v18 = vld [vmem:[#allocation7 + $0x2b8] sm:$0xff]  ;;  %v8145_v34 = vcombine.low %v1435_v17, %v1439_v24 }
 0x31f   :  { %v1427_v0 = vld [vmem:[#allocation7 + $0x698] sm:$0xff] }
 0x320   :  { %5155 = vmatpush2.bf16.msra.mxu0 %v8041_v55  ;;  %5208 = vmatpush2.bf16.msra.mxu1 %v8169_v38  ;;  %v1299_v55 = vld [vmem:[#allocation7 + $0x298] sm:$0xff] }
 0x321   :  { %5156 = vmatprep.subr.bf16.mxu0 %v8034_v58  ;;  %5209 = vmatprep.subr.bf16.mxu1 %v8162_v1  ;;  %v1431_v38 = vld [vmem:[#allocation7 + $0x6b8] sm:$0xff]  ;;  %v8010_v58 = vcombine.high %v1299_v55, %v1303_v18  ;;  %v8009_v41 = vcombine.low %v1299_v55, %v1303_v18  ;;  %v5400_v55 = vld [vmem:[#allocation7 + $0x11e0] sm:$0xff] }
 0x322   :  { %v8138_v1 = vcombine.high %v1427_v0, %v1431_v38  ;;  %v1295_v14 = vld [vmem:[#allocation7 + $0x278] sm:$0xff]  ;;  %v8137_v39 = vcombine.low %v1427_v0, %v1431_v38  ;;  %v5524_v18 = vld [vmem:[#allocation7 + $0x15c0] sm:$0xff] }
 0x323   :  { %v1419_v7 = vld [vmem:[#allocation7 + $0x658] sm:$0xff] }
 0x324   :  { %5157 = vmatpush2.bf16.msra.mxu0 %v8033_v12  ;;  %5210 = vmatpush2.bf16.msra.mxu1 %v8161_v15  ;;  %v1291_v12 = vld [vmem:[#allocation7 + $0x258] sm:$0xff] }
 0x325   :  { %5158 = vmatprep.subr.bf16.mxu0 %v8026_v21  ;;  %5211 = vmatprep.subr.bf16.mxu1 %v8154_v59  ;;  %v1423_v15 = vld [vmem:[#allocation7 + $0x678] sm:$0xff]  ;;  %v8002_v21 = vcombine.high %v1291_v12, %v1295_v14  ;;  %v8001_v17 = vcombine.low %v1291_v12, %v1295_v14  ;;  %v9119_v12 = vld [vmem:[#allocation7 + $0x1180] sm:$0xff] }
 0x326   :  { %v8130_v59 = vcombine.high %v1419_v7, %v1423_v15  ;;  %v1287_v6 = vld [vmem:[#allocation7 + $0x238] sm:$0xff]  ;;  %v8129_v24 = vcombine.low %v1419_v7, %v1423_v15  ;;  %v5392_v14 = vld [vmem:[#allocation7 + $0x11a0] sm:$0xff] }
 0x327   :  { %v1411_v63 = vld [vmem:[#allocation7 + $0x618] sm:$0xff]  ;;  %v5243_v7 = vld [vmem:[#allocation2 + $0x8] sm:$0xfc] }
 0x328   :  { %5159 = vmatpush2.bf16.msra.mxu0 %v8025_v20  ;;  %5212 = vmatpush2.bf16.msra.mxu1 %v8153_v45  ;;  %v1283_v20 = vld [vmem:[#allocation7 + $0x218] sm:$0xff] }
 0x329   :  { %5160 = vmatprep.subr.bf16.mxu0 %v8018_v51  ;;  %5213 = vmatprep.subr.bf16.mxu1 %v8146_v60  ;;  %v1415_v45 = vld [vmem:[#allocation7 + $0x638] sm:$0xff]  ;;  %v7994_v51 = vcombine.high %v1283_v20, %v1287_v6  ;;  %v7993_v0 = vcombine.low %v1283_v20, %v1287_v6 }
 0x32a   :  { %v8122_v60 = vcombine.high %v1411_v63, %v1415_v45  ;;  %v8121_v38 = vcombine.low %v1411_v63, %v1415_v45  ;;  %v5245_v45 = vld [vmem:[#allocation2 + $0x18] sm:$0xfc] }
 0x32c   :  { %5161 = vmatpush2.bf16.msra.mxu0 %v8017_v35  ;;  %5214 = vmatpush2.bf16.msra.mxu1 %v8145_v34  ;;  %v5396_v35 = vld [vmem:[#allocation7 + $0x11c0] sm:$0xff] }
 0x32d   :  { %5162 = vmatprep.subr.bf16.mxu0 %v8010_v58  ;;  %5215 = vmatprep.subr.bf16.mxu1 %v8138_v1  ;;  %v5528_v34 = vld [vmem:[#allocation7 + $0x15e0] sm:$0xff]  ;;  %v8236_v58 = vcombine.high %v5396_v35, %v5400_v55  ;;  %v8235_v63 = vcombine.low %v5396_v35, %v5400_v55 }
 0x32e   :  { %v5247_v1 = vld [vmem:[#allocation2 + $0x48] sm:$0x3] }
 0x32f   :  { %v5380_v35 = vld [vmem:[#allocation7 + $0x1140] sm:$0xff] }
 0x330   :  { %5163 = vmatpush2.bf16.msra.mxu0 %v8009_v41  ;;  %5216 = vmatpush2.bf16.msra.mxu1 %v8137_v39  ;;  %v8364_v41 = vcombine.high %v5524_v18, %v5528_v34  ;;  %v9121_v39 = vld [vmem:[#allocation7 + $0x1580] sm:$0xff] }
 0x331   :  { %5164 = vmatprep.subr.bf16.mxu0 %v8002_v21  ;;  %5217 = vmatprep.subr.bf16.mxu1 %v8130_v59  ;;  %v9123_v21 = vld [vmem:[#allocation7 + $0x15a0] sm:$0xff]  ;;  %v5289_v59 = vrot.slane %v5247_v1, 2 }
 0x332   :  { %v5384_v55 = vld [vmem:[#allocation7 + $0x1160] sm:$0xff] }
 0x334   :  { %5165 = vmatpush2.bf16.msra.mxu0 %v8001_v17  ;;  %5218 = vmatpush2.bf16.msra.mxu1 %v8129_v24  ;;  %v5249_v17 = vld [vmem:[#allocation2 + $0x58] sm:$0x3]  ;;  %v8363_v24 = vcombine.low %v5524_v18, %v5528_v34 }
 0x335   :  { %5166 = vmatprep.subr.bf16.mxu0 %v7994_v51  ;;  %5219 = vmatprep.subr.bf16.mxu1 %v8122_v60  ;;  %v8228_v60 = vcombine.high %v9119_v12, %v5392_v14  ;;  %v5293_v18 = vrot.slane %v5249_v17, 2  ;;  %v8227_v17 = vcombine.low %v9119_v12, %v5392_v14  ;;  %v5372_v14 = vld [vmem:[#allocation7 + $0x1100] sm:$0xff] }
 0x338   :  { %5167 = vmatpush2.bf16.msra.mxu0 %v7993_v0  ;;  %v4852_v15 = vpop.f32.mrf.mxu0  ;;  %5220 = vmatpush2.bf16.msra.mxu1 %v8121_v38  ;;  %v4905_v6 = vpop.f32.mrf.mxu1  ;;  %v5278_v0 = vrot.slane %v5243_v7, 2  ;;  %v5284_v7 = vrot.slane %v5245_v45, 2 }
 0x339   :  { %v4853_v20 = vadd.f32 %v4852_v15, %v9008_v44  ;;  %6876 = vmatprep.subr.bf16.mxu0 %v8236_v58  ;;  %6929 = vmatprep.subr.bf16.mxu1 %v8364_v41  ;;  %v8356_v44 = vcombine.high %v9121_v39, %v9123_v21  ;;  %v5508_v58 = vld [vmem:[#allocation7 + $0x1540] sm:$0xff]  ;;  %v5290_v41 = vsel %vm5274_vm3, %v5279_v37, %v5289_v59 }
 0x33a   :  { %v4854_v51 = vpop.f32.mrf.mxu0  ;;  %v4907_v1 = vpop.f32.mrf.mxu1  ;;  %v8220_v59 = vcombine.high %v5380_v35, %v5384_v55  ;;  %v5280_v45 = vsel %vm5274_vm3, %v5278_v0, %v5279_v37 }
 0x33b   :  { %v9127_v33 = vadd.f32 %v4905_v6, %v4853_v20  ;;  %5169 = vmatmul.mubr.bf16.vlgmr.msra.gmra.mxu0 %v9035_v13  ;;  %v4855_v38 = vadd.f32 %v4854_v51, %v9013_v3  ;;  %5222 = vmatmul.mubr.bf16.vlgmr.msra.gmra.mxu1 %v9037_v8  ;;  %v8636_v20 = vld [vmem:[#allocation2 + $0x38] sm:$0xff]  ;;  %v8348_v51 = vcombine.high %v5508_v58, %v5512_v54 }
 0x33c   :  { %5178 = vmatprep.mubr.bf16.mxu0 %v9041_v11  ;;  %v4856_v34 = vpop.f32.mrf.mxu0  ;;  %5231 = vmatprep.mubr.bf16.mxu1 %v9044_v16  ;;  %v4909_v15 = vpop.f32.mrf.mxu1  ;;  %v5285_v8 = vrot.slane %v8636_v20, 2  ;;  %v8355_v11 = vcombine.low %v9121_v39, %v9123_v21  ;;  %v5504_v39 = vld [vmem:[#allocation7 + $0x1520] sm:$0xff] }
 0x33d   :  { %6877 = vmatpush1.bf16.msra.mxu0 %v8235_v63  ;;  %v9137_v3 = vadd.f32 %v4907_v1, %v4855_v38  ;;  %v4857_v13 = vadd.f32 %v4856_v34, %v9015_v23  ;;  %6930 = vmatpush1.bf16.msra.mxu1 %v8363_v24  ;;  %v5376_v38 = vld [vmem:[#allocation7 + $0x1120] sm:$0xff]  ;;  %v8347_v34 = vcombine.low %v5508_v58, %v5512_v54 }
 0x33e   :  { %6878 = vmatprep.subr.bf16.mxu0 %v8228_v60  ;;  %v4858_v6 = vpop.f32.mrf.mxu0  ;;  %6931 = vmatprep.subr.bf16.mxu1 %v8356_v44  ;;  %v4911_v23 = vpop.f32.mrf.mxu1  ;;  %v5294_v12 = vsel %vm5274_vm3, %v5285_v8, %v5293_v18  ;;  %v9148_v60 = vpack.c.bf16 %v5290_v41, %v5280_v45  ;;  %v5500_v1 = vld [vmem:[#allocation7 + $0x1500] sm:$0xff]  ;;  %v8219_v44 = vcombine.low %v5380_v35, %v5384_v55 }
 0x33f   :  { %v9144_v16 = vadd.f32 %v4909_v15, %v4857_v13  ;;  %v4859_v63 = vadd.f32 %v4858_v6, %v9017_v19  ;;  %v5286_v19 = vsel %vm5274_vm3, %v5284_v7, %v5285_v8  ;;  %v8212_v15 = vcombine.high %v5372_v14, %v5376_v38  ;;  %v5364_v6 = vld [vmem:[#allocation7 + $0x10c0] sm:$0xff] }
 0x340   :  { %v4862_v24 = vpop.f32.mrf.mxu0  ;;  %v4915_v0 = vpop.f32.mrf.mxu1  ;;  %v9154_v18 = vpack.c.bf16 %v5294_v12, %v5286_v19  ;;  %v5368_v35 = vld [vmem:[#allocation7 + $0x10e0] sm:$0xff] }
 0x341   :  { %6879 = vmatpush1.bf16.msra.mxu0 %v8227_v17  ;;  %v9150_v21 = vadd.f32 %v4911_v23, %v4859_v63  ;;  %v4863_v37 = vadd.f32 %v4862_v24, %v9022_v26  ;;  %6932 = vmatpush1.bf16.msra.mxu1 %v8355_v11  ;;  %v8340_v26 = vcombine.high %v5500_v1, %v5504_v39  ;;  %v5492_v58 = vld [vmem:[#allocation7 + $0x14c0] sm:$0xff] }
 0x342   :  { %6880 = vmatprep.subr.bf16.mxu0 %v8220_v59  ;;  %v4864_v13 = vpop.f32.mrf.mxu0  ;;  %6933 = vmatprep.subr.bf16.mxu1 %v8348_v51  ;;  %v4917_v20 = vpop.f32.mrf.mxu1  ;;  %v5496_v54 = vld [vmem:[#allocation7 + $0x14e0] sm:$0xff]  ;;  %v8339_v11 = vcombine.low %v5500_v1, %v5504_v39  ;;  %v8204_v45 = vcombine.high %v5364_v6, %v5368_v35 }
 0x343   :  { %v9156_v41 = vadd.f32 %v4915_v0, %v4863_v37  ;;  %5179 = vmatmul.mubr.bf16.gmra.mxu0 %v9055_v50  ;;  %v4865_v17 = vadd.f32 %v4864_v13, %v9029_v5  ;;  %5232 = vmatmul.mubr.bf16.gmra.mxu1 %v9057_v47  ;;  %v8211_v5 = vcombine.low %v5372_v14, %v5376_v38  ;;  %v5356_v51 = vld [vmem:[#allocation7 + $0x1080] sm:$0xff] }
 0x344   :  { %6908 = vmatprep.mubr.bf16.mxu0 %v9148_v60  ;;  %v4866_v55 = vpop.f32.mrf.mxu0  ;;  %6961 = vmatprep.mubr.bf16.mxu1 %v9154_v18  ;;  %v4919_v8 = vpop.f32.mrf.mxu1  ;;  %v8332_v23 = vcombine.high %v5492_v58, %v5496_v54  ;;  %v5360_v12 = vld [vmem:[#allocation7 + $0x10a0] sm:$0xff]  ;;  %v8203_v14 = vcombine.low %v5364_v6, %v5368_v35  ;;  %v8331_v38 = vcombine.low %v5492_v58, %v5496_v54 }
 0x345   :  { %6881 = vmatpush1.bf16.msra.mxu0 %v8219_v44  ;;  %v9163_v7 = vadd.f32 %v4917_v20, %v4865_v17  ;;  %v4867_v50 = vadd.f32 %v4866_v55, %v9031_v42  ;;  %6934 = vmatpush1.bf16.msra.mxu1 %v8347_v34  ;;  %v5484_v37 = vld [vmem:[#allocation7 + $0x1480] sm:$0xff]  ;;  %v8196_v1 = vcombine.high %v5356_v51, %v5360_v12 }
 0x346   :  { %6882 = vmatprep.subr.bf16.mxu0 %v8212_v15  ;;  %v4868_v59 = vpop.f32.mrf.mxu0  ;;  %6935 = vmatprep.subr.bf16.mxu1 %v8340_v26  ;;  %v4921_v24 = vpop.f32.mrf.mxu1  ;;  %v5488_v0 = vld [vmem:[#allocation7 + $0x14a0] sm:$0xff]  ;;  %v8195_v13 = vcombine.low %v5356_v51, %v5360_v12 }
 0x347   :  { %v9166_v47 = vadd.f32 %v4919_v8, %v4867_v50  ;;  %v4869_v63 = vadd.f32 %v4868_v59, %v9033_v49  ;;  %v8324_v39 = vcombine.high %v5484_v37, %v5488_v0  ;;  %v5348_v44 = vld [vmem:[#allocation7 + $0x1040] sm:$0xff]  ;;  %v8323_v15 = vcombine.low %v5484_v37, %v5488_v0 }
 0x348   :  { %v5352_v19 = vld [vmem:[#allocation7 + $0x1060] sm:$0xff] }
 0x349   :  { %9419 = vst [vmem:[#allocation17_spill] sm:$0xff] %v9166_v47  ;;  %6883 = vmatpush1.bf16.msra.mxu0 %v8211_v5  ;;  %v9169_v42 = vadd.f32 %v4921_v24, %v4869_v63  ;;  %6936 = vmatpush1.bf16.msra.mxu1 %v8339_v11  ;;  %v5476_v34 = vld [vmem:[#allocation7 + $0x1440] sm:$0xff]  ;;  %v8188_v17 = vcombine.high %v5348_v44, %v5352_v19 }
 0x34a   :  { %6884 = vmatprep.subr.bf16.mxu0 %v8204_v45  ;;  %6937 = vmatprep.subr.bf16.mxu1 %v8332_v23  ;;  %v5480_v49 = vld [vmem:[#allocation7 + $0x1460] sm:$0xff]  ;;  %v8187_v58 = vcombine.low %v5348_v44, %v5352_v19 }
 0x34b   :  { %9420 = vst [vmem:[#allocation18_spill] sm:$0xff] %v9169_v42  ;;  %v8316_v20 = vcombine.high %v5476_v34, %v5480_v49  ;;  %v5340_v26 = vld [vmem:[#allocation7 + $0x1000] sm:$0xff]  ;;  %v8315_v54 = vcombine.low %v5476_v34, %v5480_v49 }
 0x34c   :  { %v5344_v6 = vld [vmem:[#allocation7 + $0x1020] sm:$0xff] }
 0x34d   :  { %6885 = vmatpush1.bf16.msra.mxu0 %v8203_v14  ;;  %6938 = vmatpush1.bf16.msra.mxu1 %v8331_v38  ;;  %v5468_v35 = vld [vmem:[#allocation7 + $0x1400] sm:$0xff]  ;;  %v8180_v50 = vcombine.high %v5340_v26, %v5344_v6  ;;  %v8179_v63 = vcombine.low %v5340_v26, %v5344_v6 }
 0x34e   :  { %6886 = vmatprep.subr.bf16.mxu0 %v8196_v1  ;;  %6939 = vmatprep.subr.bf16.mxu1 %v8324_v39  ;;  %v5472_v55 = vld [vmem:[#allocation7 + $0x1420] sm:$0xff] }
 0x34f   :  { %v8308_v8 = vcombine.high %v5468_v35, %v5472_v55  ;;  %v5460_v5 = vld [vmem:[#allocation7 + $0x13c0] sm:$0xff]  ;;  %v8307_v23 = vcombine.low %v5468_v35, %v5472_v55 }
 0x350   :  { %v5464_v11 = vld [vmem:[#allocation7 + $0x13e0] sm:$0xff] }
 0x351   :  { %6887 = vmatpush1.bf16.msra.mxu0 %v8195_v13  ;;  %6940 = vmatpush1.bf16.msra.mxu1 %v8323_v15  ;;  %v5588_v59 = vld [vmem:[#allocation7 + $0x17c0] sm:$0xff]  ;;  %v8300_v51 = vcombine.high %v5460_v5, %v5464_v11  ;;  %v8299_v38 = vcombine.low %v5460_v5, %v5464_v11 }
 0x352   :  { %6888 = vmatprep.subr.bf16.mxu0 %v8188_v17  ;;  %6941 = vmatprep.subr.bf16.mxu1 %v8316_v20  ;;  %v5592_v45 = vld [vmem:[#allocation7 + $0x17e0] sm:$0xff] }
 0x353   :  { %v8428_v12 = vcombine.high %v5588_v59, %v5592_v45  ;;  %v5452_v24 = vld [vmem:[#allocation7 + $0x1380] sm:$0xff]  ;;  %v8427_v1 = vcombine.low %v5588_v59, %v5592_v45 }
 0x354   :  { %v5456_v37 = vld [vmem:[#allocation7 + $0x13a0] sm:$0xff] }
 0x355   :  { %6889 = vmatpush1.bf16.msra.mxu0 %v8187_v58  ;;  %6942 = vmatpush1.bf16.msra.mxu1 %v8315_v54  ;;  %v5580_v0 = vld [vmem:[#allocation7 + $0x1780] sm:$0xff]  ;;  %v8292_v39 = vcombine.high %v5452_v24, %v5456_v37  ;;  %v8291_v15 = vcombine.low %v5452_v24, %v5456_v37 }
 0x356   :  { %6890 = vmatprep.subr.bf16.mxu0 %v8180_v50  ;;  %6943 = vmatprep.subr.bf16.mxu1 %v8308_v8  ;;  %v5584_v14 = vld [vmem:[#allocation7 + $0x17a0] sm:$0xff] }
 0x357   :  { %v8420_v44 = vcombine.high %v5580_v0, %v5584_v14  ;;  %v5444_v19 = vld [vmem:[#allocation7 + $0x1340] sm:$0xff]  ;;  %v8419_v17 = vcombine.low %v5580_v0, %v5584_v14 }
 0x358   :  { %v5448_v34 = vld [vmem:[#allocation7 + $0x1360] sm:$0xff] }
 0x359   :  { %6891 = vmatpush1.bf16.msra.mxu0 %v8179_v63  ;;  %6944 = vmatpush1.bf16.msra.mxu1 %v8307_v23  ;;  %v5572_v49 = vld [vmem:[#allocation7 + $0x1740] sm:$0xff]  ;;  %v8284_v20 = vcombine.high %v5444_v19, %v5448_v34  ;;  %v8283_v54 = vcombine.low %v5444_v19, %v5448_v34 }
 0x35a   :  { %6892 = vmatprep.subr.bf16.mxu0 %v8300_v51  ;;  %6945 = vmatprep.subr.bf16.mxu1 %v8428_v12  ;;  %v5576_v13 = vld [vmem:[#allocation7 + $0x1760] sm:$0xff] }
 0x35b   :  { %v8412_v26 = vcombine.high %v5572_v49, %v5576_v13  ;;  %v5436_v6 = vld [vmem:[#allocation7 + $0x1300] sm:$0xff]  ;;  %v8411_v50 = vcombine.low %v5572_v49, %v5576_v13 }
 0x35c   :  { %v5440_v35 = vld [vmem:[#allocation7 + $0x1320] sm:$0xff] }
 0x35d   :  { %6893 = vmatpush2.bf16.msra.mxu0 %v8299_v38  ;;  %6946 = vmatpush2.bf16.msra.mxu1 %v8427_v1  ;;  %v5564_v55 = vld [vmem:[#allocation7 + $0x1700] sm:$0xff]  ;;  %v8276_v8 = vcombine.high %v5436_v6, %v5440_v35  ;;  %v8275_v23 = vcombine.low %v5436_v6, %v5440_v35  ;;  %v5246_v6 = vld [vmem:[#allocation2 + $0x40] sm:$0x3] }
 0x35e   :  { %6894 = vmatprep.subr.bf16.mxu0 %v8292_v39  ;;  %6947 = vmatprep.subr.bf16.mxu1 %v8420_v44  ;;  %v5568_v58 = vld [vmem:[#allocation7 + $0x1720] sm:$0xff] }
 0x35f   :  { %v8404_v5 = vcombine.high %v5564_v55, %v5568_v58  ;;  %v5428_v11 = vld [vmem:[#allocation7 + $0x12c0] sm:$0xff]  ;;  %v8403_v51 = vcombine.low %v5564_v55, %v5568_v58 }
 0x360   :  { %v5432_v59 = vld [vmem:[#allocation7 + $0x12e0] sm:$0xff] }
 0x361   :  { %6895 = vmatpush2.bf16.msra.mxu0 %v8291_v15  ;;  %6948 = vmatpush2.bf16.msra.mxu1 %v8419_v17  ;;  %v5556_v45 = vld [vmem:[#allocation7 + $0x16c0] sm:$0xff]  ;;  %v8268_v12 = vcombine.high %v5428_v11, %v5432_v59  ;;  %v8267_v1 = vcombine.low %v5428_v11, %v5432_v59  ;;  %v5287_v59 = vrot.slane %v5246_v6, 2 }
 0x362   :  { %6896 = vmatprep.subr.bf16.mxu0 %v8284_v20  ;;  %6949 = vmatprep.subr.bf16.mxu1 %v8412_v26  ;;  %v5560_v63 = vld [vmem:[#allocation7 + $0x16e0] sm:$0xff] }
 0x363   :  { %v8396_v24 = vcombine.high %v5556_v45, %v5560_v63  ;;  %v5420_v37 = vld [vmem:[#allocation7 + $0x1280] sm:$0xff]  ;;  %v8395_v39 = vcombine.low %v5556_v45, %v5560_v63  ;;  %v5244_v45 = vld [vmem:[#allocation2 + $0x10] sm:$0xfc] }
 0x364   :  { %v5424_v0 = vld [vmem:[#allocation7 + $0x12a0] sm:$0xff] }
 0x365   :  { %6897 = vmatpush2.bf16.msra.mxu0 %v8283_v54  ;;  %6950 = vmatpush2.bf16.msra.mxu1 %v8411_v50  ;;  %v5548_v14 = vld [vmem:[#allocation7 + $0x1680] sm:$0xff]  ;;  %v8260_v44 = vcombine.high %v5420_v37, %v5424_v0  ;;  %v8259_v17 = vcombine.low %v5420_v37, %v5424_v0  ;;  %v5248_v54 = vld [vmem:[#allocation2 + $0x50] sm:$0x3]  ;;  %v5257_v37 = vld [vmem:[#allocation2 + $0xb8] sm:$0x3] }
 0x366   :  { %6898 = vmatprep.subr.bf16.mxu0 %v8276_v8  ;;  %6951 = vmatprep.subr.bf16.mxu1 %v8404_v5  ;;  %v5552_v38 = vld [vmem:[#allocation7 + $0x16a0] sm:$0xff] }
 0x367   :  { %v8388_v19 = vcombine.high %v5548_v14, %v5552_v38  ;;  %v5412_v34 = vld [vmem:[#allocation7 + $0x1240] sm:$0xff]  ;;  %v8387_v20 = vcombine.low %v5548_v14, %v5552_v38 }
 0x368   :  { %v5416_v49 = vld [vmem:[#allocation7 + $0x1260] sm:$0xff] }
 0x369   :  { %6899 = vmatpush2.bf16.msra.mxu0 %v8275_v23  ;;  %6952 = vmatpush2.bf16.msra.mxu1 %v8403_v51  ;;  %v5540_v13 = vld [vmem:[#allocation7 + $0x1640] sm:$0xff]  ;;  %v8252_v26 = vcombine.high %v5412_v34, %v5416_v49  ;;  %v8251_v11 = vcombine.low %v5412_v34, %v5416_v49  ;;  %v5281_v34 = vrot.slane %v5244_v45, 2  ;;  %v8638_v49 = vld [vmem:[#allocation2 + $0x30] sm:$0xff] }
 0x36a   :  { %6900 = vmatprep.subr.bf16.mxu0 %v8268_v12  ;;  %6953 = vmatprep.subr.bf16.mxu1 %v8396_v24  ;;  %v5544_v15 = vld [vmem:[#allocation7 + $0x1660] sm:$0xff]  ;;  %v5291_v12 = vrot.slane %v5248_v54, 2  ;;  %v5313_v54 = vrot.slane %v5257_v37, 2 }
 0x36b   :  { %v8380_v35 = vcombine.high %v5540_v13, %v5544_v15  ;;  %v5404_v55 = vld [vmem:[#allocation7 + $0x1200] sm:$0xff]  ;;  %v8379_v23 = vcombine.low %v5540_v13, %v5544_v15  ;;  %v5529_v13 = vld [vmem:[#allocation7 + $0x15e8] sm:$0xff] }
 0x36c   :  { %v5408_v58 = vld [vmem:[#allocation7 + $0x1220] sm:$0xff] }
 0x36d   :  { %6901 = vmatpush2.bf16.msra.mxu0 %v8267_v1  ;;  %6954 = vmatpush2.bf16.msra.mxu1 %v8395_v39  ;;  %v5532_v50 = vld [vmem:[#allocation7 + $0x1600] sm:$0xff]  ;;  %v8244_v51 = vcombine.high %v5404_v55, %v5408_v58  ;;  %v9171_v1 = vld [vmem:[#allocation7 + $0x11c8] sm:$0xff] }
 0x36e   :  { %6902 = vmatprep.subr.bf16.mxu0 %v8260_v44  ;;  %6955 = vmatprep.subr.bf16.mxu1 %v8388_v19  ;;  %v5536_v8 = vld [vmem:[#allocation7 + $0x1620] sm:$0xff]  ;;  %v9173_v39 = vld [vmem:[#allocation7 + $0x11e8] sm:$0xff]  ;;  %v5253_v44 = vld [vmem:[#allocation2 + $0x78] sm:$0xfc] }
 0x36f   :  { %v5242_v5 = vld [vmem:[#allocation2] sm:$0xfc]  ;;  %v5255_v63 = vld [vmem:[#allocation2 + $0xa8] sm:$0x3]  ;;  %v5251_v24 = vld [vmem:[#allocation2 + $0x68] sm:$0xfc]  ;;  %v8372_v0 = vcombine.high %v5532_v50, %v5536_v8 }
 0x370   :  { %v8637_v14 = vld [vmem:[#allocation2 + $0x20] sm:$0xff]  ;;  %v5275_v19 = vrot.slane %v5242_v5, 2  ;;  %v5309_v15 = vrot.slane %v5255_v63, 2  ;;  %v8238_v5 = vcombine.high %v9171_v1, %v9173_v39  ;;  %v8639_v45 = vld [vmem:[#allocation2 + $0x88] sm:$0xff]  ;;  %v5304_v63 = vrot.slane %v5253_v44, 2 }
 0x371   :  { %6903 = vmatpush2.bf16.msra.mxu0 %v8259_v17  ;;  %6956 = vmatpush2.bf16.msra.mxu1 %v8387_v20  ;;  %v5276_v38 = vrot.slane %v8637_v14, 2  ;;  %v5282_v17 = vrot.slane %v8638_v49, 2  ;;  %v9175_v20 = vld [vmem:[#allocation7 + $0x15c8] sm:$0xff]  ;;  %v8371_v14 = vcombine.low %v5532_v50, %v5536_v8  ;;  %v5299_v49 = vrot.slane %v8639_v45, 2 }
 0x372   :  { %6904 = vmatprep.subr.bf16.mxu0 %v8252_v26  ;;  %6957 = vmatprep.subr.bf16.mxu1 %v8380_v35  ;;  %v8243_v26 = vcombine.low %v5404_v55, %v5408_v58  ;;  %v5298_v35 = vrot.slane %v5251_v24, 2  ;;  %v8366_v47 = vcombine.high %v9175_v20, %v5529_v13  ;;  %v5389_v50 = vld [vmem:[#allocation7 + $0x1188] sm:$0xff] }
 0x373   :  { %v5288_v6 = vsel %vm5274_vm3, %v5276_v38, %v5287_v59  ;;  %v5292_v42 = vsel %vm5274_vm3, %v5282_v17, %v5291_v12  ;;  %v5277_v58 = vsel %vm5274_vm3, %v5275_v19, %v5276_v38  ;;  %v5283_v59 = vsel %vm5274_vm3, %v5281_v34, %v5282_v17  ;;  %v5393_v8 = vld [vmem:[#allocation7 + $0x11a8] sm:$0xff] }
 0x374   :  { %v9185_v12 = vpack.c.bf16 %v5288_v6, %v5277_v58  ;;  %v9187_v24 = vpack.c.bf16 %v5292_v42, %v5283_v59  ;;  %v5521_v44 = vld [vmem:[#allocation7 + $0x15a8] sm:$0xff]  ;;  %v8237_v19 = vcombine.low %v9171_v1, %v9173_v39  ;;  %v5300_v34 = vsel %vm5274_vm3, %v5298_v35, %v5299_v49 }
 0x375   :  { %6905 = vmatpush2.bf16.msra.mxu0 %v8251_v11  ;;  %6958 = vmatpush2.bf16.msra.mxu1 %v8379_v23  ;;  %v8640_v11 = vld [vmem:[#allocation2 + $0x98] sm:$0xff]  ;;  %v5310_v23 = vsel %vm5274_vm3, %v5299_v49, %v5309_v15  ;;  %v8365_v17 = vcombine.low %v9175_v20, %v5529_v13  ;;  %v8230_v6 = vcombine.high %v5389_v50, %v5393_v8  ;;  %v5381_v35 = vld [vmem:[#allocation7 + $0x1148] sm:$0xff] }
 0x376   :  { %6906 = vmatprep.subr.bf16.mxu0 %v8244_v51  ;;  %6959 = vmatprep.subr.bf16.mxu1 %v8372_v0  ;;  %v5305_v55 = vrot.slane %v8640_v11, 2  ;;  %v5517_v0 = vld [vmem:[#allocation7 + $0x1588] sm:$0xff]  ;;  %v9195_v15 = vpack.c.bf16 %v5310_v23, %v5300_v34 }
 0x377   :  { %v5509_v20 = vld [vmem:[#allocation7 + $0x1548] sm:$0xff] }
 0x378   :  { %v5314_v37 = vsel %vm5274_vm3, %v5305_v55, %v5313_v54  ;;  %v5306_v42 = vsel %vm5274_vm3, %v5304_v63, %v5305_v55  ;;  %v5513_v13 = vld [vmem:[#allocation7 + $0x1568] sm:$0xff]  ;;  %v8357_v55 = vcombine.low %v5517_v0, %v5521_v44 }
 0x379   :  { %6907 = vmatpush2.bf16.msra.mxu0 %v8243_v26  ;;  %v4958_v51 = vpop.f32.mrf.mxu0  ;;  %6960 = vmatpush2.bf16.msra.mxu1 %v8371_v14  ;;  %v5011_v38 = vpop.f32.mrf.mxu1  ;;  %v8358_v14 = vcombine.high %v5517_v0, %v5521_v44  ;;  %v8349_v44 = vcombine.low %v5509_v20, %v5513_v13 }
 0x37a   :  { %v4959_v45 = vadd.f32 %v4958_v51, %v9039_v52  ;;  %6982 = vmatprep.subr.bf16.mxu0 %v8238_v5  ;;  %7035 = vmatprep.subr.bf16.mxu1 %v8366_v47  ;;  %v9201_v52 = vpack.c.bf16 %v5314_v37, %v5306_v42  ;;  %v5385_v5 = vld [vmem:[#allocation7 + $0x1168] sm:$0xff] }
 0x37b   :  { %v4960_v26 = vpop.f32.mrf.mxu0  ;;  %v5013_v39 = vpop.f32.mrf.mxu1  ;;  %v8222_v59 = vcombine.high %v5381_v35, %v5385_v5  ;;  %v5501_v42 = vld [vmem:[#allocation7 + $0x1508] sm:$0xff]  ;;  %v8221_v0 = vcombine.low %v5381_v35, %v5385_v5 }
 0x37c   :  { %v9198_v54 = vadd.f32 %v5011_v38, %v4959_v45  ;;  %6909 = vmatmul.mubr.bf16.vlgmr.msra.gmra.mxu0 %v9185_v12  ;;  %v4961_v1 = vadd.f32 %v4960_v26, %v9048_v56  ;;  %6962 = vmatmul.mubr.bf16.vlgmr.msra.gmra.mxu1 %v9187_v24  ;;  %v8229_v56 = vcombine.low %v5389_v50, %v5393_v8  ;;  %v5373_v38 = vld [vmem:[#allocation7 + $0x1108] sm:$0xff] }
 0x37d   :  { %6918 = vmatprep.mubr.bf16.mxu0 %v9195_v15  ;;  %v4962_v47 = vpop.f32.mrf.mxu0  ;;  %6971 = vmatprep.mubr.bf16.mxu1 %v9201_v52  ;;  %v5015_v11 = vpop.f32.mrf.mxu1  ;;  %v8350_v45 = vcombine.high %v5509_v20, %v5513_v13  ;;  %v5505_v26 = vld [vmem:[#allocation7 + $0x1528] sm:$0xff] }
 0x37e   :  { %6983 = vmatpush1.bf16.msra.mxu0 %v8237_v19  ;;  %v9207_v49 = vadd.f32 %v5013_v39, %v4961_v1  ;;  %v4963_v63 = vadd.f32 %v4962_v47, %v9051_v29  ;;  %7036 = vmatpush1.bf16.msra.mxu1 %v8365_v17  ;;  %v5377_v19 = vld [vmem:[#allocation7 + $0x1128] sm:$0xff] }
 0x37f   :  { %6984 = vmatprep.subr.bf16.mxu0 %v8230_v6  ;;  %v4964_v58 = vpop.f32.mrf.mxu0  ;;  %7037 = vmatprep.subr.bf16.mxu1 %v8358_v14  ;;  %v5017_v37 = vpop.f32.mrf.mxu1  ;;  %v8214_v6 = vcombine.high %v5373_v38, %v5377_v19  ;;  %v8342_v14 = vcombine.high %v5501_v42, %v5505_v26  ;;  %v5365_v47 = vld [vmem:[#allocation7 + $0x10c8] sm:$0xff] }
 0x380   :  { %v9210_v23 = vadd.f32 %v5015_v11, %v4963_v63  ;;  %v4965_v51 = vadd.f32 %v4964_v58, %v9053_v43  ;;  %v5369_v63 = vld [vmem:[#allocation7 + $0x10e8] sm:$0xff] }
 0x381   :  { %v4968_v34 = vpop.f32.mrf.mxu0  ;;  %v5021_v8 = vpop.f32.mrf.mxu1  ;;  %v5493_v35 = vld [vmem:[#allocation7 + $0x14c8] sm:$0xff]  ;;  %v8206_v58 = vcombine.high %v5365_v47, %v5369_v63 }
 0x382   :  { %6985 = vmatpush1.bf16.msra.mxu0 %v8229_v56  ;;  %v9213_v29 = vadd.f32 %v5017_v37, %v4965_v51  ;;  %v4969_v50 = vadd.f32 %v4968_v34, %v9059_v10  ;;  %7038 = vmatpush1.bf16.msra.mxu1 %v8357_v55  ;;  %v5497_v5 = vld [vmem:[#allocation7 + $0x14e8] sm:$0xff]  ;;  %v8341_v56 = vcombine.low %v5501_v42, %v5505_v26 }
 0x383   :  { %6986 = vmatprep.subr.bf16.mxu0 %v8222_v59  ;;  %v4970_v17 = vpop.f32.mrf.mxu0  ;;  %7039 = vmatprep.subr.bf16.mxu1 %v8350_v45  ;;  %v5023_v39 = vpop.f32.mrf.mxu1  ;;  %v8334_v37 = vcombine.high %v5493_v35, %v5497_v5  ;;  %v5357_v45 = vld [vmem:[#allocation7 + $0x1088] sm:$0xff] }
 0x384   :  { %v9216_v43 = vadd.f32 %v5021_v8, %v4969_v50  ;;  %6919 = vmatmul.mubr.bf16.gmra.mxu0 %v8985_v53  ;;  %v4971_v1 = vadd.f32 %v4970_v17, %v9064_v62  ;;  %6972 = vmatmul.mubr.bf16.gmra.mxu1 %v8989_v28  ;;  %v8213_v62 = vcombine.low %v5373_v38, %v5377_v19  ;;  %v5361_v34 = vld [vmem:[#allocation7 + $0x10a8] sm:$0xff] }
 0x385   :  { %7014 = vmatprep.mubr.bf16.mxu0 %v9148_v60  ;;  %v4972_v10 = vpop.f32.mrf.mxu0  ;;  %7067 = vmatprep.mubr.bf16.mxu1 %v9154_v18  ;;  %v5025_v11 = vpop.f32.mrf.mxu1  ;;  %v5485_v8 = vld [vmem:[#allocation7 + $0x1488] sm:$0xff]  ;;  %v8205_v38 = vcombine.low %v5365_v47, %v5369_v63  ;;  %v8333_v19 = vcombine.low %v5493_v35, %v5497_v5  ;;  %v8198_v42 = vcombine.high %v5357_v45, %v5361_v34 }
 0x386   :  { %6987 = vmatpush1.bf16.msra.mxu0 %v8221_v0  ;;  %v9223_v20 = vadd.f32 %v5023_v39, %v4971_v1  ;;  %v4973_v13 = vadd.f32 %v4972_v10, %v9067_v40  ;;  %7040 = vmatpush1.bf16.msra.mxu1 %v8349_v44  ;;  %v5489_v0 = vld [vmem:[#allocation7 + $0x14a8] sm:$0xff]  ;;  %v8197_v1 = vcombine.low %v5357_v45, %v5361_v34 }
 0x387   :  { %6988 = vmatprep.subr.bf16.mxu0 %v8214_v6  ;;  %v4974_v55 = vpop.f32.mrf.mxu0  ;;  %7041 = vmatprep.subr.bf16.mxu1 %v8342_v14  ;;  %v5027_v50 = vpop.f32.mrf.mxu1  ;;  %v8326_v26 = vcombine.high %v5485_v8, %v5489_v0  ;;  %v5349_v44 = vld [vmem:[#allocation7 + $0x1048] sm:$0xff]  ;;  %v8325_v39 = vcombine.low %v5485_v8, %v5489_v0 }
 0x388   :  { %v9226_v59 = vadd.f32 %v5025_v11, %v4973_v13  ;;  %v4975_v51 = vadd.f32 %v4974_v55, %v9069_v31  ;;  %v5353_v17 = vld [vmem:[#allocation7 + $0x1068] sm:$0xff] }
 0x389   :  { %v5477_v6 = vld [vmem:[#allocation7 + $0x1448] sm:$0xff]  ;;  %v8190_v14 = vcombine.high %v5349_v44, %v5353_v17  ;;  %v8189_v35 = vcombine.low %v5349_v44, %v5353_v17 }
 0x38a   :  { %6989 = vmatpush1.bf16.msra.mxu0 %v8213_v62  ;;  %v9229_v40 = vadd.f32 %v5027_v50, %v4975_v51  ;;  %7042 = vmatpush1.bf16.msra.mxu1 %v8341_v56  ;;  %v5481_v31 = vld [vmem:[#allocation7 + $0x1468] sm:$0xff] }
 0x38b   :  { %6990 = vmatprep.subr.bf16.mxu0 %v8206_v58  ;;  %7043 = vmatprep.subr.bf16.mxu1 %v8334_v37  ;;  %v8318_v10 = vcombine.high %v5477_v6, %v5481_v31  ;;  %v5341_v13 = vld [vmem:[#allocation7 + $0x1008] sm:$0xff]  ;;  %v8317_v5 = vcombine.low %v5477_v6, %v5481_v31 }
 0x38c   :  { %v5345_v47 = vld [vmem:[#allocation7 + $0x1028] sm:$0xff] }
 0x38d   :  { %v5469_v63 = vld [vmem:[#allocation7 + $0x1408] sm:$0xff]  ;;  %v8182_v62 = vcombine.high %v5341_v13, %v5345_v47  ;;  %v8181_v45 = vcombine.low %v5341_v13, %v5345_v47 }
 0x38e   :  { %6991 = vmatpush1.bf16.msra.mxu0 %v8205_v38  ;;  %7044 = vmatpush1.bf16.msra.mxu1 %v8333_v19  ;;  %v5473_v11 = vld [vmem:[#allocation7 + $0x1428] sm:$0xff] }
 0x38f   :  { %6992 = vmatprep.subr.bf16.mxu0 %v8198_v42  ;;  %7045 = vmatprep.subr.bf16.mxu1 %v8326_v26  ;;  %v8310_v56 = vcombine.high %v5469_v63, %v5473_v11  ;;  %v5461_v55 = vld [vmem:[#allocation7 + $0x13c8] sm:$0xff]  ;;  %v8309_v34 = vcombine.low %v5469_v63, %v5473_v11 }
 0x390   :  { %v5465_v58 = vld [vmem:[#allocation7 + $0x13e8] sm:$0xff] }
 0x391   :  { %v5589_v51 = vld [vmem:[#allocation7 + $0x17c8] sm:$0xff]  ;;  %v8302_v50 = vcombine.high %v5461_v55, %v5465_v58  ;;  %v8301_v26 = vcombine.low %v5461_v55, %v5465_v58 }
 0x392   :  { %6993 = vmatpush1.bf16.msra.mxu0 %v8197_v1  ;;  %7046 = vmatpush1.bf16.msra.mxu1 %v8325_v39  ;;  %v5593_v37 = vld [vmem:[#allocation7 + $0x17e8] sm:$0xff] }
 0x393   :  { %6994 = vmatprep.subr.bf16.mxu0 %v8190_v14  ;;  %7047 = vmatprep.subr.bf16.mxu1 %v8318_v10  ;;  %v8430_v8 = vcombine.high %v5589_v51, %v5593_v37  ;;  %v5453_v0 = vld [vmem:[#allocation7 + $0x1388] sm:$0xff]  ;;  %v8429_v44 = vcombine.low %v5589_v51, %v5593_v37 }
 0x394   :  { %v5457_v38 = vld [vmem:[#allocation7 + $0x13a8] sm:$0xff] }
 0x395   :  { %v5581_v19 = vld [vmem:[#allocation7 + $0x1788] sm:$0xff]  ;;  %v8294_v17 = vcombine.high %v5453_v0, %v5457_v38  ;;  %v8293_v10 = vcombine.low %v5453_v0, %v5457_v38 }
 0x396   :  { %6995 = vmatpush1.bf16.msra.mxu0 %v8189_v35  ;;  %7048 = vmatpush1.bf16.msra.mxu1 %v8317_v5  ;;  %v5585_v42 = vld [vmem:[#allocation7 + $0x17a8] sm:$0xff] }
 0x397   :  { %6996 = vmatprep.subr.bf16.mxu0 %v8182_v62  ;;  %7049 = vmatprep.subr.bf16.mxu1 %v8310_v56  ;;  %v8422_v6 = vcombine.high %v5581_v19, %v5585_v42  ;;  %v5445_v31 = vld [vmem:[#allocation7 + $0x1348] sm:$0xff]  ;;  %v8421_v13 = vcombine.low %v5581_v19, %v5585_v42 }
 0x398   :  { %v5449_v1 = vld [vmem:[#allocation7 + $0x1368] sm:$0xff] }
 0x399   :  { %v5573_v39 = vld [vmem:[#allocation7 + $0x1748] sm:$0xff]  ;;  %v8286_v47 = vcombine.high %v5445_v31, %v5449_v1  ;;  %v8285_v56 = vcombine.low %v5445_v31, %v5449_v1 }
 0x39a   :  { %6997 = vmatpush1.bf16.msra.mxu0 %v8181_v45  ;;  %7050 = vmatpush1.bf16.msra.mxu1 %v8309_v34  ;;  %v5577_v14 = vld [vmem:[#allocation7 + $0x1768] sm:$0xff] }
 0x39b   :  { %6998 = vmatprep.subr.bf16.mxu0 %v8302_v50  ;;  %7051 = vmatprep.subr.bf16.mxu1 %v8430_v8  ;;  %v8414_v63 = vcombine.high %v5573_v39, %v5577_v14  ;;  %v5437_v11 = vld [vmem:[#allocation7 + $0x1308] sm:$0xff]  ;;  %v8413_v55 = vcombine.low %v5573_v39, %v5577_v14 }
 0x39c   :  { %v5441_v35 = vld [vmem:[#allocation7 + $0x1328] sm:$0xff] }
 0x39d   :  { %v5565_v5 = vld [vmem:[#allocation7 + $0x1708] sm:$0xff]  ;;  %v8278_v58 = vcombine.high %v5437_v11, %v5441_v35  ;;  %v8277_v8 = vcombine.low %v5437_v11, %v5441_v35 }
 0x39e   :  { %6999 = vmatpush2.bf16.msra.mxu0 %v8301_v26  ;;  %7052 = vmatpush2.bf16.msra.mxu1 %v8429_v44  ;;  %v5569_v62 = vld [vmem:[#allocation7 + $0x1728] sm:$0xff] }
 0x39f   :  { %7000 = vmatprep.subr.bf16.mxu0 %v8294_v17  ;;  %7053 = vmatprep.subr.bf16.mxu1 %v8422_v6  ;;  %v8406_v51 = vcombine.high %v5565_v5, %v5569_v62  ;;  %v5429_v37 = vld [vmem:[#allocation7 + $0x12c8] sm:$0xff]  ;;  %v8405_v0 = vcombine.low %v5565_v5, %v5569_v62 }
 0x3a0   :  { %v5433_v45 = vld [vmem:[#allocation7 + $0x12e8] sm:$0xff] }
 0x3a1   :  { %v5557_v34 = vld [vmem:[#allocation7 + $0x16c8] sm:$0xff]  ;;  %v8270_v38 = vcombine.high %v5429_v37, %v5433_v45  ;;  %v8269_v6 = vcombine.low %v5429_v37, %v5433_v45 }
 0x3a2   :  { %7001 = vmatpush2.bf16.msra.mxu0 %v8293_v10  ;;  %7054 = vmatpush2.bf16.msra.mxu1 %v8421_v13  ;;  %v5561_v50 = vld [vmem:[#allocation7 + $0x16e8] sm:$0xff] }
 0x3a3   :  { %7002 = vmatprep.subr.bf16.mxu0 %v8286_v47  ;;  %7055 = vmatprep.subr.bf16.mxu1 %v8414_v63  ;;  %v8398_v19 = vcombine.high %v5557_v34, %v5561_v50  ;;  %v5421_v42 = vld [vmem:[#allocation7 + $0x1288] sm:$0xff]  ;;  %v8397_v31 = vcombine.low %v5557_v34, %v5561_v50  ;;  %v5398_v50 = vld [vmem:[#allocation7 + $0x11d0] sm:$0xff] }
 0x3a4   :  { %v5425_v26 = vld [vmem:[#allocation7 + $0x12a8] sm:$0xff] }
 0x3a5   :  { %v5549_v44 = vld [vmem:[#allocation7 + $0x1688] sm:$0xff]  ;;  %v8262_v1 = vcombine.high %v5421_v42, %v5425_v26  ;;  %v8261_v63 = vcombine.low %v5421_v42, %v5425_v26 }
 0x3a6   :  { %7003 = vmatpush2.bf16.msra.mxu0 %v8285_v56  ;;  %7056 = vmatpush2.bf16.msra.mxu1 %v8413_v55  ;;  %v5553_v17 = vld [vmem:[#allocation7 + $0x16a8] sm:$0xff] }
 0x3a7   :  { %7004 = vmatprep.subr.bf16.mxu0 %v8278_v58  ;;  %7057 = vmatprep.subr.bf16.mxu1 %v8406_v51  ;;  %v8390_v39 = vcombine.high %v5549_v44, %v5553_v17  ;;  %v5413_v14 = vld [vmem:[#allocation7 + $0x1248] sm:$0xff]  ;;  %v8389_v11 = vcombine.low %v5549_v44, %v5553_v17  ;;  %v5390_v17 = vld [vmem:[#allocation7 + $0x1190] sm:$0xff] }
 0x3a8   :  { %v5417_v10 = vld [vmem:[#allocation7 + $0x1268] sm:$0xff] }
 0x3a9   :  { %v5541_v13 = vld [vmem:[#allocation7 + $0x1648] sm:$0xff]  ;;  %v8254_v35 = vcombine.high %v5413_v14, %v5417_v10  ;;  %v8253_v51 = vcombine.low %v5413_v14, %v5417_v10 }
 0x3aa   :  { %7005 = vmatpush2.bf16.msra.mxu0 %v8277_v8  ;;  %7058 = vmatpush2.bf16.msra.mxu1 %v8405_v0  ;;  %v5545_v47 = vld [vmem:[#allocation7 + $0x1668] sm:$0xff]  ;;  %v5402_v8 = vld [vmem:[#allocation7 + $0x11f0] sm:$0xff] }
 0x3ab   :  { %7006 = vmatprep.subr.bf16.mxu0 %v8270_v38  ;;  %7059 = vmatprep.subr.bf16.mxu1 %v8398_v19  ;;  %v8382_v5 = vcombine.high %v5541_v13, %v5545_v47  ;;  %v5405_v62 = vld [vmem:[#allocation7 + $0x1208] sm:$0xff]  ;;  %v8381_v37 = vcombine.low %v5541_v13, %v5545_v47  ;;  %v5526_v0 = vld [vmem:[#allocation7 + $0x15d0] sm:$0xff]  ;;  %v8240_v26 = vcombine.high %v5398_v50, %v5402_v8 }
 0x3ac   :  { %v5409_v56 = vld [vmem:[#allocation7 + $0x1228] sm:$0xff]  ;;  %v5530_v38 = vld [vmem:[#allocation7 + $0x15f0] sm:$0xff]  ;;  %v8239_v13 = vcombine.low %v5398_v50, %v5402_v8 }
 0x3ad   :  { %v5533_v55 = vld [vmem:[#allocation7 + $0x1608] sm:$0xff]  ;;  %v8246_v45 = vcombine.high %v5405_v62, %v5409_v56  ;;  %v8245_v19 = vcombine.low %v5405_v62, %v5409_v56  ;;  %v8368_v44 = vcombine.high %v5526_v0, %v5530_v38  ;;  %v8367_v47 = vcombine.low %v5526_v0, %v5530_v38 }
 0x3ae   :  { %7007 = vmatpush2.bf16.msra.mxu0 %v8269_v6  ;;  %7060 = vmatpush2.bf16.msra.mxu1 %v8397_v31  ;;  %v5537_v58 = vld [vmem:[#allocation7 + $0x1628] sm:$0xff]  ;;  %v5394_v6 = vld [vmem:[#allocation7 + $0x11b0] sm:$0xff] }
 0x3af   :  { %7008 = vmatprep.subr.bf16.mxu0 %v8262_v1  ;;  %7061 = vmatprep.subr.bf16.mxu1 %v8390_v39  ;;  %v8374_v34 = vcombine.high %v5533_v55, %v5537_v58  ;;  %v8373_v42 = vcombine.low %v5533_v55, %v5537_v58  ;;  %v5518_v1 = vld [vmem:[#allocation7 + $0x1590] sm:$0xff] }
 0x3b0   :  { %v5522_v39 = vld [vmem:[#allocation7 + $0x15b0] sm:$0xff] }
 0x3b1   :  { %v8360_v56 = vcombine.high %v5518_v1, %v5522_v39  ;;  %v5382_v55 = vld [vmem:[#allocation7 + $0x1150] sm:$0xff]  ;;  %v8359_v8 = vcombine.low %v5518_v1, %v5522_v39 }
 0x3b2   :  { %7009 = vmatpush2.bf16.msra.mxu0 %v8261_v63  ;;  %7062 = vmatpush2.bf16.msra.mxu1 %v8389_v11  ;;  %v8232_v11 = vcombine.high %v5390_v17, %v5394_v6  ;;  %v5386_v58 = vld [vmem:[#allocation7 + $0x1170] sm:$0xff] }
 0x3b3   :  { %7010 = vmatprep.subr.bf16.mxu0 %v8254_v35  ;;  %7063 = vmatprep.subr.bf16.mxu1 %v8382_v5  ;;  %v8224_v38 = vcombine.high %v5382_v55, %v5386_v58  ;;  %v8223_v1 = vcombine.low %v5382_v55, %v5386_v58  ;;  %v5494_v55 = vld [vmem:[#allocation7 + $0x14d0] sm:$0xff] }
 0x3b4   :  { %v5498_v58 = vld [vmem:[#allocation7 + $0x14f0] sm:$0xff] }
 0x3b6   :  { %7011 = vmatpush2.bf16.msra.mxu0 %v8253_v51  ;;  %7064 = vmatpush2.bf16.msra.mxu1 %v8381_v37  ;;  %v5510_v51 = vld [vmem:[#allocation7 + $0x1550] sm:$0xff] }
 0x3b7   :  { %7012 = vmatprep.subr.bf16.mxu0 %v8246_v45  ;;  %7065 = vmatprep.subr.bf16.mxu1 %v8374_v34  ;;  %v5514_v37 = vld [vmem:[#allocation7 + $0x1570] sm:$0xff] }
 0x3b8   :  { %v8351_v39 = vcombine.low %v5510_v51, %v5514_v37 }
 0x3ba   :  { %7013 = vmatpush2.bf16.msra.mxu0 %v8245_v19  ;;  %v5064_v31 = vpop.f32.mrf.mxu0  ;;  %7066 = vmatpush2.bf16.msra.mxu1 %v8373_v42  ;;  %v5117_v10 = vpop.f32.mrf.mxu1 }
 0x3bb   :  { %v5065_v14 = vadd.f32 %v5064_v31, %v9071_v32  ;;  %7088 = vmatprep.subr.bf16.mxu0 %v8240_v26  ;;  %7141 = vmatprep.subr.bf16.mxu1 %v8368_v44  ;;  %v8352_v44 = vcombine.high %v5510_v51, %v5514_v37  ;;  %v5374_v31 = vld [vmem:[#allocation7 + $0x1110] sm:$0xff] }
 0x3bc   :  { %v5066_v63 = vpop.f32.mrf.mxu0  ;;  %v5119_v62 = vpop.f32.mrf.mxu1 }
 0x3bd   :  { %v9232_v35 = vadd.f32 %v5117_v10, %v5065_v14  ;;  %7015 = vmatmul.mubr.bf16.vlgmr.msra.gmra.mxu0 %v9185_v12  ;;  %v5067_v5 = vadd.f32 %v5066_v63, %v9076_v46  ;;  %7068 = vmatmul.mubr.bf16.vlgmr.msra.gmra.mxu1 %v9187_v24  ;;  %v8231_v46 = vcombine.low %v5390_v17, %v5394_v6  ;;  %v5378_v14 = vld [vmem:[#allocation7 + $0x1130] sm:$0xff] }
 0x3be   :  { %7024 = vmatprep.mubr.bf16.mxu0 %v9195_v15  ;;  %v5068_v32 = vpop.f32.mrf.mxu0  ;;  %7077 = vmatprep.mubr.bf16.mxu1 %v9201_v52  ;;  %v5121_v50 = vpop.f32.mrf.mxu1  ;;  %v5506_v63 = vld [vmem:[#allocation7 + $0x1530] sm:$0xff] }
 0x3bf   :  { %7089 = vmatpush1.bf16.msra.mxu0 %v8239_v13  ;;  %v9239_v45 = vadd.f32 %v5119_v62, %v5067_v5  ;;  %v5069_v34 = vadd.f32 %v5068_v32, %v9079_v2  ;;  %7142 = vmatpush1.bf16.msra.mxu1 %v8367_v47  ;;  %v5502_v13 = vld [vmem:[#allocation7 + $0x1510] sm:$0xff] }
 0x3c0   :  { %7090 = vmatprep.subr.bf16.mxu0 %v8232_v11  ;;  %v5070_v0 = vpop.f32.mrf.mxu0  ;;  %7143 = vmatprep.subr.bf16.mxu1 %v8360_v56  ;;  %v5123_v26 = vpop.f32.mrf.mxu1  ;;  %v8216_v11 = vcombine.high %v5374_v31, %v5378_v14  ;;  %v8344_v56 = vcombine.high %v5502_v13, %v5506_v63  ;;  %v5366_v32 = vld [vmem:[#allocation7 + $0x10d0] sm:$0xff] }
 0x3c1   :  { %v9242_v19 = vadd.f32 %v5121_v50, %v5069_v34  ;;  %v5071_v42 = vadd.f32 %v5070_v0, %v9081_v25  ;;  %v5370_v34 = vld [vmem:[#allocation7 + $0x10f0] sm:$0xff] }
 0x3c2   :  { %v5074_v10 = vpop.f32.mrf.mxu0  ;;  %v5127_v6 = vpop.f32.mrf.mxu1  ;;  %v8208_v0 = vcombine.high %v5366_v32, %v5370_v34 }
 0x3c3   :  { %7091 = vmatpush1.bf16.msra.mxu0 %v8231_v46  ;;  %v9245_v2 = vadd.f32 %v5123_v26, %v5071_v42  ;;  %v5075_v17 = vadd.f32 %v5074_v10, %v9083_v27  ;;  %7144 = vmatpush1.bf16.msra.mxu1 %v8359_v8  ;;  %v8343_v46 = vcombine.low %v5502_v13, %v5506_v63  ;;  %v5362_v10 = vld [vmem:[#allocation7 + $0x10b0] sm:$0xff] }
 0x3c4   :  { %7092 = vmatprep.subr.bf16.mxu0 %v8224_v38  ;;  %v5076_v47 = vpop.f32.mrf.mxu0  ;;  %7145 = vmatprep.subr.bf16.mxu1 %v8352_v44  ;;  %v5129_v62 = vpop.f32.mrf.mxu1  ;;  %v8336_v26 = vcombine.high %v5494_v55, %v5498_v58  ;;  %v5358_v44 = vld [vmem:[#allocation7 + $0x1090] sm:$0xff] }
 0x3c5   :  { %v9248_v25 = vadd.f32 %v5127_v6, %v5075_v17  ;;  %7025 = vmatmul.mubr.bf16.gmra.mxu0 %v8985_v53  ;;  %v5077_v5 = vadd.f32 %v5076_v47, %v9088_v9  ;;  %7078 = vmatmul.mubr.bf16.gmra.mxu1 %v8989_v28  ;;  %v8215_v9 = vcombine.low %v5374_v31, %v5378_v14  ;;  %v5486_v6 = vld [vmem:[#allocation7 + $0x1490] sm:$0xff] }
 0x3c6   :  { %7120 = vmatprep.mubr.bf16.mxu0 %v9148_v60  ;;  %v5078_v27 = vpop.f32.mrf.mxu0  ;;  %7173 = vmatprep.mubr.bf16.mxu1 %v9154_v18  ;;  %v5131_v50 = vpop.f32.mrf.mxu1  ;;  %v8207_v31 = vcombine.low %v5366_v32, %v5370_v34  ;;  %v8335_v14 = vcombine.low %v5494_v55, %v5498_v58  ;;  %v8200_v13 = vcombine.high %v5358_v44, %v5362_v10  ;;  %v5354_v47 = vld [vmem:[#allocation7 + $0x1070] sm:$0xff] }
 0x3c7   :  { %7093 = vmatpush1.bf16.msra.mxu0 %v8223_v1  ;;  %v9255_v51 = vadd.f32 %v5129_v62, %v5077_v5  ;;  %v5079_v37 = vadd.f32 %v5078_v27, %v9091_v48  ;;  %7146 = vmatpush1.bf16.msra.mxu1 %v8351_v39  ;;  %v5490_v1 = vld [vmem:[#allocation7 + $0x14b0] sm:$0xff]  ;;  %v8199_v5 = vcombine.low %v5358_v44, %v5362_v10 }
 0x3c8   :  { %7094 = vmatprep.subr.bf16.mxu0 %v8216_v11  ;;  %v5080_v8 = vpop.f32.mrf.mxu0  ;;  %7147 = vmatprep.subr.bf16.mxu1 %v8344_v56  ;;  %v5133_v17 = vpop.f32.mrf.mxu1  ;;  %v8328_v63 = vcombine.high %v5486_v6, %v5490_v1  ;;  %v5350_v39 = vld [vmem:[#allocation7 + $0x1050] sm:$0xff]  ;;  %v8327_v62 = vcombine.low %v5486_v6, %v5490_v1 }
 0x3c9   :  { %v9258_v38 = vadd.f32 %v5131_v50, %v5079_v37  ;;  %v5081_v42 = vadd.f32 %v5080_v8, %v9093_v4  ;;  %v5478_v11 = vld [vmem:[#allocation7 + $0x1450] sm:$0xff]  ;;  %v8192_v56 = vcombine.high %v5350_v39, %v5354_v47  ;;  %v8191_v55 = vcombine.low %v5350_v39, %v5354_v47 }
 0x3ca   :  { %v5482_v4 = vld [vmem:[#allocation7 + $0x1470] sm:$0xff] }
 0x3cb   :  { %7095 = vmatpush1.bf16.msra.mxu0 %v8215_v9  ;;  %v9261_v48 = vadd.f32 %v5133_v17, %v5081_v42  ;;  %7148 = vmatpush1.bf16.msra.mxu1 %v8343_v46  ;;  %v8320_v27 = vcombine.high %v5478_v11, %v5482_v4  ;;  %v5342_v37 = vld [vmem:[#allocation7 + $0x1010] sm:$0xff]  ;;  %v8319_v58 = vcombine.low %v5478_v11, %v5482_v4 }
 0x3cc   :  { %7096 = vmatprep.subr.bf16.mxu0 %v8208_v0  ;;  %7149 = vmatprep.subr.bf16.mxu1 %v8336_v26  ;;  %v5346_v32 = vld [vmem:[#allocation7 + $0x1030] sm:$0xff] }
 0x3cd   :  { %v5470_v34 = vld [vmem:[#allocation7 + $0x1410] sm:$0xff]  ;;  %v8184_v9 = vcombine.high %v5342_v37, %v5346_v32  ;;  %v8183_v44 = vcombine.low %v5342_v37, %v5346_v32 }
 0x3ce   :  { %v5474_v50 = vld [vmem:[#allocation7 + $0x1430] sm:$0xff] }
 0x3cf   :  { %7097 = vmatpush1.bf16.msra.mxu0 %v8207_v31  ;;  %7150 = vmatpush1.bf16.msra.mxu1 %v8335_v14  ;;  %v8312_v46 = vcombine.high %v5470_v34, %v5474_v50  ;;  %v5462_v8 = vld [vmem:[#allocation7 + $0x13d0] sm:$0xff]  ;;  %v8311_v10 = vcombine.low %v5470_v34, %v5474_v50 }
 0x3d0   :  { %7098 = vmatprep.subr.bf16.mxu0 %v8200_v13  ;;  %7151 = vmatprep.subr.bf16.mxu1 %v8328_v63  ;;  %v5466_v0 = vld [vmem:[#allocation7 + $0x13f0] sm:$0xff] }
 0x3d1   :  { %v5590_v42 = vld [vmem:[#allocation7 + $0x17d0] sm:$0xff]  ;;  %v8304_v17 = vcombine.high %v5462_v8, %v5466_v0  ;;  %v8303_v63 = vcombine.low %v5462_v8, %v5466_v0 }
 0x3d2   :  { %v5594_v26 = vld [vmem:[#allocation7 + $0x17f0] sm:$0xff] }
 0x3d3   :  { %7099 = vmatpush1.bf16.msra.mxu0 %v8199_v5  ;;  %7152 = vmatpush1.bf16.msra.mxu1 %v8327_v62  ;;  %v8432_v6 = vcombine.high %v5590_v42, %v5594_v26  ;;  %v5454_v1 = vld [vmem:[#allocation7 + $0x1390] sm:$0xff]  ;;  %v8431_v39 = vcombine.low %v5590_v42, %v5594_v26 }
 0x3d4   :  { %7100 = vmatprep.subr.bf16.mxu0 %v8192_v56  ;;  %7153 = vmatprep.subr.bf16.mxu1 %v8320_v27  ;;  %v5458_v31 = vld [vmem:[#allocation7 + $0x13b0] sm:$0xff] }
 0x3d5   :  { %v5582_v14 = vld [vmem:[#allocation7 + $0x1790] sm:$0xff]  ;;  %v8296_v47 = vcombine.high %v5454_v1, %v5458_v31  ;;  %v8295_v27 = vcombine.low %v5454_v1, %v5458_v31 }
 0x3d6   :  { %v5586_v13 = vld [vmem:[#allocation7 + $0x17b0] sm:$0xff] }
 0x3d7   :  { %7101 = vmatpush1.bf16.msra.mxu0 %v8191_v55  ;;  %7154 = vmatpush1.bf16.msra.mxu1 %v8319_v58  ;;  %v8424_v11 = vcombine.high %v5582_v14, %v5586_v13  ;;  %v5446_v4 = vld [vmem:[#allocation7 + $0x1350] sm:$0xff]  ;;  %v8423_v37 = vcombine.low %v5582_v14, %v5586_v13 }
 0x3d8   :  { %7102 = vmatprep.subr.bf16.mxu0 %v8184_v9  ;;  %7155 = vmatprep.subr.bf16.mxu1 %v8312_v46  ;;  %v5450_v5 = vld [vmem:[#allocation7 + $0x1370] sm:$0xff] }
 0x3d9   :  { %v5574_v62 = vld [vmem:[#allocation7 + $0x1750] sm:$0xff]  ;;  %v8288_v32 = vcombine.high %v5446_v4, %v5450_v5  ;;  %v8287_v46 = vcombine.low %v5446_v4, %v5450_v5 }
 0x3da   :  { %v5578_v56 = vld [vmem:[#allocation7 + $0x1770] sm:$0xff] }
 0x3db   :  { %7103 = vmatpush1.bf16.msra.mxu0 %v8183_v44  ;;  %7156 = vmatpush1.bf16.msra.mxu1 %v8311_v10  ;;  %v8416_v34 = vcombine.high %v5574_v62, %v5578_v56  ;;  %v5438_v50 = vld [vmem:[#allocation7 + $0x1310] sm:$0xff]  ;;  %v8415_v8 = vcombine.low %v5574_v62, %v5578_v56 }
 0x3dc   :  { %7104 = vmatprep.subr.bf16.mxu0 %v8304_v17  ;;  %7157 = vmatprep.subr.bf16.mxu1 %v8432_v6  ;;  %v5442_v55 = vld [vmem:[#allocation7 + $0x1330] sm:$0xff] }
 0x3dd   :  { %v5566_v58 = vld [vmem:[#allocation7 + $0x1710] sm:$0xff]  ;;  %v8280_v0 = vcombine.high %v5438_v50, %v5442_v55  ;;  %v8279_v6 = vcombine.low %v5438_v50, %v5442_v55 }
 0x3de   :  { %v5570_v9 = vld [vmem:[#allocation7 + $0x1730] sm:$0xff] }
 0x3df   :  { %7105 = vmatpush2.bf16.msra.mxu0 %v8303_v63  ;;  %7158 = vmatpush2.bf16.msra.mxu1 %v8431_v39  ;;  %v8408_v42 = vcombine.high %v5566_v58, %v5570_v9  ;;  %v5430_v26 = vld [vmem:[#allocation7 + $0x12d0] sm:$0xff]  ;;  %v8407_v1 = vcombine.low %v5566_v58, %v5570_v9 }
 0x3e0   :  { %7106 = vmatprep.subr.bf16.mxu0 %v8296_v47  ;;  %7159 = vmatprep.subr.bf16.mxu1 %v8424_v11  ;;  %v5434_v44 = vld [vmem:[#allocation7 + $0x12f0] sm:$0xff] }
 0x3e1   :  { %v5558_v10 = vld [vmem:[#allocation7 + $0x16d0] sm:$0xff]  ;;  %v8272_v31 = vcombine.high %v5430_v26, %v5434_v44  ;;  %v8271_v11 = vcombine.low %v5430_v26, %v5434_v44 }
 0x3e2   :  { %v5562_v17 = vld [vmem:[#allocation7 + $0x16f0] sm:$0xff] }
 0x3e3   :  { %7107 = vmatpush2.bf16.msra.mxu0 %v8295_v27  ;;  %7160 = vmatpush2.bf16.msra.mxu1 %v8423_v37  ;;  %v8400_v14 = vcombine.high %v5558_v10, %v5562_v17  ;;  %v5422_v13 = vld [vmem:[#allocation7 + $0x1290] sm:$0xff]  ;;  %v8399_v4 = vcombine.low %v5558_v10, %v5562_v17  ;;  %v5399_v17 = vld [vmem:[#allocation7 + $0x11d8] sm:$0xff] }
 0x3e4   :  { %7108 = vmatprep.subr.bf16.mxu0 %v8288_v32  ;;  %7161 = vmatprep.subr.bf16.mxu1 %v8416_v34  ;;  %v5426_v63 = vld [vmem:[#allocation7 + $0x12b0] sm:$0xff] }
 0x3e5   :  { %v5550_v39 = vld [vmem:[#allocation7 + $0x1690] sm:$0xff]  ;;  %v8264_v5 = vcombine.high %v5422_v13, %v5426_v63  ;;  %v8263_v34 = vcombine.low %v5422_v13, %v5426_v63 }
 0x3e6   :  { %v5554_v47 = vld [vmem:[#allocation7 + $0x16b0] sm:$0xff] }
 0x3e7   :  { %7109 = vmatpush2.bf16.msra.mxu0 %v8287_v46  ;;  %7162 = vmatpush2.bf16.msra.mxu1 %v8415_v8  ;;  %v8392_v62 = vcombine.high %v5550_v39, %v5554_v47  ;;  %v5414_v56 = vld [vmem:[#allocation7 + $0x1250] sm:$0xff]  ;;  %v8391_v50 = vcombine.low %v5550_v39, %v5554_v47  ;;  %v5391_v47 = vld [vmem:[#allocation7 + $0x1198] sm:$0xff] }
 0x3e8   :  { %7110 = vmatprep.subr.bf16.mxu0 %v8280_v0  ;;  %7163 = vmatprep.subr.bf16.mxu1 %v8408_v42  ;;  %v5418_v27 = vld [vmem:[#allocation7 + $0x1270] sm:$0xff] }
 0x3e9   :  { %v5542_v37 = vld [vmem:[#allocation7 + $0x1650] sm:$0xff]  ;;  %v8256_v55 = vcombine.high %v5414_v56, %v5418_v27  ;;  %v8255_v42 = vcombine.low %v5414_v56, %v5418_v27 }
 0x3ea   :  { %v5546_v32 = vld [vmem:[#allocation7 + $0x1670] sm:$0xff] }
 0x3eb   :  { %7111 = vmatpush2.bf16.msra.mxu0 %v8279_v6  ;;  %7164 = vmatpush2.bf16.msra.mxu1 %v8407_v1  ;;  %v8384_v58 = vcombine.high %v5542_v37, %v5546_v32  ;;  %v5406_v9 = vld [vmem:[#allocation7 + $0x1210] sm:$0xff]  ;;  %v8383_v26 = vcombine.low %v5542_v37, %v5546_v32  ;;  %v5403_v6 = vld [vmem:[#allocation7 + $0x11f8] sm:$0xff] }
 0x3ec   :  { %7112 = vmatprep.subr.bf16.mxu0 %v8272_v31  ;;  %7165 = vmatprep.subr.bf16.mxu1 %v8400_v14  ;;  %v5410_v46 = vld [vmem:[#allocation7 + $0x1230] sm:$0xff]  ;;  %v5527_v1 = vld [vmem:[#allocation7 + $0x15d8] sm:$0xff]  ;;  %v8242_v63 = vcombine.high %v5399_v17, %v5403_v6  ;;  %v8241_v37 = vcombine.low %v5399_v17, %v5403_v6 }
 0x3ed   :  { %v5534_v8 = vld [vmem:[#allocation7 + $0x1610] sm:$0xff]  ;;  %v8248_v44 = vcombine.high %v5406_v9, %v5410_v46  ;;  %v5531_v31 = vld [vmem:[#allocation7 + $0x15f8] sm:$0xff]  ;;  %v8247_v14 = vcombine.low %v5406_v9, %v5410_v46 }
 0x3ee   :  { %v5538_v0 = vld [vmem:[#allocation7 + $0x1630] sm:$0xff]  ;;  %v8370_v39 = vcombine.high %v5527_v1, %v5531_v31  ;;  %v8369_v32 = vcombine.low %v5527_v1, %v5531_v31 }
 0x3ef   :  { %7113 = vmatpush2.bf16.msra.mxu0 %v8271_v11  ;;  %7166 = vmatpush2.bf16.msra.mxu1 %v8399_v4  ;;  %v8376_v10 = vcombine.high %v5534_v8, %v5538_v0  ;;  %v8375_v13 = vcombine.low %v5534_v8, %v5538_v0  ;;  %v5395_v11 = vld [vmem:[#allocation7 + $0x11b8] sm:$0xff] }
 0x3f0   :  { %7114 = vmatprep.subr.bf16.mxu0 %v8264_v5  ;;  %7167 = vmatprep.subr.bf16.mxu1 %v8392_v62  ;;  %v5519_v5 = vld [vmem:[#allocation7 + $0x1598] sm:$0xff] }
 0x3f1   :  { %v5523_v62 = vld [vmem:[#allocation7 + $0x15b8] sm:$0xff] }
 0x3f2   :  { %v8362_v46 = vcombine.high %v5519_v5, %v5523_v62  ;;  %v5383_v8 = vld [vmem:[#allocation7 + $0x1158] sm:$0xff]  ;;  %v8361_v6 = vcombine.low %v5519_v5, %v5523_v62 }
 0x3f3   :  { %7115 = vmatpush2.bf16.msra.mxu0 %v8263_v34  ;;  %7168 = vmatpush2.bf16.msra.mxu1 %v8391_v50  ;;  %v8234_v50 = vcombine.high %v5391_v47, %v5395_v11  ;;  %v5387_v0 = vld [vmem:[#allocation7 + $0x1178] sm:$0xff] }
 0x3f4   :  { %7116 = vmatprep.subr.bf16.mxu0 %v8256_v55  ;;  %7169 = vmatprep.subr.bf16.mxu1 %v8384_v58  ;;  %v8226_v31 = vcombine.high %v5383_v8, %v5387_v0  ;;  %v8225_v5 = vcombine.low %v5383_v8, %v5387_v0  ;;  %v5495_v8 = vld [vmem:[#allocation7 + $0x14d8] sm:$0xff] }
 0x3f5   :  { %v5499_v0 = vld [vmem:[#allocation7 + $0x14f8] sm:$0xff] }
 0x3f7   :  { %7117 = vmatpush2.bf16.msra.mxu0 %v8255_v42  ;;  %7170 = vmatpush2.bf16.msra.mxu1 %v8383_v26  ;;  %v5511_v42 = vld [vmem:[#allocation7 + $0x1558] sm:$0xff] }
 0x3f8   :  { %7118 = vmatprep.subr.bf16.mxu0 %v8248_v44  ;;  %7171 = vmatprep.subr.bf16.mxu1 %v8376_v10  ;;  %v5515_v26 = vld [vmem:[#allocation7 + $0x1578] sm:$0xff] }
 0x3f9   :  { %v8353_v62 = vcombine.low %v5511_v42, %v5515_v26 }
 0x3fb   :  { %7119 = vmatpush2.bf16.msra.mxu0 %v8247_v14  ;;  %v5170_v4 = vpop.f32.mrf.mxu0  ;;  %7172 = vmatpush2.bf16.msra.mxu1 %v8375_v13  ;;  %v5223_v27 = vpop.f32.mrf.mxu1 }
 0x3fc   :  { %v5171_v56 = vadd.f32 %v5170_v4, %v9095_v30  ;;  %7194 = vmatprep.subr.bf16.mxu0 %v8242_v63  ;;  %7247 = vmatprep.subr.bf16.mxu1 %v8370_v39  ;;  %v8354_v39 = vcombine.high %v5511_v42, %v5515_v26  ;;  %v5375_v4 = vld [vmem:[#allocation7 + $0x1118] sm:$0xff] }
 0x3fd   :  { %v5172_v34 = vpop.f32.mrf.mxu0  ;;  %v5225_v9 = vpop.f32.mrf.mxu1  ;;  %v9422_v26 = vld [vmem:[#allocation15_spill] sm:$0xff] }
 0x3fe   :  { %v9264_v55 = vadd.f32 %v5223_v27, %v5171_v56  ;;  %7121 = vmatmul.mubr.bf16.vlgmr.msra.gmra.mxu0 %v9185_v12  ;;  %v5173_v58 = vadd.f32 %v5172_v34, %v9100_v36  ;;  %7174 = vmatmul.mubr.bf16.vlgmr.msra.gmra.mxu1 %v9187_v24  ;;  %v8233_v36 = vcombine.low %v5391_v47, %v5395_v11  ;;  %v5379_v56 = vld [vmem:[#allocation7 + $0x1138] sm:$0xff] }
 0x3ff   :  { %7130 = vmatprep.mubr.bf16.mxu0 %v9195_v15  ;;  %v5174_v30 = vpop.f32.mrf.mxu0  ;;  %7183 = vmatprep.mubr.bf16.mxu1 %v9201_v52  ;;  %v5227_v17 = vpop.f32.mrf.mxu1  ;;  %v5507_v34 = vld [vmem:[#allocation7 + $0x1538] sm:$0xff] }
 0x400   :  { %7195 = vmatpush1.bf16.msra.mxu0 %v8241_v37  ;;  %v9271_v44 = vadd.f32 %v5225_v9, %v5173_v58  ;;  %v5175_v10 = vadd.f32 %v5174_v30, %v9103_v61  ;;  %7248 = vmatpush1.bf16.msra.mxu1 %v8369_v32  ;;  %v5503_v37 = vld [vmem:[#allocation7 + $0x1518] sm:$0xff]  ;;  %v9421_v58 = vld [vmem:[#allocation14_spill] sm:$0xff] }
 0x401   :  { %7196 = vmatprep.subr.bf16.mxu0 %v8234_v50  ;;  %v5176_v1 = vpop.f32.mrf.mxu0  ;;  %7249 = vmatprep.subr.bf16.mxu1 %v8362_v46  ;;  %v5229_v63 = vpop.f32.mrf.mxu1  ;;  %v8218_v50 = vcombine.high %v5375_v4, %v5379_v56  ;;  %v8346_v30 = vcombine.high %v5503_v37, %v5507_v34 }
 0x402   :  { %v9274_v14 = vadd.f32 %v5227_v17, %v5175_v10  ;;  %v5177_v13 = vadd.f32 %v5176_v1, %v9105_v22  ;;  %v5367_v10 = vld [vmem:[#allocation7 + $0x10d8] sm:$0xff]  ;;  %v8217_v1 = vcombine.low %v5375_v4, %v5379_v56  ;;  %v8337_v56 = vcombine.low %v5495_v8, %v5499_v0 }
 0x403   :  { %v5180_v27 = vpop.f32.mrf.mxu0  ;;  %v5233_v11 = vpop.f32.mrf.mxu1  ;;  %v5371_v17 = vld [vmem:[#allocation7 + $0x10f8] sm:$0xff] }
 0x404   :  { %7197 = vmatpush1.bf16.msra.mxu0 %v8233_v36  ;;  %v9277_v61 = vadd.f32 %v5229_v63, %v5177_v13  ;;  %v5181_v47 = vadd.f32 %v5180_v27, %v9107_v57  ;;  %7250 = vmatpush1.bf16.msra.mxu1 %v8361_v6  ;;  %v8210_v63 = vcombine.high %v5367_v10, %v5371_v17 }
 0x405   :  { %7198 = vmatprep.subr.bf16.mxu0 %v8226_v31  ;;  %v5182_v32 = vpop.f32.mrf.mxu0  ;;  %7251 = vmatprep.subr.bf16.mxu1 %v8354_v39  ;;  %v5235_v46 = vpop.f32.mrf.mxu1  ;;  %v8345_v31 = vcombine.low %v5503_v37, %v5507_v34  ;;  %v8209_v4 = vcombine.low %v5367_v10, %v5371_v17  ;;  %v5347_v10 = vld [vmem:[#allocation7 + $0x1038] sm:$0xff] }
 0x406   :  { %v9280_v22 = vadd.f32 %v5233_v11, %v5181_v47  ;;  %7131 = vmatmul.mubr.bf16.gmra.mxu0 %v8985_v53  ;;  %v5183_v9 = vadd.f32 %v5182_v32, %v9421_v58  ;;  %7184 = vmatmul.mubr.bf16.gmra.mxu1 %v8989_v28  ;;  %v8338_v47 = vcombine.high %v5495_v8, %v5499_v0  ;;  %v5359_v11 = vld [vmem:[#allocation7 + $0x1098] sm:$0xff] }
 0x407   :  { %7226 = vmatprep.mubr.bf16.mxu0 %v9148_v60  ;;  %v5184_v57 = vpop.f32.mrf.mxu0  ;;  %7279 = vmatprep.mubr.bf16.mxu1 %v9154_v18  ;;  %v5237_v6 = vpop.f32.mrf.mxu1  ;;  %v9423_v60 = vld [vmem:[#allocation16_spill] sm:$0xff]  ;;  %v5487_v32 = vld [vmem:[#allocation7 + $0x1498] sm:$0xff] }
 0x408   :  { %7199 = vmatpush1.bf16.msra.mxu0 %v8225_v5  ;;  %v9287_v42 = vadd.f32 %v5235_v46, %v5183_v9  ;;  %v5185_v36 = vadd.f32 %v5184_v57, %v9422_v26  ;;  %7252 = vmatpush1.bf16.msra.mxu1 %v8353_v62  ;;  %v5363_v5 = vld [vmem:[#allocation7 + $0x10b8] sm:$0xff] }
 0x409   :  { %7200 = vmatprep.subr.bf16.mxu0 %v8218_v50  ;;  %v5186_v13 = vpop.f32.mrf.mxu0  ;;  %7253 = vmatprep.subr.bf16.mxu1 %v8346_v30  ;;  %v5239_v18 = vpop.f32.mrf.mxu1  ;;  %v5491_v58 = vld [vmem:[#allocation7 + $0x14b8] sm:$0xff]  ;;  %v8202_v37 = vcombine.high %v5359_v11, %v5363_v5  ;;  %v8201_v57 = vcombine.low %v5359_v11, %v5363_v5 }
 0x40a   :  { %v9290_v39 = vadd.f32 %v5237_v6, %v5185_v36  ;;  %v5187_v27 = vadd.f32 %v5186_v13, %v9423_v60  ;;  %v8330_v34 = vcombine.high %v5487_v32, %v5491_v58  ;;  %v5351_v62 = vld [vmem:[#allocation7 + $0x1058] sm:$0xff]  ;;  %v8329_v26 = vcombine.low %v5487_v32, %v5491_v58 }
 0x40b   :  { %v5355_v50 = vld [vmem:[#allocation7 + $0x1078] sm:$0xff] }
 0x40c   :  { %7201 = vmatpush1.bf16.msra.mxu0 %v8217_v1  ;;  %v9293_v9 = vadd.f32 %v5239_v18, %v5187_v27  ;;  %7254 = vmatpush1.bf16.msra.mxu1 %v8345_v31  ;;  %v5479_v46 = vld [vmem:[#allocation7 + $0x1458] sm:$0xff]  ;;  %v8194_v36 = vcombine.high %v5351_v62, %v5355_v50  ;;  %v8193_v8 = vcombine.low %v5351_v62, %v5355_v50 }
 0x40d   :  { %7202 = vmatprep.subr.bf16.mxu0 %v8210_v63  ;;  %7255 = vmatprep.subr.bf16.mxu1 %v8338_v47  ;;  %v5483_v30 = vld [vmem:[#allocation7 + $0x1478] sm:$0xff] }
 0x40e   :  { %v8322_v6 = vcombine.high %v5479_v46, %v5483_v30  ;;  %v5343_v1 = vld [vmem:[#allocation7 + $0x1018] sm:$0xff]  ;;  %v8321_v0 = vcombine.low %v5479_v46, %v5483_v30 }
 0x40f   :  { %v5471_v17 = vld [vmem:[#allocation7 + $0x1418] sm:$0xff]  ;;  %v8186_v13 = vcombine.high %v5343_v1, %v5347_v10  ;;  %v8185_v5 = vcombine.low %v5343_v1, %v5347_v10 }
 0x410   :  { %7203 = vmatpush1.bf16.msra.mxu0 %v8209_v4  ;;  %7256 = vmatpush1.bf16.msra.mxu1 %v8337_v56  ;;  %v5475_v31 = vld [vmem:[#allocation7 + $0x1438] sm:$0xff] }
 0x411   :  { %7204 = vmatprep.subr.bf16.mxu0 %v8202_v37  ;;  %7257 = vmatprep.subr.bf16.mxu1 %v8330_v34  ;;  %v8314_v63 = vcombine.high %v5471_v17, %v5475_v31  ;;  %v5463_v60 = vld [vmem:[#allocation7 + $0x13d8] sm:$0xff]  ;;  %v8313_v18 = vcombine.low %v5471_v17, %v5475_v31 }
 0x412   :  { %v5467_v27 = vld [vmem:[#allocation7 + $0x13f8] sm:$0xff] }
 0x413   :  { %v5591_v47 = vld [vmem:[#allocation7 + $0x17d8] sm:$0xff]  ;;  %v8306_v32 = vcombine.high %v5463_v60, %v5467_v27  ;;  %v8305_v62 = vcombine.low %v5463_v60, %v5467_v27 }
 0x414   :  { %7205 = vmatpush1.bf16.msra.mxu0 %v8201_v57  ;;  %7258 = vmatpush1.bf16.msra.mxu1 %v8329_v26  ;;  %v5595_v11 = vld [vmem:[#allocation7 + $0x17f8] sm:$0xff] }
 0x415   :  { %7206 = vmatprep.subr.bf16.mxu0 %v8194_v36  ;;  %7259 = vmatprep.subr.bf16.mxu1 %v8322_v6  ;;  %v8434_v58 = vcombine.high %v5591_v47, %v5595_v11  ;;  %v5455_v4 = vld [vmem:[#allocation7 + $0x1398] sm:$0xff]  ;;  %v8433_v50 = vcombine.low %v5591_v47, %v5595_v11 }
 0x416   :  { %v5459_v56 = vld [vmem:[#allocation7 + $0x13b8] sm:$0xff] }
 0x417   :  { %v5583_v37 = vld [vmem:[#allocation7 + $0x1798] sm:$0xff]  ;;  %v8298_v46 = vcombine.high %v5455_v4, %v5459_v56  ;;  %v8297_v1 = vcombine.low %v5455_v4, %v5459_v56 }
 0x418   :  { %7207 = vmatpush1.bf16.msra.mxu0 %v8193_v8  ;;  %7260 = vmatpush1.bf16.msra.mxu1 %v8321_v0  ;;  %v5587_v34 = vld [vmem:[#allocation7 + $0x17b8] sm:$0xff] }
 0x419   :  { %7208 = vmatprep.subr.bf16.mxu0 %v8186_v13  ;;  %7261 = vmatprep.subr.bf16.mxu1 %v8314_v63  ;;  %v8426_v30 = vcombine.high %v5583_v37, %v5587_v34  ;;  %v5447_v57 = vld [vmem:[#allocation7 + $0x1358] sm:$0xff]  ;;  %v8425_v10 = vcombine.low %v5583_v37, %v5587_v34 }
 0x41a   :  { %v5451_v26 = vld [vmem:[#allocation7 + $0x1378] sm:$0xff] }
 0x41b   :  { %v5575_v36 = vld [vmem:[#allocation7 + $0x1758] sm:$0xff]  ;;  %v8290_v17 = vcombine.high %v5447_v57, %v5451_v26  ;;  %v8289_v60 = vcombine.low %v5447_v57, %v5451_v26 }
 0x41c   :  { %7209 = vmatpush1.bf16.msra.mxu0 %v8185_v5  ;;  %7262 = vmatpush1.bf16.msra.mxu1 %v8313_v18  ;;  %v5579_v6 = vld [vmem:[#allocation7 + $0x1778] sm:$0xff] }
 0x41d   :  { %7210 = vmatprep.subr.bf16.mxu0 %v8306_v32  ;;  %7263 = vmatprep.subr.bf16.mxu1 %v8434_v58  ;;  %v8418_v31 = vcombine.high %v5575_v36, %v5579_v6  ;;  %v5439_v8 = vld [vmem:[#allocation7 + $0x1318] sm:$0xff]  ;;  %v8417_v27 = vcombine.low %v5575_v36, %v5579_v6 }
 0x41e   :  { %v5443_v0 = vld [vmem:[#allocation7 + $0x1338] sm:$0xff] }
 0x41f   :  { %v5567_v13 = vld [vmem:[#allocation7 + $0x1718] sm:$0xff]  ;;  %v8282_v47 = vcombine.high %v5439_v8, %v5443_v0  ;;  %v8281_v4 = vcombine.low %v5439_v8, %v5443_v0 }
 0x420   :  { %7211 = vmatpush2.bf16.msra.mxu0 %v8305_v62  ;;  %7264 = vmatpush2.bf16.msra.mxu1 %v8433_v50  ;;  %v5571_v63 = vld [vmem:[#allocation7 + $0x1738] sm:$0xff] }
 0x421   :  { %7212 = vmatprep.subr.bf16.mxu0 %v8298_v46  ;;  %7265 = vmatprep.subr.bf16.mxu1 %v8426_v30  ;;  %v8410_v11 = vcombine.high %v5567_v13, %v5571_v63  ;;  %v5431_v5 = vld [vmem:[#allocation7 + $0x12d8] sm:$0xff]  ;;  %v8409_v56 = vcombine.low %v5567_v13, %v5571_v63 }
 0x422   :  { %v5435_v18 = vld [vmem:[#allocation7 + $0x12f8] sm:$0xff] }
 0x423   :  { %v5559_v32 = vld [vmem:[#allocation7 + $0x16d8] sm:$0xff]  ;;  %v8274_v37 = vcombine.high %v5431_v5, %v5435_v18  ;;  %v8273_v57 = vcombine.low %v5431_v5, %v5435_v18 }
 0x424   :  { %7213 = vmatpush2.bf16.msra.mxu0 %v8297_v1  ;;  %7266 = vmatpush2.bf16.msra.mxu1 %v8425_v10  ;;  %v5563_v58 = vld [vmem:[#allocation7 + $0x16f8] sm:$0xff] }
 0x425   :  { %7214 = vmatprep.subr.bf16.mxu0 %v8290_v17  ;;  %7267 = vmatprep.subr.bf16.mxu1 %v8418_v31  ;;  %v8402_v34 = vcombine.high %v5559_v32, %v5563_v58  ;;  %v5423_v62 = vld [vmem:[#allocation7 + $0x1298] sm:$0xff]  ;;  %v8401_v26 = vcombine.low %v5559_v32, %v5563_v58 }
 0x426   :  { %v5427_v50 = vld [vmem:[#allocation7 + $0x12b8] sm:$0xff] }
 0x427   :  { %v5551_v46 = vld [vmem:[#allocation7 + $0x1698] sm:$0xff]  ;;  %v8266_v36 = vcombine.high %v5423_v62, %v5427_v50  ;;  %v8265_v8 = vcombine.low %v5423_v62, %v5427_v50 }
 0x428   :  { %7215 = vmatpush2.bf16.msra.mxu0 %v8289_v60  ;;  %7268 = vmatpush2.bf16.msra.mxu1 %v8417_v27  ;;  %v5555_v30 = vld [vmem:[#allocation7 + $0x16b8] sm:$0xff] }
 0x429   :  { %7216 = vmatprep.subr.bf16.mxu0 %v8282_v47  ;;  %7269 = vmatprep.subr.bf16.mxu1 %v8410_v11  ;;  %v8394_v6 = vcombine.high %v5551_v46, %v5555_v30  ;;  %v5415_v1 = vld [vmem:[#allocation7 + $0x1258] sm:$0xff]  ;;  %v8393_v0 = vcombine.low %v5551_v46, %v5555_v30  ;;  %v9424_v46 = vld [vmem:[#allocation13_spill] sm:$0xff] }
 0x42a   :  { %v5419_v10 = vld [vmem:[#allocation7 + $0x1278] sm:$0xff]  ;;  %v9425_v30 = vsub.s32 0, %v9424_v46 }
 0x42b   :  { %v5543_v17 = vld [vmem:[#allocation7 + $0x1658] sm:$0xff]  ;;  %v8258_v13 = vcombine.high %v5415_v1, %v5419_v10  ;;  %v8257_v5 = vcombine.low %v5415_v1, %v5419_v10  ;;  %v9426_v10 = vsub.s32 1, %v9424_v46 }
 0x42c   :  { %7217 = vmatpush2.bf16.msra.mxu0 %v8281_v4  ;;  %7270 = vmatpush2.bf16.msra.mxu1 %v8409_v56  ;;  %v5547_v31 = vld [vmem:[#allocation7 + $0x1678] sm:$0xff] }
 0x42d   :  { %7218 = vmatprep.subr.bf16.mxu0 %v8274_v37  ;;  %7271 = vmatprep.subr.bf16.mxu1 %v8402_v34  ;;  %v8386_v63 = vcombine.high %v5543_v17, %v5547_v31  ;;  %v5407_v60 = vld [vmem:[#allocation7 + $0x1218] sm:$0xff]  ;;  %v8385_v18 = vcombine.low %v5543_v17, %v5547_v31  ;;  %v9295_v37 = vld [vmem:[#allocation8] sm:$0xff] }
 0x42e   :  { %v5411_v27 = vld [vmem:[#allocation7 + $0x1238] sm:$0xff]  ;;  %v7341_v17 = vrot.slane %v9295_v37, %v9426_v10 }
 0x42f   :  { %v5535_v47 = vld [vmem:[#allocation7 + $0x1618] sm:$0xff]  ;;  %v8250_v32 = vcombine.high %v5407_v60, %v5411_v27  ;;  %v8249_v4 = vcombine.low %v5407_v60, %v5411_v27 }
 0x430   :  { %7219 = vmatpush2.bf16.msra.mxu0 %v8273_v57  ;;  %7272 = vmatpush2.bf16.msra.mxu1 %v8401_v26  ;;  %v5539_v11 = vld [vmem:[#allocation7 + $0x1638] sm:$0xff]  ;;  %v7337_v57 = vrot.slane %v9295_v37, %v9425_v30 }
 0x431   :  { %7220 = vmatprep.subr.bf16.mxu0 %v8266_v36  ;;  %7273 = vmatprep.subr.bf16.mxu1 %v8394_v6  ;;  %v8378_v58 = vcombine.high %v5535_v47, %v5539_v11  ;;  %v8377_v56 = vcombine.low %v5535_v47, %v5539_v11 }
 0x434   :  { %7221 = vmatpush2.bf16.msra.mxu0 %v8265_v8  ;;  %7274 = vmatpush2.bf16.msra.mxu1 %v8393_v0 }
 0x435   :  { %7222 = vmatprep.subr.bf16.mxu0 %v8258_v13  ;;  %7275 = vmatprep.subr.bf16.mxu1 %v8386_v63 }
 0x438   :  { %7223 = vmatpush2.bf16.msra.mxu0 %v8257_v5  ;;  %7276 = vmatpush2.bf16.msra.mxu1 %v8385_v18 }
 0x439   :  { %7224 = vmatprep.subr.bf16.mxu0 %v8250_v32  ;;  %7277 = vmatprep.subr.bf16.mxu1 %v8378_v58 }
 0x43c   :  { %7225 = vmatpush2.bf16.msra.mxu0 %v8249_v4  ;;  %v6910_v34 = vpop.f32.mrf.mxu0  ;;  %7278 = vmatpush2.bf16.msra.mxu1 %v8377_v56  ;;  %v6963_v62 = vpop.f32.mrf.mxu1 }
 0x43d   :  { %v6964_v50 = vadd.f32 %v6963_v62, %v6910_v34 }
 0x43e   :  { %v6912_v26 = vpop.f32.mrf.mxu0  ;;  %v6965_v36 = vpop.f32.mrf.mxu1 }
 0x43f   :  { %7227 = vmatmul.mubr.bf16.vlgmr.msra.gmra.mxu0 %v9185_v12  ;;  %v7300_v6 = vadd.f32 %v6964_v50, %v9127_v33  ;;  %7280 = vmatmul.mubr.bf16.vlgmr.msra.gmra.mxu1 %v9187_v24  ;;  %v6966_v1 = vadd.f32 %v6965_v36, %v6912_v26 }
 0x440   :  { %7236 = vmatprep.mubr.bf16.mxu0 %v9195_v15  ;;  %v6914_v31 = vpop.f32.mrf.mxu0  ;;  %7289 = vmatprep.mubr.bf16.mxu1 %v9201_v52  ;;  %v6967_v8 = vpop.f32.mrf.mxu1 }
 0x441   :  { %v7374_v0 = vadd.f32 %v7337_v57, %v7300_v6  ;;  %v7301_v13 = vadd.f32 %v6966_v1, %v9137_v3  ;;  %v6968_v12 = vadd.f32 %v6967_v8, %v6914_v31  ;;  %v9427_v31 = vld [vmem:[#allocation17_spill] sm:$0xff] }
 0x442   :  { %v6916_v63 = vpop.f32.mrf.mxu0  ;;  %v6969_v60 = vpop.f32.mrf.mxu1 }
 0x443   :  { %v7375_v33 = vadd.f32 %v7341_v17, %v7301_v13  ;;  %v7308_v24 = vadd.f32 %v6968_v12, %v9144_v16  ;;  %v6970_v27 = vadd.f32 %v6969_v60, %v6916_v63  ;;  %v7406_v47 = vmax.f32 %v7374_v0, 0.0  ;;  %v9428_v13 = vld [vmem:[#allocation18_spill] sm:$0xff] }
 0x444   :  { %v6920_v15 = vpop.f32.mrf.mxu0  ;;  %v6973_v11 = vpop.f32.mrf.mxu1 }
 0x445   :  { %v7407_v5 = vmax.f32 %v7375_v33, 0.0  ;;  %v7382_v18 = vadd.f32 %v7337_v57, %v7308_v24  ;;  %v7309_v32 = vadd.f32 %v6970_v27, %v9150_v21  ;;  %v6974_v58 = vadd.f32 %v6973_v11, %v6920_v15 }
 0x446   :  { %v6922_v52 = vpop.f32.mrf.mxu0  ;;  %v6975_v4 = vpop.f32.mrf.mxu1 }
 0x447   :  { %7237 = vmatmul.mubr.bf16.gmra.mxu0 %v8985_v53  ;;  %v8451_v3 = vpack.c.bf16 %v7407_v5, %v7406_v47  ;;  %v7383_v56 = vadd.f32 %v7341_v17, %v7309_v32  ;;  %v7316_v34 = vadd.f32 %v6974_v58, %v9156_v41  ;;  %7290 = vmatmul.mubr.bf16.gmra.mxu1 %v8989_v28  ;;  %v7414_v30 = vmax.f32 %v7382_v18, 0.0 }
 0x448   :  { %v6924_v16 = vpop.f32.mrf.mxu0  ;;  %v6976_v62 = vadd.f32 %v6975_v4, %v6922_v52  ;;  %v6977_v50 = vpop.f32.mrf.mxu1  ;;  %v9429_v5 = vsub.s32 2, %v9424_v46  ;;  %v9430_v4 = vsub.s32 3, %v9424_v46 }
 0x449   :  { %7534 = vst [vmem:[%s9408_s5] sm:$0xff] %v8451_v3  ;;  %v7415_v21 = vmax.f32 %v7383_v56, 0.0  ;;  %v6978_v26 = vadd.f32 %v6977_v50, %v6924_v16  ;;  %v7390_v6 = vadd.f32 %v7337_v57, %v7316_v34 }
 0x44a   :  { %v6926_v36 = vpop.f32.mrf.mxu0  ;;  %v7317_v53 = vadd.f32 %v6976_v62, %v9163_v7  ;;  %v6979_v1 = vpop.f32.mrf.mxu1  ;;  %v7345_v18 = vrot.slane %v9295_v37, %v9429_v5  ;;  %v7349_v3 = vrot.slane %v9295_v37, %v9430_v4 }
 0x44b   :  { %v8455_v10 = vpack.c.bf16 %v7415_v21, %v7414_v30  ;;  %v7324_v41 = vadd.f32 %v6978_v26, %v9427_v31  ;;  %v6980_v8 = vadd.f32 %v6979_v1, %v6926_v36  ;;  %v7422_v63 = vmax.f32 %v7390_v6, 0.0 }
 0x44c   :  { %v7391_v28 = vadd.f32 %v7341_v17, %v7317_v53 }
 0x44d   :  { %7538 = vst [vmem:[%s9408_s5 + $0x20] sm:$0xff] %v8455_v10  ;;  %v7398_v0 = vadd.f32 %v7337_v57, %v7324_v41  ;;  %v7325_v12 = vadd.f32 %v6980_v8, %v9428_v13 }
 0x44e   :  { %v7423_v60 = vmax.f32 %v7391_v28, 0.0 }
 0x44f   :  { %v7399_v33 = vadd.f32 %v7341_v17, %v7325_v12  ;;  %v7430_v27 = vmax.f32 %v7398_v0, 0.0 }
 0x450   :  { %v8459_v24 = vpack.c.bf16 %v7423_v60, %v7422_v63 }
 0x451   :  { %v7431_v15 = vmax.f32 %v7399_v33, 0.0 }
 0x452   :  { %7542 = vst [vmem:[%s9408_s5 + $0x40] sm:$0xff] %v8459_v24 }
 0x453   :  { %v8463_v7 = vpack.c.bf16 %v7431_v15, %v7430_v27 }
 0x455   :  { %7546 = vst [vmem:[%s9408_s5 + $0x60] sm:$0xff] %v8463_v7 }
 0x47d   :  { %v7016_v47 = vpop.f32.mrf.mxu0  ;;  %v7069_v11 = vpop.f32.mrf.mxu1 }
 0x47e   :  { %v7070_v57 = vadd.f32 %v7069_v11, %v7016_v47 }
 0x47f   :  { %v7018_v17 = vpop.f32.mrf.mxu0  ;;  %v7071_v32 = vpop.f32.mrf.mxu1 }
 0x480   :  { %v7302_v58 = vadd.f32 %v7070_v57, %v9198_v54  ;;  %v7072_v52 = vadd.f32 %v7071_v32, %v7018_v17 }
 0x481   :  { %v7020_v56 = vpop.f32.mrf.mxu0  ;;  %v7073_v34 = vpop.f32.mrf.mxu1 }
 0x482   :  { %v7376_v16 = vadd.f32 %v7345_v18, %v7302_v58  ;;  %v7303_v62 = vadd.f32 %v7072_v52, %v9207_v49  ;;  %v7074_v50 = vadd.f32 %v7073_v34, %v7020_v56 }
 0x483   :  { %v7022_v30 = vpop.f32.mrf.mxu0  ;;  %v7075_v21 = vpop.f32.mrf.mxu1 }
 0x484   :  { %v7377_v26 = vadd.f32 %v7349_v3, %v7303_v62  ;;  %v7310_v36 = vadd.f32 %v7074_v50, %v9210_v23  ;;  %v7076_v6 = vadd.f32 %v7075_v21, %v7022_v30  ;;  %v7408_v1 = vmax.f32 %v7376_v16, 0.0 }
 0x485   :  { %v7026_v53 = vpop.f32.mrf.mxu0  ;;  %v7079_v54 = vpop.f32.mrf.mxu1 }
 0x486   :  { %v7409_v10 = vmax.f32 %v7377_v26, 0.0  ;;  %v7384_v31 = vadd.f32 %v7345_v18, %v7310_v36  ;;  %v7311_v41 = vadd.f32 %v7076_v6, %v9213_v29  ;;  %v7080_v8 = vadd.f32 %v7079_v54, %v7026_v53 }
 0x487   :  { %v7028_v28 = vpop.f32.mrf.mxu0  ;;  %v7081_v0 = vpop.f32.mrf.mxu1 }
 0x488   :  { %v8452_v13 = vpack.c.bf16 %v7409_v10, %v7408_v1  ;;  %v7385_v12 = vadd.f32 %v7349_v3, %v7311_v41  ;;  %v7318_v49 = vadd.f32 %v7080_v8, %v9216_v43  ;;  %v7082_v60 = vadd.f32 %v7081_v0, %v7028_v28 }
 0x489   :  { %v7030_v63 = vpop.f32.mrf.mxu0  ;;  %v7083_v33 = vpop.f32.mrf.mxu1  ;;  %v7416_v23 = vmax.f32 %v7384_v31, 0.0 }
 0x48a   :  { %7535 = vst [vmem:[%s9408_s5 + $0x8] sm:$0xff] %v8452_v13  ;;  %v7417_v24 = vmax.f32 %v7385_v12, 0.0  ;;  %v7084_v27 = vadd.f32 %v7083_v33, %v7030_v63  ;;  %v7392_v7 = vadd.f32 %v7345_v18, %v7318_v49  ;;  %v7319_v29 = vadd.f32 %v7082_v60, %v9223_v20 }
 0x48b   :  { %v7032_v15 = vpop.f32.mrf.mxu0  ;;  %v7085_v47 = vpop.f32.mrf.mxu1 }
 0x48c   :  { %v8456_v11 = vpack.c.bf16 %v7417_v24, %v7416_v23  ;;  %v7326_v57 = vadd.f32 %v7084_v27, %v9226_v59  ;;  %v7086_v5 = vadd.f32 %v7085_v47, %v7032_v15  ;;  %v7393_v43 = vadd.f32 %v7349_v3, %v7319_v29 }
 0x48d   :  { %v7424_v58 = vmax.f32 %v7392_v7, 0.0  ;;  %v7352_v59 = vsub.s32 4, %v9424_v46 }
 0x48e   :  { %7539 = vst [vmem:[%s9408_s5 + $0x28] sm:$0xff] %v8456_v11  ;;  %v7400_v17 = vadd.f32 %v7345_v18, %v7326_v57  ;;  %v7327_v32 = vadd.f32 %v7086_v5, %v9229_v40  ;;  %v7425_v52 = vmax.f32 %v7393_v43, 0.0  ;;  %v7356_v40 = vsub.s32 5, %v9424_v46 }
 0x490   :  { %v7401_v4 = vadd.f32 %v7349_v3, %v7327_v32  ;;  %v8460_v56 = vpack.c.bf16 %v7425_v52, %v7424_v58  ;;  %v7432_v34 = vmax.f32 %v7400_v17, 0.0  ;;  %v7353_v3 = vrot.slane %v9295_v37, %v7352_v59 }
 0x491   :  { %v7357_v6 = vrot.slane %v9295_v37, %v7356_v40 }
 0x492   :  { %v7433_v16 = vmax.f32 %v7401_v4, 0.0  ;;  %7543 = vst [vmem:[%s9408_s5 + $0x48] sm:$0xff] %v8460_v56 }
 0x494   :  { %v8464_v20 = vpack.c.bf16 %v7433_v16, %v7432_v34 }
 0x496   :  { %7547 = vst [vmem:[%s9408_s5 + $0x68] sm:$0xff] %v8464_v20 }
 0x4be   :  { %v7122_v18 = vpop.f32.mrf.mxu0  ;;  %v7175_v62 = vpop.f32.mrf.mxu1 }
 0x4bf   :  { %v7176_v50 = vadd.f32 %v7175_v62, %v7122_v18 }
 0x4c0   :  { %v7124_v30 = vpop.f32.mrf.mxu0  ;;  %v7177_v21 = vpop.f32.mrf.mxu1 }
 0x4c1   :  { %v7304_v26 = vadd.f32 %v7176_v50, %v9232_v35  ;;  %v7178_v36 = vadd.f32 %v7177_v21, %v7124_v30 }
 0x4c2   :  { %v7126_v53 = vpop.f32.mrf.mxu0  ;;  %v7179_v1 = vpop.f32.mrf.mxu1 }
 0x4c3   :  { %v7378_v54 = vadd.f32 %v7353_v3, %v7304_v26  ;;  %v7305_v10 = vadd.f32 %v7178_v36, %v9239_v45  ;;  %v7180_v31 = vadd.f32 %v7179_v1, %v7126_v53 }
 0x4c4   :  { %v7128_v41 = vpop.f32.mrf.mxu0  ;;  %v7181_v8 = vpop.f32.mrf.mxu1 }
 0x4c5   :  { %v7379_v28 = vadd.f32 %v7357_v6, %v7305_v10  ;;  %v7312_v0 = vadd.f32 %v7180_v31, %v9242_v19  ;;  %v7182_v13 = vadd.f32 %v7181_v8, %v7128_v41  ;;  %v7410_v49 = vmax.f32 %v7378_v54, 0.0 }
 0x4c6   :  { %v7132_v12 = vpop.f32.mrf.mxu0  ;;  %v7185_v63 = vpop.f32.mrf.mxu1 }
 0x4c7   :  { %v7411_v60 = vmax.f32 %v7379_v28, 0.0  ;;  %v7386_v35 = vadd.f32 %v7353_v3, %v7312_v0  ;;  %v7313_v33 = vadd.f32 %v7182_v13, %v9245_v2  ;;  %v7186_v23 = vadd.f32 %v7185_v63, %v7132_v12 }
 0x4c8   :  { %v7134_v24 = vpop.f32.mrf.mxu0  ;;  %v7187_v27 = vpop.f32.mrf.mxu1 }
 0x4c9   :  { %v8453_v15 = vpack.c.bf16 %v7411_v60, %v7410_v49  ;;  %v7387_v7 = vadd.f32 %v7357_v6, %v7313_v33  ;;  %v7320_v45 = vadd.f32 %v7186_v23, %v9248_v25  ;;  %v7188_v47 = vadd.f32 %v7187_v27, %v7134_v24 }
 0x4ca   :  { %v7136_v29 = vpop.f32.mrf.mxu0  ;;  %v7189_v11 = vpop.f32.mrf.mxu1  ;;  %v7418_v19 = vmax.f32 %v7386_v35, 0.0 }
 0x4cb   :  { %7536 = vst [vmem:[%s9408_s5 + $0x10] sm:$0xff] %v8453_v15  ;;  %v7419_v57 = vmax.f32 %v7387_v7, 0.0  ;;  %v7190_v5 = vadd.f32 %v7189_v11, %v7136_v29  ;;  %v7394_v17 = vadd.f32 %v7353_v3, %v7320_v45  ;;  %v7321_v2 = vadd.f32 %v7188_v47, %v9255_v51 }
 0x4cc   :  { %v7138_v43 = vpop.f32.mrf.mxu0  ;;  %v7191_v32 = vpop.f32.mrf.mxu1 }
 0x4cd   :  { %v8457_v58 = vpack.c.bf16 %v7419_v57, %v7418_v19  ;;  %v7328_v52 = vadd.f32 %v7190_v5, %v9258_v38  ;;  %v7192_v4 = vadd.f32 %v7191_v32, %v7138_v43  ;;  %v7395_v25 = vadd.f32 %v7357_v6, %v7321_v2 }
 0x4ce   :  { %v7426_v16 = vmax.f32 %v7394_v17, 0.0  ;;  %v7360_v38 = vsub.s32 6, %v9424_v46 }
 0x4cf   :  { %7540 = vst [vmem:[%s9408_s5 + $0x30] sm:$0xff] %v8457_v58  ;;  %v7402_v56 = vadd.f32 %v7353_v3, %v7328_v52  ;;  %v7329_v34 = vadd.f32 %v7192_v4, %v9261_v48  ;;  %v7427_v20 = vmax.f32 %v7395_v25, 0.0  ;;  %v7364_v48 = vsub.s32 7, %v9424_v46 }
 0x4d0   :  { %v7361_v21 = vrot.slane %v9295_v37, %v7360_v38 }
 0x4d1   :  { %v7403_v59 = vadd.f32 %v7357_v6, %v7329_v34  ;;  %v8461_v18 = vpack.c.bf16 %v7427_v20, %v7426_v16  ;;  %v7434_v40 = vmax.f32 %v7402_v56, 0.0  ;;  %v7365_v1 = vrot.slane %v9295_v37, %v7364_v48 }
 0x4d3   :  { %v7435_v62 = vmax.f32 %v7403_v59, 0.0  ;;  %7544 = vst [vmem:[%s9408_s5 + $0x50] sm:$0xff] %v8461_v18 }
 0x4d5   :  { %v8465_v51 = vpack.c.bf16 %v7435_v62, %v7434_v40 }
 0x4d7   :  { %7548 = vst [vmem:[%s9408_s5 + $0x70] sm:$0xff] %v8465_v51 }
 0x4ff   :  { %v7228_v50 = vpop.f32.mrf.mxu0  ;;  %v7281_v3 = vpop.f32.mrf.mxu1 }
 0x500   :  { %v7282_v30 = vadd.f32 %v7281_v3, %v7228_v50 }
 0x501   :  { %v7230_v26 = vpop.f32.mrf.mxu0  ;;  %v7283_v36 = vpop.f32.mrf.mxu1 }
 0x502   :  { %v7306_v6 = vadd.f32 %v7282_v30, %v9264_v55  ;;  %v7284_v53 = vadd.f32 %v7283_v36, %v7230_v26 }
 0x503   :  { %v7232_v54 = vpop.f32.mrf.mxu0  ;;  %v7285_v10 = vpop.f32.mrf.mxu1 }
 0x504   :  { %v7380_v31 = vadd.f32 %v7361_v21, %v7306_v6  ;;  %v7307_v41 = vadd.f32 %v7284_v53, %v9271_v44  ;;  %v7286_v8 = vadd.f32 %v7285_v10, %v7232_v54 }
 0x505   :  { %v7234_v28 = vpop.f32.mrf.mxu0  ;;  %v7287_v0 = vpop.f32.mrf.mxu1 }
 0x506   :  { %v7381_v46 = vadd.f32 %v7365_v1, %v7307_v41  ;;  %v7314_v13 = vadd.f32 %v7286_v8, %v9274_v14  ;;  %v7288_v12 = vadd.f32 %v7287_v0, %v7234_v28  ;;  %v7412_v63 = vmax.f32 %v7380_v31, 0.0 }
 0x507   :  { %v7238_v49 = vpop.f32.mrf.mxu0  ;;  %v7291_v60 = vpop.f32.mrf.mxu1 }
 0x508   :  { %v7413_v35 = vmax.f32 %v7381_v46, 0.0  ;;  %v7388_v55 = vadd.f32 %v7361_v21, %v7314_v13  ;;  %v7315_v33 = vadd.f32 %v7288_v12, %v9277_v61  ;;  %v7292_v37 = vadd.f32 %v7291_v60, %v7238_v49 }
 0x509   :  { %v7240_v23 = vpop.f32.mrf.mxu0  ;;  %v7293_v24 = vpop.f32.mrf.mxu1 }
 0x50a   :  { %v8454_v27 = vpack.c.bf16 %v7413_v35, %v7412_v63  ;;  %v7389_v15 = vadd.f32 %v7365_v1, %v7315_v33  ;;  %v7322_v44 = vadd.f32 %v7292_v37, %v9280_v22  ;;  %v7294_v45 = vadd.f32 %v7293_v24, %v7240_v23 }
 0x50b   :  { %v7242_v7 = vpop.f32.mrf.mxu0  ;;  %v7295_v29 = vpop.f32.mrf.mxu1  ;;  %v7420_v14 = vmax.f32 %v7388_v55, 0.0 }
 0x50c   :  { %7537 = vst [vmem:[%s9408_s5 + $0x18] sm:$0xff] %v8454_v27  ;;  %v7421_v47 = vmax.f32 %v7389_v15, 0.0  ;;  %v7296_v11 = vadd.f32 %v7295_v29, %v7242_v7  ;;  %v7396_v57 = vadd.f32 %v7361_v21, %v7322_v44  ;;  %v7323_v61 = vadd.f32 %v7294_v45, %v9287_v42 }
 0x50d   :  { %v7244_v19 = vpop.f32.mrf.mxu0  ;;  %v7297_v5 = vpop.f32.mrf.mxu1 }
 0x50e   :  { %v8458_v43 = vpack.c.bf16 %v7421_v47, %v7420_v14  ;;  %v7330_v17 = vadd.f32 %v7296_v11, %v9290_v39  ;;  %v7298_v2 = vadd.f32 %v7297_v5, %v7244_v19  ;;  %v7397_v22 = vadd.f32 %v7365_v1, %v7323_v61 }
 0x50f   :  { %v7428_v52 = vmax.f32 %v7396_v57, 0.0 }
 0x510   :  { %7541 = vst [vmem:[%s9408_s5 + $0x38] sm:$0xff] %v8458_v43  ;;  %v7404_v32 = vadd.f32 %v7361_v21, %v7330_v17  ;;  %v7331_v58 = vadd.f32 %v7298_v2, %v9293_v9  ;;  %v7429_v4 = vmax.f32 %v7397_v22, 0.0 }
 0x512   :  { %v7405_v25 = vadd.f32 %v7365_v1, %v7331_v58  ;;  %v8462_v56 = vpack.c.bf16 %v7429_v4, %v7428_v52  ;;  %v7436_v34 = vmax.f32 %v7404_v32, 0.0 }
 0x514   :  { %v7437_v16 = vmax.f32 %v7405_v25, 0.0  ;;  %7545 = vst [vmem:[%s9408_s5 + $0x58] sm:$0xff] %v8462_v56 }
 0x516   :  { %v8466_v42 = vpack.c.bf16 %v7437_v16, %v7436_v34 }
 0x518   :  { %7549 = vst [vmem:[%s9408_s5 + $0x78] sm:$0xff] %v8466_v42 }
 0x519   :  { %7554 = vsyncpa [#allocation4], 1 }
 0x51a   :  { %7555 = vsyncpa [#allocation6], 1 }
 0x51b   :  { %7556 = vsyncpa [#allocation9], 1 }

</bundles_post_ra>
